<compile_context>
chip_gen: v7x
topology: tpu7x:2x2x1
jax: 0.10.0
libtpu: 0.0.40
codegen_flags: <defaults>
</compile_context>

<pallas_src>
import functools

import jax
import jax.numpy as jnp
from jax import lax
from jax.experimental import pallas as pl
from jax.experimental.pallas import tpu as pltpu

CFG = dict(space_dim=1, fun_dim=1, n_hidden=32, n_head=4, n_layers=2,
           mlp_ratio=1, slice_num=8, out_dim=1, H=8, W=8)

_SQRT2_INV = 0.7071067811865476


def _gelu(x):
    # exact (erf-based) GELU, matching nn.GELU() default
    return 0.5 * x * (1.0 + lax.erf(x * _SQRT2_INV))


def _layernorm(v, g, b):
    mu = jnp.mean(v, axis=-1, keepdims=True)
    var = jnp.mean(jnp.square(v - mu), axis=-1, keepdims=True)
    return (v - mu) * lax.rsqrt(var + 1e-5) * g + b


# ----------------------------- Pallas kernels -------------------------------

def _pre_kernel(xf_ref, w1_ref, b1_ref, w2_ref, b2_ref, o_ref):
    # fused preprocess MLP: Linear(d_in, 2C) + GELU + Linear(2C, C)
    x = xf_ref[0].astype(jnp.float32)                                   # (N, d_in)
    h = jnp.dot(x, w1_ref[...], preferred_element_type=jnp.float32) + b1_ref[...]
    h = _gelu(h)
    y = jnp.dot(h, w2_ref[...], preferred_element_type=jnp.float32) + b2_ref[...]
    o_ref[0] = y.astype(o_ref.dtype)


def pallas_preprocess(xf, w1, b1, w2, b2):
    B, N, d_in = xf.shape
    C2 = w1.shape[1]
    C = w2.shape[1]
    return pl.pallas_call(
        _pre_kernel,
        out_shape=jax.ShapeDtypeStruct((B, N, C), jnp.float32),
        grid=(B,),
        in_specs=[pl.BlockSpec((1, N, d_in), lambda b: (b, 0, 0)),
                  pl.BlockSpec((d_in, C2), lambda b: (0, 0)),
                  pl.BlockSpec((1, C2), lambda b: (0, 0)),
                  pl.BlockSpec((C2, C), lambda b: (0, 0)),
                  pl.BlockSpec((1, C), lambda b: (0, 0))],
        out_specs=pl.BlockSpec((1, N, C), lambda b: (b, 0, 0)),
        compiler_params=pltpu.CompilerParams(dimension_semantics=("parallel",)),
    )(xf, w1, b1.reshape(1, C2), w2, b2.reshape(1, C))


def _block_kernel(*refs, H, W, heads, dh, G, last):
    # One fused LaMO block per (batch) grid step; everything stays in VMEM.
    if last:
        (fx_ref, ln_ref, cw_ref, cb_ref, slw_ref, slb_ref, qkv_ref,
         ow_ref, ob_ref, m1w_ref, m1b_ref, m2w_ref, m2b_ref,
         fw_ref, fb_ref, o_ref) = refs
    else:
        (fx_ref, ln_ref, cw_ref, cb_ref, slw_ref, slb_ref, qkv_ref,
         ow_ref, ob_ref, m1w_ref, m1b_ref, m2w_ref, m2b_ref, o_ref) = refs

    N = H * W
    C = heads * dh
    scale = dh ** -0.5

    fx0 = fx_ref[0].astype(jnp.float32)                                 # (N, C)

    # ---- LN1 ----
    hn = _layernorm(fx0, ln_ref[0:1, :], ln_ref[1:2, :])                # (N, C)

    # ---- fused dual 3x3 conv (zero-padded) as 9 shifted matmuls ----
    # hn is the row-major flattened (H, W, C) image; a (dy, dx) conv tap is a
    # flat shift by (dy-1)*W + (dx-1) with a column mask for horizontal wrap.
    PAD = 16                                     # >= W + 1, multiple of 8
    zpad = jnp.zeros((PAD, C), jnp.float32)
    hp = jnp.concatenate([zpad, hn, zpad], axis=0)                      # (N+2P, C)
    n_idx = lax.broadcasted_iota(jnp.int32, (N, C), 0)
    col = n_idx % W
    acc = jnp.zeros((N, 2 * C), jnp.float32)
    for dy in range(3):
        for dx in range(3):
            off = (dy - 1) * W + (dx - 1)
            patch = hp[PAD + off:PAD + off + N, :]
            if dx != 1:
                cc = col + (dx - 1)
                patch = jnp.where(jnp.logical_and(cc >= 0, cc < W), patch, 0.0)
            acc = acc + jnp.dot(patch, cw_ref[dy * 3 + dx],
                                preferred_element_type=jnp.float32)
    acc = acc + cb_ref[...]                                             # (N, 2C)
    fx_mid = acc[:, :C]           # in_project_fx output (N, C)
    x_mid = acc[:, C:]            # in_project_x  output (N, C)

    # ---- slice logits for all heads in one block-diagonal matmul ----
    # (temperature clamp already folded into the weights/bias on the host)
    logits = jnp.dot(x_mid, slw_ref[...],
                     preferred_element_type=jnp.float32) + slb_ref[...]  # (N, heads*G)

    # ---- per-head: slice softmax -> tokens -> latent attention -> de-slice,
    #      with the head-concat + output projection folded into row blocks of
    #      out_w (avoids any lane concatenation).
    # TODO(synk): Latent_SSM_Structured_Mesh_2D was not provided; assumed a
    # Transolver-style latent attention over slice tokens (per-head Wq/Wk/Wv,
    # softmax attention, de-slice via slice_weights, output Linear).
    attn_out = jnp.zeros((N, C), jnp.float32)
    for h in range(heads):
        lg = logits[:, h * G:(h + 1) * G]                               # (N, G)
        lg = lg - jnp.max(lg, axis=-1, keepdims=True)
        e = jnp.exp(lg)
        sw = e / jnp.sum(e, axis=-1, keepdims=True)                     # slice_weights
        fxh = fx_mid[:, h * dh:(h + 1) * dh]                            # (N, dh)
        norm = jnp.sum(sw, axis=0, keepdims=True)                       # (1, G)
        tok = lax.dot_general(sw, fxh, (((0,), (0,)), ((), ())),
                              preferred_element_type=jnp.float32)       # (G, dh)
        tok = tok / (jnp.transpose(norm) + 1e-5)
        qkv = jnp.dot(tok, qkv_ref[h], preferred_element_type=jnp.float32)  # (G, 3dh)
        q = qkv[:, :dh]
        k = qkv[:, dh:2 * dh]
        v = qkv[:, 2 * dh:]
        s = lax.dot_general(q, k, (((1,), (1,)), ((), ())),
                            preferred_element_type=jnp.float32) * scale     # (G, G)
        s = s - jnp.max(s, axis=-1, keepdims=True)
        p = jnp.exp(s)
        attn = p / jnp.sum(p, axis=-1, keepdims=True)
        ot = jnp.dot(attn, v, preferred_element_type=jnp.float32)           # (G, dh)
        proj = jnp.dot(ot, ow_ref[h * dh:(h + 1) * dh, :],
                       preferred_element_type=jnp.float32)                  # (G, C)
        attn_out = attn_out + jnp.dot(sw, proj,
                                      preferred_element_type=jnp.float32)   # (N, C)

    f1 = attn_out + ob_ref[...] + fx0                                   # + residual

    # ---- LN2 + MLP + residual ----
    h2 = _layernorm(f1, ln_ref[2:3, :], ln_ref[3:4, :])
    m = jnp.dot(h2, m1w_ref[...], preferred_element_type=jnp.float32) + m1b_ref[...]
    m = _gelu(m)
    m = jnp.dot(m, m2w_ref[...], preferred_element_type=jnp.float32) + m2b_ref[...]
    f2 = m + f1

    if last:
        h3 = _layernorm(f2, ln_ref[4:5, :], ln_ref[5:6, :])
        y = jnp.dot(h3, fw_ref[...], preferred_element_type=jnp.float32) + fb_ref[...]
        o_ref[0] = y.astype(o_ref.dtype)
    else:
        o_ref[0] = f2.astype(o_ref.dtype)


def pallas_block(fx, ln_gb, conv_w, conv_b, slw, slb, qkvw, out_w, out_b,
                 m1w, m1b, m2w, m2b, fin_w=None, fin_b=None, *, H, W, heads, G):
    B, N, C = fx.shape
    dh = C // heads
    last = fin_w is not None
    out_dim = fin_w.shape[-1] if last else C

    def full2(a):
        return pl.BlockSpec(a.shape, lambda b: (0, 0))

    def full3(a):
        return pl.BlockSpec(a.shape, lambda b: (0, 0, 0))

    in_specs = [pl.BlockSpec((1, N, C), lambda b: (b, 0, 0)),
                full2(ln_gb), full3(conv_w), full2(conv_b),
                full2(slw), full2(slb), full3(qkvw),
                full2(out_w), full2(out_b),
                full2(m1w), full2(m1b), full2(m2w), full2(m2b)]
    args = [fx, ln_gb, conv_w, conv_b, slw, slb, qkvw, out_w, out_b,
            m1w, m1b, m2w, m2b]
    if last:
        in_specs += [full2(fin_w), full2(fin_b)]
        args += [fin_w, fin_b]

    kern = functools.partial(_block_kernel, H=H, W=W, heads=heads, dh=dh,
                             G=G, last=last)
    return pl.pallas_call(
        kern,
        out_shape=jax.ShapeDtypeStruct((B, N, out_dim), jnp.float32),
        grid=(B,),
        in_specs=in_specs,
        out_specs=pl.BlockSpec((1, N, out_dim), lambda b: (b, 0, 0)),
        compiler_params=pltpu.CompilerParams(dimension_semantics=("parallel",)),
    )(*args)


# ------------------------------ parameters ---------------------------------

def init_params(key, cfg):
    C = cfg["n_hidden"]
    heads = cfg["n_head"]
    dh = C // heads
    G = cfg["slice_num"]
    ratio = cfg["mlp_ratio"]
    d_in = cfg["fun_dim"] + cfg["space_dim"]
    keys = iter(jax.random.split(key, 256))

    def tn(shape, std=0.02):
        return (std * jax.random.truncated_normal(next(keys), -2.0, 2.0, shape)
                ).astype(jnp.float32)

    def uni(shape, bound):
        return jax.random.uniform(next(keys), shape, jnp.float32, -bound, bound)

    p = {}
    # preprocess MLP: Linear(d_in, 2C)+GELU, Linear(2C, C)
    p["pre_w1"] = tn((d_in, 2 * C)); p["pre_b1"] = jnp.zeros((2 * C,), jnp.float32)
    p["pre_w2"] = tn((2 * C, C));    p["pre_b2"] = jnp.zeros((C,), jnp.float32)
    p["placeholder"] = (1.0 / C) * jax.random.uniform(next(keys), (C,), jnp.float32)
    p["temperature"] = 0.5 * jnp.ones((1, heads, 1, 1), jnp.float32)
    # shared 3x3 convs (PyTorch default init, HWIO layout)
    cb = 1.0 / (C * 9) ** 0.5
    p["conv_fx_w"] = uni((3, 3, C, C), cb); p["conv_fx_b"] = uni((C,), cb)
    p["conv_x_w"] = uni((3, 3, C, C), cb);  p["conv_x_b"] = uni((C,), cb)
    # in_project_slice: orthogonal weight (torch shape (G, dh)); stored as (dh, G)
    a = jax.random.normal(next(keys), (G, dh), jnp.float32)
    q_, r_ = jnp.linalg.qr(a)
    q_ = q_ * jnp.sign(jnp.diag(r_))[None, :]
    p["slice_w"] = q_.T
    p["slice_b"] = uni((G,), 1.0 / dh ** 0.5)

    blocks = []
    for li in range(cfg["n_layers"]):
        blk = {}
        blk["ln1_g"] = jnp.ones((C,), jnp.float32); blk["ln1_b"] = jnp.zeros((C,), jnp.float32)
        blk["wq"] = tn((heads, dh, dh))
        blk["wk"] = tn((heads, dh, dh))
        blk["wv"] = tn((heads, dh, dh))
        blk["out_w"] = tn((C, C)); blk["out_b"] = jnp.zeros((C,), jnp.float32)
        blk["ln2_g"] = jnp.ones((C,), jnp.float32); blk["ln2_b"] = jnp.zeros((C,), jnp.float32)
        blk["mlp_w1"] = tn((C, C * ratio)); blk["mlp_b1"] = jnp.zeros((C * ratio,), jnp.float32)
        blk["mlp_w2"] = tn((C * ratio, C)); blk["mlp_b2"] = jnp.zeros((C,), jnp.float32)
        if li == cfg["n_layers"] - 1:
            blk["ln3_g"] = jnp.ones((C,), jnp.float32); blk["ln3_b"] = jnp.zeros((C,), jnp.float32)
            blk["mlp2_w"] = tn((C, cfg["out_dim"]))
            blk["mlp2_b"] = jnp.zeros((cfg["out_dim"],), jnp.float32)
        blocks.append(blk)
    p["blocks"] = blocks
    return p


# ------------------------------ model forward -------------------------------

def model_forward(params, x, fx):
    B, N, _ = x.shape
    H, W = CFG["H"], CFG["W"]
    C = CFG["n_hidden"]
    heads = CFG["n_head"]
    dh = C // heads
    G = CFG["slice_num"]

    # preprocess (single fused kernel)
    if fx is not None:
        xin = jnp.concatenate([x, fx], axis=-1)
    else:
        # mirrors the PyTorch reference, which only works here when fun_dim == 0
        xin = x
    h = pallas_preprocess(xin, params["pre_w1"], params["pre_b1"],
                          params["pre_w2"], params["pre_b2"])
    if fx is None:
        h = h + params["placeholder"][None, None, :]

    # shared projection weights, prepared once (temperature clamp folded in;
    # heads packed block-diagonally; both convs concatenated along Cout)
    inv_t = 1.0 / jnp.clip(params["temperature"], 0.1, 5.0).reshape(heads)
    Wh = params["slice_w"][None, :, :] * inv_t[:, None, None]          # (heads, dh, G)
    eye = jnp.eye(heads, dtype=jnp.float32)
    slw_bd = jnp.einsum('hdg,hk->hdkg', Wh, eye).reshape(heads * dh, heads * G)
    slb = (params["slice_b"][None, :] * inv_t[:, None]).reshape(1, heads * G)
    conv_w = jnp.concatenate([params["conv_fx_w"], params["conv_x_w"]], axis=-1)
    conv_w = conv_w.reshape(9, C, 2 * C)                                # HWIO -> (9,Cin,2C)
    conv_b = jnp.concatenate([params["conv_fx_b"], params["conv_x_b"]]).reshape(1, 2 * C)

    n_blocks = len(params["blocks"])
    for li, blk in enumerate(params["blocks"]):
        last = (li == n_blocks - 1)
        qkvw = jnp.concatenate([blk["wq"], blk["wk"], blk["wv"]], axis=-1)  # (heads,dh,3dh)
        if last:
            ln_gb = jnp.stack([blk["ln1_g"], blk["ln1_b"], blk["ln2_g"], blk["ln2_b"],
                               blk["ln3_g"], blk["ln3_b"]], axis=0)
            h = pallas_block(h, ln_gb, conv_w, conv_b, slw_bd, slb, qkvw,
                             blk["out_w"], blk["out_b"].reshape(1, C),
                             blk["mlp_w1"], blk["mlp_b1"].reshape(1, -1),
                             blk["mlp_w2"], blk["mlp_b2"].reshape(1, C),
                             blk["mlp2_w"], blk["mlp2_b"].reshape(1, -1),
                             H=H, W=W, heads=heads, G=G)
        else:
            ln_gb = jnp.stack([blk["ln1_g"], blk["ln1_b"],
                               blk["ln2_g"], blk["ln2_b"]], axis=0)
            h = pallas_block(h, ln_gb, conv_w, conv_b, slw_bd, slb, qkvw,
                             blk["out_w"], blk["out_b"].reshape(1, C),
                             blk["mlp_w1"], blk["mlp_b1"].reshape(1, -1),
                             blk["mlp_w2"], blk["mlp_b2"].reshape(1, C),
                             H=H, W=W, heads=heads, G=G)
    return h


if __name__ == "__main__":
    key = jax.random.PRNGKey(0)
    kp, kx, kf = jax.random.split(key, 3)
    params = init_params(kp, CFG)
    B = 2
    N = CFG["H"] * CFG["W"]
    x = jax.random.uniform(kx, (B, N, CFG["space_dim"]), jnp.float32)
    fx_in = jax.random.uniform(kf, (B, N, CFG["fun_dim"]), jnp.float32)

    fwd = jax.jit(model_forward)
    out = fwd(params, x, fx_in)
    jax.block_until_ready(out)
    assert out.shape == (B, N, CFG["out_dim"])
    assert bool(jnp.all(jnp.isfinite(out)))
    print("KERNEL_OK")
</pallas_src>

<mosaic_0001>
module attributes {stable_mosaic.version = 11 : i64} {
  func.func @_block_kernel(%arg0: i32, %arg1: memref<1x64x32xf32, #tpu.memory_space<vmem>>, %arg2: memref<4x32xf32, #tpu.memory_space<vmem>>, %arg3: memref<9x32x64xf32, #tpu.memory_space<vmem>>, %arg4: memref<1x64xf32, #tpu.memory_space<vmem>>, %arg5: memref<32x32xf32, #tpu.memory_space<vmem>>, %arg6: memref<1x32xf32, #tpu.memory_space<vmem>>, %arg7: memref<4x8x24xf32, #tpu.memory_space<vmem>>, %arg8: memref<32x32xf32, #tpu.memory_space<vmem>>, %arg9: memref<1x32xf32, #tpu.memory_space<vmem>>, %arg10: memref<32x32xf32, #tpu.memory_space<vmem>>, %arg11: memref<1x32xf32, #tpu.memory_space<vmem>>, %arg12: memref<32x32xf32, #tpu.memory_space<vmem>>, %arg13: memref<1x32xf32, #tpu.memory_space<vmem>>, %arg14: memref<1x64x32xf32, #tpu.memory_space<vmem>>) attributes {dimension_semantics = [#tpu.dimension_semantics<parallel>], iteration_bounds = array<i64: 2>, scalar_prefetch = 0 : i64, scratch_operands = 0 : i64, tpu.core_type = #tpu.core_type<tc>, window_params = [{transform_indices = @transform_0, window_bounds = array<i64: 1, 64, 32>}, {pipeline_mode = #tpu.pipeline_mode<synchronous>, transform_indices = @transform_1, window_bounds = array<i64: 4, 32>}, {pipeline_mode = #tpu.pipeline_mode<synchronous>, transform_indices = @transform_2, window_bounds = array<i64: 9, 32, 64>}, {pipeline_mode = #tpu.pipeline_mode<synchronous>, transform_indices = @transform_3, window_bounds = array<i64: 1, 64>}, {pipeline_mode = #tpu.pipeline_mode<synchronous>, transform_indices = @transform_4, window_bounds = array<i64: 32, 32>}, {pipeline_mode = #tpu.pipeline_mode<synchronous>, transform_indices = @transform_5, window_bounds = array<i64: 1, 32>}, {pipeline_mode = #tpu.pipeline_mode<synchronous>, transform_indices = @transform_6, window_bounds = array<i64: 4, 8, 24>}, {pipeline_mode = #tpu.pipeline_mode<synchronous>, transform_indices = @transform_7, window_bounds = array<i64: 32, 32>}, {pipeline_mode = #tpu.pipeline_mode<synchronous>, transform_indices = @transform_8, window_bounds = array<i64: 1, 32>}, {pipeline_mode = #tpu.pipeline_mode<synchronous>, transform_indices = @transform_9, window_bounds = array<i64: 32, 32>}, {pipeline_mode = #tpu.pipeline_mode<synchronous>, transform_indices = @transform_10, window_bounds = array<i64: 1, 32>}, {pipeline_mode = #tpu.pipeline_mode<synchronous>, transform_indices = @transform_11, window_bounds = array<i64: 32, 32>}, {pipeline_mode = #tpu.pipeline_mode<synchronous>, transform_indices = @transform_12, window_bounds = array<i64: 1, 32>}, {transform_indices = @transform_13, window_bounds = array<i64: 1, 64, 32>}]} {
    %c0 = arith.constant 0 : index
    %c0_0 = arith.constant 0 : index
    %c0_1 = arith.constant 0 : index
    %0 = vector.load %arg1[%c0, %c0_0, %c0_1] : memref<1x64x32xf32, #tpu.memory_space<vmem>>, vector<1x64x32xf32>
    %1 = vector.shape_cast %0 : vector<1x64x32xf32> to vector<64x32xf32>
    %c0_2 = arith.constant 0 : index
    %c0_3 = arith.constant 0 : index
    %2 = vector.load %arg2[%c0_2, %c0_3] : memref<4x32xf32, #tpu.memory_space<vmem>>, vector<1x32xf32>
    %c1 = arith.constant 1 : index
    %c0_4 = arith.constant 0 : index
    %3 = vector.load %arg2[%c1, %c0_4] : memref<4x32xf32, #tpu.memory_space<vmem>>, vector<1x32xf32>
    %cst = arith.constant dense<0.000000e+00> : vector<64xf32>
    %4 = vector.multi_reduction <add>, %1, %cst [1] : vector<64x32xf32> to vector<64xf32>
    %5 = vector.shape_cast %4 : vector<64xf32> to vector<64x1xf32>
    %cst_5 = arith.constant 3.200000e+01 : f32
    %6 = vector.broadcast %cst_5 : f32 to vector<64x1xf32>
    %7 = arith.divf %5, %6 : vector<64x1xf32>
    %8 = vector.broadcast %7 : vector<64x1xf32> to vector<64x32xf32>
    %9 = arith.subf %1, %8 : vector<64x32xf32>
    %10 = arith.mulf %9, %9 : vector<64x32xf32>
    %cst_6 = arith.constant dense<0.000000e+00> : vector<64xf32>
    %11 = vector.multi_reduction <add>, %10, %cst_6 [1] : vector<64x32xf32> to vector<64xf32>
    %12 = vector.shape_cast %11 : vector<64xf32> to vector<64x1xf32>
    %cst_7 = arith.constant 3.200000e+01 : f32
    %13 = vector.broadcast %cst_7 : f32 to vector<64x1xf32>
    %14 = arith.divf %12, %13 : vector<64x1xf32>
    %15 = vector.broadcast %7 : vector<64x1xf32> to vector<64x32xf32>
    %16 = arith.subf %1, %15 : vector<64x32xf32>
    %cst_8 = arith.constant 9.99999974E-6 : f32
    %17 = vector.broadcast %cst_8 : f32 to vector<64x1xf32>
    %18 = arith.addf %14, %17 : vector<64x1xf32>
    %19 = math.rsqrt %18 : vector<64x1xf32>
    %20 = vector.broadcast %19 : vector<64x1xf32> to vector<64x32xf32>
    %21 = arith.mulf %16, %20 : vector<64x32xf32>
    %22 = vector.broadcast %2 : vector<1x32xf32> to vector<64x32xf32>
    %23 = arith.mulf %21, %22 : vector<64x32xf32>
    %24 = vector.broadcast %3 : vector<1x32xf32> to vector<64x32xf32>
    %25 = arith.addf %23, %24 : vector<64x32xf32>
    %cst_9 = arith.constant 0.000000e+00 : f32
    %26 = vector.broadcast %cst_9 : f32 to vector<16x32xf32>
    %27 = tpu.concatenate %26, %25, %26 in 0 : vector<16x32xf32>, vector<64x32xf32>, vector<16x32xf32> -> vector<96x32xf32>
    %28 = tpu.iota {dimensions = array<i32: 0>} : vector<64x32xi32>
    %c8_i32 = arith.constant 8 : i32
    %c0_i32 = arith.constant 0 : i32
    %29 = arith.cmpi eq, %c8_i32, %c0_i32 : i32
    %c1_i32 = arith.constant 1 : i32
    %30 = arith.select %29, %c1_i32, %c8_i32 : i32
    %31 = vector.broadcast %30 : i32 to vector<64x32xi32>
    %32 = arith.remsi %28, %31 : vector<64x32xi32>
    %c0_i32_10 = arith.constant 0 : i32
    %33 = vector.broadcast %c0_i32_10 : i32 to vector<64x32xi32>
    %34 = arith.cmpi ne, %32, %33 : vector<64x32xi32>
    %c0_i32_11 = arith.constant 0 : i32
    %35 = vector.broadcast %c0_i32_11 : i32 to vector<64x32xi32>
    %36 = arith.cmpi slt, %32, %35 : vector<64x32xi32>
    %c0_i32_12 = arith.constant 0 : i32
    %37 = arith.cmpi slt, %30, %c0_i32_12 : i32
    %38 = vector.broadcast %37 : i1 to vector<64x32xi1>
    %39 = vector.broadcast %38 : vector<64x32xi1> to vector<64x32xi1>
    %40 = arith.xori %36, %39 : vector<64x32xi1>
    %41 = arith.andi %40, %34 : vector<64x32xi1>
    %42 = vector.broadcast %30 : i32 to vector<64x32xi32>
    %43 = arith.addi %32, %42 : vector<64x32xi32>
    %44 = arith.select %41, %43, %32 : vector<64x32xi1>, vector<64x32xi32>
    %cst_13 = arith.constant 0.000000e+00 : f32
    %45 = vector.broadcast %cst_13 : f32 to vector<64x64xf32>
    %46 = vector.extract_strided_slice %27 {offsets = [7, 0], sizes = [64, 32], strides = [1, 1]} : vector<96x32xf32> to vector<64x32xf32>
    %c-1_i32 = arith.constant -1 : i32
    %47 = vector.broadcast %c-1_i32 : i32 to vector<64x32xi32>
    %48 = arith.addi %44, %47 : vector<64x32xi32>
    %c0_i32_14 = arith.constant 0 : i32
    %49 = vector.broadcast %c0_i32_14 : i32 to vector<64x32xi32>
    %50 = arith.cmpi sge, %48, %49 : vector<64x32xi32>
    %c8_i32_15 = arith.constant 8 : i32
    %51 = vector.broadcast %c8_i32_15 : i32 to vector<64x32xi32>
    %52 = arith.cmpi slt, %48, %51 : vector<64x32xi32>
    %53 = arith.andi %50, %52 : vector<64x32xi1>
    %cst_16 = arith.constant 0.000000e+00 : f32
    %54 = vector.broadcast %cst_16 : f32 to vector<64x32xf32>
    %55 = arith.select %53, %46, %54 : vector<64x32xi1>, vector<64x32xf32>
    %c0_17 = arith.constant 0 : index
    %c0_18 = arith.constant 0 : index
    %c0_19 = arith.constant 0 : index
    %56 = vector.load %arg3[%c0_17, %c0_18, %c0_19] : memref<9x32x64xf32, #tpu.memory_space<vmem>>, vector<1x32x64xf32>
    %57 = vector.shape_cast %56 : vector<1x32x64xf32> to vector<32x64xf32>
    %cst_20 = arith.constant dense<0.000000e+00> : vector<64x64xf32>
    %58 = tpu.matmul %55, %57, %cst_20 {dimension_numbers = #tpu.dot_dimension_numbers<[1], [0], [0], [1], [0, 0, 1, 1], [], []>} : vector<64x32xf32>, vector<32x64xf32>, vector<64x64xf32> -> vector<64x64xf32>
    %59 = arith.addf %45, %58 : vector<64x64xf32>
    %60 = vector.extract_strided_slice %27 {offsets = [8, 0], sizes = [64, 32], strides = [1, 1]} : vector<96x32xf32> to vector<64x32xf32>
    %c1_21 = arith.constant 1 : index
    %c0_22 = arith.constant 0 : index
    %c0_23 = arith.constant 0 : index
    %61 = vector.load %arg3[%c1_21, %c0_22, %c0_23] : memref<9x32x64xf32, #tpu.memory_space<vmem>>, vector<1x32x64xf32>
    %62 = vector.shape_cast %61 : vector<1x32x64xf32> to vector<32x64xf32>
    %cst_24 = arith.constant dense<0.000000e+00> : vector<64x64xf32>
    %63 = tpu.matmul %60, %62, %cst_24 {dimension_numbers = #tpu.dot_dimension_numbers<[1], [0], [0], [1], [0, 0, 1, 1], [], []>} : vector<64x32xf32>, vector<32x64xf32>, vector<64x64xf32> -> vector<64x64xf32>
    %64 = arith.addf %59, %63 : vector<64x64xf32>
    %65 = vector.extract_strided_slice %27 {offsets = [9, 0], sizes = [64, 32], strides = [1, 1]} : vector<96x32xf32> to vector<64x32xf32>
    %c1_i32_25 = arith.constant 1 : i32
    %66 = vector.broadcast %c1_i32_25 : i32 to vector<64x32xi32>
    %67 = arith.addi %44, %66 : vector<64x32xi32>
    %c0_i32_26 = arith.constant 0 : i32
    %68 = vector.broadcast %c0_i32_26 : i32 to vector<64x32xi32>
    %69 = arith.cmpi sge, %67, %68 : vector<64x32xi32>
    %c8_i32_27 = arith.constant 8 : i32
    %70 = vector.broadcast %c8_i32_27 : i32 to vector<64x32xi32>
    %71 = arith.cmpi slt, %67, %70 : vector<64x32xi32>
    %72 = arith.andi %69, %71 : vector<64x32xi1>
    %cst_28 = arith.constant 0.000000e+00 : f32
    %73 = vector.broadcast %cst_28 : f32 to vector<64x32xf32>
    %74 = arith.select %72, %65, %73 : vector<64x32xi1>, vector<64x32xf32>
    %c2 = arith.constant 2 : index
    %c0_29 = arith.constant 0 : index
    %c0_30 = arith.constant 0 : index
    %75 = vector.load %arg3[%c2, %c0_29, %c0_30] : memref<9x32x64xf32, #tpu.memory_space<vmem>>, vector<1x32x64xf32>
    %76 = vector.shape_cast %75 : vector<1x32x64xf32> to vector<32x64xf32>
    %cst_31 = arith.constant dense<0.000000e+00> : vector<64x64xf32>
    %77 = tpu.matmul %74, %76, %cst_31 {dimension_numbers = #tpu.dot_dimension_numbers<[1], [0], [0], [1], [0, 0, 1, 1], [], []>} : vector<64x32xf32>, vector<32x64xf32>, vector<64x64xf32> -> vector<64x64xf32>
    %78 = arith.addf %64, %77 : vector<64x64xf32>
    %79 = vector.extract_strided_slice %27 {offsets = [15, 0], sizes = [64, 32], strides = [1, 1]} : vector<96x32xf32> to vector<64x32xf32>
    %c-1_i32_32 = arith.constant -1 : i32
    %80 = vector.broadcast %c-1_i32_32 : i32 to vector<64x32xi32>
    %81 = arith.addi %44, %80 : vector<64x32xi32>
    %c0_i32_33 = arith.constant 0 : i32
    %82 = vector.broadcast %c0_i32_33 : i32 to vector<64x32xi32>
    %83 = arith.cmpi sge, %81, %82 : vector<64x32xi32>
    %c8_i32_34 = arith.constant 8 : i32
    %84 = vector.broadcast %c8_i32_34 : i32 to vector<64x32xi32>
    %85 = arith.cmpi slt, %81, %84 : vector<64x32xi32>
    %86 = arith.andi %83, %85 : vector<64x32xi1>
    %cst_35 = arith.constant 0.000000e+00 : f32
    %87 = vector.broadcast %cst_35 : f32 to vector<64x32xf32>
    %88 = arith.select %86, %79, %87 : vector<64x32xi1>, vector<64x32xf32>
    %c3 = arith.constant 3 : index
    %c0_36 = arith.constant 0 : index
    %c0_37 = arith.constant 0 : index
    %89 = vector.load %arg3[%c3, %c0_36, %c0_37] : memref<9x32x64xf32, #tpu.memory_space<vmem>>, vector<1x32x64xf32>
    %90 = vector.shape_cast %89 : vector<1x32x64xf32> to vector<32x64xf32>
    %cst_38 = arith.constant dense<0.000000e+00> : vector<64x64xf32>
    %91 = tpu.matmul %88, %90, %cst_38 {dimension_numbers = #tpu.dot_dimension_numbers<[1], [0], [0], [1], [0, 0, 1, 1], [], []>} : vector<64x32xf32>, vector<32x64xf32>, vector<64x64xf32> -> vector<64x64xf32>
    %92 = arith.addf %78, %91 : vector<64x64xf32>
    %93 = vector.extract_strided_slice %27 {offsets = [16, 0], sizes = [64, 32], strides = [1, 1]} : vector<96x32xf32> to vector<64x32xf32>
    %c4 = arith.constant 4 : index
    %c0_39 = arith.constant 0 : index
    %c0_40 = arith.constant 0 : index
    %94 = vector.load %arg3[%c4, %c0_39, %c0_40] : memref<9x32x64xf32, #tpu.memory_space<vmem>>, vector<1x32x64xf32>
    %95 = vector.shape_cast %94 : vector<1x32x64xf32> to vector<32x64xf32>
    %cst_41 = arith.constant dense<0.000000e+00> : vector<64x64xf32>
    %96 = tpu.matmul %93, %95, %cst_41 {dimension_numbers = #tpu.dot_dimension_numbers<[1], [0], [0], [1], [0, 0, 1, 1], [], []>} : vector<64x32xf32>, vector<32x64xf32>, vector<64x64xf32> -> vector<64x64xf32>
    %97 = arith.addf %92, %96 : vector<64x64xf32>
    %98 = vector.extract_strided_slice %27 {offsets = [17, 0], sizes = [64, 32], strides = [1, 1]} : vector<96x32xf32> to vector<64x32xf32>
    %c1_i32_42 = arith.constant 1 : i32
    %99 = vector.broadcast %c1_i32_42 : i32 to vector<64x32xi32>
    %100 = arith.addi %44, %99 : vector<64x32xi32>
    %c0_i32_43 = arith.constant 0 : i32
    %101 = vector.broadcast %c0_i32_43 : i32 to vector<64x32xi32>
    %102 = arith.cmpi sge, %100, %101 : vector<64x32xi32>
    %c8_i32_44 = arith.constant 8 : i32
    %103 = vector.broadcast %c8_i32_44 : i32 to vector<64x32xi32>
    %104 = arith.cmpi slt, %100, %103 : vector<64x32xi32>
    %105 = arith.andi %102, %104 : vector<64x32xi1>
    %cst_45 = arith.constant 0.000000e+00 : f32
    %106 = vector.broadcast %cst_45 : f32 to vector<64x32xf32>
    %107 = arith.select %105, %98, %106 : vector<64x32xi1>, vector<64x32xf32>
    %c5 = arith.constant 5 : index
    %c0_46 = arith.constant 0 : index
    %c0_47 = arith.constant 0 : index
    %108 = vector.load %arg3[%c5, %c0_46, %c0_47] : memref<9x32x64xf32, #tpu.memory_space<vmem>>, vector<1x32x64xf32>
    %109 = vector.shape_cast %108 : vector<1x32x64xf32> to vector<32x64xf32>
    %cst_48 = arith.constant dense<0.000000e+00> : vector<64x64xf32>
    %110 = tpu.matmul %107, %109, %cst_48 {dimension_numbers = #tpu.dot_dimension_numbers<[1], [0], [0], [1], [0, 0, 1, 1], [], []>} : vector<64x32xf32>, vector<32x64xf32>, vector<64x64xf32> -> vector<64x64xf32>
    %111 = arith.addf %97, %110 : vector<64x64xf32>
    %112 = vector.extract_strided_slice %27 {offsets = [23, 0], sizes = [64, 32], strides = [1, 1]} : vector<96x32xf32> to vector<64x32xf32>
    %c-1_i32_49 = arith.constant -1 : i32
    %113 = vector.broadcast %c-1_i32_49 : i32 to vector<64x32xi32>
    %114 = arith.addi %44, %113 : vector<64x32xi32>
    %c0_i32_50 = arith.constant 0 : i32
    %115 = vector.broadcast %c0_i32_50 : i32 to vector<64x32xi32>
    %116 = arith.cmpi sge, %114, %115 : vector<64x32xi32>
    %c8_i32_51 = arith.constant 8 : i32
    %117 = vector.broadcast %c8_i32_51 : i32 to vector<64x32xi32>
    %118 = arith.cmpi slt, %114, %117 : vector<64x32xi32>
    %119 = arith.andi %116, %118 : vector<64x32xi1>
    %cst_52 = arith.constant 0.000000e+00 : f32
    %120 = vector.broadcast %cst_52 : f32 to vector<64x32xf32>
    %121 = arith.select %119, %112, %120 : vector<64x32xi1>, vector<64x32xf32>
    %c6 = arith.constant 6 : index
    %c0_53 = arith.constant 0 : index
    %c0_54 = arith.constant 0 : index
    %122 = vector.load %arg3[%c6, %c0_53, %c0_54] : memref<9x32x64xf32, #tpu.memory_space<vmem>>, vector<1x32x64xf32>
    %123 = vector.shape_cast %122 : vector<1x32x64xf32> to vector<32x64xf32>
    %cst_55 = arith.constant dense<0.000000e+00> : vector<64x64xf32>
    %124 = tpu.matmul %121, %123, %cst_55 {dimension_numbers = #tpu.dot_dimension_numbers<[1], [0], [0], [1], [0, 0, 1, 1], [], []>} : vector<64x32xf32>, vector<32x64xf32>, vector<64x64xf32> -> vector<64x64xf32>
    %125 = arith.addf %111, %124 : vector<64x64xf32>
    %126 = vector.extract_strided_slice %27 {offsets = [24, 0], sizes = [64, 32], strides = [1, 1]} : vector<96x32xf32> to vector<64x32xf32>
    %c7 = arith.constant 7 : index
    %c0_56 = arith.constant 0 : index
    %c0_57 = arith.constant 0 : index
    %127 = vector.load %arg3[%c7, %c0_56, %c0_57] : memref<9x32x64xf32, #tpu.memory_space<vmem>>, vector<1x32x64xf32>
    %128 = vector.shape_cast %127 : vector<1x32x64xf32> to vector<32x64xf32>
    %cst_58 = arith.constant dense<0.000000e+00> : vector<64x64xf32>
    %129 = tpu.matmul %126, %128, %cst_58 {dimension_numbers = #tpu.dot_dimension_numbers<[1], [0], [0], [1], [0, 0, 1, 1], [], []>} : vector<64x32xf32>, vector<32x64xf32>, vector<64x64xf32> -> vector<64x64xf32>
    %130 = arith.addf %125, %129 : vector<64x64xf32>
    %131 = vector.extract_strided_slice %27 {offsets = [25, 0], sizes = [64, 32], strides = [1, 1]} : vector<96x32xf32> to vector<64x32xf32>
    %c1_i32_59 = arith.constant 1 : i32
    %132 = vector.broadcast %c1_i32_59 : i32 to vector<64x32xi32>
    %133 = arith.addi %44, %132 : vector<64x32xi32>
    %c0_i32_60 = arith.constant 0 : i32
    %134 = vector.broadcast %c0_i32_60 : i32 to vector<64x32xi32>
    %135 = arith.cmpi sge, %133, %134 : vector<64x32xi32>
    %c8_i32_61 = arith.constant 8 : i32
    %136 = vector.broadcast %c8_i32_61 : i32 to vector<64x32xi32>
    %137 = arith.cmpi slt, %133, %136 : vector<64x32xi32>
    %138 = arith.andi %135, %137 : vector<64x32xi1>
    %cst_62 = arith.constant 0.000000e+00 : f32
    %139 = vector.broadcast %cst_62 : f32 to vector<64x32xf32>
    %140 = arith.select %138, %131, %139 : vector<64x32xi1>, vector<64x32xf32>
    %c8 = arith.constant 8 : index
    %c0_63 = arith.constant 0 : index
    %c0_64 = arith.constant 0 : index
    %141 = vector.load %arg3[%c8, %c0_63, %c0_64] : memref<9x32x64xf32, #tpu.memory_space<vmem>>, vector<1x32x64xf32>
    %142 = vector.shape_cast %141 : vector<1x32x64xf32> to vector<32x64xf32>
    %cst_65 = arith.constant dense<0.000000e+00> : vector<64x64xf32>
    %143 = tpu.matmul %140, %142, %cst_65 {dimension_numbers = #tpu.dot_dimension_numbers<[1], [0], [0], [1], [0, 0, 1, 1], [], []>} : vector<64x32xf32>, vector<32x64xf32>, vector<64x64xf32> -> vector<64x64xf32>
    %144 = arith.addf %130, %143 : vector<64x64xf32>
    %c0_66 = arith.constant 0 : index
    %c0_67 = arith.constant 0 : index
    %145 = vector.load %arg4[%c0_66, %c0_67] : memref<1x64xf32, #tpu.memory_space<vmem>>, vector<1x64xf32>
    %146 = vector.broadcast %145 : vector<1x64xf32> to vector<64x64xf32>
    %147 = arith.addf %144, %146 : vector<64x64xf32>
    %148 = vector.extract_strided_slice %147 {offsets = [0, 0], sizes = [64, 32], strides = [1, 1]} : vector<64x64xf32> to vector<64x32xf32>
    %149 = vector.extract_strided_slice %147 {offsets = [0, 32], sizes = [64, 32], strides = [1, 1]} : vector<64x64xf32> to vector<64x32xf32>
    %c0_68 = arith.constant 0 : index
    %c0_69 = arith.constant 0 : index
    %150 = vector.load %arg5[%c0_68, %c0_69] : memref<32x32xf32, #tpu.memory_space<vmem>>, vector<32x32xf32>
    %cst_70 = arith.constant dense<0.000000e+00> : vector<64x32xf32>
    %151 = tpu.matmul %149, %150, %cst_70 {dimension_numbers = #tpu.dot_dimension_numbers<[1], [0], [0], [1], [0, 0, 1, 1], [], []>} : vector<64x32xf32>, vector<32x32xf32>, vector<64x32xf32> -> vector<64x32xf32>
    %c0_71 = arith.constant 0 : index
    %c0_72 = arith.constant 0 : index
    %152 = vector.load %arg6[%c0_71, %c0_72] : memref<1x32xf32, #tpu.memory_space<vmem>>, vector<1x32xf32>
    %153 = vector.broadcast %152 : vector<1x32xf32> to vector<64x32xf32>
    %154 = arith.addf %151, %153 : vector<64x32xf32>
    %cst_73 = arith.constant 0.000000e+00 : f32
    %155 = vector.broadcast %cst_73 : f32 to vector<64x32xf32>
    %156 = vector.extract_strided_slice %154 {offsets = [0, 0], sizes = [64, 8], strides = [1, 1]} : vector<64x32xf32> to vector<64x8xf32>
    %cst_74 = arith.constant dense<0xFF800000> : vector<64xf32>
    %157 = vector.multi_reduction <maximumf>, %156, %cst_74 [1] : vector<64x8xf32> to vector<64xf32>
    %158 = vector.shape_cast %157 : vector<64xf32> to vector<64x1xf32>
    %159 = vector.broadcast %158 : vector<64x1xf32> to vector<64x8xf32>
    %160 = arith.subf %156, %159 : vector<64x8xf32>
    %161 = math.exp %160 : vector<64x8xf32>
    %cst_75 = arith.constant dense<0.000000e+00> : vector<64xf32>
    %162 = vector.multi_reduction <add>, %161, %cst_75 [1] : vector<64x8xf32> to vector<64xf32>
    %163 = vector.shape_cast %162 : vector<64xf32> to vector<64x1xf32>
    %164 = vector.broadcast %163 : vector<64x1xf32> to vector<64x8xf32>
    %165 = arith.divf %161, %164 : vector<64x8xf32>
    %166 = vector.extract_strided_slice %148 {offsets = [0, 0], sizes = [64, 8], strides = [1, 1]} : vector<64x32xf32> to vector<64x8xf32>
    %cst_76 = arith.constant dense<0.000000e+00> : vector<8xf32>
    %167 = vector.multi_reduction <add>, %165, %cst_76 [0] : vector<64x8xf32> to vector<8xf32>
    %168 = vector.shape_cast %167 : vector<8xf32> to vector<1x8xf32>
    %cst_77 = arith.constant dense<0.000000e+00> : vector<8x8xf32>
    %169 = tpu.matmul %165, %166, %cst_77 {dimension_numbers = #tpu.dot_dimension_numbers<[0], [0], [1], [1], [0, 1, 1, 1], [], []>} : vector<64x8xf32>, vector<64x8xf32>, vector<8x8xf32> -> vector<8x8xf32>
    %170 = tpu.transpose %168, [1, 0] : vector<1x8xf32> -> vector<8x1xf32>
    %cst_78 = arith.constant 9.99999974E-6 : f32
    %171 = vector.broadcast %cst_78 : f32 to vector<8x1xf32>
    %172 = arith.addf %170, %171 : vector<8x1xf32>
    %173 = vector.broadcast %172 : vector<8x1xf32> to vector<8x8xf32>
    %174 = arith.divf %169, %173 : vector<8x8xf32>
    %c0_79 = arith.constant 0 : index
    %c0_80 = arith.constant 0 : index
    %c0_81 = arith.constant 0 : index
    %175 = vector.load %arg7[%c0_79, %c0_80, %c0_81] : memref<4x8x24xf32, #tpu.memory_space<vmem>>, vector<1x8x24xf32>
    %176 = vector.shape_cast %175 : vector<1x8x24xf32> to vector<8x24xf32>
    %cst_82 = arith.constant dense<0.000000e+00> : vector<8x24xf32>
    %177 = tpu.matmul %174, %176, %cst_82 {dimension_numbers = #tpu.dot_dimension_numbers<[1], [0], [0], [1], [0, 0, 1, 1], [], []>} : vector<8x8xf32>, vector<8x24xf32>, vector<8x24xf32> -> vector<8x24xf32>
    %178 = vector.extract_strided_slice %177 {offsets = [0, 0], sizes = [8, 8], strides = [1, 1]} : vector<8x24xf32> to vector<8x8xf32>
    %179 = vector.extract_strided_slice %177 {offsets = [0, 8], sizes = [8, 8], strides = [1, 1]} : vector<8x24xf32> to vector<8x8xf32>
    %180 = vector.extract_strided_slice %177 {offsets = [0, 16], sizes = [8, 8], strides = [1, 1]} : vector<8x24xf32> to vector<8x8xf32>
    %cst_83 = arith.constant dense<0.000000e+00> : vector<8x8xf32>
    %181 = tpu.matmul %178, %179, %cst_83 {dimension_numbers = #tpu.dot_dimension_numbers<[1], [1], [0], [0], [0, 0, 1, 0], [], []>} : vector<8x8xf32>, vector<8x8xf32>, vector<8x8xf32> -> vector<8x8xf32>
    %cst_84 = arith.constant 0.353553385 : f32
    %182 = vector.broadcast %cst_84 : f32 to vector<8x8xf32>
    %183 = arith.mulf %181, %182 : vector<8x8xf32>
    %cst_85 = arith.constant dense<0xFF800000> : vector<8xf32>
    %184 = vector.multi_reduction <maximumf>, %183, %cst_85 [1] : vector<8x8xf32> to vector<8xf32>
    %185 = vector.shape_cast %184 : vector<8xf32> to vector<8x1xf32>
    %186 = vector.broadcast %185 : vector<8x1xf32> to vector<8x8xf32>
    %187 = arith.subf %183, %186 : vector<8x8xf32>
    %188 = math.exp %187 : vector<8x8xf32>
    %cst_86 = arith.constant dense<0.000000e+00> : vector<8xf32>
    %189 = vector.multi_reduction <add>, %188, %cst_86 [1] : vector<8x8xf32> to vector<8xf32>
    %190 = vector.shape_cast %189 : vector<8xf32> to vector<8x1xf32>
    %191 = vector.broadcast %190 : vector<8x1xf32> to vector<8x8xf32>
    %192 = arith.divf %188, %191 : vector<8x8xf32>
    %cst_87 = arith.constant dense<0.000000e+00> : vector<8x8xf32>
    %193 = tpu.matmul %192, %180, %cst_87 {dimension_numbers = #tpu.dot_dimension_numbers<[1], [0], [0], [1], [0, 0, 1, 1], [], []>} : vector<8x8xf32>, vector<8x8xf32>, vector<8x8xf32> -> vector<8x8xf32>
    %c0_88 = arith.constant 0 : index
    %c0_89 = arith.constant 0 : index
    %194 = vector.load %arg8[%c0_88, %c0_89] : memref<32x32xf32, #tpu.memory_space<vmem>>, vector<8x32xf32>
    %cst_90 = arith.constant dense<0.000000e+00> : vector<8x32xf32>
    %195 = tpu.matmul %193, %194, %cst_90 {dimension_numbers = #tpu.dot_dimension_numbers<[1], [0], [0], [1], [0, 0, 1, 1], [], []>} : vector<8x8xf32>, vector<8x32xf32>, vector<8x32xf32> -> vector<8x32xf32>
    %cst_91 = arith.constant dense<0.000000e+00> : vector<64x32xf32>
    %196 = tpu.matmul %165, %195, %cst_91 {dimension_numbers = #tpu.dot_dimension_numbers<[1], [0], [0], [1], [0, 0, 1, 1], [], []>} : vector<64x8xf32>, vector<8x32xf32>, vector<64x32xf32> -> vector<64x32xf32>
    %197 = arith.addf %155, %196 : vector<64x32xf32>
    %198 = vector.extract_strided_slice %154 {offsets = [0, 8], sizes = [64, 8], strides = [1, 1]} : vector<64x32xf32> to vector<64x8xf32>
    %cst_92 = arith.constant dense<0xFF800000> : vector<64xf32>
    %199 = vector.multi_reduction <maximumf>, %198, %cst_92 [1] : vector<64x8xf32> to vector<64xf32>
    %200 = vector.shape_cast %199 : vector<64xf32> to vector<64x1xf32>
    %201 = vector.broadcast %200 : vector<64x1xf32> to vector<64x8xf32>
    %202 = arith.subf %198, %201 : vector<64x8xf32>
    %203 = math.exp %202 : vector<64x8xf32>
    %cst_93 = arith.constant dense<0.000000e+00> : vector<64xf32>
    %204 = vector.multi_reduction <add>, %203, %cst_93 [1] : vector<64x8xf32> to vector<64xf32>
    %205 = vector.shape_cast %204 : vector<64xf32> to vector<64x1xf32>
    %206 = vector.broadcast %205 : vector<64x1xf32> to vector<64x8xf32>
    %207 = arith.divf %203, %206 : vector<64x8xf32>
    %208 = vector.extract_strided_slice %148 {offsets = [0, 8], sizes = [64, 8], strides = [1, 1]} : vector<64x32xf32> to vector<64x8xf32>
    %cst_94 = arith.constant dense<0.000000e+00> : vector<8xf32>
    %209 = vector.multi_reduction <add>, %207, %cst_94 [0] : vector<64x8xf32> to vector<8xf32>
    %210 = vector.shape_cast %209 : vector<8xf32> to vector<1x8xf32>
    %cst_95 = arith.constant dense<0.000000e+00> : vector<8x8xf32>
    %211 = tpu.matmul %207, %208, %cst_95 {dimension_numbers = #tpu.dot_dimension_numbers<[0], [0], [1], [1], [0, 1, 1, 1], [], []>} : vector<64x8xf32>, vector<64x8xf32>, vector<8x8xf32> -> vector<8x8xf32>
    %212 = tpu.transpose %210, [1, 0] : vector<1x8xf32> -> vector<8x1xf32>
    %cst_96 = arith.constant 9.99999974E-6 : f32
    %213 = vector.broadcast %cst_96 : f32 to vector<8x1xf32>
    %214 = arith.addf %212, %213 : vector<8x1xf32>
    %215 = vector.broadcast %214 : vector<8x1xf32> to vector<8x8xf32>
    %216 = arith.divf %211, %215 : vector<8x8xf32>
    %c1_97 = arith.constant 1 : index
    %c0_98 = arith.constant 0 : index
    %c0_99 = arith.constant 0 : index
    %217 = vector.load %arg7[%c1_97, %c0_98, %c0_99] : memref<4x8x24xf32, #tpu.memory_space<vmem>>, vector<1x8x24xf32>
    %218 = vector.shape_cast %217 : vector<1x8x24xf32> to vector<8x24xf32>
    %cst_100 = arith.constant dense<0.000000e+00> : vector<8x24xf32>
    %219 = tpu.matmul %216, %218, %cst_100 {dimension_numbers = #tpu.dot_dimension_numbers<[1], [0], [0], [1], [0, 0, 1, 1], [], []>} : vector<8x8xf32>, vector<8x24xf32>, vector<8x24xf32> -> vector<8x24xf32>
    %220 = vector.extract_strided_slice %219 {offsets = [0, 0], sizes = [8, 8], strides = [1, 1]} : vector<8x24xf32> to vector<8x8xf32>
    %221 = vector.extract_strided_slice %219 {offsets = [0, 8], sizes = [8, 8], strides = [1, 1]} : vector<8x24xf32> to vector<8x8xf32>
    %222 = vector.extract_strided_slice %219 {offsets = [0, 16], sizes = [8, 8], strides = [1, 1]} : vector<8x24xf32> to vector<8x8xf32>
    %cst_101 = arith.constant dense<0.000000e+00> : vector<8x8xf32>
    %223 = tpu.matmul %220, %221, %cst_101 {dimension_numbers = #tpu.dot_dimension_numbers<[1], [1], [0], [0], [0, 0, 1, 0], [], []>} : vector<8x8xf32>, vector<8x8xf32>, vector<8x8xf32> -> vector<8x8xf32>
    %cst_102 = arith.constant 0.353553385 : f32
    %224 = vector.broadcast %cst_102 : f32 to vector<8x8xf32>
    %225 = arith.mulf %223, %224 : vector<8x8xf32>
    %cst_103 = arith.constant dense<0xFF800000> : vector<8xf32>
    %226 = vector.multi_reduction <maximumf>, %225, %cst_103 [1] : vector<8x8xf32> to vector<8xf32>
    %227 = vector.shape_cast %226 : vector<8xf32> to vector<8x1xf32>
    %228 = vector.broadcast %227 : vector<8x1xf32> to vector<8x8xf32>
    %229 = arith.subf %225, %228 : vector<8x8xf32>
    %230 = math.exp %229 : vector<8x8xf32>
    %cst_104 = arith.constant dense<0.000000e+00> : vector<8xf32>
    %231 = vector.multi_reduction <add>, %230, %cst_104 [1] : vector<8x8xf32> to vector<8xf32>
    %232 = vector.shape_cast %231 : vector<8xf32> to vector<8x1xf32>
    %233 = vector.broadcast %232 : vector<8x1xf32> to vector<8x8xf32>
    %234 = arith.divf %230, %233 : vector<8x8xf32>
    %cst_105 = arith.constant dense<0.000000e+00> : vector<8x8xf32>
    %235 = tpu.matmul %234, %222, %cst_105 {dimension_numbers = #tpu.dot_dimension_numbers<[1], [0], [0], [1], [0, 0, 1, 1], [], []>} : vector<8x8xf32>, vector<8x8xf32>, vector<8x8xf32> -> vector<8x8xf32>
    %c8_106 = arith.constant 8 : index
    %c0_107 = arith.constant 0 : index
    %236 = vector.load %arg8[%c8_106, %c0_107] : memref<32x32xf32, #tpu.memory_space<vmem>>, vector<8x32xf32>
    %cst_108 = arith.constant dense<0.000000e+00> : vector<8x32xf32>
    %237 = tpu.matmul %235, %236, %cst_108 {dimension_numbers = #tpu.dot_dimension_numbers<[1], [0], [0], [1], [0, 0, 1, 1], [], []>} : vector<8x8xf32>, vector<8x32xf32>, vector<8x32xf32> -> vector<8x32xf32>
    %cst_109 = arith.constant dense<0.000000e+00> : vector<64x32xf32>
    %238 = tpu.matmul %207, %237, %cst_109 {dimension_numbers = #tpu.dot_dimension_numbers<[1], [0], [0], [1], [0, 0, 1, 1], [], []>} : vector<64x8xf32>, vector<8x32xf32>, vector<64x32xf32> -> vector<64x32xf32>
    %239 = arith.addf %197, %238 : vector<64x32xf32>
    %240 = vector.extract_strided_slice %154 {offsets = [0, 16], sizes = [64, 8], strides = [1, 1]} : vector<64x32xf32> to vector<64x8xf32>
    %cst_110 = arith.constant dense<0xFF800000> : vector<64xf32>
    %241 = vector.multi_reduction <maximumf>, %240, %cst_110 [1] : vector<64x8xf32> to vector<64xf32>
    %242 = vector.shape_cast %241 : vector<64xf32> to vector<64x1xf32>
    %243 = vector.broadcast %242 : vector<64x1xf32> to vector<64x8xf32>
    %244 = arith.subf %240, %243 : vector<64x8xf32>
    %245 = math.exp %244 : vector<64x8xf32>
    %cst_111 = arith.constant dense<0.000000e+00> : vector<64xf32>
    %246 = vector.multi_reduction <add>, %245, %cst_111 [1] : vector<64x8xf32> to vector<64xf32>
    %247 = vector.shape_cast %246 : vector<64xf32> to vector<64x1xf32>
    %248 = vector.broadcast %247 : vector<64x1xf32> to vector<64x8xf32>
    %249 = arith.divf %245, %248 : vector<64x8xf32>
    %250 = vector.extract_strided_slice %148 {offsets = [0, 16], sizes = [64, 8], strides = [1, 1]} : vector<64x32xf32> to vector<64x8xf32>
    %cst_112 = arith.constant dense<0.000000e+00> : vector<8xf32>
    %251 = vector.multi_reduction <add>, %249, %cst_112 [0] : vector<64x8xf32> to vector<8xf32>
    %252 = vector.shape_cast %251 : vector<8xf32> to vector<1x8xf32>
    %cst_113 = arith.constant dense<0.000000e+00> : vector<8x8xf32>
    %253 = tpu.matmul %249, %250, %cst_113 {dimension_numbers = #tpu.dot_dimension_numbers<[0], [0], [1], [1], [0, 1, 1, 1], [], []>} : vector<64x8xf32>, vector<64x8xf32>, vector<8x8xf32> -> vector<8x8xf32>
    %254 = tpu.transpose %252, [1, 0] : vector<1x8xf32> -> vector<8x1xf32>
    %cst_114 = arith.constant 9.99999974E-6 : f32
    %255 = vector.broadcast %cst_114 : f32 to vector<8x1xf32>
    %256 = arith.addf %254, %255 : vector<8x1xf32>
    %257 = vector.broadcast %256 : vector<8x1xf32> to vector<8x8xf32>
    %258 = arith.divf %253, %257 : vector<8x8xf32>
    %c2_115 = arith.constant 2 : index
    %c0_116 = arith.constant 0 : index
    %c0_117 = arith.constant 0 : index
    %259 = vector.load %arg7[%c2_115, %c0_116, %c0_117] : memref<4x8x24xf32, #tpu.memory_space<vmem>>, vector<1x8x24xf32>
    %260 = vector.shape_cast %259 : vector<1x8x24xf32> to vector<8x24xf32>
    %cst_118 = arith.constant dense<0.000000e+00> : vector<8x24xf32>
    %261 = tpu.matmul %258, %260, %cst_118 {dimension_numbers = #tpu.dot_dimension_numbers<[1], [0], [0], [1], [0, 0, 1, 1], [], []>} : vector<8x8xf32>, vector<8x24xf32>, vector<8x24xf32> -> vector<8x24xf32>
    %262 = vector.extract_strided_slice %261 {offsets = [0, 0], sizes = [8, 8], strides = [1, 1]} : vector<8x24xf32> to vector<8x8xf32>
    %263 = vector.extract_strided_slice %261 {offsets = [0, 8], sizes = [8, 8], strides = [1, 1]} : vector<8x24xf32> to vector<8x8xf32>
    %264 = vector.extract_strided_slice %261 {offsets = [0, 16], sizes = [8, 8], strides = [1, 1]} : vector<8x24xf32> to vector<8x8xf32>
    %cst_119 = arith.constant dense<0.000000e+00> : vector<8x8xf32>
    %265 = tpu.matmul %262, %263, %cst_119 {dimension_numbers = #tpu.dot_dimension_numbers<[1], [1], [0], [0], [0, 0, 1, 0], [], []>} : vector<8x8xf32>, vector<8x8xf32>, vector<8x8xf32> -> vector<8x8xf32>
    %cst_120 = arith.constant 0.353553385 : f32
    %266 = vector.broadcast %cst_120 : f32 to vector<8x8xf32>
    %267 = arith.mulf %265, %266 : vector<8x8xf32>
    %cst_121 = arith.constant dense<0xFF800000> : vector<8xf32>
    %268 = vector.multi_reduction <maximumf>, %267, %cst_121 [1] : vector<8x8xf32> to vector<8xf32>
    %269 = vector.shape_cast %268 : vector<8xf32> to vector<8x1xf32>
    %270 = vector.broadcast %269 : vector<8x1xf32> to vector<8x8xf32>
    %271 = arith.subf %267, %270 : vector<8x8xf32>
    %272 = math.exp %271 : vector<8x8xf32>
    %cst_122 = arith.constant dense<0.000000e+00> : vector<8xf32>
    %273 = vector.multi_reduction <add>, %272, %cst_122 [1] : vector<8x8xf32> to vector<8xf32>
    %274 = vector.shape_cast %273 : vector<8xf32> to vector<8x1xf32>
    %275 = vector.broadcast %274 : vector<8x1xf32> to vector<8x8xf32>
    %276 = arith.divf %272, %275 : vector<8x8xf32>
    %cst_123 = arith.constant dense<0.000000e+00> : vector<8x8xf32>
    %277 = tpu.matmul %276, %264, %cst_123 {dimension_numbers = #tpu.dot_dimension_numbers<[1], [0], [0], [1], [0, 0, 1, 1], [], []>} : vector<8x8xf32>, vector<8x8xf32>, vector<8x8xf32> -> vector<8x8xf32>
    %c16 = arith.constant 16 : index
    %c0_124 = arith.constant 0 : index
    %278 = vector.load %arg8[%c16, %c0_124] : memref<32x32xf32, #tpu.memory_space<vmem>>, vector<8x32xf32>
    %cst_125 = arith.constant dense<0.000000e+00> : vector<8x32xf32>
    %279 = tpu.matmul %277, %278, %cst_125 {dimension_numbers = #tpu.dot_dimension_numbers<[1], [0], [0], [1], [0, 0, 1, 1], [], []>} : vector<8x8xf32>, vector<8x32xf32>, vector<8x32xf32> -> vector<8x32xf32>
    %cst_126 = arith.constant dense<0.000000e+00> : vector<64x32xf32>
    %280 = tpu.matmul %249, %279, %cst_126 {dimension_numbers = #tpu.dot_dimension_numbers<[1], [0], [0], [1], [0, 0, 1, 1], [], []>} : vector<64x8xf32>, vector<8x32xf32>, vector<64x32xf32> -> vector<64x32xf32>
    %281 = arith.addf %239, %280 : vector<64x32xf32>
    %282 = vector.extract_strided_slice %154 {offsets = [0, 24], sizes = [64, 8], strides = [1, 1]} : vector<64x32xf32> to vector<64x8xf32>
    %cst_127 = arith.constant dense<0xFF800000> : vector<64xf32>
    %283 = vector.multi_reduction <maximumf>, %282, %cst_127 [1] : vector<64x8xf32> to vector<64xf32>
    %284 = vector.shape_cast %283 : vector<64xf32> to vector<64x1xf32>
    %285 = vector.broadcast %284 : vector<64x1xf32> to vector<64x8xf32>
    %286 = arith.subf %282, %285 : vector<64x8xf32>
    %287 = math.exp %286 : vector<64x8xf32>
    %cst_128 = arith.constant dense<0.000000e+00> : vector<64xf32>
    %288 = vector.multi_reduction <add>, %287, %cst_128 [1] : vector<64x8xf32> to vector<64xf32>
    %289 = vector.shape_cast %288 : vector<64xf32> to vector<64x1xf32>
    %290 = vector.broadcast %289 : vector<64x1xf32> to vector<64x8xf32>
    %291 = arith.divf %287, %290 : vector<64x8xf32>
    %292 = vector.extract_strided_slice %148 {offsets = [0, 24], sizes = [64, 8], strides = [1, 1]} : vector<64x32xf32> to vector<64x8xf32>
    %cst_129 = arith.constant dense<0.000000e+00> : vector<8xf32>
    %293 = vector.multi_reduction <add>, %291, %cst_129 [0] : vector<64x8xf32> to vector<8xf32>
    %294 = vector.shape_cast %293 : vector<8xf32> to vector<1x8xf32>
    %cst_130 = arith.constant dense<0.000000e+00> : vector<8x8xf32>
    %295 = tpu.matmul %291, %292, %cst_130 {dimension_numbers = #tpu.dot_dimension_numbers<[0], [0], [1], [1], [0, 1, 1, 1], [], []>} : vector<64x8xf32>, vector<64x8xf32>, vector<8x8xf32> -> vector<8x8xf32>
    %296 = tpu.transpose %294, [1, 0] : vector<1x8xf32> -> vector<8x1xf32>
    %cst_131 = arith.constant 9.99999974E-6 : f32
    %297 = vector.broadcast %cst_131 : f32 to vector<8x1xf32>
    %298 = arith.addf %296, %297 : vector<8x1xf32>
    %299 = vector.broadcast %298 : vector<8x1xf32> to vector<8x8xf32>
    %300 = arith.divf %295, %299 : vector<8x8xf32>
    %c3_132 = arith.constant 3 : index
    %c0_133 = arith.constant 0 : index
    %c0_134 = arith.constant 0 : index
    %301 = vector.load %arg7[%c3_132, %c0_133, %c0_134] : memref<4x8x24xf32, #tpu.memory_space<vmem>>, vector<1x8x24xf32>
    %302 = vector.shape_cast %301 : vector<1x8x24xf32> to vector<8x24xf32>
    %cst_135 = arith.constant dense<0.000000e+00> : vector<8x24xf32>
    %303 = tpu.matmul %300, %302, %cst_135 {dimension_numbers = #tpu.dot_dimension_numbers<[1], [0], [0], [1], [0, 0, 1, 1], [], []>} : vector<8x8xf32>, vector<8x24xf32>, vector<8x24xf32> -> vector<8x24xf32>
    %304 = vector.extract_strided_slice %303 {offsets = [0, 0], sizes = [8, 8], strides = [1, 1]} : vector<8x24xf32> to vector<8x8xf32>
    %305 = vector.extract_strided_slice %303 {offsets = [0, 8], sizes = [8, 8], strides = [1, 1]} : vector<8x24xf32> to vector<8x8xf32>
    %306 = vector.extract_strided_slice %303 {offsets = [0, 16], sizes = [8, 8], strides = [1, 1]} : vector<8x24xf32> to vector<8x8xf32>
    %cst_136 = arith.constant dense<0.000000e+00> : vector<8x8xf32>
    %307 = tpu.matmul %304, %305, %cst_136 {dimension_numbers = #tpu.dot_dimension_numbers<[1], [1], [0], [0], [0, 0, 1, 0], [], []>} : vector<8x8xf32>, vector<8x8xf32>, vector<8x8xf32> -> vector<8x8xf32>
    %cst_137 = arith.constant 0.353553385 : f32
    %308 = vector.broadcast %cst_137 : f32 to vector<8x8xf32>
    %309 = arith.mulf %307, %308 : vector<8x8xf32>
    %cst_138 = arith.constant dense<0xFF800000> : vector<8xf32>
    %310 = vector.multi_reduction <maximumf>, %309, %cst_138 [1] : vector<8x8xf32> to vector<8xf32>
    %311 = vector.shape_cast %310 : vector<8xf32> to vector<8x1xf32>
    %312 = vector.broadcast %311 : vector<8x1xf32> to vector<8x8xf32>
    %313 = arith.subf %309, %312 : vector<8x8xf32>
    %314 = math.exp %313 : vector<8x8xf32>
    %cst_139 = arith.constant dense<0.000000e+00> : vector<8xf32>
    %315 = vector.multi_reduction <add>, %314, %cst_139 [1] : vector<8x8xf32> to vector<8xf32>
    %316 = vector.shape_cast %315 : vector<8xf32> to vector<8x1xf32>
    %317 = vector.broadcast %316 : vector<8x1xf32> to vector<8x8xf32>
    %318 = arith.divf %314, %317 : vector<8x8xf32>
    %cst_140 = arith.constant dense<0.000000e+00> : vector<8x8xf32>
    %319 = tpu.matmul %318, %306, %cst_140 {dimension_numbers = #tpu.dot_dimension_numbers<[1], [0], [0], [1], [0, 0, 1, 1], [], []>} : vector<8x8xf32>, vector<8x8xf32>, vector<8x8xf32> -> vector<8x8xf32>
    %c24 = arith.constant 24 : index
    %c0_141 = arith.constant 0 : index
    %320 = vector.load %arg8[%c24, %c0_141] : memref<32x32xf32, #tpu.memory_space<vmem>>, vector<8x32xf32>
    %cst_142 = arith.constant dense<0.000000e+00> : vector<8x32xf32>
    %321 = tpu.matmul %319, %320, %cst_142 {dimension_numbers = #tpu.dot_dimension_numbers<[1], [0], [0], [1], [0, 0, 1, 1], [], []>} : vector<8x8xf32>, vector<8x32xf32>, vector<8x32xf32> -> vector<8x32xf32>
    %cst_143 = arith.constant dense<0.000000e+00> : vector<64x32xf32>
    %322 = tpu.matmul %291, %321, %cst_143 {dimension_numbers = #tpu.dot_dimension_numbers<[1], [0], [0], [1], [0, 0, 1, 1], [], []>} : vector<64x8xf32>, vector<8x32xf32>, vector<64x32xf32> -> vector<64x32xf32>
    %323 = arith.addf %281, %322 : vector<64x32xf32>
    %c0_144 = arith.constant 0 : index
    %c0_145 = arith.constant 0 : index
    %324 = vector.load %arg9[%c0_144, %c0_145] : memref<1x32xf32, #tpu.memory_space<vmem>>, vector<1x32xf32>
    %325 = vector.broadcast %324 : vector<1x32xf32> to vector<64x32xf32>
    %326 = arith.addf %323, %325 : vector<64x32xf32>
    %327 = arith.addf %326, %1 : vector<64x32xf32>
    %c2_146 = arith.constant 2 : index
    %c0_147 = arith.constant 0 : index
    %328 = vector.load %arg2[%c2_146, %c0_147] : memref<4x32xf32, #tpu.memory_space<vmem>>, vector<1x32xf32>
    %c3_148 = arith.constant 3 : index
    %c0_149 = arith.constant 0 : index
    %329 = vector.load %arg2[%c3_148, %c0_149] : memref<4x32xf32, #tpu.memory_space<vmem>>, vector<1x32xf32>
    %cst_150 = arith.constant dense<0.000000e+00> : vector<64xf32>
    %330 = vector.multi_reduction <add>, %327, %cst_150 [1] : vector<64x32xf32> to vector<64xf32>
    %331 = vector.shape_cast %330 : vector<64xf32> to vector<64x1xf32>
    %cst_151 = arith.constant 3.200000e+01 : f32
    %332 = vector.broadcast %cst_151 : f32 to vector<64x1xf32>
    %333 = arith.divf %331, %332 : vector<64x1xf32>
    %334 = vector.broadcast %333 : vector<64x1xf32> to vector<64x32xf32>
    %335 = arith.subf %327, %334 : vector<64x32xf32>
    %336 = arith.mulf %335, %335 : vector<64x32xf32>
    %cst_152 = arith.constant dense<0.000000e+00> : vector<64xf32>
    %337 = vector.multi_reduction <add>, %336, %cst_152 [1] : vector<64x32xf32> to vector<64xf32>
    %338 = vector.shape_cast %337 : vector<64xf32> to vector<64x1xf32>
    %cst_153 = arith.constant 3.200000e+01 : f32
    %339 = vector.broadcast %cst_153 : f32 to vector<64x1xf32>
    %340 = arith.divf %338, %339 : vector<64x1xf32>
    %341 = vector.broadcast %333 : vector<64x1xf32> to vector<64x32xf32>
    %342 = arith.subf %327, %341 : vector<64x32xf32>
    %cst_154 = arith.constant 9.99999974E-6 : f32
    %343 = vector.broadcast %cst_154 : f32 to vector<64x1xf32>
    %344 = arith.addf %340, %343 : vector<64x1xf32>
    %345 = math.rsqrt %344 : vector<64x1xf32>
    %346 = vector.broadcast %345 : vector<64x1xf32> to vector<64x32xf32>
    %347 = arith.mulf %342, %346 : vector<64x32xf32>
    %348 = vector.broadcast %328 : vector<1x32xf32> to vector<64x32xf32>
    %349 = arith.mulf %347, %348 : vector<64x32xf32>
    %350 = vector.broadcast %329 : vector<1x32xf32> to vector<64x32xf32>
    %351 = arith.addf %349, %350 : vector<64x32xf32>
    %c0_155 = arith.constant 0 : index
    %c0_156 = arith.constant 0 : index
    %352 = vector.load %arg10[%c0_155, %c0_156] : memref<32x32xf32, #tpu.memory_space<vmem>>, vector<32x32xf32>
    %cst_157 = arith.constant dense<0.000000e+00> : vector<64x32xf32>
    %353 = tpu.matmul %351, %352, %cst_157 {dimension_numbers = #tpu.dot_dimension_numbers<[1], [0], [0], [1], [0, 0, 1, 1], [], []>} : vector<64x32xf32>, vector<32x32xf32>, vector<64x32xf32> -> vector<64x32xf32>
    %c0_158 = arith.constant 0 : index
    %c0_159 = arith.constant 0 : index
    %354 = vector.load %arg11[%c0_158, %c0_159] : memref<1x32xf32, #tpu.memory_space<vmem>>, vector<1x32xf32>
    %355 = vector.broadcast %354 : vector<1x32xf32> to vector<64x32xf32>
    %356 = arith.addf %353, %355 : vector<64x32xf32>
    %cst_160 = arith.constant 5.000000e-01 : f32
    %357 = vector.broadcast %cst_160 : f32 to vector<64x32xf32>
    %358 = arith.mulf %357, %356 : vector<64x32xf32>
    %cst_161 = arith.constant 0.707106769 : f32
    %359 = vector.broadcast %cst_161 : f32 to vector<64x32xf32>
    %360 = arith.mulf %356, %359 : vector<64x32xf32>
    %361 = math.erf %360 : vector<64x32xf32>
    %cst_162 = arith.constant 1.000000e+00 : f32
    %362 = vector.broadcast %cst_162 : f32 to vector<64x32xf32>
    %363 = arith.addf %362, %361 : vector<64x32xf32>
    %364 = arith.mulf %358, %363 : vector<64x32xf32>
    %c0_163 = arith.constant 0 : index
    %c0_164 = arith.constant 0 : index
    %365 = vector.load %arg12[%c0_163, %c0_164] : memref<32x32xf32, #tpu.memory_space<vmem>>, vector<32x32xf32>
    %cst_165 = arith.constant dense<0.000000e+00> : vector<64x32xf32>
    %366 = tpu.matmul %364, %365, %cst_165 {dimension_numbers = #tpu.dot_dimension_numbers<[1], [0], [0], [1], [0, 0, 1, 1], [], []>} : vector<64x32xf32>, vector<32x32xf32>, vector<64x32xf32> -> vector<64x32xf32>
    %c0_166 = arith.constant 0 : index
    %c0_167 = arith.constant 0 : index
    %367 = vector.load %arg13[%c0_166, %c0_167] : memref<1x32xf32, #tpu.memory_space<vmem>>, vector<1x32xf32>
    %368 = vector.broadcast %367 : vector<1x32xf32> to vector<64x32xf32>
    %369 = arith.addf %366, %368 : vector<64x32xf32>
    %370 = arith.addf %369, %327 : vector<64x32xf32>
    %c0_168 = arith.constant 0 : index
    %c0_169 = arith.constant 0 : index
    %c0_170 = arith.constant 0 : index
    %371 = vector.load %arg14[%c0_168, %c0_169, %c0_170] : memref<1x64x32xf32, #tpu.memory_space<vmem>>, vector<1x64x32xf32>
    %372 = vector.shape_cast %371 : vector<1x64x32xf32> to vector<64x32xf32>
    %373 = vector.shape_cast %370 : vector<64x32xf32> to vector<1x64x32xf32>
    tpu.vector_store %arg14[%c0_168, %c0_169, %c0_170], %373 {strides = array<i32>} : memref<1x64x32xf32, #tpu.memory_space<vmem>>, vector<1x64x32xf32>,
    return
  }
  func.func @transform_0(%arg0: i32) -> (i32, i32, i32) {
    %c0_i32 = arith.constant 0 : i32
    %c0_i32_0 = arith.constant 0 : i32
    %c0_i32_1 = arith.constant 0 : i32
    return %arg0, %c0_i32, %c0_i32_0 : i32, i32, i32
  }
  func.func @transform_1(%arg0: i32) -> (i32, i32) {
    %c0_i32 = arith.constant 0 : i32
    %c0_i32_0 = arith.constant 0 : i32
    %c0_i32_1 = arith.constant 0 : i32
    return %c0_i32, %c0_i32_0 : i32, i32
  }
  func.func @transform_2(%arg0: i32) -> (i32, i32, i32) {
    %c0_i32 = arith.constant 0 : i32
    %c0_i32_0 = arith.constant 0 : i32
    %c0_i32_1 = arith.constant 0 : i32
    %c0_i32_2 = arith.constant 0 : i32
    return %c0_i32, %c0_i32_0, %c0_i32_1 : i32, i32, i32
  }
  func.func @transform_3(%arg0: i32) -> (i32, i32) {
    %c0_i32 = arith.constant 0 : i32
    %c0_i32_0 = arith.constant 0 : i32
    %c0_i32_1 = arith.constant 0 : i32
    return %c0_i32, %c0_i32_0 : i32, i32
  }
  func.func @transform_4(%arg0: i32) -> (i32, i32) {
    %c0_i32 = arith.constant 0 : i32
    %c0_i32_0 = arith.constant 0 : i32
    %c0_i32_1 = arith.constant 0 : i32
    return %c0_i32, %c0_i32_0 : i32, i32
  }
  func.func @transform_5(%arg0: i32) -> (i32, i32) {
    %c0_i32 = arith.constant 0 : i32
    %c0_i32_0 = arith.constant 0 : i32
    %c0_i32_1 = arith.constant 0 : i32
    return %c0_i32, %c0_i32_0 : i32, i32
  }
  func.func @transform_6(%arg0: i32) -> (i32, i32, i32) {
    %c0_i32 = arith.constant 0 : i32
    %c0_i32_0 = arith.constant 0 : i32
    %c0_i32_1 = arith.constant 0 : i32
    %c0_i32_2 = arith.constant 0 : i32
    return %c0_i32, %c0_i32_0, %c0_i32_1 : i32, i32, i32
  }
  func.func @transform_7(%arg0: i32) -> (i32, i32) {
    %c0_i32 = arith.constant 0 : i32
    %c0_i32_0 = arith.constant 0 : i32
    %c0_i32_1 = arith.constant 0 : i32
    return %c0_i32, %c0_i32_0 : i32, i32
  }
  func.func @transform_8(%arg0: i32) -> (i32, i32) {
    %c0_i32 = arith.constant 0 : i32
    %c0_i32_0 = arith.constant 0 : i32
    %c0_i32_1 = arith.constant 0 : i32
    return %c0_i32, %c0_i32_0 : i32, i32
  }
  func.func @transform_9(%arg0: i32) -> (i32, i32) {
    %c0_i32 = arith.constant 0 : i32
    %c0_i32_0 = arith.constant 0 : i32
    %c0_i32_1 = arith.constant 0 : i32
    return %c0_i32, %c0_i32_0 : i32, i32
  }
  func.func @transform_10(%arg0: i32) -> (i32, i32) {
    %c0_i32 = arith.constant 0 : i32
    %c0_i32_0 = arith.constant 0 : i32
    %c0_i32_1 = arith.constant 0 : i32
    return %c0_i32, %c0_i32_0 : i32, i32
  }
  func.func @transform_11(%arg0: i32) -> (i32, i32) {
    %c0_i32 = arith.constant 0 : i32
    %c0_i32_0 = arith.constant 0 : i32
    %c0_i32_1 = arith.constant 0 : i32
    return %c0_i32, %c0_i32_0 : i32, i32
  }
  func.func @transform_12(%arg0: i32) -> (i32, i32) {
    %c0_i32 = arith.constant 0 : i32
    %c0_i32_0 = arith.constant 0 : i32
    %c0_i32_1 = arith.constant 0 : i32
    return %c0_i32, %c0_i32_0 : i32, i32
  }
  func.func @transform_13(%arg0: i32) -> (i32, i32, i32) {
    %c0_i32 = arith.constant 0 : i32
    %c0_i32_0 = arith.constant 0 : i32
    %c0_i32_1 = arith.constant 0 : i32
    return %arg0, %c0_i32, %c0_i32_0 : i32, i32, i32
  }
}

module attributes {stable_mosaic.version = 11 : i64} {
  func.func @_pre_kernel(%arg0: i32, %arg1: memref<1x64x2xf32, #tpu.memory_space<vmem>>, %arg2: memref<2x64xf32, #tpu.memory_space<vmem>>, %arg3: memref<1x64xf32, #tpu.memory_space<vmem>>, %arg4: memref<64x32xf32, #tpu.memory_space<vmem>>, %arg5: memref<1x32xf32, #tpu.memory_space<vmem>>, %arg6: memref<1x64x32xf32, #tpu.memory_space<vmem>>) attributes {dimension_semantics = [#tpu.dimension_semantics<parallel>], iteration_bounds = array<i64: 2>, scalar_prefetch = 0 : i64, scratch_operands = 0 : i64, tpu.core_type = #tpu.core_type<tc>, window_params = [{transform_indices = @transform_0, window_bounds = array<i64: 1, 64, 2>}, {pipeline_mode = #tpu.pipeline_mode<synchronous>, transform_indices = @transform_1, window_bounds = array<i64: 2, 64>}, {pipeline_mode = #tpu.pipeline_mode<synchronous>, transform_indices = @transform_2, window_bounds = array<i64: 1, 64>}, {pipeline_mode = #tpu.pipeline_mode<synchronous>, transform_indices = @transform_3, window_bounds = array<i64: 64, 32>}, {pipeline_mode = #tpu.pipeline_mode<synchronous>, transform_indices = @transform_4, window_bounds = array<i64: 1, 32>}, {transform_indices = @transform_5, window_bounds = array<i64: 1, 64, 32>}]} {
    %c0 = arith.constant 0 : index
    %c0_0 = arith.constant 0 : index
    %c0_1 = arith.constant 0 : index
    %0 = vector.load %arg1[%c0, %c0_0, %c0_1] : memref<1x64x2xf32, #tpu.memory_space<vmem>>, vector<1x64x2xf32>
    %1 = vector.shape_cast %0 : vector<1x64x2xf32> to vector<64x2xf32>
    %c0_2 = arith.constant 0 : index
    %c0_3 = arith.constant 0 : index
    %2 = vector.load %arg2[%c0_2, %c0_3] : memref<2x64xf32, #tpu.memory_space<vmem>>, vector<2x64xf32>
    %cst = arith.constant dense<0.000000e+00> : vector<64x64xf32>
    %3 = tpu.matmul %1, %2, %cst {dimension_numbers = #tpu.dot_dimension_numbers<[1], [0], [0], [1], [0, 0, 1, 1], [], []>} : vector<64x2xf32>, vector<2x64xf32>, vector<64x64xf32> -> vector<64x64xf32>
    %c0_4 = arith.constant 0 : index
    %c0_5 = arith.constant 0 : index
    %4 = vector.load %arg3[%c0_4, %c0_5] : memref<1x64xf32, #tpu.memory_space<vmem>>, vector<1x64xf32>
    %5 = vector.broadcast %4 : vector<1x64xf32> to vector<64x64xf32>
    %6 = arith.addf %3, %5 : vector<64x64xf32>
    %cst_6 = arith.constant 5.000000e-01 : f32
    %7 = vector.broadcast %cst_6 : f32 to vector<64x64xf32>
    %8 = arith.mulf %7, %6 : vector<64x64xf32>
    %cst_7 = arith.constant 0.707106769 : f32
    %9 = vector.broadcast %cst_7 : f32 to vector<64x64xf32>
    %10 = arith.mulf %6, %9 : vector<64x64xf32>
    %11 = math.erf %10 : vector<64x64xf32>
    %cst_8 = arith.constant 1.000000e+00 : f32
    %12 = vector.broadcast %cst_8 : f32 to vector<64x64xf32>
    %13 = arith.addf %12, %11 : vector<64x64xf32>
    %14 = arith.mulf %8, %13 : vector<64x64xf32>
    %c0_9 = arith.constant 0 : index
    %c0_10 = arith.constant 0 : index
    %15 = vector.load %arg4[%c0_9, %c0_10] : memref<64x32xf32, #tpu.memory_space<vmem>>, vector<64x32xf32>
    %cst_11 = arith.constant dense<0.000000e+00> : vector<64x32xf32>
    %16 = tpu.matmul %14, %15, %cst_11 {dimension_numbers = #tpu.dot_dimension_numbers<[1], [0], [0], [1], [0, 0, 1, 1], [], []>} : vector<64x64xf32>, vector<64x32xf32>, vector<64x32xf32> -> vector<64x32xf32>
    %c0_12 = arith.constant 0 : index
    %c0_13 = arith.constant 0 : index
    %17 = vector.load %arg5[%c0_12, %c0_13] : memref<1x32xf32, #tpu.memory_space<vmem>>, vector<1x32xf32>
    %18 = vector.broadcast %17 : vector<1x32xf32> to vector<64x32xf32>
    %19 = arith.addf %16, %18 : vector<64x32xf32>
    %c0_14 = arith.constant 0 : index
    %c0_15 = arith.constant 0 : index
    %c0_16 = arith.constant 0 : index
    %20 = vector.load %arg6[%c0_14, %c0_15, %c0_16] : memref<1x64x32xf32, #tpu.memory_space<vmem>>, vector<1x64x32xf32>
    %21 = vector.shape_cast %20 : vector<1x64x32xf32> to vector<64x32xf32>
    %22 = vector.shape_cast %19 : vector<64x32xf32> to vector<1x64x32xf32>
    tpu.vector_store %arg6[%c0_14, %c0_15, %c0_16], %22 {strides = array<i32>} : memref<1x64x32xf32, #tpu.memory_space<vmem>>, vector<1x64x32xf32>,
    return
  }
  func.func @transform_0(%arg0: i32) -> (i32, i32, i32) {
    %c0_i32 = arith.constant 0 : i32
    %c0_i32_0 = arith.constant 0 : i32
    %c0_i32_1 = arith.constant 0 : i32
    return %arg0, %c0_i32, %c0_i32_0 : i32, i32, i32
  }
  func.func @transform_1(%arg0: i32) -> (i32, i32) {
    %c0_i32 = arith.constant 0 : i32
    %c0_i32_0 = arith.constant 0 : i32
    %c0_i32_1 = arith.constant 0 : i32
    return %c0_i32, %c0_i32_0 : i32, i32
  }
  func.func @transform_2(%arg0: i32) -> (i32, i32) {
    %c0_i32 = arith.constant 0 : i32
    %c0_i32_0 = arith.constant 0 : i32
    %c0_i32_1 = arith.constant 0 : i32
    return %c0_i32, %c0_i32_0 : i32, i32
  }
  func.func @transform_3(%arg0: i32) -> (i32, i32) {
    %c0_i32 = arith.constant 0 : i32
    %c0_i32_0 = arith.constant 0 : i32
    %c0_i32_1 = arith.constant 0 : i32
    return %c0_i32, %c0_i32_0 : i32, i32
  }
  func.func @transform_4(%arg0: i32) -> (i32, i32) {
    %c0_i32 = arith.constant 0 : i32
    %c0_i32_0 = arith.constant 0 : i32
    %c0_i32_1 = arith.constant 0 : i32
    return %c0_i32, %c0_i32_0 : i32, i32
  }
  func.func @transform_5(%arg0: i32) -> (i32, i32, i32) {
    %c0_i32 = arith.constant 0 : i32
    %c0_i32_0 = arith.constant 0 : i32
    %c0_i32_1 = arith.constant 0 : i32
    return %arg0, %c0_i32, %c0_i32_0 : i32, i32, i32
  }
}

module attributes {stable_mosaic.version = 11 : i64} {
  func.func @_block_kernel(%arg0: i32, %arg1: memref<1x64x32xf32, #tpu.memory_space<vmem>>, %arg2: memref<6x32xf32, #tpu.memory_space<vmem>>, %arg3: memref<9x32x64xf32, #tpu.memory_space<vmem>>, %arg4: memref<1x64xf32, #tpu.memory_space<vmem>>, %arg5: memref<32x32xf32, #tpu.memory_space<vmem>>, %arg6: memref<1x32xf32, #tpu.memory_space<vmem>>, %arg7: memref<4x8x24xf32, #tpu.memory_space<vmem>>, %arg8: memref<32x32xf32, #tpu.memory_space<vmem>>, %arg9: memref<1x32xf32, #tpu.memory_space<vmem>>, %arg10: memref<32x32xf32, #tpu.memory_space<vmem>>, %arg11: memref<1x32xf32, #tpu.memory_space<vmem>>, %arg12: memref<32x32xf32, #tpu.memory_space<vmem>>, %arg13: memref<1x32xf32, #tpu.memory_space<vmem>>, %arg14: memref<32x1xf32, #tpu.memory_space<vmem>>, %arg15: memref<1x1xf32, #tpu.memory_space<vmem>>, %arg16: memref<1x64x1xf32, #tpu.memory_space<vmem>>) attributes {dimension_semantics = [#tpu.dimension_semantics<parallel>], iteration_bounds = array<i64: 2>, scalar_prefetch = 0 : i64, scratch_operands = 0 : i64, tpu.core_type = #tpu.core_type<tc>, window_params = [{transform_indices = @transform_0, window_bounds = array<i64: 1, 64, 32>}, {pipeline_mode = #tpu.pipeline_mode<synchronous>, transform_indices = @transform_1, window_bounds = array<i64: 6, 32>}, {pipeline_mode = #tpu.pipeline_mode<synchronous>, transform_indices = @transform_2, window_bounds = array<i64: 9, 32, 64>}, {pipeline_mode = #tpu.pipeline_mode<synchronous>, transform_indices = @transform_3, window_bounds = array<i64: 1, 64>}, {pipeline_mode = #tpu.pipeline_mode<synchronous>, transform_indices = @transform_4, window_bounds = array<i64: 32, 32>}, {pipeline_mode = #tpu.pipeline_mode<synchronous>, transform_indices = @transform_5, window_bounds = array<i64: 1, 32>}, {pipeline_mode = #tpu.pipeline_mode<synchronous>, transform_indices = @transform_6, window_bounds = array<i64: 4, 8, 24>}, {pipeline_mode = #tpu.pipeline_mode<synchronous>, transform_indices = @transform_7, window_bounds = array<i64: 32, 32>}, {pipeline_mode = #tpu.pipeline_mode<synchronous>, transform_indices = @transform_8, window_bounds = array<i64: 1, 32>}, {pipeline_mode = #tpu.pipeline_mode<synchronous>, transform_indices = @transform_9, window_bounds = array<i64: 32, 32>}, {pipeline_mode = #tpu.pipeline_mode<synchronous>, transform_indices = @transform_10, window_bounds = array<i64: 1, 32>}, {pipeline_mode = #tpu.pipeline_mode<synchronous>, transform_indices = @transform_11, window_bounds = array<i64: 32, 32>}, {pipeline_mode = #tpu.pipeline_mode<synchronous>, transform_indices = @transform_12, window_bounds = array<i64: 1, 32>}, {pipeline_mode = #tpu.pipeline_mode<synchronous>, transform_indices = @transform_13, window_bounds = array<i64: 32, 1>}, {pipeline_mode = #tpu.pipeline_mode<synchronous>, transform_indices = @transform_14, window_bounds = array<i64: 1, 1>}, {transform_indices = @transform_15, window_bounds = array<i64: 1, 64, 1>}]} {
    %c0 = arith.constant 0 : index
    %c0_0 = arith.constant 0 : index
    %c0_1 = arith.constant 0 : index
    %0 = vector.load %arg1[%c0, %c0_0, %c0_1] : memref<1x64x32xf32, #tpu.memory_space<vmem>>, vector<1x64x32xf32>
    %1 = vector.shape_cast %0 : vector<1x64x32xf32> to vector<64x32xf32>
    %c0_2 = arith.constant 0 : index
    %c0_3 = arith.constant 0 : index
    %2 = vector.load %arg2[%c0_2, %c0_3] : memref<6x32xf32, #tpu.memory_space<vmem>>, vector<1x32xf32>
    %c1 = arith.constant 1 : index
    %c0_4 = arith.constant 0 : index
    %3 = vector.load %arg2[%c1, %c0_4] : memref<6x32xf32, #tpu.memory_space<vmem>>, vector<1x32xf32>
    %cst = arith.constant dense<0.000000e+00> : vector<64xf32>
    %4 = vector.multi_reduction <add>, %1, %cst [1] : vector<64x32xf32> to vector<64xf32>
    %5 = vector.shape_cast %4 : vector<64xf32> to vector<64x1xf32>
    %cst_5 = arith.constant 3.200000e+01 : f32
    %6 = vector.broadcast %cst_5 : f32 to vector<64x1xf32>
    %7 = arith.divf %5, %6 : vector<64x1xf32>
    %8 = vector.broadcast %7 : vector<64x1xf32> to vector<64x32xf32>
    %9 = arith.subf %1, %8 : vector<64x32xf32>
    %10 = arith.mulf %9, %9 : vector<64x32xf32>
    %cst_6 = arith.constant dense<0.000000e+00> : vector<64xf32>
    %11 = vector.multi_reduction <add>, %10, %cst_6 [1] : vector<64x32xf32> to vector<64xf32>
    %12 = vector.shape_cast %11 : vector<64xf32> to vector<64x1xf32>
    %cst_7 = arith.constant 3.200000e+01 : f32
    %13 = vector.broadcast %cst_7 : f32 to vector<64x1xf32>
    %14 = arith.divf %12, %13 : vector<64x1xf32>
    %15 = vector.broadcast %7 : vector<64x1xf32> to vector<64x32xf32>
    %16 = arith.subf %1, %15 : vector<64x32xf32>
    %cst_8 = arith.constant 9.99999974E-6 : f32
    %17 = vector.broadcast %cst_8 : f32 to vector<64x1xf32>
    %18 = arith.addf %14, %17 : vector<64x1xf32>
    %19 = math.rsqrt %18 : vector<64x1xf32>
    %20 = vector.broadcast %19 : vector<64x1xf32> to vector<64x32xf32>
    %21 = arith.mulf %16, %20 : vector<64x32xf32>
    %22 = vector.broadcast %2 : vector<1x32xf32> to vector<64x32xf32>
    %23 = arith.mulf %21, %22 : vector<64x32xf32>
    %24 = vector.broadcast %3 : vector<1x32xf32> to vector<64x32xf32>
    %25 = arith.addf %23, %24 : vector<64x32xf32>
    %cst_9 = arith.constant 0.000000e+00 : f32
    %26 = vector.broadcast %cst_9 : f32 to vector<16x32xf32>
    %27 = tpu.concatenate %26, %25, %26 in 0 : vector<16x32xf32>, vector<64x32xf32>, vector<16x32xf32> -> vector<96x32xf32>
    %28 = tpu.iota {dimensions = array<i32: 0>} : vector<64x32xi32>
    %c8_i32 = arith.constant 8 : i32
    %c0_i32 = arith.constant 0 : i32
    %29 = arith.cmpi eq, %c8_i32, %c0_i32 : i32
    %c1_i32 = arith.constant 1 : i32
    %30 = arith.select %29, %c1_i32, %c8_i32 : i32
    %31 = vector.broadcast %30 : i32 to vector<64x32xi32>
    %32 = arith.remsi %28, %31 : vector<64x32xi32>
    %c0_i32_10 = arith.constant 0 : i32
    %33 = vector.broadcast %c0_i32_10 : i32 to vector<64x32xi32>
    %34 = arith.cmpi ne, %32, %33 : vector<64x32xi32>
    %c0_i32_11 = arith.constant 0 : i32
    %35 = vector.broadcast %c0_i32_11 : i32 to vector<64x32xi32>
    %36 = arith.cmpi slt, %32, %35 : vector<64x32xi32>
    %c0_i32_12 = arith.constant 0 : i32
    %37 = arith.cmpi slt, %30, %c0_i32_12 : i32
    %38 = vector.broadcast %37 : i1 to vector<64x32xi1>
    %39 = vector.broadcast %38 : vector<64x32xi1> to vector<64x32xi1>
    %40 = arith.xori %36, %39 : vector<64x32xi1>
    %41 = arith.andi %40, %34 : vector<64x32xi1>
    %42 = vector.broadcast %30 : i32 to vector<64x32xi32>
    %43 = arith.addi %32, %42 : vector<64x32xi32>
    %44 = arith.select %41, %43, %32 : vector<64x32xi1>, vector<64x32xi32>
    %cst_13 = arith.constant 0.000000e+00 : f32
    %45 = vector.broadcast %cst_13 : f32 to vector<64x64xf32>
    %46 = vector.extract_strided_slice %27 {offsets = [7, 0], sizes = [64, 32], strides = [1, 1]} : vector<96x32xf32> to vector<64x32xf32>
    %c-1_i32 = arith.constant -1 : i32
    %47 = vector.broadcast %c-1_i32 : i32 to vector<64x32xi32>
    %48 = arith.addi %44, %47 : vector<64x32xi32>
    %c0_i32_14 = arith.constant 0 : i32
    %49 = vector.broadcast %c0_i32_14 : i32 to vector<64x32xi32>
    %50 = arith.cmpi sge, %48, %49 : vector<64x32xi32>
    %c8_i32_15 = arith.constant 8 : i32
    %51 = vector.broadcast %c8_i32_15 : i32 to vector<64x32xi32>
    %52 = arith.cmpi slt, %48, %51 : vector<64x32xi32>
    %53 = arith.andi %50, %52 : vector<64x32xi1>
    %cst_16 = arith.constant 0.000000e+00 : f32
    %54 = vector.broadcast %cst_16 : f32 to vector<64x32xf32>
    %55 = arith.select %53, %46, %54 : vector<64x32xi1>, vector<64x32xf32>
    %c0_17 = arith.constant 0 : index
    %c0_18 = arith.constant 0 : index
    %c0_19 = arith.constant 0 : index
    %56 = vector.load %arg3[%c0_17, %c0_18, %c0_19] : memref<9x32x64xf32, #tpu.memory_space<vmem>>, vector<1x32x64xf32>
    %57 = vector.shape_cast %56 : vector<1x32x64xf32> to vector<32x64xf32>
    %cst_20 = arith.constant dense<0.000000e+00> : vector<64x64xf32>
    %58 = tpu.matmul %55, %57, %cst_20 {dimension_numbers = #tpu.dot_dimension_numbers<[1], [0], [0], [1], [0, 0, 1, 1], [], []>} : vector<64x32xf32>, vector<32x64xf32>, vector<64x64xf32> -> vector<64x64xf32>
    %59 = arith.addf %45, %58 : vector<64x64xf32>
    %60 = vector.extract_strided_slice %27 {offsets = [8, 0], sizes = [64, 32], strides = [1, 1]} : vector<96x32xf32> to vector<64x32xf32>
    %c1_21 = arith.constant 1 : index
    %c0_22 = arith.constant 0 : index
    %c0_23 = arith.constant 0 : index
    %61 = vector.load %arg3[%c1_21, %c0_22, %c0_23] : memref<9x32x64xf32, #tpu.memory_space<vmem>>, vector<1x32x64xf32>
    %62 = vector.shape_cast %61 : vector<1x32x64xf32> to vector<32x64xf32>
    %cst_24 = arith.constant dense<0.000000e+00> : vector<64x64xf32>
    %63 = tpu.matmul %60, %62, %cst_24 {dimension_numbers = #tpu.dot_dimension_numbers<[1], [0], [0], [1], [0, 0, 1, 1], [], []>} : vector<64x32xf32>, vector<32x64xf32>, vector<64x64xf32> -> vector<64x64xf32>
    %64 = arith.addf %59, %63 : vector<64x64xf32>
    %65 = vector.extract_strided_slice %27 {offsets = [9, 0], sizes = [64, 32], strides = [1, 1]} : vector<96x32xf32> to vector<64x32xf32>
    %c1_i32_25 = arith.constant 1 : i32
    %66 = vector.broadcast %c1_i32_25 : i32 to vector<64x32xi32>
    %67 = arith.addi %44, %66 : vector<64x32xi32>
    %c0_i32_26 = arith.constant 0 : i32
    %68 = vector.broadcast %c0_i32_26 : i32 to vector<64x32xi32>
    %69 = arith.cmpi sge, %67, %68 : vector<64x32xi32>
    %c8_i32_27 = arith.constant 8 : i32
    %70 = vector.broadcast %c8_i32_27 : i32 to vector<64x32xi32>
    %71 = arith.cmpi slt, %67, %70 : vector<64x32xi32>
    %72 = arith.andi %69, %71 : vector<64x32xi1>
    %cst_28 = arith.constant 0.000000e+00 : f32
    %73 = vector.broadcast %cst_28 : f32 to vector<64x32xf32>
    %74 = arith.select %72, %65, %73 : vector<64x32xi1>, vector<64x32xf32>
    %c2 = arith.constant 2 : index
    %c0_29 = arith.constant 0 : index
    %c0_30 = arith.constant 0 : index
    %75 = vector.load %arg3[%c2, %c0_29, %c0_30] : memref<9x32x64xf32, #tpu.memory_space<vmem>>, vector<1x32x64xf32>
    %76 = vector.shape_cast %75 : vector<1x32x64xf32> to vector<32x64xf32>
    %cst_31 = arith.constant dense<0.000000e+00> : vector<64x64xf32>
    %77 = tpu.matmul %74, %76, %cst_31 {dimension_numbers = #tpu.dot_dimension_numbers<[1], [0], [0], [1], [0, 0, 1, 1], [], []>} : vector<64x32xf32>, vector<32x64xf32>, vector<64x64xf32> -> vector<64x64xf32>
    %78 = arith.addf %64, %77 : vector<64x64xf32>
    %79 = vector.extract_strided_slice %27 {offsets = [15, 0], sizes = [64, 32], strides = [1, 1]} : vector<96x32xf32> to vector<64x32xf32>
    %c-1_i32_32 = arith.constant -1 : i32
    %80 = vector.broadcast %c-1_i32_32 : i32 to vector<64x32xi32>
    %81 = arith.addi %44, %80 : vector<64x32xi32>
    %c0_i32_33 = arith.constant 0 : i32
    %82 = vector.broadcast %c0_i32_33 : i32 to vector<64x32xi32>
    %83 = arith.cmpi sge, %81, %82 : vector<64x32xi32>
    %c8_i32_34 = arith.constant 8 : i32
    %84 = vector.broadcast %c8_i32_34 : i32 to vector<64x32xi32>
    %85 = arith.cmpi slt, %81, %84 : vector<64x32xi32>
    %86 = arith.andi %83, %85 : vector<64x32xi1>
    %cst_35 = arith.constant 0.000000e+00 : f32
    %87 = vector.broadcast %cst_35 : f32 to vector<64x32xf32>
    %88 = arith.select %86, %79, %87 : vector<64x32xi1>, vector<64x32xf32>
    %c3 = arith.constant 3 : index
    %c0_36 = arith.constant 0 : index
    %c0_37 = arith.constant 0 : index
    %89 = vector.load %arg3[%c3, %c0_36, %c0_37] : memref<9x32x64xf32, #tpu.memory_space<vmem>>, vector<1x32x64xf32>
    %90 = vector.shape_cast %89 : vector<1x32x64xf32> to vector<32x64xf32>
    %cst_38 = arith.constant dense<0.000000e+00> : vector<64x64xf32>
    %91 = tpu.matmul %88, %90, %cst_38 {dimension_numbers = #tpu.dot_dimension_numbers<[1], [0], [0], [1], [0, 0, 1, 1], [], []>} : vector<64x32xf32>, vector<32x64xf32>, vector<64x64xf32> -> vector<64x64xf32>
    %92 = arith.addf %78, %91 : vector<64x64xf32>
    %93 = vector.extract_strided_slice %27 {offsets = [16, 0], sizes = [64, 32], strides = [1, 1]} : vector<96x32xf32> to vector<64x32xf32>
    %c4 = arith.constant 4 : index
    %c0_39 = arith.constant 0 : index
    %c0_40 = arith.constant 0 : index
    %94 = vector.load %arg3[%c4, %c0_39, %c0_40] : memref<9x32x64xf32, #tpu.memory_space<vmem>>, vector<1x32x64xf32>
    %95 = vector.shape_cast %94 : vector<1x32x64xf32> to vector<32x64xf32>
    %cst_41 = arith.constant dense<0.000000e+00> : vector<64x64xf32>
    %96 = tpu.matmul %93, %95, %cst_41 {dimension_numbers = #tpu.dot_dimension_numbers<[1], [0], [0], [1], [0, 0, 1, 1], [], []>} : vector<64x32xf32>, vector<32x64xf32>, vector<64x64xf32> -> vector<64x64xf32>
    %97 = arith.addf %92, %96 : vector<64x64xf32>
    %98 = vector.extract_strided_slice %27 {offsets = [17, 0], sizes = [64, 32], strides = [1, 1]} : vector<96x32xf32> to vector<64x32xf32>
    %c1_i32_42 = arith.constant 1 : i32
    %99 = vector.broadcast %c1_i32_42 : i32 to vector<64x32xi32>
    %100 = arith.addi %44, %99 : vector<64x32xi32>
    %c0_i32_43 = arith.constant 0 : i32
    %101 = vector.broadcast %c0_i32_43 : i32 to vector<64x32xi32>
    %102 = arith.cmpi sge, %100, %101 : vector<64x32xi32>
    %c8_i32_44 = arith.constant 8 : i32
    %103 = vector.broadcast %c8_i32_44 : i32 to vector<64x32xi32>
    %104 = arith.cmpi slt, %100, %103 : vector<64x32xi32>
    %105 = arith.andi %102, %104 : vector<64x32xi1>
    %cst_45 = arith.constant 0.000000e+00 : f32
    %106 = vector.broadcast %cst_45 : f32 to vector<64x32xf32>
    %107 = arith.select %105, %98, %106 : vector<64x32xi1>, vector<64x32xf32>
    %c5 = arith.constant 5 : index
    %c0_46 = arith.constant 0 : index
    %c0_47 = arith.constant 0 : index
    %108 = vector.load %arg3[%c5, %c0_46, %c0_47] : memref<9x32x64xf32, #tpu.memory_space<vmem>>, vector<1x32x64xf32>
    %109 = vector.shape_cast %108 : vector<1x32x64xf32> to vector<32x64xf32>
    %cst_48 = arith.constant dense<0.000000e+00> : vector<64x64xf32>
    %110 = tpu.matmul %107, %109, %cst_48 {dimension_numbers = #tpu.dot_dimension_numbers<[1], [0], [0], [1], [0, 0, 1, 1], [], []>} : vector<64x32xf32>, vector<32x64xf32>, vector<64x64xf32> -> vector<64x64xf32>
    %111 = arith.addf %97, %110 : vector<64x64xf32>
    %112 = vector.extract_strided_slice %27 {offsets = [23, 0], sizes = [64, 32], strides = [1, 1]} : vector<96x32xf32> to vector<64x32xf32>
    %c-1_i32_49 = arith.constant -1 : i32
    %113 = vector.broadcast %c-1_i32_49 : i32 to vector<64x32xi32>
    %114 = arith.addi %44, %113 : vector<64x32xi32>
    %c0_i32_50 = arith.constant 0 : i32
    %115 = vector.broadcast %c0_i32_50 : i32 to vector<64x32xi32>
    %116 = arith.cmpi sge, %114, %115 : vector<64x32xi32>
    %c8_i32_51 = arith.constant 8 : i32
    %117 = vector.broadcast %c8_i32_51 : i32 to vector<64x32xi32>
    %118 = arith.cmpi slt, %114, %117 : vector<64x32xi32>
    %119 = arith.andi %116, %118 : vector<64x32xi1>
    %cst_52 = arith.constant 0.000000e+00 : f32
    %120 = vector.broadcast %cst_52 : f32 to vector<64x32xf32>
    %121 = arith.select %119, %112, %120 : vector<64x32xi1>, vector<64x32xf32>
    %c6 = arith.constant 6 : index
    %c0_53 = arith.constant 0 : index
    %c0_54 = arith.constant 0 : index
    %122 = vector.load %arg3[%c6, %c0_53, %c0_54] : memref<9x32x64xf32, #tpu.memory_space<vmem>>, vector<1x32x64xf32>
    %123 = vector.shape_cast %122 : vector<1x32x64xf32> to vector<32x64xf32>
    %cst_55 = arith.constant dense<0.000000e+00> : vector<64x64xf32>
    %124 = tpu.matmul %121, %123, %cst_55 {dimension_numbers = #tpu.dot_dimension_numbers<[1], [0], [0], [1], [0, 0, 1, 1], [], []>} : vector<64x32xf32>, vector<32x64xf32>, vector<64x64xf32> -> vector<64x64xf32>
    %125 = arith.addf %111, %124 : vector<64x64xf32>
    %126 = vector.extract_strided_slice %27 {offsets = [24, 0], sizes = [64, 32], strides = [1, 1]} : vector<96x32xf32> to vector<64x32xf32>
    %c7 = arith.constant 7 : index
    %c0_56 = arith.constant 0 : index
    %c0_57 = arith.constant 0 : index
    %127 = vector.load %arg3[%c7, %c0_56, %c0_57] : memref<9x32x64xf32, #tpu.memory_space<vmem>>, vector<1x32x64xf32>
    %128 = vector.shape_cast %127 : vector<1x32x64xf32> to vector<32x64xf32>
    %cst_58 = arith.constant dense<0.000000e+00> : vector<64x64xf32>
    %129 = tpu.matmul %126, %128, %cst_58 {dimension_numbers = #tpu.dot_dimension_numbers<[1], [0], [0], [1], [0, 0, 1, 1], [], []>} : vector<64x32xf32>, vector<32x64xf32>, vector<64x64xf32> -> vector<64x64xf32>
    %130 = arith.addf %125, %129 : vector<64x64xf32>
    %131 = vector.extract_strided_slice %27 {offsets = [25, 0], sizes = [64, 32], strides = [1, 1]} : vector<96x32xf32> to vector<64x32xf32>
    %c1_i32_59 = arith.constant 1 : i32
    %132 = vector.broadcast %c1_i32_59 : i32 to vector<64x32xi32>
    %133 = arith.addi %44, %132 : vector<64x32xi32>
    %c0_i32_60 = arith.constant 0 : i32
    %134 = vector.broadcast %c0_i32_60 : i32 to vector<64x32xi32>
    %135 = arith.cmpi sge, %133, %134 : vector<64x32xi32>
    %c8_i32_61 = arith.constant 8 : i32
    %136 = vector.broadcast %c8_i32_61 : i32 to vector<64x32xi32>
    %137 = arith.cmpi slt, %133, %136 : vector<64x32xi32>
    %138 = arith.andi %135, %137 : vector<64x32xi1>
    %cst_62 = arith.constant 0.000000e+00 : f32
    %139 = vector.broadcast %cst_62 : f32 to vector<64x32xf32>
    %140 = arith.select %138, %131, %139 : vector<64x32xi1>, vector<64x32xf32>
    %c8 = arith.constant 8 : index
    %c0_63 = arith.constant 0 : index
    %c0_64 = arith.constant 0 : index
    %141 = vector.load %arg3[%c8, %c0_63, %c0_64] : memref<9x32x64xf32, #tpu.memory_space<vmem>>, vector<1x32x64xf32>
    %142 = vector.shape_cast %141 : vector<1x32x64xf32> to vector<32x64xf32>
    %cst_65 = arith.constant dense<0.000000e+00> : vector<64x64xf32>
    %143 = tpu.matmul %140, %142, %cst_65 {dimension_numbers = #tpu.dot_dimension_numbers<[1], [0], [0], [1], [0, 0, 1, 1], [], []>} : vector<64x32xf32>, vector<32x64xf32>, vector<64x64xf32> -> vector<64x64xf32>
    %144 = arith.addf %130, %143 : vector<64x64xf32>
    %c0_66 = arith.constant 0 : index
    %c0_67 = arith.constant 0 : index
    %145 = vector.load %arg4[%c0_66, %c0_67] : memref<1x64xf32, #tpu.memory_space<vmem>>, vector<1x64xf32>
    %146 = vector.broadcast %145 : vector<1x64xf32> to vector<64x64xf32>
    %147 = arith.addf %144, %146 : vector<64x64xf32>
    %148 = vector.extract_strided_slice %147 {offsets = [0, 0], sizes = [64, 32], strides = [1, 1]} : vector<64x64xf32> to vector<64x32xf32>
    %149 = vector.extract_strided_slice %147 {offsets = [0, 32], sizes = [64, 32], strides = [1, 1]} : vector<64x64xf32> to vector<64x32xf32>
    %c0_68 = arith.constant 0 : index
    %c0_69 = arith.constant 0 : index
    %150 = vector.load %arg5[%c0_68, %c0_69] : memref<32x32xf32, #tpu.memory_space<vmem>>, vector<32x32xf32>
    %cst_70 = arith.constant dense<0.000000e+00> : vector<64x32xf32>
    %151 = tpu.matmul %149, %150, %cst_70 {dimension_numbers = #tpu.dot_dimension_numbers<[1], [0], [0], [1], [0, 0, 1, 1], [], []>} : vector<64x32xf32>, vector<32x32xf32>, vector<64x32xf32> -> vector<64x32xf32>
    %c0_71 = arith.constant 0 : index
    %c0_72 = arith.constant 0 : index
    %152 = vector.load %arg6[%c0_71, %c0_72] : memref<1x32xf32, #tpu.memory_space<vmem>>, vector<1x32xf32>
    %153 = vector.broadcast %152 : vector<1x32xf32> to vector<64x32xf32>
    %154 = arith.addf %151, %153 : vector<64x32xf32>
    %cst_73 = arith.constant 0.000000e+00 : f32
    %155 = vector.broadcast %cst_73 : f32 to vector<64x32xf32>
    %156 = vector.extract_strided_slice %154 {offsets = [0, 0], sizes = [64, 8], strides = [1, 1]} : vector<64x32xf32> to vector<64x8xf32>
    %cst_74 = arith.constant dense<0xFF800000> : vector<64xf32>
    %157 = vector.multi_reduction <maximumf>, %156, %cst_74 [1] : vector<64x8xf32> to vector<64xf32>
    %158 = vector.shape_cast %157 : vector<64xf32> to vector<64x1xf32>
    %159 = vector.broadcast %158 : vector<64x1xf32> to vector<64x8xf32>
    %160 = arith.subf %156, %159 : vector<64x8xf32>
    %161 = math.exp %160 : vector<64x8xf32>
    %cst_75 = arith.constant dense<0.000000e+00> : vector<64xf32>
    %162 = vector.multi_reduction <add>, %161, %cst_75 [1] : vector<64x8xf32> to vector<64xf32>
    %163 = vector.shape_cast %162 : vector<64xf32> to vector<64x1xf32>
    %164 = vector.broadcast %163 : vector<64x1xf32> to vector<64x8xf32>
    %165 = arith.divf %161, %164 : vector<64x8xf32>
    %166 = vector.extract_strided_slice %148 {offsets = [0, 0], sizes = [64, 8], strides = [1, 1]} : vector<64x32xf32> to vector<64x8xf32>
    %cst_76 = arith.constant dense<0.000000e+00> : vector<8xf32>
    %167 = vector.multi_reduction <add>, %165, %cst_76 [0] : vector<64x8xf32> to vector<8xf32>
    %168 = vector.shape_cast %167 : vector<8xf32> to vector<1x8xf32>
    %cst_77 = arith.constant dense<0.000000e+00> : vector<8x8xf32>
    %169 = tpu.matmul %165, %166, %cst_77 {dimension_numbers = #tpu.dot_dimension_numbers<[0], [0], [1], [1], [0, 1, 1, 1], [], []>} : vector<64x8xf32>, vector<64x8xf32>, vector<8x8xf32> -> vector<8x8xf32>
    %170 = tpu.transpose %168, [1, 0] : vector<1x8xf32> -> vector<8x1xf32>
    %cst_78 = arith.constant 9.99999974E-6 : f32
    %171 = vector.broadcast %cst_78 : f32 to vector<8x1xf32>
    %172 = arith.addf %170, %171 : vector<8x1xf32>
    %173 = vector.broadcast %172 : vector<8x1xf32> to vector<8x8xf32>
    %174 = arith.divf %169, %173 : vector<8x8xf32>
    %c0_79 = arith.constant 0 : index
    %c0_80 = arith.constant 0 : index
    %c0_81 = arith.constant 0 : index
    %175 = vector.load %arg7[%c0_79, %c0_80, %c0_81] : memref<4x8x24xf32, #tpu.memory_space<vmem>>, vector<1x8x24xf32>
    %176 = vector.shape_cast %175 : vector<1x8x24xf32> to vector<8x24xf32>
    %cst_82 = arith.constant dense<0.000000e+00> : vector<8x24xf32>
    %177 = tpu.matmul %174, %176, %cst_82 {dimension_numbers = #tpu.dot_dimension_numbers<[1], [0], [0], [1], [0, 0, 1, 1], [], []>} : vector<8x8xf32>, vector<8x24xf32>, vector<8x24xf32> -> vector<8x24xf32>
    %178 = vector.extract_strided_slice %177 {offsets = [0, 0], sizes = [8, 8], strides = [1, 1]} : vector<8x24xf32> to vector<8x8xf32>
    %179 = vector.extract_strided_slice %177 {offsets = [0, 8], sizes = [8, 8], strides = [1, 1]} : vector<8x24xf32> to vector<8x8xf32>
    %180 = vector.extract_strided_slice %177 {offsets = [0, 16], sizes = [8, 8], strides = [1, 1]} : vector<8x24xf32> to vector<8x8xf32>
    %cst_83 = arith.constant dense<0.000000e+00> : vector<8x8xf32>
    %181 = tpu.matmul %178, %179, %cst_83 {dimension_numbers = #tpu.dot_dimension_numbers<[1], [1], [0], [0], [0, 0, 1, 0], [], []>} : vector<8x8xf32>, vector<8x8xf32>, vector<8x8xf32> -> vector<8x8xf32>
    %cst_84 = arith.constant 0.353553385 : f32
    %182 = vector.broadcast %cst_84 : f32 to vector<8x8xf32>
    %183 = arith.mulf %181, %182 : vector<8x8xf32>
    %cst_85 = arith.constant dense<0xFF800000> : vector<8xf32>
    %184 = vector.multi_reduction <maximumf>, %183, %cst_85 [1] : vector<8x8xf32> to vector<8xf32>
    %185 = vector.shape_cast %184 : vector<8xf32> to vector<8x1xf32>
    %186 = vector.broadcast %185 : vector<8x1xf32> to vector<8x8xf32>
    %187 = arith.subf %183, %186 : vector<8x8xf32>
    %188 = math.exp %187 : vector<8x8xf32>
    %cst_86 = arith.constant dense<0.000000e+00> : vector<8xf32>
    %189 = vector.multi_reduction <add>, %188, %cst_86 [1] : vector<8x8xf32> to vector<8xf32>
    %190 = vector.shape_cast %189 : vector<8xf32> to vector<8x1xf32>
    %191 = vector.broadcast %190 : vector<8x1xf32> to vector<8x8xf32>
    %192 = arith.divf %188, %191 : vector<8x8xf32>
    %cst_87 = arith.constant dense<0.000000e+00> : vector<8x8xf32>
    %193 = tpu.matmul %192, %180, %cst_87 {dimension_numbers = #tpu.dot_dimension_numbers<[1], [0], [0], [1], [0, 0, 1, 1], [], []>} : vector<8x8xf32>, vector<8x8xf32>, vector<8x8xf32> -> vector<8x8xf32>
    %c0_88 = arith.constant 0 : index
    %c0_89 = arith.constant 0 : index
    %194 = vector.load %arg8[%c0_88, %c0_89] : memref<32x32xf32, #tpu.memory_space<vmem>>, vector<8x32xf32>
    %cst_90 = arith.constant dense<0.000000e+00> : vector<8x32xf32>
    %195 = tpu.matmul %193, %194, %cst_90 {dimension_numbers = #tpu.dot_dimension_numbers<[1], [0], [0], [1], [0, 0, 1, 1], [], []>} : vector<8x8xf32>, vector<8x32xf32>, vector<8x32xf32> -> vector<8x32xf32>
    %cst_91 = arith.constant dense<0.000000e+00> : vector<64x32xf32>
    %196 = tpu.matmul %165, %195, %cst_91 {dimension_numbers = #tpu.dot_dimension_numbers<[1], [0], [0], [1], [0, 0, 1, 1], [], []>} : vector<64x8xf32>, vector<8x32xf32>, vector<64x32xf32> -> vector<64x32xf32>
    %197 = arith.addf %155, %196 : vector<64x32xf32>
    %198 = vector.extract_strided_slice %154 {offsets = [0, 8], sizes = [64, 8], strides = [1, 1]} : vector<64x32xf32> to vector<64x8xf32>
    %cst_92 = arith.constant dense<0xFF800000> : vector<64xf32>
    %199 = vector.multi_reduction <maximumf>, %198, %cst_92 [1] : vector<64x8xf32> to vector<64xf32>
    %200 = vector.shape_cast %199 : vector<64xf32> to vector<64x1xf32>
    %201 = vector.broadcast %200 : vector<64x1xf32> to vector<64x8xf32>
    %202 = arith.subf %198, %201 : vector<64x8xf32>
    %203 = math.exp %202 : vector<64x8xf32>
    %cst_93 = arith.constant dense<0.000000e+00> : vector<64xf32>
    %204 = vector.multi_reduction <add>, %203, %cst_93 [1] : vector<64x8xf32> to vector<64xf32>
    %205 = vector.shape_cast %204 : vector<64xf32> to vector<64x1xf32>
    %206 = vector.broadcast %205 : vector<64x1xf32> to vector<64x8xf32>
    %207 = arith.divf %203, %206 : vector<64x8xf32>
    %208 = vector.extract_strided_slice %148 {offsets = [0, 8], sizes = [64, 8], strides = [1, 1]} : vector<64x32xf32> to vector<64x8xf32>
    %cst_94 = arith.constant dense<0.000000e+00> : vector<8xf32>
    %209 = vector.multi_reduction <add>, %207, %cst_94 [0] : vector<64x8xf32> to vector<8xf32>
    %210 = vector.shape_cast %209 : vector<8xf32> to vector<1x8xf32>
    %cst_95 = arith.constant dense<0.000000e+00> : vector<8x8xf32>
    %211 = tpu.matmul %207, %208, %cst_95 {dimension_numbers = #tpu.dot_dimension_numbers<[0], [0], [1], [1], [0, 1, 1, 1], [], []>} : vector<64x8xf32>, vector<64x8xf32>, vector<8x8xf32> -> vector<8x8xf32>
    %212 = tpu.transpose %210, [1, 0] : vector<1x8xf32> -> vector<8x1xf32>
    %cst_96 = arith.constant 9.99999974E-6 : f32
    %213 = vector.broadcast %cst_96 : f32 to vector<8x1xf32>
    %214 = arith.addf %212, %213 : vector<8x1xf32>
    %215 = vector.broadcast %214 : vector<8x1xf32> to vector<8x8xf32>
    %216 = arith.divf %211, %215 : vector<8x8xf32>
    %c1_97 = arith.constant 1 : index
    %c0_98 = arith.constant 0 : index
    %c0_99 = arith.constant 0 : index
    %217 = vector.load %arg7[%c1_97, %c0_98, %c0_99] : memref<4x8x24xf32, #tpu.memory_space<vmem>>, vector<1x8x24xf32>
    %218 = vector.shape_cast %217 : vector<1x8x24xf32> to vector<8x24xf32>
    %cst_100 = arith.constant dense<0.000000e+00> : vector<8x24xf32>
    %219 = tpu.matmul %216, %218, %cst_100 {dimension_numbers = #tpu.dot_dimension_numbers<[1], [0], [0], [1], [0, 0, 1, 1], [], []>} : vector<8x8xf32>, vector<8x24xf32>, vector<8x24xf32> -> vector<8x24xf32>
    %220 = vector.extract_strided_slice %219 {offsets = [0, 0], sizes = [8, 8], strides = [1, 1]} : vector<8x24xf32> to vector<8x8xf32>
    %221 = vector.extract_strided_slice %219 {offsets = [0, 8], sizes = [8, 8], strides = [1, 1]} : vector<8x24xf32> to vector<8x8xf32>
    %222 = vector.extract_strided_slice %219 {offsets = [0, 16], sizes = [8, 8], strides = [1, 1]} : vector<8x24xf32> to vector<8x8xf32>
    %cst_101 = arith.constant dense<0.000000e+00> : vector<8x8xf32>
    %223 = tpu.matmul %220, %221, %cst_101 {dimension_numbers = #tpu.dot_dimension_numbers<[1], [1], [0], [0], [0, 0, 1, 0], [], []>} : vector<8x8xf32>, vector<8x8xf32>, vector<8x8xf32> -> vector<8x8xf32>
    %cst_102 = arith.constant 0.353553385 : f32
    %224 = vector.broadcast %cst_102 : f32 to vector<8x8xf32>
    %225 = arith.mulf %223, %224 : vector<8x8xf32>
    %cst_103 = arith.constant dense<0xFF800000> : vector<8xf32>
    %226 = vector.multi_reduction <maximumf>, %225, %cst_103 [1] : vector<8x8xf32> to vector<8xf32>
    %227 = vector.shape_cast %226 : vector<8xf32> to vector<8x1xf32>
    %228 = vector.broadcast %227 : vector<8x1xf32> to vector<8x8xf32>
    %229 = arith.subf %225, %228 : vector<8x8xf32>
    %230 = math.exp %229 : vector<8x8xf32>
    %cst_104 = arith.constant dense<0.000000e+00> : vector<8xf32>
    %231 = vector.multi_reduction <add>, %230, %cst_104 [1] : vector<8x8xf32> to vector<8xf32>
    %232 = vector.shape_cast %231 : vector<8xf32> to vector<8x1xf32>
    %233 = vector.broadcast %232 : vector<8x1xf32> to vector<8x8xf32>
    %234 = arith.divf %230, %233 : vector<8x8xf32>
    %cst_105 = arith.constant dense<0.000000e+00> : vector<8x8xf32>
    %235 = tpu.matmul %234, %222, %cst_105 {dimension_numbers = #tpu.dot_dimension_numbers<[1], [0], [0], [1], [0, 0, 1, 1], [], []>} : vector<8x8xf32>, vector<8x8xf32>, vector<8x8xf32> -> vector<8x8xf32>
    %c8_106 = arith.constant 8 : index
    %c0_107 = arith.constant 0 : index
    %236 = vector.load %arg8[%c8_106, %c0_107] : memref<32x32xf32, #tpu.memory_space<vmem>>, vector<8x32xf32>
    %cst_108 = arith.constant dense<0.000000e+00> : vector<8x32xf32>
    %237 = tpu.matmul %235, %236, %cst_108 {dimension_numbers = #tpu.dot_dimension_numbers<[1], [0], [0], [1], [0, 0, 1, 1], [], []>} : vector<8x8xf32>, vector<8x32xf32>, vector<8x32xf32> -> vector<8x32xf32>
    %cst_109 = arith.constant dense<0.000000e+00> : vector<64x32xf32>
    %238 = tpu.matmul %207, %237, %cst_109 {dimension_numbers = #tpu.dot_dimension_numbers<[1], [0], [0], [1], [0, 0, 1, 1], [], []>} : vector<64x8xf32>, vector<8x32xf32>, vector<64x32xf32> -> vector<64x32xf32>
    %239 = arith.addf %197, %238 : vector<64x32xf32>
    %240 = vector.extract_strided_slice %154 {offsets = [0, 16], sizes = [64, 8], strides = [1, 1]} : vector<64x32xf32> to vector<64x8xf32>
    %cst_110 = arith.constant dense<0xFF800000> : vector<64xf32>
    %241 = vector.multi_reduction <maximumf>, %240, %cst_110 [1] : vector<64x8xf32> to vector<64xf32>
    %242 = vector.shape_cast %241 : vector<64xf32> to vector<64x1xf32>
    %243 = vector.broadcast %242 : vector<64x1xf32> to vector<64x8xf32>
    %244 = arith.subf %240, %243 : vector<64x8xf32>
    %245 = math.exp %244 : vector<64x8xf32>
    %cst_111 = arith.constant dense<0.000000e+00> : vector<64xf32>
    %246 = vector.multi_reduction <add>, %245, %cst_111 [1] : vector<64x8xf32> to vector<64xf32>
    %247 = vector.shape_cast %246 : vector<64xf32> to vector<64x1xf32>
    %248 = vector.broadcast %247 : vector<64x1xf32> to vector<64x8xf32>
    %249 = arith.divf %245, %248 : vector<64x8xf32>
    %250 = vector.extract_strided_slice %148 {offsets = [0, 16], sizes = [64, 8], strides = [1, 1]} : vector<64x32xf32> to vector<64x8xf32>
    %cst_112 = arith.constant dense<0.000000e+00> : vector<8xf32>
    %251 = vector.multi_reduction <add>, %249, %cst_112 [0] : vector<64x8xf32> to vector<8xf32>
    %252 = vector.shape_cast %251 : vector<8xf32> to vector<1x8xf32>
    %cst_113 = arith.constant dense<0.000000e+00> : vector<8x8xf32>
    %253 = tpu.matmul %249, %250, %cst_113 {dimension_numbers = #tpu.dot_dimension_numbers<[0], [0], [1], [1], [0, 1, 1, 1], [], []>} : vector<64x8xf32>, vector<64x8xf32>, vector<8x8xf32> -> vector<8x8xf32>
    %254 = tpu.transpose %252, [1, 0] : vector<1x8xf32> -> vector<8x1xf32>
    %cst_114 = arith.constant 9.99999974E-6 : f32
    %255 = vector.broadcast %cst_114 : f32 to vector<8x1xf32>
    %256 = arith.addf %254, %255 : vector<8x1xf32>
    %257 = vector.broadcast %256 : vector<8x1xf32> to vector<8x8xf32>
    %258 = arith.divf %253, %257 : vector<8x8xf32>
    %c2_115 = arith.constant 2 : index
    %c0_116 = arith.constant 0 : index
    %c0_117 = arith.constant 0 : index
    %259 = vector.load %arg7[%c2_115, %c0_116, %c0_117] : memref<4x8x24xf32, #tpu.memory_space<vmem>>, vector<1x8x24xf32>
    %260 = vector.shape_cast %259 : vector<1x8x24xf32> to vector<8x24xf32>
    %cst_118 = arith.constant dense<0.000000e+00> : vector<8x24xf32>
    %261 = tpu.matmul %258, %260, %cst_118 {dimension_numbers = #tpu.dot_dimension_numbers<[1], [0], [0], [1], [0, 0, 1, 1], [], []>} : vector<8x8xf32>, vector<8x24xf32>, vector<8x24xf32> -> vector<8x24xf32>
    %262 = vector.extract_strided_slice %261 {offsets = [0, 0], sizes = [8, 8], strides = [1, 1]} : vector<8x24xf32> to vector<8x8xf32>
    %263 = vector.extract_strided_slice %261 {offsets = [0, 8], sizes = [8, 8], strides = [1, 1]} : vector<8x24xf32> to vector<8x8xf32>
    %264 = vector.extract_strided_slice %261 {offsets = [0, 16], sizes = [8, 8], strides = [1, 1]} : vector<8x24xf32> to vector<8x8xf32>
    %cst_119 = arith.constant dense<0.000000e+00> : vector<8x8xf32>
    %265 = tpu.matmul %262, %263, %cst_119 {dimension_numbers = #tpu.dot_dimension_numbers<[1], [1], [0], [0], [0, 0, 1, 0], [], []>} : vector<8x8xf32>, vector<8x8xf32>, vector<8x8xf32> -> vector<8x8xf32>
    %cst_120 = arith.constant 0.353553385 : f32
    %266 = vector.broadcast %cst_120 : f32 to vector<8x8xf32>
    %267 = arith.mulf %265, %266 : vector<8x8xf32>
    %cst_121 = arith.constant dense<0xFF800000> : vector<8xf32>
    %268 = vector.multi_reduction <maximumf>, %267, %cst_121 [1] : vector<8x8xf32> to vector<8xf32>
    %269 = vector.shape_cast %268 : vector<8xf32> to vector<8x1xf32>
    %270 = vector.broadcast %269 : vector<8x1xf32> to vector<8x8xf32>
    %271 = arith.subf %267, %270 : vector<8x8xf32>
    %272 = math.exp %271 : vector<8x8xf32>
    %cst_122 = arith.constant dense<0.000000e+00> : vector<8xf32>
    %273 = vector.multi_reduction <add>, %272, %cst_122 [1] : vector<8x8xf32> to vector<8xf32>
    %274 = vector.shape_cast %273 : vector<8xf32> to vector<8x1xf32>
    %275 = vector.broadcast %274 : vector<8x1xf32> to vector<8x8xf32>
    %276 = arith.divf %272, %275 : vector<8x8xf32>
    %cst_123 = arith.constant dense<0.000000e+00> : vector<8x8xf32>
    %277 = tpu.matmul %276, %264, %cst_123 {dimension_numbers = #tpu.dot_dimension_numbers<[1], [0], [0], [1], [0, 0, 1, 1], [], []>} : vector<8x8xf32>, vector<8x8xf32>, vector<8x8xf32> -> vector<8x8xf32>
    %c16 = arith.constant 16 : index
    %c0_124 = arith.constant 0 : index
    %278 = vector.load %arg8[%c16, %c0_124] : memref<32x32xf32, #tpu.memory_space<vmem>>, vector<8x32xf32>
    %cst_125 = arith.constant dense<0.000000e+00> : vector<8x32xf32>
    %279 = tpu.matmul %277, %278, %cst_125 {dimension_numbers = #tpu.dot_dimension_numbers<[1], [0], [0], [1], [0, 0, 1, 1], [], []>} : vector<8x8xf32>, vector<8x32xf32>, vector<8x32xf32> -> vector<8x32xf32>
    %cst_126 = arith.constant dense<0.000000e+00> : vector<64x32xf32>
    %280 = tpu.matmul %249, %279, %cst_126 {dimension_numbers = #tpu.dot_dimension_numbers<[1], [0], [0], [1], [0, 0, 1, 1], [], []>} : vector<64x8xf32>, vector<8x32xf32>, vector<64x32xf32> -> vector<64x32xf32>
    %281 = arith.addf %239, %280 : vector<64x32xf32>
    %282 = vector.extract_strided_slice %154 {offsets = [0, 24], sizes = [64, 8], strides = [1, 1]} : vector<64x32xf32> to vector<64x8xf32>
    %cst_127 = arith.constant dense<0xFF800000> : vector<64xf32>
    %283 = vector.multi_reduction <maximumf>, %282, %cst_127 [1] : vector<64x8xf32> to vector<64xf32>
    %284 = vector.shape_cast %283 : vector<64xf32> to vector<64x1xf32>
    %285 = vector.broadcast %284 : vector<64x1xf32> to vector<64x8xf32>
    %286 = arith.subf %282, %285 : vector<64x8xf32>
    %287 = math.exp %286 : vector<64x8xf32>
    %cst_128 = arith.constant dense<0.000000e+00> : vector<64xf32>
    %288 = vector.multi_reduction <add>, %287, %cst_128 [1] : vector<64x8xf32> to vector<64xf32>
    %289 = vector.shape_cast %288 : vector<64xf32> to vector<64x1xf32>
    %290 = vector.broadcast %289 : vector<64x1xf32> to vector<64x8xf32>
    %291 = arith.divf %287, %290 : vector<64x8xf32>
    %292 = vector.extract_strided_slice %148 {offsets = [0, 24], sizes = [64, 8], strides = [1, 1]} : vector<64x32xf32> to vector<64x8xf32>
    %cst_129 = arith.constant dense<0.000000e+00> : vector<8xf32>
    %293 = vector.multi_reduction <add>, %291, %cst_129 [0] : vector<64x8xf32> to vector<8xf32>
    %294 = vector.shape_cast %293 : vector<8xf32> to vector<1x8xf32>
    %cst_130 = arith.constant dense<0.000000e+00> : vector<8x8xf32>
    %295 = tpu.matmul %291, %292, %cst_130 {dimension_numbers = #tpu.dot_dimension_numbers<[0], [0], [1], [1], [0, 1, 1, 1], [], []>} : vector<64x8xf32>, vector<64x8xf32>, vector<8x8xf32> -> vector<8x8xf32>
    %296 = tpu.transpose %294, [1, 0] : vector<1x8xf32> -> vector<8x1xf32>
    %cst_131 = arith.constant 9.99999974E-6 : f32
    %297 = vector.broadcast %cst_131 : f32 to vector<8x1xf32>
    %298 = arith.addf %296, %297 : vector<8x1xf32>
    %299 = vector.broadcast %298 : vector<8x1xf32> to vector<8x8xf32>
    %300 = arith.divf %295, %299 : vector<8x8xf32>
    %c3_132 = arith.constant 3 : index
    %c0_133 = arith.constant 0 : index
    %c0_134 = arith.constant 0 : index
    %301 = vector.load %arg7[%c3_132, %c0_133, %c0_134] : memref<4x8x24xf32, #tpu.memory_space<vmem>>, vector<1x8x24xf32>
    %302 = vector.shape_cast %301 : vector<1x8x24xf32> to vector<8x24xf32>
    %cst_135 = arith.constant dense<0.000000e+00> : vector<8x24xf32>
    %303 = tpu.matmul %300, %302, %cst_135 {dimension_numbers = #tpu.dot_dimension_numbers<[1], [0], [0], [1], [0, 0, 1, 1], [], []>} : vector<8x8xf32>, vector<8x24xf32>, vector<8x24xf32> -> vector<8x24xf32>
    %304 = vector.extract_strided_slice %303 {offsets = [0, 0], sizes = [8, 8], strides = [1, 1]} : vector<8x24xf32> to vector<8x8xf32>
    %305 = vector.extract_strided_slice %303 {offsets = [0, 8], sizes = [8, 8], strides = [1, 1]} : vector<8x24xf32> to vector<8x8xf32>
    %306 = vector.extract_strided_slice %303 {offsets = [0, 16], sizes = [8, 8], strides = [1, 1]} : vector<8x24xf32> to vector<8x8xf32>
    %cst_136 = arith.constant dense<0.000000e+00> : vector<8x8xf32>
    %307 = tpu.matmul %304, %305, %cst_136 {dimension_numbers = #tpu.dot_dimension_numbers<[1], [1], [0], [0], [0, 0, 1, 0], [], []>} : vector<8x8xf32>, vector<8x8xf32>, vector<8x8xf32> -> vector<8x8xf32>
    %cst_137 = arith.constant 0.353553385 : f32
    %308 = vector.broadcast %cst_137 : f32 to vector<8x8xf32>
    %309 = arith.mulf %307, %308 : vector<8x8xf32>
    %cst_138 = arith.constant dense<0xFF800000> : vector<8xf32>
    %310 = vector.multi_reduction <maximumf>, %309, %cst_138 [1] : vector<8x8xf32> to vector<8xf32>
    %311 = vector.shape_cast %310 : vector<8xf32> to vector<8x1xf32>
    %312 = vector.broadcast %311 : vector<8x1xf32> to vector<8x8xf32>
    %313 = arith.subf %309, %312 : vector<8x8xf32>
    %314 = math.exp %313 : vector<8x8xf32>
    %cst_139 = arith.constant dense<0.000000e+00> : vector<8xf32>
    %315 = vector.multi_reduction <add>, %314, %cst_139 [1] : vector<8x8xf32> to vector<8xf32>
    %316 = vector.shape_cast %315 : vector<8xf32> to vector<8x1xf32>
    %317 = vector.broadcast %316 : vector<8x1xf32> to vector<8x8xf32>
    %318 = arith.divf %314, %317 : vector<8x8xf32>
    %cst_140 = arith.constant dense<0.000000e+00> : vector<8x8xf32>
    %319 = tpu.matmul %318, %306, %cst_140 {dimension_numbers = #tpu.dot_dimension_numbers<[1], [0], [0], [1], [0, 0, 1, 1], [], []>} : vector<8x8xf32>, vector<8x8xf32>, vector<8x8xf32> -> vector<8x8xf32>
    %c24 = arith.constant 24 : index
    %c0_141 = arith.constant 0 : index
    %320 = vector.load %arg8[%c24, %c0_141] : memref<32x32xf32, #tpu.memory_space<vmem>>, vector<8x32xf32>
    %cst_142 = arith.constant dense<0.000000e+00> : vector<8x32xf32>
    %321 = tpu.matmul %319, %320, %cst_142 {dimension_numbers = #tpu.dot_dimension_numbers<[1], [0], [0], [1], [0, 0, 1, 1], [], []>} : vector<8x8xf32>, vector<8x32xf32>, vector<8x32xf32> -> vector<8x32xf32>
    %cst_143 = arith.constant dense<0.000000e+00> : vector<64x32xf32>
    %322 = tpu.matmul %291, %321, %cst_143 {dimension_numbers = #tpu.dot_dimension_numbers<[1], [0], [0], [1], [0, 0, 1, 1], [], []>} : vector<64x8xf32>, vector<8x32xf32>, vector<64x32xf32> -> vector<64x32xf32>
    %323 = arith.addf %281, %322 : vector<64x32xf32>
    %c0_144 = arith.constant 0 : index
    %c0_145 = arith.constant 0 : index
    %324 = vector.load %arg9[%c0_144, %c0_145] : memref<1x32xf32, #tpu.memory_space<vmem>>, vector<1x32xf32>
    %325 = vector.broadcast %324 : vector<1x32xf32> to vector<64x32xf32>
    %326 = arith.addf %323, %325 : vector<64x32xf32>
    %327 = arith.addf %326, %1 : vector<64x32xf32>
    %c2_146 = arith.constant 2 : index
    %c0_147 = arith.constant 0 : index
    %328 = vector.load %arg2[%c2_146, %c0_147] : memref<6x32xf32, #tpu.memory_space<vmem>>, vector<1x32xf32>
    %c3_148 = arith.constant 3 : index
    %c0_149 = arith.constant 0 : index
    %329 = vector.load %arg2[%c3_148, %c0_149] : memref<6x32xf32, #tpu.memory_space<vmem>>, vector<1x32xf32>
    %cst_150 = arith.constant dense<0.000000e+00> : vector<64xf32>
    %330 = vector.multi_reduction <add>, %327, %cst_150 [1] : vector<64x32xf32> to vector<64xf32>
    %331 = vector.shape_cast %330 : vector<64xf32> to vector<64x1xf32>
    %cst_151 = arith.constant 3.200000e+01 : f32
    %332 = vector.broadcast %cst_151 : f32 to vector<64x1xf32>
    %333 = arith.divf %331, %332 : vector<64x1xf32>
    %334 = vector.broadcast %333 : vector<64x1xf32> to vector<64x32xf32>
    %335 = arith.subf %327, %334 : vector<64x32xf32>
    %336 = arith.mulf %335, %335 : vector<64x32xf32>
    %cst_152 = arith.constant dense<0.000000e+00> : vector<64xf32>
    %337 = vector.multi_reduction <add>, %336, %cst_152 [1] : vector<64x32xf32> to vector<64xf32>
    %338 = vector.shape_cast %337 : vector<64xf32> to vector<64x1xf32>
    %cst_153 = arith.constant 3.200000e+01 : f32
    %339 = vector.broadcast %cst_153 : f32 to vector<64x1xf32>
    %340 = arith.divf %338, %339 : vector<64x1xf32>
    %341 = vector.broadcast %333 : vector<64x1xf32> to vector<64x32xf32>
    %342 = arith.subf %327, %341 : vector<64x32xf32>
    %cst_154 = arith.constant 9.99999974E-6 : f32
    %343 = vector.broadcast %cst_154 : f32 to vector<64x1xf32>
    %344 = arith.addf %340, %343 : vector<64x1xf32>
    %345 = math.rsqrt %344 : vector<64x1xf32>
    %346 = vector.broadcast %345 : vector<64x1xf32> to vector<64x32xf32>
    %347 = arith.mulf %342, %346 : vector<64x32xf32>
    %348 = vector.broadcast %328 : vector<1x32xf32> to vector<64x32xf32>
    %349 = arith.mulf %347, %348 : vector<64x32xf32>
    %350 = vector.broadcast %329 : vector<1x32xf32> to vector<64x32xf32>
    %351 = arith.addf %349, %350 : vector<64x32xf32>
    %c0_155 = arith.constant 0 : index
    %c0_156 = arith.constant 0 : index
    %352 = vector.load %arg10[%c0_155, %c0_156] : memref<32x32xf32, #tpu.memory_space<vmem>>, vector<32x32xf32>
    %cst_157 = arith.constant dense<0.000000e+00> : vector<64x32xf32>
    %353 = tpu.matmul %351, %352, %cst_157 {dimension_numbers = #tpu.dot_dimension_numbers<[1], [0], [0], [1], [0, 0, 1, 1], [], []>} : vector<64x32xf32>, vector<32x32xf32>, vector<64x32xf32> -> vector<64x32xf32>
    %c0_158 = arith.constant 0 : index
    %c0_159 = arith.constant 0 : index
    %354 = vector.load %arg11[%c0_158, %c0_159] : memref<1x32xf32, #tpu.memory_space<vmem>>, vector<1x32xf32>
    %355 = vector.broadcast %354 : vector<1x32xf32> to vector<64x32xf32>
    %356 = arith.addf %353, %355 : vector<64x32xf32>
    %cst_160 = arith.constant 5.000000e-01 : f32
    %357 = vector.broadcast %cst_160 : f32 to vector<64x32xf32>
    %358 = arith.mulf %357, %356 : vector<64x32xf32>
    %cst_161 = arith.constant 0.707106769 : f32
    %359 = vector.broadcast %cst_161 : f32 to vector<64x32xf32>
    %360 = arith.mulf %356, %359 : vector<64x32xf32>
    %361 = math.erf %360 : vector<64x32xf32>
    %cst_162 = arith.constant 1.000000e+00 : f32
    %362 = vector.broadcast %cst_162 : f32 to vector<64x32xf32>
    %363 = arith.addf %362, %361 : vector<64x32xf32>
    %364 = arith.mulf %358, %363 : vector<64x32xf32>
    %c0_163 = arith.constant 0 : index
    %c0_164 = arith.constant 0 : index
    %365 = vector.load %arg12[%c0_163, %c0_164] : memref<32x32xf32, #tpu.memory_space<vmem>>, vector<32x32xf32>
    %cst_165 = arith.constant dense<0.000000e+00> : vector<64x32xf32>
    %366 = tpu.matmul %364, %365, %cst_165 {dimension_numbers = #tpu.dot_dimension_numbers<[1], [0], [0], [1], [0, 0, 1, 1], [], []>} : vector<64x32xf32>, vector<32x32xf32>, vector<64x32xf32> -> vector<64x32xf32>
    %c0_166 = arith.constant 0 : index
    %c0_167 = arith.constant 0 : index
    %367 = vector.load %arg13[%c0_166, %c0_167] : memref<1x32xf32, #tpu.memory_space<vmem>>, vector<1x32xf32>
    %368 = vector.broadcast %367 : vector<1x32xf32> to vector<64x32xf32>
    %369 = arith.addf %366, %368 : vector<64x32xf32>
    %370 = arith.addf %369, %327 : vector<64x32xf32>
    %c4_168 = arith.constant 4 : index
    %c0_169 = arith.constant 0 : index
    %371 = vector.load %arg2[%c4_168, %c0_169] : memref<6x32xf32, #tpu.memory_space<vmem>>, vector<1x32xf32>
    %c5_170 = arith.constant 5 : index
    %c0_171 = arith.constant 0 : index
    %372 = vector.load %arg2[%c5_170, %c0_171] : memref<6x32xf32, #tpu.memory_space<vmem>>, vector<1x32xf32>
    %cst_172 = arith.constant dense<0.000000e+00> : vector<64xf32>
    %373 = vector.multi_reduction <add>, %370, %cst_172 [1] : vector<64x32xf32> to vector<64xf32>
    %374 = vector.shape_cast %373 : vector<64xf32> to vector<64x1xf32>
    %cst_173 = arith.constant 3.200000e+01 : f32
    %375 = vector.broadcast %cst_173 : f32 to vector<64x1xf32>
    %376 = arith.divf %374, %375 : vector<64x1xf32>
    %377 = vector.broadcast %376 : vector<64x1xf32> to vector<64x32xf32>
    %378 = arith.subf %370, %377 : vector<64x32xf32>
    %379 = arith.mulf %378, %378 : vector<64x32xf32>
    %cst_174 = arith.constant dense<0.000000e+00> : vector<64xf32>
    %380 = vector.multi_reduction <add>, %379, %cst_174 [1] : vector<64x32xf32> to vector<64xf32>
    %381 = vector.shape_cast %380 : vector<64xf32> to vector<64x1xf32>
    %cst_175 = arith.constant 3.200000e+01 : f32
    %382 = vector.broadcast %cst_175 : f32 to vector<64x1xf32>
    %383 = arith.divf %381, %382 : vector<64x1xf32>
    %384 = vector.broadcast %376 : vector<64x1xf32> to vector<64x32xf32>
    %385 = arith.subf %370, %384 : vector<64x32xf32>
    %cst_176 = arith.constant 9.99999974E-6 : f32
    %386 = vector.broadcast %cst_176 : f32 to vector<64x1xf32>
    %387 = arith.addf %383, %386 : vector<64x1xf32>
    %388 = math.rsqrt %387 : vector<64x1xf32>
    %389 = vector.broadcast %388 : vector<64x1xf32> to vector<64x32xf32>
    %390 = arith.mulf %385, %389 : vector<64x32xf32>
    %391 = vector.broadcast %371 : vector<1x32xf32> to vector<64x32xf32>
    %392 = arith.mulf %390, %391 : vector<64x32xf32>
    %393 = vector.broadcast %372 : vector<1x32xf32> to vector<64x32xf32>
    %394 = arith.addf %392, %393 : vector<64x32xf32>
    %c0_177 = arith.constant 0 : index
    %c0_178 = arith.constant 0 : index
    %395 = vector.load %arg14[%c0_177, %c0_178] : memref<32x1xf32, #tpu.memory_space<vmem>>, vector<32x1xf32>
    %cst_179 = arith.constant dense<0.000000e+00> : vector<64x1xf32>
    %396 = tpu.matmul %394, %395, %cst_179 {dimension_numbers = #tpu.dot_dimension_numbers<[1], [0], [0], [1], [0, 0, 1, 1], [], []>} : vector<64x32xf32>, vector<32x1xf32>, vector<64x1xf32> -> vector<64x1xf32>
    %c0_180 = arith.constant 0 : index
    %c0_181 = arith.constant 0 : index
    %397 = vector.load %arg15[%c0_180, %c0_181] : memref<1x1xf32, #tpu.memory_space<vmem>>, vector<1x1xf32>
    %398 = vector.broadcast %397 : vector<1x1xf32> to vector<64x1xf32>
    %399 = arith.addf %396, %398 : vector<64x1xf32>
    %c0_182 = arith.constant 0 : index
    %c0_183 = arith.constant 0 : index
    %c0_184 = arith.constant 0 : index
    %400 = vector.load %arg16[%c0_182, %c0_183, %c0_184] : memref<1x64x1xf32, #tpu.memory_space<vmem>>, vector<1x64x1xf32>
    %401 = vector.shape_cast %400 : vector<1x64x1xf32> to vector<64x1xf32>
    %402 = vector.shape_cast %399 : vector<64x1xf32> to vector<1x64x1xf32>
    tpu.vector_store %arg16[%c0_182, %c0_183, %c0_184], %402 {strides = array<i32>} : memref<1x64x1xf32, #tpu.memory_space<vmem>>, vector<1x64x1xf32>,
    return
  }
  func.func @transform_0(%arg0: i32) -> (i32, i32, i32) {
    %c0_i32 = arith.constant 0 : i32
    %c0_i32_0 = arith.constant 0 : i32
    %c0_i32_1 = arith.constant 0 : i32
    return %arg0, %c0_i32, %c0_i32_0 : i32, i32, i32
  }
  func.func @transform_1(%arg0: i32) -> (i32, i32) {
    %c0_i32 = arith.constant 0 : i32
    %c0_i32_0 = arith.constant 0 : i32
    %c0_i32_1 = arith.constant 0 : i32
    return %c0_i32, %c0_i32_0 : i32, i32
  }
  func.func @transform_2(%arg0: i32) -> (i32, i32, i32) {
    %c0_i32 = arith.constant 0 : i32
    %c0_i32_0 = arith.constant 0 : i32
    %c0_i32_1 = arith.constant 0 : i32
    %c0_i32_2 = arith.constant 0 : i32
    return %c0_i32, %c0_i32_0, %c0_i32_1 : i32, i32, i32
  }
  func.func @transform_3(%arg0: i32) -> (i32, i32) {
    %c0_i32 = arith.constant 0 : i32
    %c0_i32_0 = arith.constant 0 : i32
    %c0_i32_1 = arith.constant 0 : i32
    return %c0_i32, %c0_i32_0 : i32, i32
  }
  func.func @transform_4(%arg0: i32) -> (i32, i32) {
    %c0_i32 = arith.constant 0 : i32
    %c0_i32_0 = arith.constant 0 : i32
    %c0_i32_1 = arith.constant 0 : i32
    return %c0_i32, %c0_i32_0 : i32, i32
  }
  func.func @transform_5(%arg0: i32) -> (i32, i32) {
    %c0_i32 = arith.constant 0 : i32
    %c0_i32_0 = arith.constant 0 : i32
    %c0_i32_1 = arith.constant 0 : i32
    return %c0_i32, %c0_i32_0 : i32, i32
  }
  func.func @transform_6(%arg0: i32) -> (i32, i32, i32) {
    %c0_i32 = arith.constant 0 : i32
    %c0_i32_0 = arith.constant 0 : i32
    %c0_i32_1 = arith.constant 0 : i32
    %c0_i32_2 = arith.constant 0 : i32
    return %c0_i32, %c0_i32_0, %c0_i32_1 : i32, i32, i32
  }
  func.func @transform_7(%arg0: i32) -> (i32, i32) {
    %c0_i32 = arith.constant 0 : i32
    %c0_i32_0 = arith.constant 0 : i32
    %c0_i32_1 = arith.constant 0 : i32
    return %c0_i32, %c0_i32_0 : i32, i32
  }
  func.func @transform_8(%arg0: i32) -> (i32, i32) {
    %c0_i32 = arith.constant 0 : i32
    %c0_i32_0 = arith.constant 0 : i32
    %c0_i32_1 = arith.constant 0 : i32
    return %c0_i32, %c0_i32_0 : i32, i32
  }
  func.func @transform_9(%arg0: i32) -> (i32, i32) {
    %c0_i32 = arith.constant 0 : i32
    %c0_i32_0 = arith.constant 0 : i32
    %c0_i32_1 = arith.constant 0 : i32
    return %c0_i32, %c0_i32_0 : i32, i32
  }
  func.func @transform_10(%arg0: i32) -> (i32, i32) {
    %c0_i32 = arith.constant 0 : i32
    %c0_i32_0 = arith.constant 0 : i32
    %c0_i32_1 = arith.constant 0 : i32
    return %c0_i32, %c0_i32_0 : i32, i32
  }
  func.func @transform_11(%arg0: i32) -> (i32, i32) {
    %c0_i32 = arith.constant 0 : i32
    %c0_i32_0 = arith.constant 0 : i32
    %c0_i32_1 = arith.constant 0 : i32
    return %c0_i32, %c0_i32_0 : i32, i32
  }
  func.func @transform_12(%arg0: i32) -> (i32, i32) {
    %c0_i32 = arith.constant 0 : i32
    %c0_i32_0 = arith.constant 0 : i32
    %c0_i32_1 = arith.constant 0 : i32
    return %c0_i32, %c0_i32_0 : i32, i32
  }
  func.func @transform_13(%arg0: i32) -> (i32, i32) {
    %c0_i32 = arith.constant 0 : i32
    %c0_i32_0 = arith.constant 0 : i32
    %c0_i32_1 = arith.constant 0 : i32
    return %c0_i32, %c0_i32_0 : i32, i32
  }
  func.func @transform_14(%arg0: i32) -> (i32, i32) {
    %c0_i32 = arith.constant 0 : i32
    %c0_i32_0 = arith.constant 0 : i32
    %c0_i32_1 = arith.constant 0 : i32
    return %c0_i32, %c0_i32_0 : i32, i32
  }
  func.func @transform_15(%arg0: i32) -> (i32, i32, i32) {
    %c0_i32 = arith.constant 0 : i32
    %c0_i32_0 = arith.constant 0 : i32
    %c0_i32_1 = arith.constant 0 : i32
    return %arg0, %c0_i32, %c0_i32_0 : i32, i32, i32
  }
}

</mosaic_0001>

<bundles_post_ra>
// kernel: model_forward.3
= control target key start
LH: loop header
LB: loop body
LE: loop exit
PB: predicated region body
PF: predicated region fallthrough
CT: control target
= control target key end

     0   :  { %s809_s18 = smov 0   ;;  %s890_s0 = inlined_call_operand.vmem [shape: f32[2,64,2], index: 0, kind: input, shape index: {}]   ;;  %s891_s1 = inlined_call_operand.vmem [shape: f32[2,64], index: 1, kind: input, shape index: {}]   ;;  %s892_s2 = inlined_call_operand.vmem [shape: f32[1,64], index: 2, kind: input, shape index: {}]   ;;  %s893_s3 = inlined_call_operand.vmem [shape: f32[64,32], index: 3, kind: input, shape index: {}]   ;;  %s894_s4 = inlined_call_operand.vmem [shape: f32[1,32], index: 4, kind: input, shape index: {}]   ;;  %s895_s5 = inlined_call_operand.vmem [shape: f32[2,64,32], index: 5, kind: output, shape index: {}]  }
   0x1 LB: > { %s624_s19 = sadd.s32 4294967295, %s777_s18   ;;  %p628_p0 = scmp.ge.s32.totalorder %s777_s18, 1  ;;  %s777_s18 = sphi %s809_s18, %s15_s18  }
   0x2   : > { %p187_p1 = scmp.lt.s32.totalorder %s777_s18, 3 }
   0x4   : > { %p188_p2 = pnand %p628_p0, %p187_p1 }
   0x5   : > { %v233_v0 = vld [vmem:[%s891_s1] sm:$0x3] (!%p188_p2)  ;;  %vm266_vm0 = vcmask (!%p188_p2), 1041408   ;;  %p215_p3 = scmp.lt.s32.totalorder (!%p188_p2), %s624_s19, 1  ;;  %vm241_vm1 = vcmask (!%p188_p2), 15360   ;;  %v416_v10 = vld [vmem:[%s893_s3 + $0x8] sm:$0xff] (!%p188_p2) }
   0x6   : > { %191 = sbr.rel (%p188_p2) target bundleno = 479 (0x1df), region = 40  ;;  %681 = vmatprep.subr.msk.mxu0 (!%p188_p2), %vm266_vm0, %v233_v0  ;;  %v415_v9 = vld [vmem:[%s893_s3] sm:$0xff] (!%p188_p2)  ;;  %v417_v12 = vld [vmem:[%s893_s3 + $0x10] sm:$0xff] (!%p188_p2)  ;;  %v418_v13 = vld [vmem:[%s893_s3 + $0x18] sm:$0xff] (!%p188_p2)  ;;  %vm430_vm2 = vcmask (!%p188_p2), 523264   ;;  %vm560_vm3 = vcmask (!%p188_p2), 261120  }
   0x7   : > { %682 = vmatpush3.msk.msra.mxu0 (!%p188_p2), %vm266_vm0, %v233_v0  ;;  %v723_v11 = vpack.c.bf16 (!%p188_p2), %v416_v10, %v415_v9  ;;  %v727_v14 = vpack.c.bf16 (!%p188_p2), %v418_v13, %v417_v12  ;;  %v419_v15 = vld [vmem:[%s893_s3 + $0x20] sm:$0xff] (!%p188_p2)  ;;  %v420_v16 = vld [vmem:[%s893_s3 + $0x28] sm:$0xff] (!%p188_p2)  ;;  %v421_v18 = vld [vmem:[%s893_s3 + $0x30] sm:$0xff] (!%p188_p2) }
   0x8   : > { %v731_v17 = vpack.c.bf16 (!%p188_p2), %v420_v16, %v419_v15  ;;  %v422_v19 = vld [vmem:[%s893_s3 + $0x38] sm:$0xff] (!%p188_p2)  ;;  %v633_v21 = vld [vmem:[%s892_s2] ss:$0 sm:$0xff] (!%p188_p2) }
   0x9   : > { %724 = vmatprep.subr.bf16.mxu0 (!%p188_p2), %v723_v11  ;;  %739 = vmatprep.subr.bf16.mxu1 (!%p188_p2), %v723_v11  ;;  %v735_v20 = vpack.c.bf16 (!%p188_p2), %v422_v19, %v421_v18 }
   0xa   : > { %743 = vmatpush3.bf16.msra.mxu1 (!%p188_p2), %v723_v11 }
   0xb   : > { %740 = vmatprep.subr.bf16.mxu1 (!%p188_p2), %v727_v14 }
   0xd   : > { %s897_s19 = smov (!%p215_p3, %s624_s19), 1 }
   0xe   : > { %s654_s22 = sshll.u32 %s897_s19, 6  ;;  %744 = vmatpush3.bf16.msra.mxu1 %v727_v14 }
   0xf   : > { %s219_s25 = scalar_lea.vmem %s890_s0, %s654_s22  ;;  %741 = vmatprep.subr.bf16.mxu1 %v731_v17  ;;  %s224_s26 = scalar_lea.vmem %s895_s5, %s654_s22 }
  0x10   : > { %v225_v1 = vld [vmem:[%s219_s25] sm:$0xff]  ;;  %v226_v2 = vld [vmem:[%s219_s25 + $0x8] sm:$0xff]  ;;  %v227_v3 = vld [vmem:[%s219_s25 + $0x10] sm:$0xff] }
  0x11   : > { %683 = vmatprep.mubr.msk.f32.mxu0 %vm241_vm1, %v225_v1  ;;  %v228_v4 = vld [vmem:[%s219_s25 + $0x18] sm:$0xff]  ;;  %v229_v5 = vld [vmem:[%s219_s25 + $0x20] sm:$0xff]  ;;  %v230_v6 = vld [vmem:[%s219_s25 + $0x28] sm:$0xff] }
  0x12   : > { %684 = vmatmul.mubr.msk.f32.vlgmr.msra.gmra.mrb[0].mxu0 %vm241_vm1, %v226_v2  ;;  %v231_v7 = vld [vmem:[%s219_s25 + $0x30] sm:$0xff]  ;;  %v232_v8 = vld [vmem:[%s219_s25 + $0x38] sm:$0xff]  ;;  %745 = vmatpush3.bf16.msra.mxu1 %v731_v17 }
  0x13   : > { %686 = vmatprep.mubr.msk.f32.mxu0 %vm241_vm1, %v227_v3  ;;  %726 = vmatpush3.bf16.msra.mxu0 %v723_v11 }
  0x14   : > { %728 = vmatprep.subr.bf16.mxu0 %v727_v14  ;;  %742 = vmatprep.subr.bf16.mxu1 %v735_v20 }
  0x16   : > { %687 = vmatmul.mubr.msk.f32.gmra.mrb[2].mxu0 %vm241_vm1, %v228_v4  ;;  %746 = vmatpush3.bf16.msra.mxu1 %v735_v20 }
  0x17   : > { %689 = vmatprep.mubr.msk.f32.mxu0 %vm241_vm1, %v229_v5  ;;  %730 = vmatpush3.bf16.msra.mxu0 %v727_v14  ;;  %v643_v14 = vld [vmem:[%s894_s4] ss:$0 sm:$0xff] }
  0x18   : > { %732 = vmatprep.subr.bf16.mxu0 %v731_v17 }
  0x1a   : > { %690 = vmatmul.mubr.msk.f32.gmra.mrb[4].mxu0 %vm241_vm1, %v230_v6 }
  0x1b   : > { %692 = vmatprep.mubr.msk.f32.mxu0 %vm241_vm1, %v231_v7  ;;  %734 = vmatpush3.bf16.msra.mxu0 %v731_v17 }
  0x1c   : > { %736 = vmatprep.subr.bf16.mxu0 %v735_v20 }
  0x1e   : > { %693 = vmatmul.mubr.msk.f32.gmra.mrb[6].mxu0 %vm241_vm1, %v232_v8 }
  0x1f   : > { %738 = vmatpush3.bf16.msra.mxu0 %v735_v20 }
  0xe5   : > { %v685_v22 = vpop.f32.mrb[0].mxu0 }
  0xe6   : > { %v342_v23 = vadd.f32 %v685_v22, %v633_v21  ;;  %v336_v24 = vpop.f32.mrb[1].mxu0 }
  0xe7   : > { %v337_v25 = vadd.f32 %v633_v21, %v336_v24 }
  0xe8   : > { %v384_v26 = vmul.f32 0.70710677, %v342_v23  ;;  %v376_v51 = vmul.f32 0.5, %v342_v23 }
  0xe9   : > { %v383_v27 = vmul.f32 0.70710677, %v337_v25  ;;  %v688_v28 = vpop.f32.mrb[2].mxu0  ;;  %v375_v49 = vmul.f32 0.5, %v337_v25 }
  0xea   : > { %755 = verf.f32 %v384_v26  ;;  %v352_v29 = vadd.f32 %v688_v28, %v633_v21  ;;  %v346_v30 = vpop.f32.mrb[3].mxu0 }
  0xeb   : > { %757 = verf.f32 %v383_v27  ;;  %v347_v31 = vadd.f32 %v633_v21, %v346_v30 }
  0xec   : > { %v386_v32 = vmul.f32 0.70710677, %v352_v29  ;;  %v378_v59 = vmul.f32 0.5, %v352_v29 }
  0xed   : > { %v385_v33 = vmul.f32 0.70710677, %v347_v31  ;;  %v691_v34 = vpop.f32.mrb[4].mxu0  ;;  %v377_v57 = vmul.f32 0.5, %v347_v31 }
  0xee   : > { %759 = verf.f32 %v386_v32  ;;  %v362_v35 = vadd.f32 %v691_v34, %v633_v21  ;;  %v356_v36 = vpop.f32.mrb[5].mxu0 }
  0xef   : > { %761 = verf.f32 %v385_v33  ;;  %v357_v37 = vadd.f32 %v633_v21, %v356_v36 }
  0xf0   : > { %v388_v38 = vmul.f32 0.70710677, %v362_v35  ;;  %v380_v3 = vmul.f32 0.5, %v362_v35 }
  0xf1   : > { %v387_v39 = vmul.f32 0.70710677, %v357_v37  ;;  %v694_v40 = vpop.f32.mrb[6].mxu0  ;;  %v379_v1 = vmul.f32 0.5, %v357_v37 }
  0xf2   : > { %763 = verf.f32 %v388_v38  ;;  %v372_v41 = vadd.f32 %v694_v40, %v633_v21  ;;  %v366_v42 = vpop.f32.mrb[7].mxu0 }
  0xf3   : > { %765 = verf.f32 %v387_v39  ;;  %v367_v43 = vadd.f32 %v633_v21, %v366_v42 }
  0xf4   : > { %v756_v44 = vpop.eup %755  ;;  %v390_v45 = vmul.f32 0.70710677, %v372_v41  ;;  %v382_v11 = vmul.f32 0.5, %v372_v41 }
  0xf5   : > { %v758_v46 = vpop.eup %757  ;;  %v400_v47 = vadd.f32 1.0, %v756_v44  ;;  %v389_v48 = vmul.f32 0.70710677, %v367_v43  ;;  %v381_v9 = vmul.f32 0.5, %v367_v43 }
  0xf6   : > { %v399_v50 = vadd.f32 1.0, %v758_v46  ;;  %767 = verf.f32 %v390_v45 }
  0xf7   : > { %769 = verf.f32 %v389_v48  ;;  %v408_v55 = vmul.f32 %v400_v47, %v376_v51 }
  0xf8   : > { %v760_v52 = vpop.eup %759  ;;  %v407_v53 = vmul.f32 %v399_v50, %v375_v49 }
  0xf9   : > { %v762_v54 = vpop.eup %761  ;;  %v402_v56 = vadd.f32 1.0, %v760_v52 }
  0xfa   : > { %711 = vmatprep.mubr.msk.f32.mxu0 %vm430_vm2, %v407_v53  ;;  %v401_v58 = vadd.f32 1.0, %v762_v54 }
  0xfb   : > { %712 = vmatmul.mubr.msk.f32.vlgmr.msra.gmra.mrb[8].mxu0 %vm430_vm2, %v408_v55  ;;  %v410_v63 = vmul.f32 %v402_v56, %v378_v59 }
  0xfc   : > { %v764_v60 = vpop.eup %763  ;;  %v409_v61 = vmul.f32 %v401_v58, %v377_v57 }
  0xfd   : > { %v766_v62 = vpop.eup %765  ;;  %v404_v0 = vadd.f32 1.0, %v764_v60 }
  0xfe   : > { %v403_v2 = vadd.f32 1.0, %v766_v62  ;;  %714 = vmatprep.mubr.msk.f32.mxu1 %vm430_vm2, %v409_v61 }
  0xff   : > { %715 = vmatmul.mubr.msk.f32.vlgmr.msra.gmra.mrb[0].mxu1 %vm430_vm2, %v410_v63  ;;  %v412_v7 = vmul.f32 %v404_v0, %v380_v3 }
 0x100   : > { %v768_v4 = vpop.eup %767  ;;  %v411_v5 = vmul.f32 %v403_v2, %v379_v1 }
 0x101   : > { %v770_v6 = vpop.eup %769  ;;  %v406_v8 = vadd.f32 1.0, %v768_v4 }
 0x102   : > { %v405_v10 = vadd.f32 1.0, %v770_v6  ;;  %717 = vmatprep.mubr.msk.f32.mxu1 %vm430_vm2, %v411_v5 }
 0x103   : > { %718 = vmatmul.mubr.msk.f32.gmra.mrb[2].mxu1 %vm430_vm2, %v412_v7  ;;  %v414_v13 = vmul.f32 %v406_v8, %v382_v11 }
 0x104   : > { %v413_v12 = vmul.f32 %v405_v10, %v381_v9 }
 0x106   : > { %720 = vmatprep.mubr.msk.f32.mxu1 %vm430_vm2, %v413_v12 }
 0x107   : > { %721 = vmatmul.mubr.msk.f32.gmra.mrb[4].mxu1 %vm430_vm2, %v414_v13 }
 0x1ce   : > { %v713_v15 = vpop.f32.mrb[8].mxu0 }
 0x1cf   : > { %v527_v16 = vadd.f32 %v713_v15, %v643_v14  ;;  %v521_v17 = vpop.f32.mrb[9].mxu0 }
 0x1d0   : > { %v522_v18 = vadd.f32 %v643_v14, %v521_v17 }
 0x1d1   : > { %562 = vst.msk [vmem:[%s224_s26 + $0x8] sm:$0xff] %vm560_vm3, %v527_v16 }
 0x1d2   : > { %561 = vst.msk [vmem:[%s224_s26] sm:$0xff] %vm560_vm3, %v522_v18  ;;  %v716_v19 = vpop.f32.mrb[0].mxu1 }
 0x1d3   : > { %v537_v20 = vadd.f32 %v716_v19, %v643_v14  ;;  %v531_v21 = vpop.f32.mrb[1].mxu1 }
 0x1d4   : > { %v532_v22 = vadd.f32 %v643_v14, %v531_v21 }
 0x1d5   : > { %564 = vst.msk [vmem:[%s224_s26 + $0x18] sm:$0xff] %vm560_vm3, %v537_v20 }
 0x1d6   : > { %563 = vst.msk [vmem:[%s224_s26 + $0x10] sm:$0xff] %vm560_vm3, %v532_v22  ;;  %v719_v23 = vpop.f32.mrb[2].mxu1 }
 0x1d7   : > { %v547_v24 = vadd.f32 %v719_v23, %v643_v14  ;;  %v541_v25 = vpop.f32.mrb[3].mxu1 }
 0x1d8   : > { %v542_v26 = vadd.f32 %v643_v14, %v541_v25 }
 0x1d9   : > { %566 = vst.msk [vmem:[%s224_s26 + $0x28] sm:$0xff] %vm560_vm3, %v547_v24 }
 0x1da   : > { %565 = vst.msk [vmem:[%s224_s26 + $0x20] sm:$0xff] %vm560_vm3, %v542_v26  ;;  %v722_v27 = vpop.f32.mrb[4].mxu1 }
 0x1db   : > { %v557_v28 = vadd.f32 %v722_v27, %v643_v14  ;;  %v551_v29 = vpop.f32.mrb[5].mxu1 }
 0x1dc   : > { %v552_v30 = vadd.f32 %v643_v14, %v551_v29 }
 0x1dd   : > { %568 = vst.msk [vmem:[%s224_s26 + $0x38] sm:$0xff] %vm560_vm3, %v557_v28 }
 0x1de   : > { %567 = vst.msk [vmem:[%s224_s26 + $0x30] sm:$0xff] %vm560_vm3, %v552_v30 }
 0x1df PF: > { %s15_s18 = sadd.s32 1, %s777_s18  }
 0x1e0   : > { %p12_p4 = scmp.ge.s32.totalorder %s15_s18, 4  }
 0x1e2   :  { %14 = sbr.rel (!%p12_p4) target bundleno = 1 (0x1), region = 70 }

// kernel: model_forward.4
= control target key start
LH: loop header
LB: loop body
LE: loop exit
PB: predicated region body
PF: predicated region fallthrough
CT: control target
= control target key end

     0   :  { %s7360_s25 = smov 0   ;;  %s8919_s0 = inlined_call_operand.vmem [shape: f32[2,64,32], index: 0, kind: input, shape index: {}]   ;;  %s8920_s1 = inlined_call_operand.vmem [shape: f32[4,32], index: 1, kind: input, shape index: {}]   ;;  %s8921_s2 = inlined_call_operand.vmem [shape: f32[9,32,64], index: 2, kind: input, shape index: {}]   ;;  %s8922_s3 = inlined_call_operand.vmem [shape: f32[1,64], index: 3, kind: input, shape index: {}]   ;;  %s8923_s4 = inlined_call_operand.vmem [shape: f32[32,32], index: 4, kind: input, shape index: {}]   ;;  %s8924_s5 = inlined_call_operand.vmem [shape: f32[1,32], index: 5, kind: input, shape index: {}]   ;;  %s8925_s6 = inlined_call_operand.vmem [shape: f32[4,8,24], index: 6, kind: input, shape index: {}]   ;;  %s8926_s7 = inlined_call_operand.vmem [shape: f32[32,32], index: 7, kind: input, shape index: {}]   ;;  %s8927_s8 = inlined_call_operand.vmem [shape: f32[1,32], index: 8, kind: input, shape index: {}]   ;;  %s8928_s9 = inlined_call_operand.vmem [shape: f32[32,32], index: 9, kind: input, shape index: {}]   ;;  %s8929_s10 = inlined_call_operand.vmem [shape: f32[1,32], index: 10, kind: input, shape index: {}]   ;;  %s8930_s11 = inlined_call_operand.vmem [shape: f32[32,32], index: 11, kind: input, shape index: {}]   ;;  %s8931_s12 = inlined_call_operand.vmem [shape: f32[1,32], index: 12, kind: input, shape index: {}]   ;;  %s8932_s13 = inlined_call_operand.vmem [shape: f32[2,64,32], index: 13, kind: output, shape index: {}]  }
   0x1 LB: > { %s5849_s26 = sadd.s32 4294967295, %s7280_s25   ;;  %p5853_p0 = scmp.ge.s32.totalorder %s7280_s25, 1  ;;  %s7280_s25 = sphi %s7360_s25, %s23_s25  }
   0x2   : > { %p387_p1 = scmp.lt.s32.totalorder %s7280_s25, 3 }
   0x4   : > { %p388_p2 = pnand %p5853_p0, %p387_p1 }
   0x5   : > { %p431_p3 = scmp.lt.s32.totalorder (!%p388_p2), %s5849_s26, 1  ;;  %vm451_vm0 = vcmask (!%p388_p2), 261120   ;;  %v5860_v56 = vld [vmem:[%s8921_s2 + $0x20] sm:$0xff] (!%p388_p2)  ;;  %v5861_v57 = vld [vmem:[%s8921_s2 + $0x28] sm:$0xff] (!%p388_p2)  ;;  %v5862_v59 = vld [vmem:[%s8921_s2 + $0x30] sm:$0xff] (!%p388_p2)  ;;  %v8936_v62 = vmov (!%p388_p2), 0.0  }
   0x6   : > { %391 = sbr.rel (%p388_p2) target bundleno = 8599 (0x2197), region = 72  ;;  %v6756_v58 = vpack.c.bf16 (!%p388_p2), %v5861_v57, %v5860_v56  ;;  %v5863_v60 = vld [vmem:[%s8921_s2 + $0x38] sm:$0xff] (!%p388_p2)  ;;  %6312 = vmatprep.mubr.f32.mxu0 (!%p388_p2), %v8936_v62  ;;  %v759_v63 = vld [vmem:[%s8921_s2] sm:$0xff] (!%p388_p2)  ;;  %v7503_v57 = vrot.slane (!%p388_p2), %v8936_v62, 7  ;;  %vm726_vm1 = vcmask (!%p388_p2), 1040384   ;;  %vm1051_vm4 = vcmask (!%p388_p2), 1046528  }
   0x7   : > { %v6760_v61 = vpack.c.bf16 (!%p388_p2), %v5863_v60, %v5862_v59  ;;  %v5879_v59 = vld [vmem:[%s8921_s2 + $0x40] sm:$0xff] (!%p388_p2)  ;;  %s7284_s22 = smov (!%p388_p2), 96   ;;  %s7287_s14 = smov (!%p388_p2), 120  }
   0x8   : > { %6757 = vmatprep.subr.bf16.mxu0 (!%p388_p2), %v6756_v58  ;;  %s7288_s15 = smov (!%p388_p2), 112   ;;  %s7289_s24 = smov (!%p388_p2), 104  }
   0x9   : > { %6759 = vmatpush3.bf16.msra.mxu0 (!%p388_p2), %v6756_v58 }
   0xa   : > { %6761 = vmatprep.subr.bf16.mxu0 (!%p388_p2), %v6760_v61 }
   0xd   : > { %s8951_s26 = smov (!%p431_p3, %s5849_s26), 1  ;;  %6763 = vmatpush3.bf16.msra.mxu0 %v6760_v61 }
   0xe   : > { %s6054_s27 = sshll.u32 %s8951_s26, 6 }
   0xf   : > { %s7376_s30 = scalar_lea.vmem %s8919_s0, %s6054_s27  ;;  %s440_s18 = scalar_lea.vmem %s8932_s13, %s6054_s27 }
  0x10   : > { %v441_v0 = vld [vmem:[%s7376_s30] sm:$0xff]  ;;  %v443_v1 = vld [vmem:[%s7376_s30 + $0x10] sm:$0xff]  ;;  %v442_v2 = vld [vmem:[%s7376_s30 + $0x8] sm:$0xff] }
  0x11   : > { %v452_v3 = vsel %vm451_vm0, %v441_v0, 0.0  ;;  %v458_v4 = vsel %vm451_vm0, %v443_v1, 0.0  ;;  %v444_v5 = vld [vmem:[%s7376_s30 + $0x18] sm:$0xff]  ;;  %v455_v6 = vsel %vm451_vm0, %v442_v2, 0.0  ;;  %v445_v8 = vld [vmem:[%s7376_s30 + $0x20] sm:$0xff]  ;;  %v446_v9 = vld [vmem:[%s7376_s30 + $0x28] sm:$0xff] }
  0x12   : > { %453 = vadd.xlane.f32.xlu0 %v452_v3  ;;  %459 = vadd.xlane.f32.xlu1 %v458_v4  ;;  %v461_v7 = vsel %vm451_vm0, %v444_v5, 0.0  ;;  %v464_v10 = vsel %vm451_vm0, %v445_v8, 0.0  ;;  %v467_v11 = vsel %vm451_vm0, %v446_v9, 0.0  ;;  %v447_v12 = vld [vmem:[%s7376_s30 + $0x30] sm:$0xff]  ;;  %v448_v13 = vld [vmem:[%s7376_s30 + $0x38] sm:$0xff] }
  0x13   : > { %v470_v14 = vsel %vm451_vm0, %v447_v12, 0.0  ;;  %v473_v15 = vsel %vm451_vm0, %v448_v13, 0.0 }
  0x16   : > { %456 = vadd.xlane.f32.xlu0 %v455_v6  ;;  %462 = vadd.xlane.f32.xlu1 %v461_v7 }
  0x1a   : > { %465 = vadd.xlane.f32.xlu0 %v464_v10  ;;  %468 = vadd.xlane.f32.xlu1 %v467_v11 }
  0x1e   : > { %471 = vadd.xlane.f32.xlu0 %v470_v14  ;;  %474 = vadd.xlane.f32.xlu1 %v473_v15 }
  0x9f   : > { %v454_v16 = vpop.xlane.xlu0 %453  ;;  %v460_v17 = vpop.xlane.xlu1 %459 }
  0xa0   : > { %v477_v18 = vmul.f32 0.03125, %v454_v16  ;;  %v479_v19 = vmul.f32 0.03125, %v460_v17 }
  0xa2   : > { %v7394_v20 = vsub.f32 %v441_v0, %v477_v18  ;;  %v7396_v21 = vsub.f32 %v443_v1, %v479_v19  ;;  %v760_v0 = vld [vmem:[%s8921_s2 + $0x8] sm:$0xff] }
  0xa3   : > { %v457_v22 = vpop.xlane.xlu0 %456  ;;  %v463_v23 = vpop.xlane.xlu1 %462  ;;  %v7453_v1 = vpack.c.bf16 %v760_v0, %v759_v63 }
  0xa4   : > { %v478_v24 = vmul.f32 0.03125, %v457_v22  ;;  %v480_v25 = vmul.f32 0.03125, %v463_v23  ;;  %v493_v26 = vmul.f32 %v7394_v20, %v7394_v20  ;;  %v495_v27 = vmul.f32 %v7396_v21, %v7396_v21 }
  0xa5   : > { %6765 = vmatprep.subr.bf16.mxu0 %v7453_v1 }
  0xa6   : > { %v7402_v28 = vsub.f32 %v442_v2, %v478_v24  ;;  %v7404_v29 = vsub.f32 %v444_v5, %v480_v25  ;;  %v501_v30 = vsel %vm451_vm0, %v493_v26, 0.0  ;;  %v507_v33 = vsel %vm451_vm0, %v495_v27, 0.0  ;;  %v7464_v26 = vld [vmem:[%s8920_s1] ss:$0 sm:$0xff] }
  0xa7   : > { %502 = vadd.xlane.f32.xlu0 %v501_v30  ;;  %v466_v31 = vpop.xlane.xlu0 %465  ;;  %v469_v32 = vpop.xlane.xlu1 %468  ;;  %v581_v5 = vlaneseq }
  0xa8   : > { %v481_v34 = vmul.f32 0.03125, %v466_v31  ;;  %v482_v35 = vmul.f32 0.03125, %v469_v32  ;;  %v494_v36 = vmul.f32 %v7402_v28, %v7402_v28  ;;  %v496_v37 = vmul.f32 %v7404_v29, %v7404_v29 }
  0xaa   : > { %v7412_v38 = vsub.f32 %v445_v8, %v481_v34  ;;  %v7414_v39 = vsub.f32 %v446_v9, %v482_v35  ;;  %v504_v40 = vsel %vm451_vm0, %v494_v36, 0.0  ;;  %v510_v43 = vsel %vm451_vm0, %v496_v37, 0.0  ;;  %v7472_v36 = vld [vmem:[%s8920_s1 + $0x1] ss:$0 sm:$0xff] }
  0xab   : > { %508 = vadd.xlane.f32.xlu0 %v507_v33  ;;  %505 = vadd.xlane.f32.xlu1 %v504_v40  ;;  %v472_v41 = vpop.xlane.xlu0 %471  ;;  %v475_v42 = vpop.xlane.xlu1 %474  ;;  %v761_v40 = vld [vmem:[%s8921_s2 + $0x10] sm:$0xff] }
  0xac   : > { %v483_v44 = vmul.f32 0.03125, %v472_v41  ;;  %v484_v45 = vmul.f32 0.03125, %v475_v42  ;;  %v497_v46 = vmul.f32 %v7412_v38, %v7412_v38  ;;  %v498_v47 = vmul.f32 %v7414_v39, %v7414_v39  ;;  %v762_v41 = vld [vmem:[%s8921_s2 + $0x18] sm:$0xff] }
  0xae   : > { %v7422_v48 = vsub.f32 %v447_v12, %v483_v44  ;;  %v7424_v49 = vsub.f32 %v448_v13, %v484_v45  ;;  %v513_v50 = vsel %vm451_vm0, %v497_v46, 0.0  ;;  %v516_v51 = vsel %vm451_vm0, %v498_v47, 0.0 }
  0xaf   : > { %511 = vadd.xlane.f32.xlu1 %v510_v43  ;;  %514 = vadd.xlane.f32.xlu0 %v513_v50  ;;  %v7456_v12 = vshrl.u32 %v581_v5, 7 }
  0xb0   : > { %v499_v52 = vmul.f32 %v7422_v48, %v7422_v48  ;;  %v500_v53 = vmul.f32 %v7424_v49, %v7424_v49 }
  0xb1   : > { %v7459_v19 = vadd.s32 8, %v7456_v12  ;;  %v594_v32 = vand.u32 7, %v7456_v12  ;;  %v7481_v42 = vadd.s32 16, %v7456_v12  ;;  %v7485_v43 = vadd.s32 24, %v7456_v12 }
  0xb2   : > { %v519_v54 = vsel %vm451_vm0, %v499_v52, 0.0  ;;  %v522_v55 = vsel %vm451_vm0, %v500_v53, 0.0  ;;  %v7492_v50 = vadd.s32 32, %v7456_v12 }
  0xb3   : > { %517 = vadd.xlane.f32.xlu1 %v516_v51  ;;  %520 = vadd.xlane.f32.xlu0 %v519_v54  ;;  %v601_v33 = vand.u32 7, %v7459_v19  ;;  %v7487_v46 = vadd.s32 4294967295, %v594_v32  ;;  %v6768_v54 = vpack.c.bf16 %v762_v41, %v761_v40  ;;  %v608_v58 = vand.u32 7, %v7481_v42 }
  0xb4   : > { %v615_v60 = vand.u32 7, %v7485_v43  ;;  %v7516_v61 = vadd.s32 1, %v594_v32 }
  0xb5   : > { %v7489_v47 = vadd.s32 4294967295, %v601_v33  ;;  %vm8934_vm3 = vcmp.ge.s32.totalorder %v7487_v46, 0  ;;  %v7556_v19 = vadd.s32 1, %v601_v33 }
  0xb6   : > { %v751_v43 = vsel %vm8934_vm3, %v7503_v57, 0.0  ;;  %vm1034_vm11 = vcmp.lt.s32.totalorder %v7516_v61, 8 }
  0xb7   : > { %523 = vadd.xlane.f32.xlu1 %v522_v55  ;;  %v7499_v55 = vadd.s32 40, %v7456_v12  ;;  %vm8933_vm2 = vcmp.ge.s32.totalorder %v7489_v47, 0  ;;  %vm8935_vm7 = vcmp.lt.s32.totalorder %v7556_v19, 8 }
 0x134   : > { %v503_v2 = vpop.xlane.xlu0 %502 }
 0x135   : > { %v525_v3 = vmul.f32 0.03125, %v503_v2  ;;  %v7522_v2 = vadd.s32 48, %v7456_v12 }
 0x137   : > { %v533_v4 = vadd.f32 1e-05, %v525_v3  ;;  %v7525_v3 = vrot.slane %v8936_v62, 1 }
 0x138   : > { %v506_v6 = vpop.xlane.xlu1 %505  ;;  %v509_v7 = vpop.xlane.xlu0 %508 }
 0x139   : > { %7066 = vrsqrt.f32 %v533_v4  ;;  %v526_v8 = vmul.f32 0.03125, %v506_v6  ;;  %v527_v9 = vmul.f32 0.03125, %v509_v7  ;;  %v629_v7 = vand.u32 7, %v7499_v55 }
 0x13b   : > { %v534_v10 = vadd.f32 1e-05, %v526_v8  ;;  %v535_v11 = vadd.f32 1e-05, %v527_v9  ;;  %v7627_v55 = vadd.s32 1, %v629_v7 }
 0x13c   : > { %v512_v13 = vpop.xlane.xlu1 %511  ;;  %v515_v14 = vpop.xlane.xlu0 %514 }
 0x13d   : > { %7068 = vrsqrt.f32 %v534_v10  ;;  %v528_v15 = vmul.f32 0.03125, %v512_v13  ;;  %v529_v16 = vmul.f32 0.03125, %v515_v14  ;;  %v7538_v10 = vadd.s32 4294967295, %v608_v58 }
 0x13e   : > { %7070 = vrsqrt.f32 %v535_v11  ;;  %v7546_v14 = vadd.s32 4294967295, %v615_v60 }
 0x13f   : > { %v536_v17 = vadd.f32 1e-05, %v528_v15  ;;  %v537_v18 = vadd.f32 1e-05, %v529_v16  ;;  %v7549_v15 = vadd.s32 56, %v7456_v12  ;;  %vm696_vm5 = vcmp.ge.s32.totalorder %v7538_v10, 0 }
 0x140   : > { %v518_v22 = vpop.xlane.xlu1 %517  ;;  %v521_v23 = vpop.xlane.xlu0 %520  ;;  %vm697_vm6 = vcmp.ge.s32.totalorder %v7546_v14, 0 }
 0x141   : > { %7072 = vrsqrt.f32 %v536_v17  ;;  %v530_v24 = vmul.f32 0.03125, %v518_v22  ;;  %v531_v25 = vmul.f32 0.03125, %v521_v23  ;;  %v643_v33 = vand.u32 7, %v7549_v15 }
 0x142   : > { %7074 = vrsqrt.f32 %v537_v18  ;;  %v636_v18 = vand.u32 7, %v7522_v2 }
 0x143   : > { %v7067_v27 = vpop.eup %7066  ;;  %v538_v30 = vadd.f32 1e-05, %v530_v24  ;;  %v539_v31 = vadd.f32 1e-05, %v531_v25  ;;  %v7564_v25 = vadd.s32 4294967295, %v629_v7  ;;  %v7654_v2 = vadd.s32 1, %v643_v33 }
 0x144   : > { %v524_v34 = vpop.xlane.xlu1 %523  ;;  %v549_v35 = vmul.f32 %v7067_v27, %v7394_v20  ;;  %v7593_v40 = vadd.s32 4294967295, %v636_v18  ;;  %v5891_v7 = vld [vmem:[%s8921_s2 + $0x60] sm:$0xff] }
 0x145   : > { %7076 = vrsqrt.f32 %v538_v30  ;;  %v532_v37 = vmul.f32 0.03125, %v524_v34  ;;  %vm699_vm9 = vcmp.ge.s32.totalorder %v7564_v25, 0 }
 0x146   : > { %7078 = vrsqrt.f32 %v539_v31  ;;  %v561_v20 = vmul.f32 %v7464_v26, %v549_v35  ;;  %v7572_v31 = vadd.s32 1, %v608_v58  ;;  %vm700_vm10 = vcmp.ge.s32.totalorder %v7593_v40, 0  ;;  %v2091_v40 = vld [vmem:[%s8923_s4 + $0x10] sm:$0xff] }
 0x147   : > { %v7069_v44 = vpop.eup %7068  ;;  %v540_v45 = vadd.f32 1e-05, %v532_v37  ;;  %v7634_v58 = vadd.s32 1, %v636_v18 }
 0x148   : > { %v7071_v51 = vpop.eup %7070  ;;  %v550_v52 = vmul.f32 %v7069_v44, %v7402_v28  ;;  %v7496_v53 = vadd.f32 %v7472_v36, %v561_v20  ;;  %v7608_v44 = vadd.s32 1, %v615_v60  ;;  %vm1036_vm12 = vcmp.lt.s32.totalorder %v7572_v31, 8 }
 0x149   : > { %v551_v56 = vmul.f32 %v7071_v51, %v7396_v21  ;;  %7080 = vrsqrt.f32 %v540_v45  ;;  %v5880_v21 = vld [vmem:[%s8921_s2 + $0x48] sm:$0xff]  ;;  %v5881_v51 = vld [vmem:[%s8921_s2 + $0x50] sm:$0xff]  ;;  %vm1040_vm3 = vcmp.lt.s32.totalorder %v7634_v58, 8 }
 0x14a   : > { %6313 = vmatmul.mubr.msk.f32.vlgmr.msra.gmra.mrb[0].mxu0 %vm451_vm0, %v7496_v53  ;;  %v562_v28 = vmul.f32 %v7464_v26, %v550_v52  ;;  %v7540_v11 = vpack.c.bf16 %v5880_v21, %v5879_v59  ;;  %v729_v32 = vrot.slane %v7496_v53, 7  ;;  %v5882_v52 = vld [vmem:[%s8921_s2 + $0x58] sm:$0xff]  ;;  %vm1037_vm13 = vcmp.lt.s32.totalorder %v7608_v44, 8 }
 0x14b   : > { %v7073_v63 = vpop.eup %7072  ;;  %6767 = vmatpush3.bf16.msra.mxu0 %v7453_v1  ;;  %v563_v0 = vmul.f32 %v7464_v26, %v551_v56  ;;  %v622_v1 = vand.u32 7, %v7492_v50 }
 0x14c   : > { %v7075_v4 = vpop.eup %7074  ;;  %v552_v5 = vmul.f32 %v7073_v63, %v7404_v29  ;;  %v7529_v6 = vadd.f32 %v7472_v36, %v562_v28  ;;  %6769 = vmatprep.subr.bf16.mxu0 %v6768_v54  ;;  %v7617_v50 = vsel %vm726_vm1, %v7503_v57, %v729_v32 }
 0x14d   : > { %v553_v8 = vmul.f32 %v7075_v4, %v7412_v38  ;;  %v7536_v9 = vadd.f32 %v7472_v36, %v563_v0  ;;  %v7562_v12 = vadd.s32 4294967295, %v622_v1  ;;  %v7610_v45 = vadd.s32 1, %v622_v1 }
 0x14e   : > { %6315 = vmatprep.mubr.msk.f32.mxu0 %vm451_vm0, %v7529_v6  ;;  %v564_v29 = vmul.f32 %v7464_v26, %v552_v5  ;;  %v731_v13 = vrot.slane %v7529_v6, 7  ;;  %v752_v63 = vsel %vm8933_vm2, %v7617_v50, 0.0  ;;  %v6776_v0 = vpack.c.bf16 %v5882_v52, %v5881_v51 }
 0x14f   : > { %v7077_v38 = vpop.eup %7076  ;;  %6316 = vmatmul.mubr.msk.f32.gmra.mrb[2].mxu0 %vm451_vm0, %v7536_v9  ;;  %v565_v16 = vmul.f32 %v7464_v26, %v553_v8  ;;  %v733_v17 = vrot.slane %v7536_v9, 7  ;;  %vm698_vm8 = vcmp.ge.s32.totalorder %v7562_v12, 0  ;;  %v1055_v1 = vrot.slane %v7529_v6, 1  ;;  %v5892_v8 = vld [vmem:[%s8921_s2 + $0x68] sm:$0xff] }
 0x150   : > { %v7079_v22 = vpop.eup %7078  ;;  %v554_v23 = vmul.f32 %v7077_v38, %v7414_v39  ;;  %v7560_v24 = vadd.f32 %v7472_v36, %v564_v29  ;;  %6771 = vmatpush3.bf16.msra.mxu0 %v6768_v54  ;;  %v7625_v54 = vadd.s32 4294967295, %v643_v33  ;;  %v7641_v59 = vsel %vm726_vm1, %v729_v32, %v731_v13 }
 0x151   : > { %v555_v27 = vmul.f32 %v7079_v22, %v7422_v48  ;;  %v7568_v30 = vadd.f32 %v7472_v36, %v565_v16  ;;  %6773 = vmatprep.subr.bf16.mxu0 %v7540_v11  ;;  %v7582_v48 = vsel %vm726_vm1, %v731_v13, %v733_v17  ;;  %vm1038_vm15 = vcmp.lt.s32.totalorder %v7610_v45, 8 }
 0x152   : > { %6318 = vmatprep.mubr.msk.f32.mxu0 %vm451_vm0, %v7560_v24  ;;  %v566_v39 = vmul.f32 %v7464_v26, %v554_v23  ;;  %v7591_v37 = vsel %vm8933_vm2, %v7582_v48, 0.0  ;;  %v1059_v56 = vrot.slane %v7560_v24, 1  ;;  %v735_v21 = vrot.slane %v7560_v24, 7 }
 0x153   : > { %v7081_v34 = vpop.eup %7080  ;;  %6319 = vmatmul.mubr.msk.f32.gmra.mrb[4].mxu0 %vm451_vm0, %v7568_v30  ;;  %v567_v35 = vmul.f32 %v7464_v26, %v555_v27  ;;  %v737_v60 = vrot.slane %v7568_v30, 7  ;;  %vm8938_vm14 = vcmp.ge.s32.totalorder %v7625_v54, 0  ;;  %vm1039_vm2 = vcmp.lt.s32.totalorder %v7627_v55, 8  ;;  %v5942_v55 = vld [vmem:[%s8921_s2 + $0xf8] sm:$0xff] }
 0x154   : > { %v556_v41 = vmul.f32 %v7081_v34, %v7424_v49  ;;  %v7598_v42 = vadd.f32 %v7472_v36, %v566_v39  ;;  %v753_v13 = vsel %vm696_vm5, %v7641_v59, 0.0  ;;  %v1061_v15 = vrot.slane %v7568_v30, 1 }
 0x155   : > { %v7603_v20 = vadd.f32 %v7472_v36, %v567_v35  ;;  %v7685_v16 = vsel %vm726_vm1, %v733_v17, %v735_v21  ;;  %v7688_v18 = vsel %vm726_vm1, %v735_v21, %v737_v60  ;;  %v754_v27 = vsel %vm697_vm6, %v7582_v48, 0.0 }
 0x156   : > { %v568_v49 = vmul.f32 %v7464_v26, %v556_v41  ;;  %6321 = vmatprep.mubr.msk.f32.mxu0 %vm451_vm0, %v7598_v42  ;;  %v1057_v26 = vrot.slane %v7536_v9, 1  ;;  %v739_v4 = vrot.slane %v7598_v42, 7  ;;  %v1063_v38 = vrot.slane %v7598_v42, 1 }
 0x157   : > { %6322 = vmatmul.mubr.msk.f32.gmra.mrb[6].mxu0 %vm451_vm0, %v7603_v20  ;;  %v8939_v5 = vrot.slane %v7603_v20, 7  ;;  %v1065_v22 = vrot.slane %v7603_v20, 1  ;;  %v1053_v39 = vrot.slane %v7496_v53, 1  ;;  %v755_v35 = vsel %vm698_vm8, %v7685_v16, 0.0 }
 0x158   : > { %v7637_v28 = vadd.f32 %v7472_v36, %v568_v49  ;;  %6332 = vmatprep.mubr.msk.f32.mxu0 %vm451_vm0, %v751_v43  ;;  %v7652_v36 = vsel %vm1051_vm4, %v1057_v26, %v1059_v56  ;;  %v7698_v17 = vsel %vm726_vm1, %v737_v60, %v739_v4  ;;  %v7706_v33 = vsel %vm1051_vm4, %v1055_v1, %v1057_v26 }
 0x159   : > { %v7669_v29 = vsel %vm8935_vm7, %v7652_v36, 0.0  ;;  %vm1041_vm7 = vcmp.lt.s32.totalorder %v7654_v2, 8  ;;  %v7703_v32 = vsel %vm726_vm1, %v739_v4, %v8939_v5  ;;  %v756_v41 = vsel %vm699_vm9, %v7688_v18, 0.0  ;;  %v5950_v2 = vld [vmem:[%s8921_s2 + $0x100] sm:$0xff] }
 0x15a   : > { %v1067_v23 = vrot.slane %v7637_v28, 1  ;;  %v8940_v34 = vrot.slane %v7637_v28, 7  ;;  %v7717_v43 = vsel %vm1051_vm4, %v1059_v56, %v1061_v15  ;;  %v7720_v49 = vsel %vm1051_vm4, %v1061_v15, %v1063_v38 }
 0x15b   : > { %6333 = vmatmul.mubr.msk.f32.vlgmr.msra.gmra.mrb[0].mxu0 %vm451_vm0, %v752_v63  ;;  %v7724_v51 = vsel %vm1051_vm4, %v1063_v38, %v1065_v22  ;;  %v7736_v56 = vsel %vm696_vm5, %v7685_v16, 0.0  ;;  %v757_v21 = vsel %vm700_vm10, %v7698_v17, 0.0  ;;  %v7744_v60 = vsel %vm697_vm6, %v7688_v18, 0.0 }
 0x15c   : > { %6335 = vmatprep.mubr.msk.f32.mxu0 %vm451_vm0, %v753_v13  ;;  %6775 = vmatpush3.bf16.msra.mxu0 %v7540_v11  ;;  %v6780_v11 = vpack.c.bf16 %v5892_v8, %v5891_v7  ;;  %v7727_v52 = vsel %vm1051_vm4, %v1065_v22, %v1067_v23  ;;  %v7731_v26 = vsel %vm1051_vm4, %v1067_v23, %v7525_v3  ;;  %v7749_v63 = vsel %vm698_vm8, %v7698_v17, 0.0 }
 0x15d   : > { %6777 = vmatprep.subr.bf16.mxu0 %v6776_v0  ;;  %v1652_v4 = vsel %vm726_vm1, %v8940_v34, %v7503_v57  ;;  %v7763_v7 = vsel %vm1034_vm11, %v7706_v33, 0.0  ;;  %v7768_v8 = vsel %vm1036_vm12, %v7717_v43, 0.0  ;;  %v7773_v13 = vsel %vm1037_vm13, %v7720_v49, 0.0  ;;  %v5903_v34 = vld [vmem:[%s8921_s2 + $0x80] sm:$0xff] }
 0x15e   : > { %v7778_v57 = vsel %vm8938_vm14, %v1652_v4, 0.0  ;;  %v7783_v15 = vsel %vm1038_vm15, %v7724_v51, 0.0  ;;  %v7788_v38 = vsel %vm1039_vm2, %v7727_v52, 0.0  ;;  %v7793_v22 = vsel %vm1040_vm3, %v7731_v26, 0.0 }
 0x15f   : > { %6336 = vmatmul.mubr.msk.f32.gmra.mrb[2].mxu0 %vm451_vm0, %v754_v27  ;;  %v1054_v23 = vsel %vm1051_vm4, %v7525_v3, %v1053_v39  ;;  %v7801_v27 = vsel %vm1041_vm7, %v7525_v3, 0.0  ;;  %v7816_v3 = vsel %vm1051_vm4, %v1053_v39, %v1055_v1  ;;  %v1079_v1 = vsel %vm1036_vm12, %v7706_v33, 0.0 }
 0x160   : > { %6338 = vmatprep.mubr.msk.f32.mxu0 %vm451_vm0, %v755_v35  ;;  %6779 = vmatpush3.bf16.msra.mxu0 %v6776_v0  ;;  %v7754_v0 = vsel %vm699_vm9, %v7703_v32, 0.0  ;;  %v758_v35 = vsel %vm8938_vm14, %v7703_v32, 0.0  ;;  %v1077_v4 = vsel %vm1034_vm11, %v1054_v23, 0.0  ;;  %vm8941_vm14 = vcmp.lt.s32.totalorder %v7556_v19, 8 }
 0x161   : > { %6781 = vmatprep.subr.bf16.mxu0 %v6780_v11  ;;  %v1078_v5 = vsel %vm8941_vm14, %v7816_v3, 0.0  ;;  %v1080_v23 = vsel %vm1037_vm13, %v7652_v36, 0.0  ;;  %vm8942_vm4 = vcmp.ge.s32.totalorder %v7487_v46, 0  ;;  %vm8943_vm14 = vcmp.ge.s32.totalorder %v7489_v47, 0 }
 0x162   : > { %v1235_v10 = vsel %vm699_vm9, %v7698_v17, 0.0  ;;  %v1236_v14 = vsel %vm700_vm10, %v7703_v32, 0.0  ;;  %v5918_v17 = vld [vmem:[%s8921_s2 + $0xb8] sm:$0xff]  ;;  %v1504_v61 = vsel %vm1036_vm12, %v7652_v36, 0.0  ;;  %v1507_v31 = vsel %vm1039_vm2, %v7724_v51, 0.0  ;;  %v5941_v36 = vld [vmem:[%s8921_s2 + $0xf0] sm:$0xff] }
 0x163   : > { %6339 = vmatmul.mubr.msk.f32.gmra.mrb[4].mxu0 %vm451_vm0, %v756_v41  ;;  %v5893_v41 = vld [vmem:[%s8921_s2 + $0x70] sm:$0xff]  ;;  %v1508_v44 = vsel %vm1040_vm3, %v7727_v52, 0.0  ;;  %v1509_v45 = vsel %vm1041_vm7, %v7731_v26, 0.0  ;;  %vm3725_vm9 = vcmask 195712  }
 0x164   : > { %6341 = vmatprep.mubr.msk.f32.mxu0 %vm451_vm0, %v757_v21  ;;  %v5894_v21 = vld [vmem:[%s8921_s2 + $0x78] sm:$0xff] }
 0x165   : > { %v6784_v62 = vpack.c.bf16 %v5894_v21, %v5893_v41  ;;  %v1081_v41 = vsel %vm1038_vm15, %v7717_v43, 0.0  ;;  %v5906_v21 = vld [vmem:[%s8921_s2 + $0x98] sm:$0xff] }
 0x167   : > { %6342 = vmatmul.mubr.msk.f32.gmra.mrb[6].mxu0 %vm451_vm0, %v758_v35  ;;  %v5904_v35 = vld [vmem:[%s8921_s2 + $0x88] sm:$0xff] }
 0x168   : > { %6352 = vmatprep.mubr.msk.f32.mxu0 %vm451_vm0, %v1077_v4  ;;  %v6788_v39 = vpack.c.bf16 %v5904_v35, %v5903_v34  ;;  %v1084_v34 = vsel %vm1041_vm7, %v7727_v52, 0.0  ;;  %v1230_v4 = vsel %vm8942_vm4, %v7617_v50, 0.0  ;;  %v1232_v50 = vsel %vm696_vm5, %v7582_v48, 0.0 }
 0x169   : > { %v8944_v48 = vrot.slane %v7637_v28, 7  ;;  %vm8946_vm5 = vcmp.ge.s32.totalorder %v7625_v54, 0  ;;  %v5928_v54 = vld [vmem:[%s8921_s2 + $0xc8] sm:$0xff]  ;;  %vm2387_vm7 = vcmask 523264  }
 0x16b   : > { %6353 = vmatmul.mubr.msk.f32.vlgmr.msra.gmra.mrb[0].mxu0 %vm451_vm0, %v1078_v5  ;;  %v1082_v5 = vsel %vm1039_vm2, %v7720_v49, 0.0  ;;  %vm8948_vm2 = vmmov %vm8942_vm4 }
 0x16c   : > { %6355 = vmatprep.mubr.msk.f32.mxu0 %vm451_vm0, %v1079_v1  ;;  %6783 = vmatpush3.bf16.msra.mxu0 %v6780_v11  ;;  %v1083_v11 = vsel %vm1040_vm3, %v7724_v51, 0.0  ;;  %v1231_v1 = vsel %vm8943_vm14, %v7641_v59, 0.0  ;;  %v1654_v58 = vsel %vm8948_vm2, %v7641_v59, 0.0  ;;  %v5952_v59 = vld [vmem:[%s8921_s2 + $0x110] sm:$0xff]  ;;  %v5953_v51 = vld [vmem:[%s8921_s2 + $0x118] sm:$0xff]  ;;  %vm2245_vm3 = vcmask 64512  }
 0x16d   : > { %6785 = vmatprep.subr.bf16.mxu0 %v6784_v62  ;;  %v6824_v52 = vpack.c.bf16 %v5953_v51, %v5952_v59 }
 0x16f   : > { %6356 = vmatmul.mubr.msk.f32.gmra.mrb[2].mxu0 %vm451_vm0, %v1080_v23  ;;  %v5915_v23 = vld [vmem:[%s8921_s2 + $0xa0] sm:$0xff] }
 0x170   : > { %6358 = vmatprep.mubr.msk.f32.mxu0 %vm451_vm0, %v1081_v41  ;;  %6787 = vmatpush3.bf16.msra.mxu0 %v6784_v62  ;;  %v5905_v62 = vld [vmem:[%s8921_s2 + $0x90] sm:$0xff]  ;;  %v5916_v41 = vld [vmem:[%s8921_s2 + $0xa8] sm:$0xff] }
 0x171   : > { %6789 = vmatprep.subr.bf16.mxu0 %v6788_v39  ;;  %v6792_v35 = vpack.c.bf16 %v5906_v21, %v5905_v62  ;;  %v6796_v47 = vpack.c.bf16 %v5916_v41, %v5915_v23  ;;  %v5930_v62 = vld [vmem:[%s8921_s2 + $0xd8] sm:$0xff]  ;;  %v1502_v21 = vsel %vm1034_vm11, %v7816_v3, 0.0  ;;  %v5940_v23 = vld [vmem:[%s8921_s2 + $0xe8] sm:$0xff]  ;;  %v1506_v3 = vsel %vm1038_vm15, %v7720_v49, 0.0 }
 0x172   : > { %v5951_v49 = vld [vmem:[%s8921_s2 + $0x108] sm:$0xff] }
 0x173   : > { %6359 = vmatmul.mubr.msk.f32.gmra.mrb[4].mxu0 %vm451_vm0, %v1082_v5  ;;  %v1233_v5 = vsel %vm697_vm6, %v7685_v16, 0.0  ;;  %v8945_v16 = vrot.slane %v7603_v20, 7  ;;  %v6820_v46 = vpack.c.bf16 %v5951_v49, %v5950_v2  ;;  %vm7285_vm6 = vmmov 0  }
 0x174   : > { %6361 = vmatprep.mubr.msk.f32.mxu0 %vm451_vm0, %v1083_v11  ;;  %v1234_v11 = vsel %vm698_vm8, %v7688_v18, 0.0  ;;  %v5917_v18 = vld [vmem:[%s8921_s2 + $0xb0] sm:$0xff]  ;;  %vm2814_vm8 = vcmask 130112  }
 0x175   : > { %v7897_v12 = vsel %vm726_vm1, %v8945_v16, %v8944_v48  ;;  %v6800_v32 = vpack.c.bf16 %v5918_v17, %v5917_v18  ;;  %vm8947_vm1 = vcmp.lt.s32.totalorder %v7556_v19, 8 }
 0x176   : > { %v1237_v25 = vsel %vm8946_vm5, %v7897_v12, 0.0 }
 0x177   : > { %6362 = vmatmul.mubr.msk.f32.gmra.mrb[6].mxu0 %vm451_vm0, %v1084_v34 }
 0x178   : > { %6372 = vmatprep.mubr.msk.f32.mxu0 %vm451_vm0, %v1230_v4 }
 0x17b   : > { %6373 = vmatmul.mubr.msk.f32.vlgmr.msra.gmra.mrb[0].mxu0 %vm451_vm0, %v1231_v1  ;;  %v5939_v1 = vld [vmem:[%s8921_s2 + $0xe0] sm:$0xff] }
 0x17c   : > { %6375 = vmatprep.mubr.msk.f32.mxu0 %vm451_vm0, %v1232_v50  ;;  %6791 = vmatpush3.bf16.msra.mxu0 %v6788_v39  ;;  %v5927_v39 = vld [vmem:[%s8921_s2 + $0xc0] sm:$0xff]  ;;  %v6812_v19 = vpack.c.bf16 %v5940_v23, %v5939_v1 }
 0x17d   : > { %6793 = vmatprep.subr.bf16.mxu0 %v6792_v35  ;;  %v6804_v34 = vpack.c.bf16 %v5928_v54, %v5927_v39 }
 0x17f   : > { %6376 = vmatmul.mubr.msk.f32.gmra.mrb[2].mxu0 %vm451_vm0, %v1233_v5 }
 0x180   : > { %6378 = vmatprep.mubr.msk.f32.mxu0 %vm451_vm0, %v1234_v11  ;;  %6795 = vmatpush3.bf16.msra.mxu0 %v6792_v35  ;;  %v1503_v35 = vsel %vm8947_vm1, %v7706_v33, 0.0  ;;  %v1505_v33 = vsel %vm1037_vm13, %v7717_v43, 0.0  ;;  %v6816_v43 = vpack.c.bf16 %v5942_v55, %v5941_v36 }
 0x181   : > { %6797 = vmatprep.subr.bf16.mxu0 %v6796_v47 }
 0x183   : > { %6379 = vmatmul.mubr.msk.f32.gmra.mrb[4].mxu0 %vm451_vm0, %v1235_v10 }
 0x184   : > { %6381 = vmatprep.mubr.msk.f32.mxu0 %vm451_vm0, %v1236_v14 }
 0x187   : > { %6382 = vmatmul.mubr.msk.f32.gmra.mrb[6].mxu0 %vm451_vm0, %v1237_v25 }
 0x188   : > { %6392 = vmatprep.mubr.msk.f32.mxu0 %vm451_vm0, %v7496_v53  ;;  %v5929_v53 = vld [vmem:[%s8921_s2 + $0xd0] sm:$0xff] }
 0x189   : > { %v6808_v4 = vpack.c.bf16 %v5930_v62, %v5929_v53 }
 0x18b   : > { %6393 = vmatmul.mubr.msk.f32.vlgmr.msra.gmra.mrb[0].mxu0 %vm451_vm0, %v7529_v6 }
 0x18c   : > { %6395 = vmatprep.mubr.msk.f32.mxu0 %vm451_vm0, %v7536_v9  ;;  %6799 = vmatpush3.bf16.msra.mxu0 %v6796_v47 }
 0x18d   : > { %6801 = vmatprep.subr.bf16.mxu0 %v6800_v32 }
 0x18f   : > { %6396 = vmatmul.mubr.msk.f32.gmra.mrb[2].mxu0 %vm451_vm0, %v7560_v24 }
 0x190   : > { %6398 = vmatprep.mubr.msk.f32.mxu0 %vm451_vm0, %v7568_v30  ;;  %6803 = vmatpush3.bf16.msra.mxu0 %v6800_v32 }
 0x191   : > { %6805 = vmatprep.subr.bf16.mxu0 %v6804_v34 }
 0x193   : > { %6399 = vmatmul.mubr.msk.f32.gmra.mrb[4].mxu0 %vm451_vm0, %v7598_v42 }
 0x194   : > { %6401 = vmatprep.mubr.msk.f32.mxu0 %vm451_vm0, %v7603_v20 }
 0x197   : > { %6402 = vmatmul.mubr.msk.f32.gmra.mrb[6].mxu0 %vm451_vm0, %v7637_v28 }
 0x198   : > { %6412 = vmatprep.mubr.msk.f32.mxu0 %vm451_vm0, %v1502_v21  ;;  %v5963_v21 = vld [vmem:[%s8924_s5] ss:$0 sm:$0xff] }
 0x19b   : > { %6413 = vmatmul.mubr.msk.f32.vlgmr.msra.gmra.mrb[0].mxu0 %vm451_vm0, %v1503_v35 }
 0x19c   : > { %6415 = vmatprep.mubr.msk.f32.mxu0 %vm451_vm0, %v1504_v61  ;;  %6807 = vmatpush3.bf16.msra.mxu0 %v6804_v34 }
 0x19d   : > { %6809 = vmatprep.subr.bf16.mxu0 %v6808_v4 }
 0x19f   : > { %6416 = vmatmul.mubr.msk.f32.gmra.mrb[2].mxu0 %vm451_vm0, %v1505_v33 }
 0x1a0   : > { %6418 = vmatprep.mubr.msk.f32.mxu0 %vm451_vm0, %v1506_v3  ;;  %6811 = vmatpush3.bf16.msra.mxu0 %v6808_v4 }
 0x1a1   : > { %6813 = vmatprep.subr.bf16.mxu0 %v6812_v19 }
 0x1a3   : > { %6419 = vmatmul.mubr.msk.f32.gmra.mrb[4].mxu0 %vm451_vm0, %v1507_v31 }
 0x1a4   : > { %6421 = vmatprep.mubr.msk.f32.mxu0 %vm451_vm0, %v1508_v44 }
 0x1a7   : > { %6422 = vmatmul.mubr.msk.f32.gmra.mrb[6].mxu0 %vm451_vm0, %v1509_v45 }
 0x1a8   : > { %6432 = vmatprep.mubr.msk.f32.mxu0 %vm451_vm0, %v1654_v58 }
 0x1ab   : > { %6433 = vmatmul.mubr.msk.f32.vlgmr.msra.gmra.mrb[0].mxu0 %vm451_vm0, %v7591_v37  ;;  %v1660_v37 = vsel %vm700_vm10, %v7897_v12, 0.0  ;;  %vm4515_vm10 = vcmask 261312  }
 0x1ac   : > { %6435 = vmatprep.mubr.msk.f32.mxu0 %vm451_vm0, %v7736_v56  ;;  %6815 = vmatpush3.bf16.msra.mxu0 %v6812_v19 }
 0x1ad   : > { %6817 = vmatprep.subr.bf16.mxu0 %v6816_v43 }
 0x1af   : > { %6436 = vmatmul.mubr.msk.f32.gmra.mrb[2].mxu0 %vm451_vm0, %v7744_v60 }
 0x1b0   : > { %6438 = vmatprep.mubr.msk.f32.mxu0 %vm451_vm0, %v7749_v63  ;;  %6819 = vmatpush3.bf16.msra.mxu0 %v6816_v43 }
 0x1b1   : > { %6821 = vmatprep.subr.bf16.mxu0 %v6820_v46 }
 0x1b3   : > { %6439 = vmatmul.mubr.msk.f32.gmra.mrb[4].mxu0 %vm451_vm0, %v7754_v0 }
 0x1b4   : > { %6441 = vmatprep.mubr.msk.f32.mxu0 %vm451_vm0, %v1660_v37 }
 0x1b7   : > { %6442 = vmatmul.mubr.msk.f32.gmra.mrb[6].mxu0 %vm451_vm0, %v7778_v57 }
 0x1b8   : > { %6452 = vmatprep.mubr.msk.f32.mxu0 %vm451_vm0, %v7529_v6  ;;  %v8949_v6 = vmov 0.0  }
 0x1bb   : > { %6453 = vmatmul.mubr.msk.f32.vlgmr.msra.gmra.mrb[0].mxu0 %vm451_vm0, %v7536_v9  ;;  %v7283_v9 = vmov 0.0|0.0  }
 0x1bc   : > { %6455 = vmatprep.mubr.msk.f32.mxu0 %vm451_vm0, %v7560_v24  ;;  %6823 = vmatpush3.bf16.msra.mxu0 %v6820_v46  ;;  %v2089_v24 = vld [vmem:[%s8923_s4] sm:$0xff] }
 0x1bd   : > { %6825 = vmatprep.subr.bf16.mxu0 %v6824_v52 }
 0x1bf   : > { %6456 = vmatmul.mubr.msk.f32.gmra.mrb[2].mxu0 %vm451_vm0, %v7568_v30  ;;  %v2090_v30 = vld [vmem:[%s8923_s4 + $0x8] sm:$0xff] }
 0x1c0   : > { %6458 = vmatprep.mubr.msk.f32.mxu0 %vm451_vm0, %v7598_v42  ;;  %6827 = vmatpush3.bf16.msra.mxu0 %v6824_v52  ;;  %v6828_v42 = vpack.c.bf16 %v2090_v30, %v2089_v24 }
 0x1c1   : > { %6836 = vmatprep.subr.bf16.mxu0 %v7283_v9 }
 0x1c2   : > { %6829 = vmatprep.subr.bf16.mxu1 %v6828_v42 }
 0x1c3   : > { %6459 = vmatmul.mubr.msk.f32.gmra.mrb[4].mxu0 %vm451_vm0, %v7603_v20  ;;  %v2092_v20 = vld [vmem:[%s8923_s4 + $0x18] sm:$0xff]  ;;  %6831 = vmatpush3.bf16.msra.mxu1 %v6828_v42 }
 0x1c4   : > { %6461 = vmatprep.mubr.msk.f32.mxu0 %vm451_vm0, %v7637_v28  ;;  %v6832_v28 = vpack.c.bf16 %v2092_v20, %v2091_v40 }
 0x1c6   : > { %6833 = vmatprep.subr.bf16.mxu1 %v6832_v28 }
 0x1c7   : > { %6462 = vmatmul.mubr.f32.gmra.mrb[6].mxu0 %v8949_v6  ;;  %6835 = vmatpush3.bf16.msra.mxu1 %v6832_v28 }
 0x1c8   : > { %6472 = vmatprep.mubr.msk.f32.mxu0 %vm451_vm0, %v7763_v7  ;;  %6523 = vmatprep.subr.mxu1 %v8949_v6 }
 0x1cb   : > { %6473 = vmatmul.mubr.msk.f32.vlgmr.msra.gmra.mrb[0].mxu0 %vm451_vm0, %v7669_v29  ;;  %v5962_v29 = vld [vmem:[%s8922_s3] ss:$0 sm:$0xff] }
 0x1cc   : > { %6475 = vmatprep.mubr.msk.f32.mxu0 %vm451_vm0, %v7768_v8 }
 0x1cf   : > { %6476 = vmatmul.mubr.msk.f32.gmra.mrb[2].mxu0 %vm451_vm0, %v7773_v13 }
 0x1d0   : > { %6478 = vmatprep.mubr.msk.f32.mxu0 %vm451_vm0, %v7783_v15 }
 0x1d3   : > { %6479 = vmatmul.mubr.msk.f32.gmra.mrb[4].mxu0 %vm451_vm0, %v7788_v38 }
 0x1d4   : > { %6481 = vmatprep.mubr.msk.f32.mxu0 %vm451_vm0, %v7793_v22 }
 0x1d7   : > { %6482 = vmatmul.mubr.msk.f32.gmra.mrb[6].mxu0 %vm451_vm0, %v7801_v27 }
 0x1d8   : > { %6520 = vmatprep.mubr.msk.f32.mxu0 %vm7285_vm6, %v8949_v6 }
 0x29e   : > { %v6474_v26 = vpop.f32.mrb[0].mxu0 }
 0x29f   : > { %v2082_v56 = vadd.f32 %v6474_v26, %v5962_v29  ;;  %v2027_v60 = vpop.f32.mrb[1].mxu0 }
 0x2a0   : > { %v2081_v63 = vadd.f32 %v5962_v29, %v2027_v60 }
 0x2a1   : > { %2110 = vrot.lane.b32.xlu1 %v2082_v56, %s7284_s22 }
 0x2a2   : > { %2108 = vrot.lane.b32.xlu0 %v2081_v63, %s7284_s22  ;;  %v6477_v0 = vpop.f32.mrb[2].mxu0  ;;  %v6837_v7 = vpack.c.bf16 %v2082_v56, %v2081_v63  ;;  %v8064_v8 = vpack.i.bf16 %v2082_v56, %v2081_v63 }
 0x2a3   : > { %v2084_v13 = vadd.f32 %v6477_v0, %v5962_v29  ;;  %v2037_v57 = vpop.f32.mrb[3].mxu0 }
 0x2a4   : > { %v2083_v15 = vadd.f32 %v5962_v29, %v2037_v57  ;;  %6838 = vmatpush3.bf16.msra.mxu0 %v6837_v7 }
 0x2a5   : > { %6839 = vmatprep.subr.bf16.mxu0 %v7283_v9 }
 0x2a6   : > { %2112 = vrot.lane.b32.xlu1 %v2083_v15, %s7284_s22  ;;  %v6480_v38 = vpop.f32.mrb[4].mxu0  ;;  %v6840_v22 = vpack.c.bf16 %v2084_v13, %v2083_v15  ;;  %v8068_v27 = vpack.i.bf16 %v2084_v13, %v2083_v15 }
 0x2a7   : > { %v2086_v41 = vadd.f32 %v6480_v38, %v5962_v29  ;;  %v2047_v50 = vpop.f32.mrb[5].mxu0 }
 0x2a8   : > { %v2085_v47 = vadd.f32 %v5962_v29, %v2047_v50  ;;  %6841 = vmatpush3.bf16.msra.mxu0 %v6840_v22 }
 0x2a9   : > { %6842 = vmatprep.subr.bf16.mxu0 %v7283_v9 }
 0x2aa   : > { %2114 = vrot.lane.b32.xlu1 %v2084_v13, %s7284_s22  ;;  %2116 = vrot.lane.b32.xlu0 %v2085_v47, %s7284_s22  ;;  %v6483_v5 = vpop.f32.mrb[6].mxu0  ;;  %v6843_v11 = vpack.c.bf16 %v2086_v41, %v2085_v47  ;;  %v8073_v10 = vpack.i.bf16 %v2086_v41, %v2085_v47 }
 0x2ab   : > { %v2088_v14 = vadd.f32 %v6483_v5, %v5962_v29  ;;  %v2057_v48 = vpop.f32.mrb[7].mxu0 }
 0x2ac   : > { %v2087_v16 = vadd.f32 %v5962_v29, %v2057_v48  ;;  %6844 = vmatpush3.bf16.msra.mxu0 %v6843_v11 }
 0x2ad   : > { %6845 = vmatprep.subr.bf16.mxu0 %v7283_v9 }
 0x2ae   : > { %2118 = vrot.lane.b32.xlu1 %v2086_v41, %s7284_s22  ;;  %2120 = vrot.lane.b32.xlu0 %v2087_v16, %s7284_s22  ;;  %v6846_v12 = vpack.c.bf16 %v2088_v14, %v2087_v16  ;;  %v8078_v25 = vpack.i.bf16 %v2088_v14, %v2087_v16 }
 0x2b0   : > { %6847 = vmatpush3.bf16.msra.mxu0 %v6846_v12 }
 0x2b1   : > { %6687 = vmatprep.subr.mxu0 %v8949_v6 }
 0x2b2   : > { %2122 = vrot.lane.b32.xlu1 %v2088_v14, %s7284_s22 }
 0x313   : > { %v2111_v18 = vpop.permute.xlu1 %2110 }
 0x314   : > { %v2109_v17 = vpop.permute.xlu0 %2108 }
 0x315   : > { %6492 = vmatprep.mubr.msk.f32.mxu1 %vm451_vm0, %v2109_v17 }
 0x316   : > { %6493 = vmatmul.mubr.msk.f32.vlgmr.msra.gmra.mrb[0].mxu1 %vm451_vm0, %v2111_v18 }
 0x318   : > { %v2113_v32 = vpop.permute.xlu1 %2112 }
 0x319   : > { %6495 = vmatprep.mubr.msk.f32.mxu1 %vm451_vm0, %v2113_v32 }
 0x31c   : > { %v2115_v39 = vpop.permute.xlu1 %2114  ;;  %v2117_v54 = vpop.permute.xlu0 %2116 }
 0x31d   : > { %6496 = vmatmul.mubr.msk.f32.gmra.mrb[2].mxu1 %vm451_vm0, %v2115_v39 }
 0x31e   : > { %6498 = vmatprep.mubr.msk.f32.mxu1 %vm451_vm0, %v2117_v54 }
 0x320   : > { %v2119_v34 = vpop.permute.xlu1 %2118  ;;  %v2121_v53 = vpop.permute.xlu0 %2120 }
 0x321   : > { %6499 = vmatmul.mubr.msk.f32.gmra.mrb[4].mxu1 %vm451_vm0, %v2119_v34 }
 0x322   : > { %6501 = vmatprep.mubr.msk.f32.mxu1 %vm451_vm0, %v2121_v53 }
 0x324   : > { %v2123_v62 = vpop.permute.xlu1 %2122 }
 0x325   : > { %6502 = vmatmul.mubr.msk.f32.gmra.mrb[6].mxu1 %vm451_vm0, %v2123_v62 }
 0x326   : > { %6525 = vmatprep.mubr.msk.f32.mxu1 %vm7285_vm6, %v8949_v6 }
 0x3e9   : > { %v6494_v4 = vpop.f32.mrb[0].mxu1 }
 0x3ea   : > { %v8093_v35 = vadd.f32 %v6494_v4, %v5963_v21  ;;  %v2206_v1 = vpop.f32.mrb[1].mxu1 }
 0x3eb   : > { %v8095_v23 = vadd.f32 %v5963_v21, %v2206_v1 }
 0x3ec   : > { %v2249_v61 = vsel %vm2245_vm3, %v8093_v35, -inf }
 0x3ed   : > { %2250 = vmax.xlane.f32.xlu1 %v2249_v61  ;;  %v2246_v19 = vsel %vm2245_vm3, %v8095_v23, -inf }
 0x3ee   : > { %2247 = vmax.xlane.f32.xlu0 %v2246_v19 }
 0x3f0   : > { %v6497_v33 = vpop.f32.mrb[2].mxu1 }
 0x3f1   : > { %v8101_v3 = vadd.f32 %v6497_v33, %v5963_v21  ;;  %v2216_v31 = vpop.f32.mrb[3].mxu1 }
 0x3f2   : > { %v8103_v44 = vadd.f32 %v5963_v21, %v2216_v31 }
 0x3f3   : > { %v2255_v45 = vsel %vm2245_vm3, %v8101_v3, -inf }
 0x3f4   : > { %v6500_v36 = vpop.f32.mrb[4].mxu1  ;;  %2256 = vmax.xlane.f32.xlu0 %v2255_v45  ;;  %v2252_v49 = vsel %vm2245_vm3, %v8103_v44, -inf }
 0x3f5   : > { %v8107_v55 = vadd.f32 %v6500_v36, %v5963_v21  ;;  %v2226_v58 = vpop.f32.mrb[5].mxu1 }
 0x3f6   : > { %v8109_v43 = vadd.f32 %v5963_v21, %v2226_v58 }
 0x3f7   : > { %v2261_v2 = vsel %vm2245_vm3, %v8107_v55, -inf }
 0x3f8   : > { %2262 = vmax.xlane.f32.xlu1 %v2261_v2  ;;  %2253 = vmax.xlane.f32.xlu0 %v2252_v49  ;;  %v6503_v46 = vpop.f32.mrb[6].mxu1  ;;  %v2258_v52 = vsel %vm2245_vm3, %v8109_v43, -inf }
 0x3f9   : > { %v8115_v37 = vadd.f32 %v6503_v46, %v5963_v21  ;;  %v2236_v59 = vpop.f32.mrb[7].mxu1 }
 0x3fa   : > { %v8117_v51 = vadd.f32 %v5963_v21, %v2236_v59 }
 0x3fb   : > { %v2267_v24 = vsel %vm2245_vm3, %v8115_v37, -inf }
 0x3fc   : > { %2259 = vmax.xlane.f32.xlu0 %v2258_v52  ;;  %2268 = vmax.xlane.f32.xlu1 %v2267_v24  ;;  %v2264_v30 = vsel %vm2245_vm3, %v8117_v51, -inf }
 0x400   : > { %2265 = vmax.xlane.f32.xlu0 %v2264_v30 }
 0x47a   : > { %v2251_v40 = vpop.xlane.xlu1 %2250 }
 0x47b   : > { %v2271_v42 = vsub.f32 %v8093_v35, %v2251_v40  ;;  %v2248_v20 = vpop.xlane.xlu0 %2247 }
 0x47c   : > { %v2270_v28 = vsub.f32 %v8095_v23, %v2248_v20 }
 0x47d   : > { %v2280_v29 = vmul.f32 1.442695, %v2271_v42 }
 0x47e   : > { %v2278_v26 = vmul.f32 1.442695, %v2270_v28 }
 0x47f   : > { %7082 = vpow2.f32 %v2280_v29 }
 0x480   : > { %7084 = vpow2.f32 %v2278_v26 }
 0x481   : > { %v2257_v56 = vpop.xlane.xlu0 %2256 }
 0x482   : > { %v2273_v60 = vsub.f32 %v8101_v3, %v2257_v56 }
 0x484   : > { %v2284_v63 = vmul.f32 1.442695, %v2273_v60 }
 0x485   : > { %v2263_v0 = vpop.xlane.xlu1 %2262  ;;  %v2254_v7 = vpop.xlane.xlu0 %2253 }
 0x486   : > { %7086 = vpow2.f32 %v2284_v63  ;;  %v2275_v13 = vsub.f32 %v8107_v55, %v2263_v0  ;;  %v2272_v57 = vsub.f32 %v8103_v44, %v2254_v7 }
 0x488   : > { %v2288_v15 = vmul.f32 1.442695, %v2275_v13  ;;  %v2282_v38 = vmul.f32 1.442695, %v2272_v57 }
 0x489   : > { %v7083_v22 = vpop.eup %7082  ;;  %v2269_v41 = vpop.xlane.xlu1 %2268 }
 0x48a   : > { %v2260_v50 = vpop.xlane.xlu0 %2259  ;;  %v7085_v47 = vpop.eup %7084  ;;  %7088 = vpow2.f32 %v2288_v15  ;;  %v2277_v5 = vsub.f32 %v8115_v37, %v2269_v41  ;;  %v2297_v14 = vsel %vm2245_vm3, %v7083_v22, 0.0 }
 0x48b   : > { %v2274_v11 = vsub.f32 %v8109_v43, %v2260_v50  ;;  %7090 = vpow2.f32 %v2282_v38  ;;  %2298 = vadd.xlane.f32.xlu1 %v2297_v14  ;;  %v2294_v48 = vsel %vm2245_vm3, %v7085_v47, 0.0 }
 0x48c   : > { %v2292_v16 = vmul.f32 1.442695, %v2277_v5  ;;  %2295 = vadd.xlane.f32.xlu0 %v2294_v48 }
 0x48d   : > { %v2286_v12 = vmul.f32 1.442695, %v2274_v11 }
 0x48e   : > { %v2266_v18 = vpop.xlane.xlu0 %2265  ;;  %7092 = vpow2.f32 %v2292_v16 }
 0x48f   : > { %v2276_v17 = vsub.f32 %v8117_v51, %v2266_v18  ;;  %7094 = vpow2.f32 %v2286_v12 }
 0x490   : > { %v7087_v32 = vpop.eup %7086 }
 0x491   : > { %v2290_v39 = vmul.f32 1.442695, %v2276_v17  ;;  %v2303_v54 = vsel %vm2245_vm3, %v7087_v32, 0.0 }
 0x492   : > { %2304 = vadd.xlane.f32.xlu1 %v2303_v54 }
 0x493   : > { %7096 = vpow2.f32 %v2290_v39 }
 0x494   : > { %v7089_v34 = vpop.eup %7088 }
 0x495   : > { %v7091_v53 = vpop.eup %7090  ;;  %v2309_v62 = vsel %vm2245_vm3, %v7089_v34, 0.0 }
 0x496   : > { %2310 = vadd.xlane.f32.xlu1 %v2309_v62  ;;  %v2300_v21 = vsel %vm2245_vm3, %v7091_v53, 0.0 }
 0x497   : > { %2301 = vadd.xlane.f32.xlu0 %v2300_v21 }
 0x498   : > { %v7093_v4 = vpop.eup %7092 }
 0x499   : > { %v7095_v1 = vpop.eup %7094  ;;  %v2315_v61 = vsel %vm2245_vm3, %v7093_v4, 0.0 }
 0x49a   : > { %2316 = vadd.xlane.f32.xlu1 %v2315_v61  ;;  %v2306_v19 = vsel %vm2245_vm3, %v7095_v1, 0.0 }
 0x49b   : > { %2307 = vadd.xlane.f32.xlu0 %v2306_v19 }
 0x49d   : > { %v7097_v33 = vpop.eup %7096 }
 0x49e   : > { %v2312_v31 = vsel %vm2245_vm3, %v7097_v33, 0.0 }
 0x49f   : > { %2313 = vadd.xlane.f32.xlu0 %v2312_v31  ;;  %v2501_v31 = vld [vmem:[%s8925_s6] sm:$0xff] }
 0x4a0   : > { %6524 = vmatpush3.msra.mxu1 %v2501_v31 }
 0x4a1   : > { %6528 = vmatprep.subr.mxu1 %v8949_v6 }
 0x518   : > { %v2299_v45 = vpop.xlane.xlu1 %2298 }
 0x519   : > { %v2296_v36 = vpop.xlane.xlu0 %2295 }
 0x51a   : > { %7098 = vrcp.f32 %v2296_v36 }
 0x51b   : > { %7100 = vrcp.f32 %v2299_v45 }
 0x51f   : > { %v2305_v58 = vpop.xlane.xlu1 %2304 }
 0x520   : > { %7102 = vrcp.f32 %v2305_v58 }
 0x523   : > { %v2311_v2 = vpop.xlane.xlu1 %2310 }
 0x524   : > { %v7099_v49 = vpop.eup %7098  ;;  %v2302_v46 = vpop.xlane.xlu0 %2301 }
 0x525   : > { %7104 = vrcp.f32 %v2302_v46  ;;  %v8145_v59 = vmul.f32 %v7099_v49, %v7085_v47  ;;  %v7101_v52 = vpop.eup %7100 }
 0x526   : > { %7106 = vrcp.f32 %v2311_v2  ;;  %v8148_v40 = vmul.f32 %v7101_v52, %v7083_v22 }
 0x527   : > { %2355 = vxpose.xlu0.b32.start [1/8] (short) (narrow) %v8145_v59, 8  ;;  %v2317_v24 = vpop.xlane.xlu1 %2316  ;;  %v2334_v28 = vsel %vm2245_vm3, %v8145_v59, 0.0 }
 0x528   : > { %v2308_v30 = vpop.xlane.xlu0 %2307  ;;  %v2335_v29 = vsel %vm2245_vm3, %v8148_v40, 0.0 }
 0x529   : > { %7108 = vrcp.f32 %v2308_v30  ;;  %v2336_v0 = vadd.f32 %v2335_v29, %v2334_v28 }
 0x52a   : > { %7110 = vrcp.f32 %v2317_v24  ;;  %v7103_v20 = vpop.eup %7102  ;;  %v2815_v24 = vsel %vm2814_vm8, %v8095_v23, -inf }
 0x52b   : > { %2356 = vxpose.xlu0.b32.cont [2/8] (short) (narrow) %v8148_v40, 8  ;;  %v8157_v60 = vmul.f32 %v7103_v20, %v7087_v32 }
 0x52c   : > { %v2314_v42 = vpop.xlane.xlu0 %2313 }
 0x52d   : > { %7112 = vrcp.f32 %v2314_v42  ;;  %v2339_v15 = vsel %vm2245_vm3, %v8157_v60, 0.0 }
 0x52f   : > { %v7105_v26 = vpop.eup %7104 }
 0x530   : > { %v8155_v56 = vmul.f32 %v7105_v26, %v7091_v53  ;;  %v7107_v63 = vpop.eup %7106  ;;  %v2818_v26 = vsel %vm2814_vm8, %v8093_v35, -inf }
 0x531   : > { %v8166_v22 = vmul.f32 %v7107_v63, %v7089_v34  ;;  %v2821_v63 = vsel %vm2814_vm8, %v8103_v44, -inf }
 0x532   : > { %2357 = vxpose.xlu0.b32.cont [3/8] (short) (narrow) %v8155_v56, 8  ;;  %v2337_v7 = vsel %vm2245_vm3, %v8155_v56, 0.0 }
 0x533   : > { %v7109_v13 = vpop.eup %7108  ;;  %v2338_v57 = vadd.f32 %v2337_v7, %v2336_v0  ;;  %v2343_v14 = vsel %vm2245_vm3, %v8166_v22, 0.0  ;;  %v2824_v0 = vsel %vm2814_vm8, %v8101_v3, -inf  ;;  %v2827_v7 = vsel %vm2814_vm8, %v8109_v43, -inf }
 0x534   : > { %v8164_v38 = vmul.f32 %v7109_v13, %v7095_v1  ;;  %v7111_v41 = vpop.eup %7110  ;;  %v7286_v1 = vmov 0   ;;  %v2830_v13 = vsel %vm2814_vm8, %v8107_v55, -inf }
 0x535   : > { %v2340_v50 = vadd.f32 %v2339_v15, %v2338_v57  ;;  %v8175_v16 = vmul.f32 %v7111_v41, %v7093_v4  ;;  %v2833_v57 = vsel %vm2814_vm8, %v8117_v51, -inf  ;;  %v2836_v15 = vsel %vm2814_vm8, %v8115_v37, -inf }
 0x536   : > { %2358 = vxpose.xlu0.b32.cont [4/8] (short) (narrow) %v8157_v60, 8  ;;  %v2341_v47 = vsel %vm2245_vm3, %v8164_v38, 0.0 }
 0x537   : > { %v7113_v5 = vpop.eup %7112  ;;  %v2342_v11 = vadd.f32 %v2341_v47, %v2340_v50  ;;  %v2347_v32 = vsel %vm2245_vm3, %v8175_v16, 0.0 }
 0x538   : > { %v8173_v48 = vmul.f32 %v7113_v5, %v7097_v33 }
 0x539   : > { %v2344_v12 = vadd.f32 %v2343_v14, %v2342_v11 }
 0x53a   : > { %2359 = vxpose.xlu0.b32.cont [5/8] (short) (narrow) %v8164_v38, 8  ;;  %v2345_v18 = vsel %vm2245_vm3, %v8173_v48, 0.0 }
 0x53b   : > { %v2346_v17 = vadd.f32 %v2345_v18, %v2344_v12 }
 0x53d   : > { %v2348_v39 = vadd.f32 %v2347_v32, %v2346_v17 }
 0x53e   : > { %2360 = vxpose.xlu0.b32.cont [6/8] (short) (narrow) %v8166_v22, 8 }
 0x53f   : > { %v2349_v54 = vrot.slane %v2348_v39, 4 }
 0x541   : > { %v2350_v34 = vadd.f32 %v2349_v54, %v2348_v39 }
 0x542   : > { %2361 = vxpose.xlu0.b32.cont [7/8] (short) (narrow) %v8173_v48, 8 }
 0x543   : > { %v2351_v53 = vrot.slane %v2350_v34, 2 }
 0x545   : > { %v2352_v62 = vadd.f32 %v2351_v53, %v2350_v34 }
 0x546   : > { %2362 = vxpose.xlu0.b32.end [8/8] (short) (narrow) %v8175_v16, 8 }
 0x547   : > { %v2353_v21 = vrot.slane %v2352_v62, 1 }
 0x549   : > { %v2354_v4 = vadd.f32 %v2353_v21, %v2352_v62 }
 0x54b   : > { %2461 = vxpose.xlu1.b32.start.end [1/1] (short) (narrow) %v2354_v4, 8 }
 0x569   : > { %7004 = vset.pattern.permute.xlu1 %v7286_v1 }
 0x5aa   : > { %v2371_v61 = vpop.trf.xlu0 }
 0x5ab   : > { %6521 = vmatmul.mubr.msk.f32.vlgmr.msra.gmra.mrb[8].mxu0 %vm2387_vm7, %v2371_v61 }
 0x5ac   : > { %6689 = vmatprep.mubr.msk.f32.mxu0 %vm7285_vm6, %v8949_v6 }
 0x5cb   : > { %v2477_v19 = vpop.trf.xlu1 }
 0x5cc   : > { %v2493_v33 = vadd.f32 1e-05, %v2477_v19 }
 0x5ce   : > { %2496 = vperm.xlu1 %7004, %v2493_v33  }
 0x64d   : > { %v2497_v45 = vpop.permute.xlu1 %2496 }
 0x64e   : > { %7114 = vrcp.f32 %v2497_v45 }
 0x658   : > { %v7115_v36 = vpop.eup %7114 }
 0x67e   : > { %v2457_v58 = vpop.f32.mrb[8].mxu0 }
 0x67f   : > { %v2500_v2 = vmul.f32 %v7115_v36, %v2457_v58  ;;  %v6522_v49 = vpop.f32.mrb[9].mxu0 }
 0x681   : > { %6526 = vmatmul.mubr.msk.f32.vlgmr.msra.gmra.mrb[8].mxu1 %vm2245_vm3, %v2500_v2 }
 0x682   : > { %6530 = vmatprep.mubr.msk.f32.mxu1 %vm7285_vm6, %v8949_v6 }
 0x754   : > { %v2571_v46 = vpop.f32.mrb[8].mxu1 }
 0x755   : > { %2576 = vrot.lane.b32.xlu0 %v2571_v46, %s7287_s14  ;;  %v6527_v52 = vpop.f32.mrb[9].mxu1 }
 0x774   : > { %2816 = vmax.xlane.f32.xlu0 %v2815_v24 }
 0x7c7   : > { %v2577_v30 = vpop.permute.xlu0 %2576 }
 0x7c8   : > { %6529 = vmatpush3.xpose.msk.msra.mxu1 %vm2245_vm3, %v2577_v30 }
 0x7c9   : > { %6533 = vmatprep.subr.mxu1 %v8949_v6 }
 0x7cb   : > { %6531 = vmatmul.mubr.msk.f32.vlgmr.msra.gmra.mrb[10].mxu1 %vm2245_vm3, %v2571_v46 }
 0x7cc   : > { %6535 = vmatprep.mubr.msk.f32.mxu1 %vm7285_vm6, %v8949_v6 }
 0x801   : > { %v2817_v21 = vpop.xlane.xlu0 %2816 }
 0x802   : > { %v2839_v61 = vsub.f32 %v8095_v23, %v2817_v21 }
 0x804   : > { %v2847_v36 = vmul.f32 1.442695, %v2839_v61 }
 0x89e   : > { %v2648_v42 = vpop.f32.mrb[10].mxu1 }
 0x89f   : > { %v2652_v20 = vmul.f32 0.35355338, %v2648_v42  ;;  %v6532_v28 = vpop.f32.mrb[11].mxu1 }
 0x8a1   : > { %v2653_v29 = vsel %vm2245_vm3, %v2652_v20, -inf }
 0x8a2   : > { %2654 = vmax.xlane.f32.xlu1 %v2653_v29 }
 0x8a6   : > { %2819 = vmax.xlane.f32.xlu1 %v2818_v26 }
 0x8aa   : > { %2822 = vmax.xlane.f32.xlu1 %v2821_v63 }
 0x8ae   : > { %2825 = vmax.xlane.f32.xlu1 %v2824_v0 }
 0x8b2   : > { %2828 = vmax.xlane.f32.xlu1 %v2827_v7 }
 0x8b6   : > { %2831 = vmax.xlane.f32.xlu1 %v2830_v13 }
 0x8ba   : > { %2834 = vmax.xlane.f32.xlu1 %v2833_v57 }
 0x8be   : > { %2837 = vmax.xlane.f32.xlu1 %v2836_v15 }
 0x8cf   : > { %2664 = vrot.lane.b32.xlu1 %v2571_v46, %s7288_s15 }
 0x92f   : > { %v2655_v41 = vpop.xlane.xlu1 %2654 }
 0x930   : > { %v2656_v50 = vsub.f32 %v2652_v20, %v2655_v41 }
 0x932   : > { %v2657_v47 = vmul.f32 1.442695, %v2656_v50 }
 0x933   : > { %v2820_v5 = vpop.xlane.xlu1 %2819 }
 0x934   : > { %7116 = vpow2.f32 %v2657_v47  ;;  %v2840_v11 = vsub.f32 %v8093_v35, %v2820_v5 }
 0x936   : > { %v2849_v14 = vmul.f32 1.442695, %v2840_v11 }
 0x937   : > { %v2823_v12 = vpop.xlane.xlu1 %2822 }
 0x938   : > { %7118 = vpow2.f32 %v2849_v14  ;;  %v2841_v18 = vsub.f32 %v8103_v44, %v2823_v12 }
 0x93a   : > { %v2851_v17 = vmul.f32 1.442695, %v2841_v18 }
 0x93b   : > { %v2826_v32 = vpop.xlane.xlu1 %2825 }
 0x93c   : > { %7120 = vpow2.f32 %v2851_v17  ;;  %v2842_v39 = vsub.f32 %v8101_v3, %v2826_v32 }
 0x93e   : > { %v8223_v54 = vpop.eup %7116  ;;  %v2853_v34 = vmul.f32 1.442695, %v2842_v39 }
 0x93f   : > { %v2829_v53 = vpop.xlane.xlu1 %2828  ;;  %v2659_v62 = vsel %vm2245_vm3, %v8223_v54, 0.0 }
 0x940   : > { %7122 = vpow2.f32 %v2853_v34  ;;  %2660 = vadd.xlane.f32.xlu0 %v2659_v62  ;;  %v2843_v58 = vsub.f32 %v8109_v43, %v2829_v53 }
 0x942   : > { %v8227_v4 = vpop.eup %7118  ;;  %v2855_v46 = vmul.f32 1.442695, %v2843_v58 }
 0x943   : > { %2873 = vrot.lane.b32.xlu1 %v8227_v4, %s7287_s14  ;;  %v2832_v19 = vpop.xlane.xlu1 %2831 }
 0x944   : > { %v2844_v33 = vsub.f32 %v8107_v55, %v2832_v19  ;;  %v2740_v19 = vld [vmem:[%s8926_s7] sm:$0xff] }
 0x946   : > { %v8233_v31 = vpop.eup %7120  ;;  %v2857_v45 = vmul.f32 1.442695, %v2844_v33 }
 0x947   : > { %2875 = vrot.lane.b32.xlu1 %v8233_v31, %s7287_s14  ;;  %v2835_v2 = vpop.xlane.xlu1 %2834 }
 0x948   : > { %7124 = vpow2.f32 %v2857_v45  ;;  %v2845_v52 = vsub.f32 %v8117_v51, %v2835_v2 }
 0x949   : > { %7126 = vpow2.f32 %v2847_v36 }
 0x94a   : > { %v8238_v49 = vpop.eup %7122  ;;  %7128 = vpow2.f32 %v2855_v46  ;;  %v2859_v20 = vmul.f32 1.442695, %v2845_v52 }
 0x94b   : > { %2877 = vrot.lane.b32.xlu1 %v8238_v49, %s7287_s14  ;;  %v2838_v24 = vpop.xlane.xlu1 %2837 }
 0x94c   : > { %v2846_v30 = vsub.f32 %v8115_v37, %v2838_v24 }
 0x94e   : > { %v2861_v42 = vmul.f32 1.442695, %v2846_v30 }
 0x94f   : > { %v2665_v28 = vpop.permute.xlu1 %2664 }
 0x950   : > { %7130 = vpow2.f32 %v2861_v42  ;;  %6534 = vmatpush3.msra.mxu1 %v2665_v28 }
 0x951   : > { %6538 = vmatprep.subr.mxu1 %v8949_v6  ;;  %7132 = vpow2.f32 %v2859_v20 }
 0x952   : > { %v8245_v29 = vpop.eup %7124 }
 0x953   : > { %2881 = vrot.lane.b32.xlu1 %v8245_v29, %s7287_s14  ;;  %v7127_v26 = vpop.eup %7126 }
 0x954   : > { %v8250_v63 = vpop.eup %7128 }
 0x956   : > { %2871 = vrot.lane.b32.xlu0 %v7127_v26, %s7287_s14 }
 0x95a   : > { %v8252_v0 = vpop.eup %7130  ;;  %2879 = vrot.lane.b32.xlu0 %v8250_v63, %s7287_s14 }
 0x95b   : > { %2885 = vrot.lane.b32.xlu1 %v8252_v0, %s7287_s14  ;;  %v8258_v7 = vpop.eup %7132 }
 0x95e   : > { %2883 = vrot.lane.b32.xlu0 %v8258_v7, %s7287_s14 }
 0x9b5   : > { %v2874_v13 = vpop.permute.xlu1 %2873 }
 0x9b6   : > { %v2898_v57 = vsel %vm2245_vm3, %v2874_v13, 0.0 }
 0x9b7   : > { %2899 = vadd.xlane.f32.xlu1 %v2898_v57 }
 0x9b9   : > { %v2876_v15 = vpop.permute.xlu1 %2875 }
 0x9ba   : > { %v2901_v17 = vsel %vm2245_vm3, %v2876_v15, 0.0 }
 0x9bd   : > { %v2878_v41 = vpop.permute.xlu1 %2877 }
 0x9be   : > { %v2904_v53 = vsel %vm2245_vm3, %v2878_v41, 0.0 }
 0x9c5   : > { %v2882_v50 = vpop.permute.xlu1 %2881 }
 0x9c6   : > { %v2910_v47 = vsel %vm2245_vm3, %v2882_v50, 0.0 }
 0x9c7   : > { %2911 = vadd.xlane.f32.xlu1 %v2910_v47 }
 0x9cd   : > { %v2661_v5 = vpop.xlane.xlu0 %2660  ;;  %v2886_v11 = vpop.permute.xlu1 %2885 }
 0x9ce   : > { %7134 = vrcp.f32 %v2661_v5  ;;  %v2916_v14 = vsel %vm2245_vm3, %v2886_v11, 0.0 }
 0x9cf   : > { %2917 = vadd.xlane.f32.xlu1 %v2916_v14 }
 0x9d1   : > { %v2872_v12 = vpop.permute.xlu0 %2871 }
 0x9d2   : > { %v2895_v18 = vsel %vm2245_vm3, %v2872_v12, 0.0 }
 0x9d3   : > { %2896 = vadd.xlane.f32.xlu0 %v2895_v18 }
 0x9d5   : > { %v2880_v39 = vpop.permute.xlu0 %2879 }
 0x9d6   : > { %v2907_v62 = vsel %vm2245_vm3, %v2880_v39, 0.0 }
 0x9d7   : > { %2902 = vadd.xlane.f32.xlu0 %v2901_v17 }
 0x9d8   : > { %v7135_v32 = vpop.eup %7134 }
 0x9d9   : > { %v2663_v34 = vmul.f32 %v7135_v32, %v8223_v54  ;;  %v2884_v21 = vpop.permute.xlu0 %2883 }
 0x9da   : > { %v2913_v61 = vsel %vm2245_vm3, %v2884_v21, 0.0 }
 0x9db   : > { %6536 = vmatmul.mubr.msk.f32.vlgmr.msra.gmra.mrb[12].mxu1 %vm2245_vm3, %v2663_v34  ;;  %2905 = vadd.xlane.f32.xlu0 %v2904_v53 }
 0x9dc   : > { %6540 = vmatprep.mubr.msk.f32.mxu1 %vm7285_vm6, %v8949_v6  ;;  %6539 = vmatpush3.msra.mxu1 %v2740_v19 }
 0x9dd   : > { %6848 = vmatprep.subr.bf16.mxu1 %v7283_v9 }
 0x9df   : > { %2908 = vadd.xlane.f32.xlu0 %v2907_v62 }
 0x9e3   : > { %2914 = vadd.xlane.f32.xlu0 %v2913_v61 }
 0xa44   : > { %v2900_v54 = vpop.xlane.xlu1 %2899 }
 0xa45   : > { %7136 = vrcp.f32 %v2900_v54 }
 0xa4f   : > { %v7137_v33 = vpop.eup %7136 }
 0xa50   : > { %v2922_v45 = vmul.f32 %v7137_v33, %v8227_v4 }
 0xa52   : > { %2966 = vrot.lane.b32.xlu1 %v2922_v45, %s7287_s14  ;;  %v2936_v15 = vsel %vm2814_vm8, %v2922_v45, 0.0 }
 0xa54   : > { %v2912_v2 = vpop.xlane.xlu1 %2911 }
 0xa5c   : > { %v2918_v24 = vpop.xlane.xlu1 %2917 }
 0xa60   : > { %v2897_v36 = vpop.xlane.xlu0 %2896 }
 0xa61   : > { %7138 = vrcp.f32 %v2897_v36 }
 0xa64   : > { %v2903_v58 = vpop.xlane.xlu0 %2902 }
 0xa65   : > { %7140 = vrcp.f32 %v2903_v58 }
 0xa68   : > { %v2906_v46 = vpop.xlane.xlu0 %2905 }
 0xa69   : > { %7142 = vrcp.f32 %v2906_v46 }
 0xa6a   : > { %7144 = vrcp.f32 %v2912_v2 }
 0xa6b   : > { %v7139_v52 = vpop.eup %7138 }
 0xa6c   : > { %v2909_v30 = vpop.xlane.xlu0 %2908  ;;  %v2920_v42 = vmul.f32 %v7139_v52, %v7127_v26 }
 0xa6d   : > { %7146 = vrcp.f32 %v2909_v30 }
 0xa6e   : > { %2964 = vrot.lane.b32.xlu0 %v2920_v42, %s7287_s14  ;;  %7148 = vrcp.f32 %v2918_v24  ;;  %v2935_v13 = vsel %vm2814_vm8, %v2920_v42, 0.0 }
 0xa6f   : > { %v7141_v20 = vpop.eup %7140  ;;  %v2937_v47 = vadd.f32 %v2936_v15, %v2935_v13 }
 0xa70   : > { %v2915_v4 = vpop.xlane.xlu0 %2914  ;;  %v2924_v28 = vmul.f32 %v7141_v20, %v8233_v31 }
 0xa71   : > { %7150 = vrcp.f32 %v2915_v4 }
 0xa72   : > { %2968 = vrot.lane.b32.xlu1 %v2924_v28, %s7287_s14  ;;  %v2938_v41 = vsel %vm2814_vm8, %v2924_v28, 0.0 }
 0xa73   : > { %v7143_v57 = vpop.eup %7142  ;;  %v2939_v31 = vadd.f32 %v2938_v41, %v2937_v47 }
 0xa74   : > { %v2926_v26 = vmul.f32 %v7143_v57, %v8238_v49  ;;  %v7145_v50 = vpop.eup %7144 }
 0xa75   : > { %v2930_v12 = vmul.f32 %v7145_v50, %v8245_v29 }
 0xa76   : > { %v2940_v5 = vsel %vm2814_vm8, %v2926_v26, 0.0  ;;  %2970 = vrot.lane.b32.xlu1 %v2926_v26, %s7287_s14 }
 0xa77   : > { %v7147_v11 = vpop.eup %7146  ;;  %v2941_v17 = vadd.f32 %v2940_v5, %v2939_v31  ;;  %v2944_v34 = vsel %vm2814_vm8, %v2930_v12, 0.0 }
 0xa78   : > { %v2928_v14 = vmul.f32 %v7147_v11, %v8250_v63  ;;  %v7149_v18 = vpop.eup %7148 }
 0xa79   : > { %v2934_v62 = vmul.f32 %v7149_v18, %v8252_v0 }
 0xa7a   : > { %2972 = vrot.lane.b32.xlu0 %v2928_v14, %s7287_s14  ;;  %v2942_v32 = vsel %vm2814_vm8, %v2928_v14, 0.0  ;;  %2974 = vrot.lane.b32.xlu1 %v2930_v12, %s7287_s14 }
 0xa7b   : > { %v7151_v49 = vpop.eup %7150  ;;  %v2943_v39 = vadd.f32 %v2942_v32, %v2941_v17  ;;  %v2948_v61 = vsel %vm2814_vm8, %v2934_v62, 0.0 }
 0xa7c   : > { %v2932_v53 = vmul.f32 %v7151_v49, %v8258_v7 }
 0xa7d   : > { %v2945_v21 = vadd.f32 %v2944_v34, %v2943_v39 }
 0xa7e   : > { %2976 = vrot.lane.b32.xlu0 %v2932_v53, %s7287_s14  ;;  %v2946_v29 = vsel %vm2814_vm8, %v2932_v53, 0.0  ;;  %2978 = vrot.lane.b32.xlu1 %v2934_v62, %s7287_s14 }
 0xa7f   : > { %v2947_v63 = vadd.f32 %v2946_v29, %v2945_v21 }
 0xa81   : > { %v2949_v19 = vadd.f32 %v2948_v61, %v2947_v63  ;;  %v5979_v63 = vld [vmem:[%s8925_s6 + $0x8] sm:$0xff] }
 0xa82   : > { %7006 = vrot.lane.b32.xlu0 %v8064_v8, %s7287_s14  ;;  %7011 = vrot.lane.b32.xlu1 %v8068_v27, %s7287_s14 }
 0xa83   : > { %v2950_v7 = vrot.slane %v2949_v19, 4 }
 0xa85   : > { %v2951_v54 = vadd.f32 %v2950_v7, %v2949_v19 }
 0xa86   : > { %7016 = vrot.lane.b32.xlu0 %v8073_v10, %s7287_s14  ;;  %7021 = vrot.lane.b32.xlu1 %v8078_v25, %s7287_s14 }
 0xa87   : > { %v2952_v0 = vrot.slane %v2951_v54, 2 }
 0xa89   : > { %v2953_v33 = vadd.f32 %v2952_v0, %v2951_v54 }
 0xa8b   : > { %v2954_v45 = vrot.slane %v2953_v33, 1 }
 0xa8d   : > { %v2955_v36 = vadd.f32 %v2954_v45, %v2953_v33 }
 0xa8f   : > { %3118 = vrot.lane.b32.xlu1 %v2955_v36, %s7287_s14 }
 0xaae   : > { %v2736_v58 = vpop.f32.mrb[12].mxu1 }
 0xaaf   : > { %v6537_v2 = vpop.f32.mrb[13].mxu1  ;;  %6541 = vmatmul.mubr.msk.f32.vlgmr.msra.gmra.mrb[14].mxu1 %vm2245_vm3, %v2736_v58 }
 0xab0   : > { %6559 = vmatprep.mubr.msk.f32.mxu1 %vm7285_vm6, %v8949_v6 }
 0xac4   : > { %v8313_v46 = vpop.permute.xlu1 %2966 }
 0xae0   : > { %v8315_v52 = vpop.permute.xlu0 %2964 }
 0xae1   : > { %2988 = vxpose.xlu0.b32.start [1/8] (short) (narrow) %v8315_v52, 8 }
 0xae4   : > { %v8318_v24 = vpop.permute.xlu1 %2968 }
 0xae5   : > { %2989 = vxpose.xlu0.b32.cont [2/8] (short) (narrow) %v8313_v46, 8 }
 0xae8   : > { %v8321_v30 = vpop.permute.xlu1 %2970 }
 0xae9   : > { %2990 = vxpose.xlu0.b32.cont [3/8] (short) (narrow) %v8318_v24, 8 }
 0xaec   : > { %v8324_v42 = vpop.permute.xlu0 %2972  ;;  %v8326_v20 = vpop.permute.xlu1 %2974 }
 0xaed   : > { %2991 = vxpose.xlu0.b32.cont [4/8] (short) (narrow) %v8321_v30, 8 }
 0xaf0   : > { %v8329_v4 = vpop.permute.xlu0 %2976  ;;  %v8331_v28 = vpop.permute.xlu1 %2978 }
 0xaf1   : > { %2992 = vxpose.xlu0.b32.cont [5/8] (short) (narrow) %v8324_v42, 8 }
 0xaf4   : > { %v7007_v13 = vpop.permute.xlu0 %7006  ;;  %v7012_v57 = vpop.permute.xlu1 %7011 }
 0xaf5   : > { %v7009_v15 = vunpack.i.h.bf16 %v7007_v13  ;;  %v7008_v41 = vunpack.i.l.bf16 %v7007_v13  ;;  %2993 = vxpose.xlu0.b32.cont [6/8] (short) (narrow) %v8326_v20, 8  ;;  %v7014_v50 = vunpack.i.h.bf16 %v7012_v57  ;;  %v7013_v47 = vunpack.i.l.bf16 %v7012_v57 }
 0xaf7   : > { %v6849_v26 = vpack.c.bf16 %v7009_v15, %v7008_v41  ;;  %v6852_v11 = vpack.c.bf16 %v7014_v50, %v7013_v47  ;;  %v3729_v15 = vsel %vm3725_vm9, %v8093_v35, -inf }
 0xaf8   : > { %v7017_v5 = vpop.permute.xlu0 %7016  ;;  %v7022_v12 = vpop.permute.xlu1 %7021 }
 0xaf9   : > { %2994 = vxpose.xlu0.b32.cont [7/8] (short) (narrow) %v8329_v4, 8  ;;  %6850 = vmatpush3.bf16.msra.mxu1 %v6849_v26  ;;  %v7019_v31 = vunpack.i.h.bf16 %v7017_v5  ;;  %v7018_v14 = vunpack.i.l.bf16 %v7017_v5  ;;  %v7024_v17 = vunpack.i.h.bf16 %v7022_v12  ;;  %v7023_v32 = vunpack.i.l.bf16 %v7022_v12 }
 0xafa   : > { %6851 = vmatprep.subr.bf16.mxu1 %v7283_v9  ;;  %v3735_v12 = vsel %vm3725_vm9, %v8101_v3, -inf }
 0xafb   : > { %v6855_v18 = vpack.c.bf16 %v7019_v31, %v7018_v14  ;;  %v6858_v39 = vpack.c.bf16 %v7024_v17, %v7023_v32  ;;  %v3726_v31 = vsel %vm3725_vm9, %v8095_v23, -inf  ;;  %v3732_v14 = vsel %vm3725_vm9, %v8103_v44, -inf }
 0xafc   : > { %v3741_v17 = vsel %vm3725_vm9, %v8107_v55, -inf  ;;  %v3744_v32 = vsel %vm3725_vm9, %v8117_v51, -inf }
 0xafd   : > { %2995 = vxpose.xlu0.b32.end [8/8] (short) (narrow) %v8331_v28, 8  ;;  %6853 = vmatpush3.bf16.msra.mxu1 %v6852_v11 }
 0xafe   : > { %6854 = vmatprep.subr.bf16.mxu1 %v7283_v9 }
 0xb01   : > { %v3119_v49 = vpop.permute.xlu1 %3118  ;;  %6856 = vmatpush3.bf16.msra.mxu1 %v6855_v18  ;;  %v3738_v18 = vsel %vm3725_vm9, %v8109_v43, -inf }
 0xb02   : > { %3121 = vxpose.xlu1.b32.start.end [1/1] (short) (narrow) %v3119_v49, 8  ;;  %6857 = vmatprep.subr.bf16.mxu1 %v7283_v9  ;;  %v3747_v49 = vsel %vm3725_vm9, %v8115_v37, -inf }
 0xb05   : > { %6859 = vmatpush3.bf16.msra.mxu1 %v6858_v39 }
 0xb06   : > { %6562 = vmatprep.subr.mxu1 %v8949_v6 }
 0xb61   : > { %v3004_v34 = vpop.trf.xlu0 }
 0xb62   : > { %6560 = vmatmul.mubr.msk.f32.vlgmr.msra.gmra.mrb[16].mxu1 %vm2387_vm7, %v3004_v34 }
 0xb63   : > { %6564 = vmatprep.mubr.msk.f32.mxu1 %vm7285_vm6, %v8949_v6  ;;  %6563 = vmatpush3.msra.mxu1 %v5979_v63 }
 0xb64   : > { %6567 = vmatprep.subr.mxu1 %v8949_v6 }
 0xb82   : > { %v3137_v53 = vpop.trf.xlu1  ;;  %v8344_v62 = vpop.f32.mrb[14].mxu1 }
 0xb83   : > { %v3153_v21 = vadd.f32 1e-05, %v3137_v53  ;;  %v6542_v29 = vpop.f32.mrb[15].mxu1 }
 0xb85   : > { %3156 = vperm.xlu1 %7004, %v3153_v21  }
 0xc04   : > { %v3157_v61 = vpop.permute.xlu1 %3156 }
 0xc05   : > { %7152 = vrcp.f32 %v3157_v61 }
 0xc0f   : > { %v7153_v19 = vpop.eup %7152 }
 0xc35   : > { %v3113_v7 = vpop.f32.mrb[16].mxu1 }
 0xc36   : > { %v3160_v54 = vmul.f32 %v7153_v19, %v3113_v7  ;;  %v6561_v0 = vpop.f32.mrb[17].mxu1 }
 0xc38   : > { %6565 = vmatmul.mubr.msk.f32.vlgmr.msra.gmra.mrb[18].mxu1 %vm2245_vm3, %v3160_v54 }
 0xc39   : > { %6569 = vmatprep.mubr.msk.f32.mxu1 %vm7285_vm6, %v8949_v6 }
 0xd0b   : > { %v3232_v33 = vpop.f32.mrb[18].mxu1 }
 0xd0c   : > { %3237 = vrot.lane.b32.xlu0 %v3232_v33, %s7287_s14  ;;  %v6566_v45 = vpop.f32.mrb[19].mxu1 }
 0xd7e   : > { %v3238_v36 = vpop.permute.xlu0 %3237 }
 0xd7f   : > { %6568 = vmatpush3.xpose.msk.msra.mxu1 %vm2245_vm3, %v3238_v36 }
 0xd80   : > { %6572 = vmatprep.subr.mxu1 %v8949_v6 }
 0xd82   : > { %6570 = vmatmul.mubr.msk.f32.vlgmr.msra.gmra.mrb[20].mxu1 %vm2245_vm3, %v3232_v33 }
 0xd83   : > { %6574 = vmatprep.mubr.msk.f32.mxu1 %vm7285_vm6, %v8949_v6 }
 0xe55   : > { %v3309_v58 = vpop.f32.mrb[20].mxu1 }
 0xe56   : > { %v3313_v2 = vmul.f32 0.35355338, %v3309_v58  ;;  %v6571_v13 = vpop.f32.mrb[21].mxu1 }
 0xe58   : > { %v3314_v57 = vsel %vm2245_vm3, %v3313_v2, -inf }
 0xe59   : > { %3315 = vmax.xlane.f32.xlu1 %v3314_v57 }
 0xe6a   : > { %3325 = vrot.lane.b32.xlu1 %v3232_v33, %s7288_s15 }
 0xe8e   : > { %3730 = vmax.xlane.f32.xlu1 %v3729_v15 }
 0xee6   : > { %v3316_v41 = vpop.xlane.xlu1 %3315 }
 0xee7   : > { %v3317_v26 = vsub.f32 %v3313_v2, %v3316_v41 }
 0xee9   : > { %v3318_v50 = vmul.f32 1.442695, %v3317_v26 }
 0xeea   : > { %v3326_v47 = vpop.permute.xlu1 %3325 }
 0xeeb   : > { %7154 = vpow2.f32 %v3318_v50  ;;  %6573 = vmatpush3.msra.mxu1 %v3326_v47 }
 0xeec   : > { %6577 = vmatprep.subr.mxu1 %v8949_v6 }
 0xef5   : > { %v7155_v5 = vpop.eup %7154 }
 0xef6   : > { %v3320_v11 = vsel %vm2245_vm3, %v7155_v5, 0.0 }
 0xef7   : > { %3321 = vadd.xlane.f32.xlu0 %v3320_v11 }
 0xefb   : > { %3727 = vmax.xlane.f32.xlu0 %v3726_v31 }
 0xeff   : > { %3733 = vmax.xlane.f32.xlu0 %v3732_v14 }
 0xf03   : > { %3736 = vmax.xlane.f32.xlu0 %v3735_v12 }
 0xf07   : > { %3739 = vmax.xlane.f32.xlu0 %v3738_v18 }
 0xf0b   : > { %3742 = vmax.xlane.f32.xlu0 %v3741_v17 }
 0xf0f   : > { %3745 = vmax.xlane.f32.xlu0 %v3744_v32 }
 0xf13   : > { %3748 = vmax.xlane.f32.xlu0 %v3747_v49 }
 0xf1b   : > { %v3731_v39 = vpop.xlane.xlu1 %3730 }
 0xf1c   : > { %v3751_v34 = vsub.f32 %v8093_v35, %v3731_v39 }
 0xf1e   : > { %v3760_v53 = vmul.f32 1.442695, %v3751_v34 }
 0xf20   : > { %7156 = vpow2.f32 %v3760_v53 }
 0xf2a   : > { %v8380_v21 = vpop.eup %7156 }
 0xf2b   : > { %3784 = vrot.lane.b32.xlu1 %v8380_v21, %s7288_s15 }
 0xf84   : > { %v3322_v29 = vpop.xlane.xlu0 %3321 }
 0xf85   : > { %7158 = vrcp.f32 %v3322_v29 }
 0xf88   : > { %v3728_v63 = vpop.xlane.xlu0 %3727 }
 0xf89   : > { %v3750_v61 = vsub.f32 %v8095_v23, %v3728_v63 }
 0xf8b   : > { %v3758_v19 = vmul.f32 1.442695, %v3750_v61  ;;  %v3401_v61 = vld [vmem:[%s8926_s7 + $0x8] sm:$0xff] }
 0xf8c   : > { %v3734_v7 = vpop.xlane.xlu0 %3733 }
 0xf8d   : > { %7160 = vpow2.f32 %v3758_v19  ;;  %v3752_v54 = vsub.f32 %v8103_v44, %v3734_v7 }
 0xf8f   : > { %v7159_v0 = vpop.eup %7158  ;;  %v3762_v33 = vmul.f32 1.442695, %v3752_v54 }
 0xf90   : > { %v3737_v45 = vpop.xlane.xlu0 %3736  ;;  %v3324_v36 = vmul.f32 %v7159_v0, %v7155_v5 }
 0xf91   : > { %7162 = vpow2.f32 %v3762_v33  ;;  %v3753_v58 = vsub.f32 %v8101_v3, %v3737_v45 }
 0xf92   : > { %6575 = vmatmul.mubr.msk.f32.vlgmr.msra.gmra.mrb[22].mxu1 %vm2245_vm3, %v3324_v36 }
 0xf93   : > { %v3764_v2 = vmul.f32 1.442695, %v3753_v58  ;;  %6579 = vmatprep.mubr.msk.f32.mxu1 %vm7285_vm6, %v8949_v6  ;;  %6578 = vmatpush3.msra.mxu1 %v3401_v61 }
 0xf94   : > { %v3740_v13 = vpop.xlane.xlu0 %3739 }
 0xf95   : > { %7164 = vpow2.f32 %v3764_v2  ;;  %v3754_v57 = vsub.f32 %v8109_v43, %v3740_v13 }
 0xf97   : > { %v8391_v15 = vpop.eup %7160  ;;  %v3766_v41 = vmul.f32 1.442695, %v3754_v57 }
 0xf98   : > { %3782 = vrot.lane.b32.xlu0 %v8391_v15, %s7288_s15  ;;  %v3743_v26 = vpop.xlane.xlu0 %3742 }
 0xf99   : > { %7166 = vpow2.f32 %v3766_v41  ;;  %v3755_v50 = vsub.f32 %v8107_v55, %v3743_v26 }
 0xf9b   : > { %v8396_v47 = vpop.eup %7162  ;;  %v3768_v5 = vmul.f32 1.442695, %v3755_v50 }
 0xf9c   : > { %3786 = vrot.lane.b32.xlu0 %v8396_v47, %s7288_s15  ;;  %v3746_v11 = vpop.xlane.xlu0 %3745 }
 0xf9d   : > { %7168 = vpow2.f32 %v3768_v5  ;;  %v3756_v31 = vsub.f32 %v8117_v51, %v3746_v11  ;;  %v3785_v29 = vpop.permute.xlu1 %3784 }
 0xf9e   : > { %v3809_v63 = vsel %vm2245_vm3, %v3785_v29, 0.0 }
 0xf9f   : > { %v8401_v14 = vpop.eup %7164  ;;  %v3770_v12 = vmul.f32 1.442695, %v3756_v31 }
 0xfa0   : > { %3788 = vrot.lane.b32.xlu0 %v8401_v14, %s7288_s15  ;;  %v3749_v18 = vpop.xlane.xlu0 %3748 }
 0xfa1   : > { %7170 = vpow2.f32 %v3770_v12  ;;  %v3757_v17 = vsub.f32 %v8115_v37, %v3749_v18 }
 0xfa3   : > { %v8406_v32 = vpop.eup %7166  ;;  %v3772_v49 = vmul.f32 1.442695, %v3757_v17 }
 0xfa4   : > { %3790 = vrot.lane.b32.xlu1 %v8406_v32, %s7288_s15 }
 0xfa5   : > { %7172 = vpow2.f32 %v3772_v49 }
 0xfa7   : > { %v8410_v39 = vpop.eup %7168 }
 0xfa8   : > { %3792 = vrot.lane.b32.xlu0 %v8410_v39, %s7288_s15 }
 0xfab   : > { %v8414_v34 = vpop.eup %7170 }
 0xfac   : > { %3794 = vrot.lane.b32.xlu1 %v8414_v34, %s7288_s15 }
 0xfaf   : > { %v8418_v53 = vpop.eup %7172 }
 0xfb0   : > { %3796 = vrot.lane.b32.xlu0 %v8418_v53, %s7288_s15 }
 0xfcf   : > { %3810 = vadd.xlane.f32.xlu0 %v3809_v63 }
0x100a   : > { %v3783_v19 = vpop.permute.xlu0 %3782 }
0x100b   : > { %v3806_v7 = vsel %vm2245_vm3, %v3783_v19, 0.0 }
0x100c   : > { %3807 = vadd.xlane.f32.xlu1 %v3806_v7 }
0x100e   : > { %v3787_v54 = vpop.permute.xlu0 %3786 }
0x100f   : > { %v3812_v0 = vsel %vm2245_vm3, %v3787_v54, 0.0 }
0x1010   : > { %3813 = vadd.xlane.f32.xlu0 %v3812_v0 }
0x1012   : > { %v3789_v33 = vpop.permute.xlu0 %3788 }
0x1013   : > { %v3815_v45 = vsel %vm2245_vm3, %v3789_v33, 0.0 }
0x1014   : > { %3816 = vadd.xlane.f32.xlu1 %v3815_v45 }
0x1016   : > { %v3791_v36 = vpop.permute.xlu1 %3790 }
0x1017   : > { %v3818_v58 = vsel %vm2245_vm3, %v3791_v36, 0.0 }
0x1018   : > { %3819 = vadd.xlane.f32.xlu0 %v3818_v58 }
0x101a   : > { %v3793_v2 = vpop.permute.xlu0 %3792 }
0x101b   : > { %v3821_v13 = vsel %vm2245_vm3, %v3793_v2, 0.0 }
0x101c   : > { %3822 = vadd.xlane.f32.xlu1 %v3821_v13 }
0x101e   : > { %v3795_v57 = vpop.permute.xlu1 %3794 }
0x101f   : > { %v3824_v41 = vsel %vm2245_vm3, %v3795_v57, 0.0 }
0x1020   : > { %3825 = vadd.xlane.f32.xlu0 %v3824_v41 }
0x1022   : > { %v3797_v26 = vpop.permute.xlu0 %3796 }
0x1023   : > { %v3827_v50 = vsel %vm2245_vm3, %v3797_v26, 0.0 }
0x1024   : > { %3828 = vadd.xlane.f32.xlu1 %v3827_v50 }
0x105c   : > { %v3811_v5 = vpop.xlane.xlu0 %3810 }
0x105d   : > { %7174 = vrcp.f32 %v3811_v5 }
0x1065   : > { %v3397_v11 = vpop.f32.mrb[22].mxu1 }
0x1066   : > { %v6576_v31 = vpop.f32.mrb[23].mxu1  ;;  %6580 = vmatmul.mubr.msk.f32.vlgmr.msra.gmra.mrb[24].mxu1 %vm2245_vm3, %v3397_v11 }
0x1067   : > { %v7175_v12 = vpop.eup %7174  ;;  %6584 = vmatprep.mubr.msk.f32.mxu1 %vm2245_vm3, %v8315_v52 }
0x1068   : > { %v3833_v18 = vmul.f32 %v7175_v12, %v8380_v21 }
0x106a   : > { %3877 = vrot.lane.b32.xlu1 %v3833_v18, %s7288_s15  ;;  %v3847_v2 = vsel %vm3725_vm9, %v3833_v18, 0.0 }
0x1099   : > { %v3808_v17 = vpop.xlane.xlu1 %3807 }
0x109a   : > { %7176 = vrcp.f32 %v3808_v17 }
0x109d   : > { %v3814_v49 = vpop.xlane.xlu0 %3813 }
0x109e   : > { %7178 = vrcp.f32 %v3814_v49 }
0x10a1   : > { %v3817_v29 = vpop.xlane.xlu1 %3816 }
0x10a2   : > { %7180 = vrcp.f32 %v3817_v29 }
0x10a4   : > { %v7177_v63 = vpop.eup %7176 }
0x10a5   : > { %v3820_v61 = vpop.xlane.xlu0 %3819  ;;  %v3831_v19 = vmul.f32 %v7177_v63, %v8391_v15 }
0x10a6   : > { %7182 = vrcp.f32 %v3820_v61 }
0x10a7   : > { %3875 = vrot.lane.b32.xlu0 %v3831_v19, %s7288_s15  ;;  %v3846_v15 = vsel %vm3725_vm9, %v3831_v19, 0.0 }
0x10a8   : > { %v7179_v7 = vpop.eup %7178  ;;  %v3848_v57 = vadd.f32 %v3847_v2, %v3846_v15 }
0x10a9   : > { %v3823_v54 = vpop.xlane.xlu1 %3822  ;;  %v3835_v52 = vmul.f32 %v7179_v7, %v8396_v47 }
0x10aa   : > { %7184 = vrcp.f32 %v3823_v54 }
0x10ab   : > { %3879 = vrot.lane.b32.xlu1 %v3835_v52, %s7288_s15  ;;  %v3849_v47 = vsel %vm3725_vm9, %v3835_v52, 0.0 }
0x10ac   : > { %v7181_v21 = vpop.eup %7180  ;;  %v3850_v26 = vadd.f32 %v3849_v47, %v3848_v57 }
0x10ad   : > { %v3826_v0 = vpop.xlane.xlu0 %3825  ;;  %v3837_v33 = vmul.f32 %v7181_v21, %v8401_v14 }
0x10ae   : > { %7186 = vrcp.f32 %v3826_v0 }
0x10af   : > { %3881 = vrot.lane.b32.xlu0 %v3837_v33, %s7288_s15  ;;  %v3851_v14 = vsel %vm3725_vm9, %v3837_v33, 0.0 }
0x10b0   : > { %v7183_v45 = vpop.eup %7182 }
0x10b1   : > { %v3829_v36 = vpop.xlane.xlu1 %3828  ;;  %v3839_v58 = vmul.f32 %v7183_v45, %v8406_v32  ;;  %v3852_v32 = vadd.f32 %v3851_v14, %v3850_v26 }
0x10b2   : > { %7188 = vrcp.f32 %v3829_v36 }
0x10b3   : > { %3883 = vrot.lane.b32.xlu1 %v3839_v58, %s7288_s15  ;;  %v3853_v50 = vsel %vm3725_vm9, %v3839_v58, 0.0 }
0x10b4   : > { %v7185_v13 = vpop.eup %7184  ;;  %v3854_v12 = vadd.f32 %v3853_v50, %v3852_v32 }
0x10b5   : > { %v3841_v41 = vmul.f32 %v7185_v13, %v8410_v39 }
0x10b7   : > { %3885 = vrot.lane.b32.xlu0 %v3841_v41, %s7288_s15  ;;  %v3855_v11 = vsel %vm3725_vm9, %v3841_v41, 0.0 }
0x10b8   : > { %v7187_v5 = vpop.eup %7186  ;;  %v3856_v49 = vadd.f32 %v3855_v11, %v3854_v12 }
0x10b9   : > { %v3843_v31 = vmul.f32 %v7187_v5, %v8414_v34 }
0x10bb   : > { %3887 = vrot.lane.b32.xlu1 %v3843_v31, %s7288_s15  ;;  %v3857_v18 = vsel %vm3725_vm9, %v3843_v31, 0.0 }
0x10bc   : > { %v7189_v17 = vpop.eup %7188  ;;  %v3858_v29 = vadd.f32 %v3857_v18, %v3856_v49 }
0x10bd   : > { %v3845_v39 = vmul.f32 %v7189_v17, %v8418_v53 }
0x10bf   : > { %7026 = vrot.lane.b32.xlu1 %v8064_v8, %s7288_s15  ;;  %3889 = vrot.lane.b32.xlu0 %v3845_v39, %s7288_s15  ;;  %v3859_v63 = vsel %vm3725_vm9, %v3845_v39, 0.0 }
0x10c0   : > { %v3860_v61 = vadd.f32 %v3859_v63, %v3858_v29 }
0x10c2   : > { %v3861_v19 = vrot.slane %v3860_v61, 4 }
0x10c3   : > { %7036 = vrot.lane.b32.xlu1 %v8073_v10, %s7288_s15  ;;  %7031 = vrot.lane.b32.xlu0 %v8068_v27, %s7288_s15 }
0x10c4   : > { %v3862_v34 = vadd.f32 %v3861_v19, %v3860_v61  ;;  %v4516_v61 = vsel %vm4515_vm10, %v8095_v23, -inf }
0x10c6   : > { %v3863_v7 = vrot.slane %v3862_v34, 2 }
0x10c7   : > { %7041 = vrot.lane.b32.xlu0 %v8078_v25, %s7288_s15 }
0x10c8   : > { %v3864_v53 = vadd.f32 %v3863_v7, %v3862_v34 }
0x10ca   : > { %v3865_v54 = vrot.slane %v3864_v53, 1 }
0x10cc   : > { %v3866_v52 = vadd.f32 %v3865_v54, %v3864_v53 }
0x10ce   : > { %4029 = vrot.lane.b32.xlu0 %v3866_v52, %s7288_s15 }
0x10dc   : > { %v8472_v0 = vpop.permute.xlu1 %3877 }
0x1119   : > { %v8469_v21 = vpop.permute.xlu0 %3875 }
0x111a   : > { %3899 = vxpose.xlu1.b32.start [1/8] (short) (narrow) %v8469_v21, 8 }
0x111d   : > { %v8475_v33 = vpop.permute.xlu1 %3879 }
0x111e   : > { %3900 = vxpose.xlu1.b32.cont [2/8] (short) (narrow) %v8472_v0, 8 }
0x1121   : > { %v8478_v45 = vpop.permute.xlu0 %3881 }
0x1122   : > { %3901 = vxpose.xlu1.b32.cont [3/8] (short) (narrow) %v8475_v33, 8 }
0x1125   : > { %v8481_v15 = vpop.permute.xlu1 %3883 }
0x1126   : > { %3902 = vxpose.xlu1.b32.cont [4/8] (short) (narrow) %v8478_v45, 8 }
0x1129   : > { %v8484_v36 = vpop.permute.xlu0 %3885 }
0x112a   : > { %3903 = vxpose.xlu1.b32.cont [5/8] (short) (narrow) %v8481_v15, 8 }
0x112d   : > { %v8487_v58 = vpop.permute.xlu1 %3887 }
0x112e   : > { %3904 = vxpose.xlu1.b32.cont [6/8] (short) (narrow) %v8484_v36, 8 }
0x1131   : > { %v8489_v2 = vpop.permute.xlu0 %3889  ;;  %v7027_v26 = vpop.permute.xlu1 %7026 }
0x1132   : > { %3905 = vxpose.xlu1.b32.cont [7/8] (short) (narrow) %v8487_v58, 8 }
0x1135   : > { %v7032_v47 = vpop.permute.xlu0 %7031  ;;  %v7037_v5 = vpop.permute.xlu1 %7036 }
0x1136   : > { %3906 = vxpose.xlu1.b32.end [8/8] (short) (narrow) %v8489_v2, 8  ;;  %v7033_v50 = vunpack.i.l.bf16 %v7032_v47 }
0x1139   : > { %v3471_v13 = vpop.f32.mrb[24].mxu1  ;;  %v7042_v14 = vpop.permute.xlu0 %7041 }
0x113a   : > { %v6581_v57 = vpop.f32.mrb[25].mxu1  ;;  %6582 = vmatprep.subr.mxu1 %v3471_v13 }
0x113b   : > { %6583 = vmatpush3.msra.mxu1 %v3471_v13  ;;  %v4522_v13 = vsel %vm4515_vm10, %v8103_v44, -inf  ;;  %v4525_v57 = vsel %vm4515_vm10, %v8101_v3, -inf }
0x113c   : > { %6585 = vmatmul.mubr.msk.f32.vlgmr.msra.gmra.mrb[26].mxu1 %vm2245_vm3, %v8313_v46  ;;  %6596 = vmatprep.subr.mxu1 %v8344_v62  ;;  %v7029_v46 = vunpack.i.h.bf16 %v7027_v26 }
0x113d   : > { %6587 = vmatprep.mubr.msk.f32.mxu1 %vm2245_vm3, %v8318_v24  ;;  %6597 = vmatpush3.msra.mxu1 %v8344_v62  ;;  %v7028_v24 = vunpack.i.l.bf16 %v7027_v26  ;;  %v7034_v62 = vunpack.i.h.bf16 %v7032_v47  ;;  %v4519_v47 = vsel %vm4515_vm10, %v8093_v35, -inf  ;;  %v4534_v26 = vsel %vm4515_vm10, %v8117_v51, -inf }
0x113e   : > { %6860 = vmatprep.subr.bf16.mxu1 %v7283_v9 }
0x1140   : > { %v4030_v41 = vpop.permute.xlu0 %4029  ;;  %6588 = vmatmul.mubr.msk.f32.gmra.mrb[28].mxu1 %vm2245_vm3, %v8321_v30  ;;  %v6861_v30 = vpack.c.bf16 %v7029_v46, %v7028_v24  ;;  %v4537_v46 = vsel %vm4515_vm10, %v8115_v37, -inf }
0x1141   : > { %4032 = vxpose.xlu0.b32.start.end [1/1] (short) (narrow) %v4030_v41, 8  ;;  %6590 = vmatprep.mubr.msk.f32.mxu1 %vm2245_vm3, %v8324_v42  ;;  %v6864_v42 = vpack.c.bf16 %v7034_v62, %v7033_v50  ;;  %v4531_v41 = vsel %vm4515_vm10, %v8107_v55, -inf }
0x1144   : > { %6591 = vmatmul.mubr.msk.f32.gmra.mrb[30].mxu1 %vm2245_vm3, %v8326_v20  ;;  %v7039_v20 = vunpack.i.h.bf16 %v7037_v5 }
0x1145   : > { %6593 = vmatprep.mubr.msk.f32.mxu1 %vm2245_vm3, %v8329_v4  ;;  %v7038_v4 = vunpack.i.l.bf16 %v7037_v5 }
0x1148   : > { %6594 = vmatmul.mubr.msk.f32.gmra.mrb[32].mxu1 %vm2245_vm3, %v8331_v28  ;;  %v7043_v28 = vunpack.i.l.bf16 %v7042_v14 }
0x1149   : > { %6598 = vmatprep.mubr.msk.f32.mxu1 %vm2245_vm3, %v8145_v59  ;;  %v6867_v59 = vpack.c.bf16 %v7039_v20, %v7038_v4 }
0x114c   : > { %6599 = vmatmul.mubr.msk.f32.vlgmr.msra.gmra.mrb[26].mxu1 %vm2245_vm3, %v8148_v40  ;;  %v7044_v40 = vunpack.i.h.bf16 %v7042_v14  ;;  %v4528_v14 = vsel %vm4515_vm10, %v8109_v43, -inf }
0x114d   : > { %6862 = vmatpush3.bf16.msra.mxu1 %v6861_v30  ;;  %6601 = vmatprep.mubr.msk.f32.mxu1 %vm2245_vm3, %v8155_v56 }
0x114e   : > { %6863 = vmatprep.subr.bf16.mxu1 %v7283_v9  ;;  %v6870_v56 = vpack.c.bf16 %v7044_v40, %v7043_v28 }
0x1150   : > { %6602 = vmatmul.mubr.msk.f32.gmra.mrb[28].mxu1 %vm2245_vm3, %v8157_v60 }
0x1151   : > { %6865 = vmatpush3.bf16.msra.mxu1 %v6864_v42  ;;  %6604 = vmatprep.mubr.msk.f32.mxu1 %vm2245_vm3, %v8164_v38 }
0x1152   : > { %6866 = vmatprep.subr.bf16.mxu1 %v7283_v9 }
0x1154   : > { %6605 = vmatmul.mubr.msk.f32.gmra.mrb[30].mxu1 %vm2245_vm3, %v8166_v22 }
0x1155   : > { %6868 = vmatpush3.bf16.msra.mxu1 %v6867_v59  ;;  %6607 = vmatprep.mubr.msk.f32.mxu1 %vm2245_vm3, %v8173_v48  ;;  %v6002_v48 = vld [vmem:[%s8925_s6 + $0x10] sm:$0xff] }
0x1156   : > { %6869 = vmatprep.subr.bf16.mxu1 %v7283_v9 }
0x1158   : > { %6608 = vmatmul.mubr.msk.f32.gmra.mrb[32].mxu1 %vm2245_vm3, %v8175_v16 }
0x1159   : > { %6871 = vmatpush3.bf16.msra.mxu1 %v6870_v56  ;;  %6626 = vmatprep.mubr.msk.f32.mxu1 %vm7285_vm6, %v8949_v6 }
0x115a   : > { %6629 = vmatprep.subr.mxu1 %v8949_v6 }
0x116a   : > { %7045 = vset.pattern.permute.xlu0 %v7286_v1 }
0x119a   : > { %v3915_v60 = vpop.trf.xlu1 }
0x119b   : > { %6627 = vmatmul.mubr.msk.f32.vlgmr.msra.gmra.mrb[34].mxu1 %vm2387_vm7, %v3915_v60 }
0x119c   : > { %6631 = vmatprep.mubr.msk.f32.mxu1 %vm7285_vm6, %v8949_v6  ;;  %6630 = vmatpush3.msra.mxu1 %v6002_v48 }
0x119d   : > { %6634 = vmatprep.subr.mxu1 %v8949_v6 }
0x11c1   : > { %v4048_v38 = vpop.trf.xlu0 }
0x11c2   : > { %v4064_v22 = vadd.f32 1e-05, %v4048_v38 }
0x11c4   : > { %4067 = vperm.xlu0 %7045, %v4064_v22  }
0x1243   : > { %v4068_v16 = vpop.permute.xlu0 %4067 }
0x1244   : > { %7190 = vrcp.f32 %v4068_v16 }
0x124e   : > { %v7191_v32 = vpop.eup %7190 }
0x126e   : > { %v4024_v1 = vpop.f32.mrb[34].mxu1 }
0x126f   : > { %v4071_v11 = vmul.f32 %v7191_v32, %v4024_v1  ;;  %v6628_v31 = vpop.f32.mrb[35].mxu1 }
0x1271   : > { %6632 = vmatmul.mubr.msk.f32.vlgmr.msra.gmra.mrb[36].mxu1 %vm2245_vm3, %v4071_v11 }
0x1272   : > { %6636 = vmatprep.mubr.msk.f32.mxu1 %vm7285_vm6, %v8949_v6 }
0x1344   : > { %v4143_v12 = vpop.f32.mrb[36].mxu1 }
0x1345   : > { %4148 = vrot.lane.b32.xlu1 %v4143_v12, %s7287_s14  ;;  %v6633_v18 = vpop.f32.mrb[37].mxu1 }
0x13b7   : > { %v4149_v17 = vpop.permute.xlu1 %4148 }
0x13b8   : > { %6635 = vmatpush3.xpose.msk.msra.mxu1 %vm2245_vm3, %v4149_v17 }
0x13b9   : > { %6639 = vmatprep.subr.mxu1 %v8949_v6 }
0x13bb   : > { %6637 = vmatmul.mubr.msk.f32.vlgmr.msra.gmra.mrb[38].mxu1 %vm2245_vm3, %v4143_v12 }
0x13bc   : > { %6641 = vmatprep.mubr.msk.f32.mxu1 %vm7285_vm6, %v8949_v6 }
0x148e   : > { %v4220_v49 = vpop.f32.mrb[38].mxu1 }
0x148f   : > { %v4224_v39 = vmul.f32 0.35355338, %v4220_v49  ;;  %v6638_v29 = vpop.f32.mrb[39].mxu1 }
0x1491   : > { %v4225_v63 = vsel %vm2245_vm3, %v4224_v39, -inf }
0x1492   : > { %4226 = vmax.xlane.f32.xlu0 %v4225_v63 }
0x14a8   : > { %4236 = vrot.lane.b32.xlu0 %v4143_v12, %s7288_s15 }
0x14c7   : > { %4517 = vmax.xlane.f32.xlu0 %v4516_v61 }
0x151f   : > { %v4227_v19 = vpop.xlane.xlu0 %4226 }
0x1520   : > { %v4228_v34 = vsub.f32 %v4224_v39, %v4227_v19  ;;  %v4312_v19 = vld [vmem:[%s8926_s7 + $0x10] sm:$0xff] }
0x1522   : > { %v4229_v7 = vmul.f32 1.442695, %v4228_v34 }
0x1523   : > { %v4237_v53 = vpop.permute.xlu0 %4236 }
0x1524   : > { %7192 = vpow2.f32 %v4229_v7  ;;  %6640 = vmatpush3.msra.mxu1 %v4237_v53 }
0x1525   : > { %6644 = vmatprep.subr.mxu1 %v8949_v6 }
0x152e   : > { %v7193_v54 = vpop.eup %7192 }
0x152f   : > { %v4231_v52 = vsel %vm2245_vm3, %v7193_v54, 0.0 }
0x1530   : > { %4232 = vadd.xlane.f32.xlu1 %v4231_v52 }
0x1534   : > { %4520 = vmax.xlane.f32.xlu1 %v4519_v47 }
0x1538   : > { %4523 = vmax.xlane.f32.xlu1 %v4522_v13 }
0x153c   : > { %4526 = vmax.xlane.f32.xlu1 %v4525_v57 }
0x1540   : > { %4529 = vmax.xlane.f32.xlu1 %v4528_v14 }
0x1544   : > { %4532 = vmax.xlane.f32.xlu1 %v4531_v41 }
0x1548   : > { %4535 = vmax.xlane.f32.xlu1 %v4534_v26 }
0x154c   : > { %4538 = vmax.xlane.f32.xlu1 %v4537_v46 }
0x1554   : > { %v4518_v24 = vpop.xlane.xlu0 %4517 }
0x1555   : > { %v4540_v30 = vsub.f32 %v8095_v23, %v4518_v24 }
0x1557   : > { %v4548_v62 = vmul.f32 1.442695, %v4540_v30 }
0x1559   : > { %7194 = vpow2.f32 %v4548_v62 }
0x1563   : > { %v8570_v50 = vpop.eup %7194 }
0x1564   : > { %4572 = vrot.lane.b32.xlu0 %v8570_v50, %s7289_s24 }
0x15bd   : > { %v4233_v5 = vpop.xlane.xlu1 %4232 }
0x15be   : > { %7196 = vrcp.f32 %v4233_v5 }
0x15c1   : > { %v4521_v42 = vpop.xlane.xlu1 %4520 }
0x15c2   : > { %v4541_v20 = vsub.f32 %v8093_v35, %v4521_v42 }
0x15c4   : > { %v4550_v4 = vmul.f32 1.442695, %v4541_v20 }
0x15c5   : > { %v4524_v59 = vpop.xlane.xlu1 %4523 }
0x15c6   : > { %7198 = vpow2.f32 %v4550_v4  ;;  %v4542_v40 = vsub.f32 %v8103_v44, %v4524_v59 }
0x15c8   : > { %v7197_v28 = vpop.eup %7196  ;;  %v4552_v23 = vmul.f32 1.442695, %v4542_v40 }
0x15c9   : > { %v4235_v56 = vmul.f32 %v7197_v28, %v7193_v54  ;;  %v4527_v60 = vpop.xlane.xlu1 %4526 }
0x15ca   : > { %7200 = vpow2.f32 %v4552_v23  ;;  %v4543_v38 = vsub.f32 %v8101_v3, %v4527_v60 }
0x15cb   : > { %6642 = vmatmul.mubr.msk.f32.vlgmr.msra.gmra.mrb[40].mxu1 %vm2245_vm3, %v4235_v56 }
0x15cc   : > { %v4554_v22 = vmul.f32 1.442695, %v4543_v38  ;;  %6646 = vmatprep.mubr.msk.f32.mxu1 %vm7285_vm6, %v8949_v6  ;;  %6645 = vmatpush3.msra.mxu1 %v4312_v19 }
0x15cd   : > { %v4530_v48 = vpop.xlane.xlu1 %4529 }
0x15ce   : > { %7202 = vpow2.f32 %v4554_v22  ;;  %v4544_v35 = vsub.f32 %v8109_v43, %v4530_v48 }
0x15d0   : > { %v8581_v16 = vpop.eup %7198  ;;  %v4556_v44 = vmul.f32 1.442695, %v4544_v35 }
0x15d1   : > { %4574 = vrot.lane.b32.xlu1 %v8581_v16, %s7289_s24  ;;  %v4533_v32 = vpop.xlane.xlu1 %4532 }
0x15d2   : > { %7204 = vpow2.f32 %v4556_v44  ;;  %v4545_v3 = vsub.f32 %v8107_v55, %v4533_v32 }
0x15d4   : > { %v8586_v1 = vpop.eup %7200  ;;  %v4558_v11 = vmul.f32 1.442695, %v4545_v3 }
0x15d5   : > { %4576 = vrot.lane.b32.xlu1 %v8586_v1, %s7289_s24  ;;  %v4536_v31 = vpop.xlane.xlu1 %4535 }
0x15d6   : > { %7206 = vpow2.f32 %v4558_v11  ;;  %v4546_v43 = vsub.f32 %v8117_v51, %v4536_v31 }
0x15d8   : > { %v8591_v12 = vpop.eup %7202  ;;  %v4560_v18 = vmul.f32 1.442695, %v4546_v43 }
0x15d9   : > { %4578 = vrot.lane.b32.xlu1 %v8591_v12, %s7289_s24  ;;  %v4539_v17 = vpop.xlane.xlu1 %4538 }
0x15da   : > { %7208 = vpow2.f32 %v4560_v18  ;;  %v4547_v55 = vsub.f32 %v8115_v37, %v4539_v17  ;;  %v4573_v37 = vpop.permute.xlu0 %4572 }
0x15db   : > { %v4596_v61 = vsel %vm2245_vm3, %v4573_v37, 0.0 }
0x15dc   : > { %v8596_v49 = vpop.eup %7204  ;;  %v4562_v39 = vmul.f32 1.442695, %v4547_v55 }
0x15dd   : > { %4580 = vrot.lane.b32.xlu0 %v8596_v49, %s7289_s24 }
0x15de   : > { %7210 = vpow2.f32 %v4562_v39 }
0x15e0   : > { %v8600_v29 = vpop.eup %7206 }
0x15e1   : > { %4582 = vrot.lane.b32.xlu1 %v8600_v29, %s7289_s24 }
0x15e4   : > { %v8604_v51 = vpop.eup %7208 }
0x15e5   : > { %4584 = vrot.lane.b32.xlu0 %v8604_v51, %s7289_s24 }
0x15e8   : > { %v8608_v63 = vpop.eup %7210 }
0x15e9   : > { %4586 = vrot.lane.b32.xlu1 %v8608_v63, %s7289_s24 }
0x1604   : > { %4597 = vadd.xlane.f32.xlu0 %v4596_v61 }
0x1643   : > { %v4575_v34 = vpop.permute.xlu1 %4574 }
0x1644   : > { %v4599_v7 = vsel %vm2245_vm3, %v4575_v34, 0.0 }
0x1645   : > { %4600 = vadd.xlane.f32.xlu1 %v4599_v7 }
0x1647   : > { %v4577_v53 = vpop.permute.xlu1 %4576 }
0x1648   : > { %v4602_v54 = vsel %vm2245_vm3, %v4577_v53, 0.0 }
0x1649   : > { %4603 = vadd.xlane.f32.xlu0 %v4602_v54 }
0x164b   : > { %v4579_v52 = vpop.permute.xlu1 %4578 }
0x164c   : > { %v4605_v47 = vsel %vm2245_vm3, %v4579_v52, 0.0 }
0x164d   : > { %4606 = vadd.xlane.f32.xlu0 %v4605_v47 }
0x164f   : > { %v4581_v13 = vpop.permute.xlu0 %4580 }
0x1650   : > { %v4608_v57 = vsel %vm2245_vm3, %v4581_v13, 0.0 }
0x1651   : > { %4609 = vadd.xlane.f32.xlu0 %v4608_v57 }
0x1653   : > { %v4583_v14 = vpop.permute.xlu1 %4582 }
0x1654   : > { %v4611_v41 = vsel %vm2245_vm3, %v4583_v14, 0.0 }
0x1655   : > { %4612 = vadd.xlane.f32.xlu1 %v4611_v41 }
0x1657   : > { %v4585_v26 = vpop.permute.xlu0 %4584 }
0x1658   : > { %v4614_v46 = vsel %vm2245_vm3, %v4585_v26, 0.0 }
0x1659   : > { %4615 = vadd.xlane.f32.xlu0 %v4614_v46 }
0x165b   : > { %v4587_v24 = vpop.permute.xlu1 %4586 }
0x165c   : > { %v4617_v30 = vsel %vm2245_vm3, %v4587_v24, 0.0 }
0x165d   : > { %4618 = vadd.xlane.f32.xlu1 %v4617_v30 }
0x1691   : > { %v4598_v62 = vpop.xlane.xlu0 %4597 }
0x1692   : > { %7212 = vrcp.f32 %v4598_v62 }
0x169c   : > { %v7213_v5 = vpop.eup %7212 }
0x169d   : > { %v4621_v42 = vmul.f32 %v7213_v5, %v8570_v50 }
0x169e   : > { %v4308_v20 = vpop.f32.mrb[40].mxu1 }
0x169f   : > { %4665 = vrot.lane.b32.xlu0 %v4621_v42, %s7289_s24  ;;  %v6643_v4 = vpop.f32.mrb[41].mxu1  ;;  %6647 = vmatmul.mubr.msk.f32.vlgmr.msra.gmra.mrb[42].mxu1 %vm2245_vm3, %v4308_v20  ;;  %v4636_v11 = vsel %vm4515_vm10, %v4621_v42, 0.0 }
0x16a0   : > { %6651 = vmatprep.mubr.msk.f32.mxu1 %vm2245_vm3, %v8469_v21 }
0x16d2   : > { %v4601_v59 = vpop.xlane.xlu1 %4600 }
0x16d3   : > { %7214 = vrcp.f32 %v4601_v59 }
0x16d6   : > { %v4604_v40 = vpop.xlane.xlu0 %4603 }
0x16d7   : > { %7216 = vrcp.f32 %v4604_v40 }
0x16da   : > { %v4607_v28 = vpop.xlane.xlu0 %4606 }
0x16db   : > { %7218 = vrcp.f32 %v4607_v28 }
0x16dd   : > { %v7215_v23 = vpop.eup %7214 }
0x16de   : > { %v4610_v56 = vpop.xlane.xlu0 %4609  ;;  %v4623_v60 = vmul.f32 %v7215_v23, %v8581_v16 }
0x16df   : > { %7220 = vrcp.f32 %v4610_v56 }
0x16e0   : > { %4667 = vrot.lane.b32.xlu1 %v4623_v60, %s7289_s24  ;;  %v4637_v16 = vsel %vm4515_vm10, %v4623_v60, 0.0 }
0x16e1   : > { %v7217_v50 = vpop.eup %7216  ;;  %v4638_v43 = vadd.f32 %v4637_v16, %v4636_v11 }
0x16e2   : > { %v4613_v38 = vpop.xlane.xlu1 %4612  ;;  %v4625_v22 = vmul.f32 %v7217_v50, %v8586_v1 }
0x16e3   : > { %7222 = vrcp.f32 %v4613_v38 }
0x16e4   : > { %4669 = vrot.lane.b32.xlu1 %v4625_v22, %s7289_s24  ;;  %v4639_v1 = vsel %vm4515_vm10, %v4625_v22, 0.0 }
0x16e5   : > { %v7219_v21 = vpop.eup %7218  ;;  %v4640_v17 = vadd.f32 %v4639_v1, %v4638_v43 }
0x16e6   : > { %v4616_v48 = vpop.xlane.xlu0 %4615  ;;  %v4627_v35 = vmul.f32 %v7219_v21, %v8591_v12 }
0x16e7   : > { %7224 = vrcp.f32 %v4616_v48 }
0x16e8   : > { %4671 = vrot.lane.b32.xlu1 %v4627_v35, %s7289_s24  ;;  %v4641_v12 = vsel %vm4515_vm10, %v4627_v35, 0.0 }
0x16e9   : > { %v7221_v44 = vpop.eup %7220 }
0x16ea   : > { %v4619_v32 = vpop.xlane.xlu1 %4618  ;;  %v4629_v3 = vmul.f32 %v7221_v44, %v8596_v49  ;;  %v4642_v49 = vadd.f32 %v4641_v12, %v4640_v17 }
0x16eb   : > { %7226 = vrcp.f32 %v4619_v32 }
0x16ec   : > { %4673 = vrot.lane.b32.xlu0 %v4629_v3, %s7289_s24  ;;  %v4643_v55 = vsel %vm4515_vm10, %v4629_v3, 0.0 }
0x16ed   : > { %v7223_v31 = vpop.eup %7222  ;;  %v4644_v19 = vadd.f32 %v4643_v55, %v4642_v49 }
0x16ee   : > { %v4631_v18 = vmul.f32 %v7223_v31, %v8600_v29 }
0x16f0   : > { %4675 = vrot.lane.b32.xlu1 %v4631_v18, %s7289_s24  ;;  %v4645_v37 = vsel %vm4515_vm10, %v4631_v18, 0.0 }
0x16f1   : > { %v7225_v39 = vpop.eup %7224  ;;  %v4646_v53 = vadd.f32 %v4645_v37, %v4644_v19 }
0x16f2   : > { %v4633_v61 = vmul.f32 %v7225_v39, %v8604_v51 }
0x16f4   : > { %4677 = vrot.lane.b32.xlu0 %v4633_v61, %s7289_s24  ;;  %v4647_v34 = vsel %vm4515_vm10, %v4633_v61, 0.0 }
0x16f5   : > { %v7227_v7 = vpop.eup %7226  ;;  %v4648_v54 = vadd.f32 %v4647_v34, %v4646_v53 }
0x16f6   : > { %v4635_v29 = vmul.f32 %v7227_v7, %v8608_v63  ;;  %v5102_v7 = vld [vmem:[%s8926_s7 + $0x18] sm:$0xff] }
0x16f8   : > { %v4649_v52 = vsel %vm4515_vm10, %v4635_v29, 0.0  ;;  %4679 = vrot.lane.b32.xlu1 %v4635_v29, %s7289_s24  ;;  %7047 = vrot.lane.b32.xlu0 %v8064_v8, %s7289_s24 }
0x16f9   : > { %v4650_v47 = vadd.f32 %v4649_v52, %v4648_v54 }
0x16fb   : > { %v4651_v13 = vrot.slane %v4650_v47, 4 }
0x16fc   : > { %7052 = vrot.lane.b32.xlu1 %v8068_v27, %s7289_s24  ;;  %7057 = vrot.lane.b32.xlu0 %v8073_v10, %s7289_s24 }
0x16fd   : > { %v4652_v51 = vadd.f32 %v4651_v13, %v4650_v47  ;;  %v6031_v47 = vld [vmem:[%s8927_s8] ss:$0 sm:$0xff] }
0x16ff   : > { %v4653_v57 = vrot.slane %v4652_v51, 2 }
0x1700   : > { %7062 = vrot.lane.b32.xlu1 %v8078_v25, %s7289_s24 }
0x1701   : > { %v4654_v63 = vadd.f32 %v4653_v57, %v4652_v51 }
0x1703   : > { %v4655_v14 = vrot.slane %v4654_v63, 1 }
0x1705   : > { %v4656_v41 = vadd.f32 %v4655_v14, %v4654_v63  ;;  %v7266_v14 = vld [vmem:[%s7376_s30 + $0x8] sm:$0xff] }
0x1707   : > { %4819 = vrot.lane.b32.xlu1 %v4656_v41, %s7289_s24 }
0x1711   : > { %v8659_v26 = vpop.permute.xlu0 %4665 }
0x171a   : > { %4689 = vxpose.xlu0.b32.start [1/8] (short) (narrow) %v8659_v26, 8 }
0x1752   : > { %v8662_v8 = vpop.permute.xlu1 %4667 }
0x1753   : > { %4690 = vxpose.xlu0.b32.cont [2/8] (short) (narrow) %v8662_v8, 8 }
0x1756   : > { %v8665_v27 = vpop.permute.xlu1 %4669 }
0x1757   : > { %4691 = vxpose.xlu0.b32.cont [3/8] (short) (narrow) %v8665_v27, 8 }
0x175a   : > { %v8668_v10 = vpop.permute.xlu1 %4671 }
0x175b   : > { %4692 = vxpose.xlu0.b32.cont [4/8] (short) (narrow) %v8668_v10, 8 }
0x175e   : > { %v8671_v25 = vpop.permute.xlu0 %4673 }
0x175f   : > { %4693 = vxpose.xlu0.b32.cont [5/8] (short) (narrow) %v8671_v25, 8 }
0x1762   : > { %v8674_v46 = vpop.permute.xlu1 %4675 }
0x1763   : > { %4694 = vxpose.xlu0.b32.cont [6/8] (short) (narrow) %v8674_v46, 8 }
0x1766   : > { %v8677_v24 = vpop.permute.xlu0 %4677 }
0x1767   : > { %4695 = vxpose.xlu0.b32.cont [7/8] (short) (narrow) %v8677_v24, 8 }
0x176a   : > { %v8680_v30 = vpop.permute.xlu1 %4679  ;;  %v7048_v62 = vpop.permute.xlu0 %7047 }
0x176b   : > { %4696 = vxpose.xlu0.b32.end [8/8] (short) (narrow) %v8680_v30, 8  ;;  %v7050_v42 = vunpack.i.h.bf16 %v7048_v62  ;;  %v7049_v20 = vunpack.i.l.bf16 %v7048_v62  ;;  %v7268_v62 = vld [vmem:[%s7376_s30 + $0x18] sm:$0xff] }
0x176d   : > { %v6873_v40 = vpack.c.bf16 %v7050_v42, %v7049_v20 }
0x176e   : > { %v7053_v5 = vpop.permute.xlu1 %7052  ;;  %v7058_v60 = vpop.permute.xlu0 %7057 }
0x176f   : > { %v7055_v28 = vunpack.i.h.bf16 %v7053_v5  ;;  %v7054_v23 = vunpack.i.l.bf16 %v7053_v5  ;;  %v7060_v38 = vunpack.i.h.bf16 %v7058_v60  ;;  %v7059_v22 = vunpack.i.l.bf16 %v7058_v60  ;;  %v7270_v60 = vld [vmem:[%s7376_s30 + $0x28] sm:$0xff] }
0x1771   : > { %v6876_v50 = vpack.c.bf16 %v7055_v28, %v7054_v23 }
0x1772   : > { %v4382_v4 = vpop.f32.mrb[42].mxu1  ;;  %v7063_v56 = vpop.permute.xlu1 %7062 }
0x1773   : > { %v6648_v59 = vpop.f32.mrb[43].mxu1  ;;  %6649 = vmatprep.subr.mxu1 %v4382_v4  ;;  %v7065_v48 = vunpack.i.h.bf16 %v7063_v56 }
0x1774   : > { %6650 = vmatpush3.msra.mxu1 %v4382_v4  ;;  %v7269_v59 = vld [vmem:[%s7376_s30 + $0x10] sm:$0xff] }
0x1775   : > { %6652 = vmatmul.mubr.msk.f32.vlgmr.msra.gmra.mrb[26].mxu1 %vm2245_vm3, %v8472_v0  ;;  %6872 = vmatprep.subr.bf16.mxu1 %v7283_v9  ;;  %v6879_v0 = vpack.c.bf16 %v7060_v38, %v7059_v22 }
0x1776   : > { %6654 = vmatprep.mubr.msk.f32.mxu1 %vm2245_vm3, %v8475_v33  ;;  %6874 = vmatpush3.bf16.msra.mxu1 %v6873_v40  ;;  %v7064_v33 = vunpack.i.l.bf16 %v7063_v56 }
0x1777   : > { %6875 = vmatprep.subr.bf16.mxu1 %v7283_v9 }
0x1779   : > { %v4820_v21 = vpop.permute.xlu1 %4819  ;;  %6655 = vmatmul.mubr.msk.f32.gmra.mrb[28].mxu1 %vm2245_vm3, %v8478_v45  ;;  %v6882_v45 = vpack.c.bf16 %v7065_v48, %v7064_v33 }
0x177a   : > { %4822 = vxpose.xlu1.b32.start.end [1/1] (short) (narrow) %v4820_v21, 8  ;;  %6657 = vmatprep.mubr.msk.f32.mxu1 %vm2245_vm3, %v8481_v15  ;;  %v7271_v21 = vld [vmem:[%s7376_s30 + $0x20] sm:$0xff] }
0x177b   : > { %6877 = vmatpush3.bf16.msra.mxu1 %v6876_v50 }
0x177c   : > { %6878 = vmatprep.subr.bf16.mxu1 %v7283_v9 }
0x177d   : > { %6658 = vmatmul.mubr.msk.f32.gmra.mrb[30].mxu1 %vm2245_vm3, %v8484_v36 }
0x177e   : > { %6660 = vmatprep.mubr.msk.f32.mxu1 %vm2245_vm3, %v8487_v58 }
0x177f   : > { %6880 = vmatpush3.bf16.msra.mxu1 %v6879_v0 }
0x1780   : > { %6881 = vmatprep.subr.bf16.mxu1 %v7283_v9  ;;  %v6017_v9 = vld [vmem:[%s8925_s6 + $0x18] sm:$0xff] }
0x1781   : > { %6661 = vmatmul.mubr.msk.f32.gmra.mrb[32].mxu1 %vm2245_vm3, %v8489_v2 }
0x1782   : > { %6679 = vmatprep.mubr.msk.f32.mxu1 %vm7285_vm6, %v8949_v6 }
0x1783   : > { %6883 = vmatpush3.bf16.msra.mxu1 %v6882_v45 }
0x1784   : > { %6682 = vmatprep.subr.mxu1 %v8949_v6 }
0x17cf   : > { %v4705_v15 = vpop.trf.xlu0 }
0x17d0   : > { %6680 = vmatmul.mubr.msk.f32.vlgmr.msra.gmra.mrb[44].mxu1 %vm2387_vm7, %v4705_v15  ;;  %v7272_v15 = vld [vmem:[%s7376_s30 + $0x30] sm:$0xff] }
0x17d1   : > { %6684 = vmatprep.mubr.msk.f32.mxu1 %vm7285_vm6, %v8949_v6  ;;  %6683 = vmatpush3.msra.mxu1 %v6017_v9  ;;  %v7273_v9 = vld [vmem:[%s7376_s30 + $0x38] sm:$0xff] }
0x17d2   : > { %6692 = vmatprep.subr.mxu1 %v8949_v6 }
0x17fa   : > { %v4838_v36 = vpop.trf.xlu1 }
0x17fb   : > { %v4854_v58 = vadd.f32 1e-05, %v4838_v36 }
0x17fd   : > { %4857 = vperm.xlu1 %7004, %v4854_v58  }
0x187c   : > { %v4858_v2 = vpop.permute.xlu1 %4857 }
0x187d   : > { %7228 = vrcp.f32 %v4858_v2 }
0x1887   : > { %v7229_v35 = vpop.eup %7228 }
0x18a3   : > { %v4814_v44 = vpop.f32.mrb[44].mxu1 }
0x18a4   : > { %v4861_v16 = vmul.f32 %v7229_v35, %v4814_v44  ;;  %v6681_v32 = vpop.f32.mrb[45].mxu1 }
0x18a6   : > { %6685 = vmatmul.mubr.msk.f32.vlgmr.msra.gmra.mrb[46].mxu1 %vm2245_vm3, %v4861_v16 }
0x18a7   : > { %6694 = vmatprep.mubr.msk.f32.mxu1 %vm7285_vm6, %v8949_v6 }
0x1979   : > { %v4933_v3 = vpop.f32.mrb[46].mxu1 }
0x197a   : > { %4938 = vrot.lane.b32.xlu0 %v4933_v3, %s7287_s14  ;;  %v6686_v11 = vpop.f32.mrb[47].mxu1 }
0x19ec   : > { %v4939_v1 = vpop.permute.xlu0 %4938 }
0x19ed   : > { %6688 = vmatpush3.xpose.msk.msra.mxu0 %vm2245_vm3, %v4939_v1 }
0x19ee   : > { %6697 = vmatprep.subr.mxu0 %v8949_v6 }
0x19f0   : > { %6690 = vmatmul.mubr.msk.f32.vlgmr.msra.gmra.mrb[10].mxu0 %vm2245_vm3, %v4933_v3 }
0x19f1   : > { %6699 = vmatprep.mubr.msk.f32.mxu0 %vm7285_vm6, %v8949_v6  ;;  %6698 = vmatpush3.msra.mxu0 %v5102_v7 }
0x1ac3   : > { %v5010_v31 = vpop.f32.mrb[10].mxu0 }
0x1ac4   : > { %v5014_v43 = vmul.f32 0.35355338, %v5010_v31  ;;  %v6691_v12 = vpop.f32.mrb[11].mxu0 }
0x1ac6   : > { %v5015_v18 = vsel %vm2245_vm3, %v5014_v43, -inf }
0x1ac7   : > { %5016 = vmax.xlane.f32.xlu1 %v5015_v18 }
0x1ad8   : > { %5026 = vrot.lane.b32.xlu1 %v4933_v3, %s7288_s15 }
0x1b54   : > { %v5017_v17 = vpop.xlane.xlu1 %5016 }
0x1b55   : > { %v5018_v55 = vsub.f32 %v5014_v43, %v5017_v17 }
0x1b57   : > { %v5019_v39 = vmul.f32 1.442695, %v5018_v55 }
0x1b58   : > { %v5027_v49 = vpop.permute.xlu1 %5026 }
0x1b59   : > { %7230 = vpow2.f32 %v5019_v39  ;;  %6693 = vmatpush3.msra.mxu1 %v5027_v49 }
0x1b63   : > { %v7231_v37 = vpop.eup %7230 }
0x1b64   : > { %v5021_v61 = vsel %vm2245_vm3, %v7231_v37, 0.0 }
0x1b65   : > { %5022 = vadd.xlane.f32.xlu0 %v5021_v61 }
0x1bf2   : > { %v5023_v19 = vpop.xlane.xlu0 %5022 }
0x1bf3   : > { %7232 = vrcp.f32 %v5023_v19 }
0x1bfd   : > { %v7233_v6 = vpop.eup %7232 }
0x1bfe   : > { %v5025_v34 = vmul.f32 %v7233_v6, %v7231_v37 }
0x1c00   : > { %6695 = vmatmul.mubr.msk.f32.vlgmr.msra.gmra.mrb[48].mxu1 %vm2245_vm3, %v5025_v34 }
0x1c01   : > { %6704 = vmatprep.mubr.msk.f32.mxu1 %vm2245_vm3, %v8659_v26  ;;  %v7267_v26 = vld [vmem:[%s7376_s30] sm:$0xff] }
0x1cd3   : > { %v5098_v53 = vpop.f32.mrb[48].mxu1 }
0x1cd4   : > { %v6696_v29 = vpop.f32.mrb[49].mxu1  ;;  %6700 = vmatmul.mubr.msk.f32.vlgmr.msra.gmra.mrb[12].mxu0 %vm2245_vm3, %v5098_v53 }
0x1da7   : > { %v5172_v54 = vpop.f32.mrb[12].mxu0 }
0x1da8   : > { %v6701_v52 = vpop.f32.mrb[13].mxu0  ;;  %6702 = vmatprep.subr.mxu1 %v5172_v54 }
0x1da9   : > { %6703 = vmatpush3.msra.mxu1 %v5172_v54 }
0x1daa   : > { %6705 = vmatmul.mubr.msk.f32.vlgmr.msra.gmra.mrb[26].mxu1 %vm2245_vm3, %v8662_v8 }
0x1dab   : > { %6707 = vmatprep.mubr.msk.f32.mxu1 %vm2245_vm3, %v8665_v27 }
0x1dae   : > { %6708 = vmatmul.mubr.msk.f32.gmra.mrb[28].mxu1 %vm2245_vm3, %v8668_v10 }
0x1daf   : > { %6710 = vmatprep.mubr.msk.f32.mxu1 %vm2245_vm3, %v8671_v25 }
0x1db2   : > { %6711 = vmatmul.mubr.msk.f32.gmra.mrb[30].mxu1 %vm2245_vm3, %v8674_v46 }
0x1db3   : > { %6713 = vmatprep.mubr.msk.f32.mxu1 %vm2245_vm3, %v8677_v24 }
0x1db6   : > { %6714 = vmatmul.mubr.msk.f32.gmra.mrb[32].mxu1 %vm2245_vm3, %v8680_v30 }
0x1e7d   : > { %v6706_v13 = vpop.f32.mrb[26].mxu1 }
0x1e7e   : > { %v5313_v51 = vadd.f32 %v6706_v13, %v6031_v47  ;;  %v5258_v57 = vpop.f32.mrb[27].mxu1 }
0x1e7f   : > { %v5312_v63 = vadd.f32 %v6031_v47, %v5258_v57 }
0x1e80   : > { %v8748_v41 = vadd.f32 %v7266_v14, %v5313_v51 }
0x1e81   : > { %v8751_v8 = vadd.f32 %v7267_v26, %v5312_v63  ;;  %v6709_v27 = vpop.f32.mrb[28].mxu1 }
0x1e82   : > { %v5315_v10 = vadd.f32 %v6709_v27, %v6031_v47  ;;  %v5268_v25 = vpop.f32.mrb[29].mxu1  ;;  %v5333_v46 = vsel %vm451_vm0, %v8748_v41, 0.0 }
0x1e83   : > { %v5314_v24 = vadd.f32 %v6031_v47, %v5268_v25  ;;  %5334 = vadd.xlane.f32.xlu1 %v5333_v46  ;;  %v5330_v30 = vsel %vm451_vm0, %v8751_v8, 0.0 }
0x1e84   : > { %v8758_v5 = vadd.f32 %v7268_v62, %v5315_v10  ;;  %5331 = vadd.xlane.f32.xlu0 %v5330_v30 }
0x1e85   : > { %v6712_v42 = vpop.f32.mrb[30].mxu1  ;;  %v8763_v40 = vadd.f32 %v7269_v59, %v5314_v24  ;;  %v5458_v59 = vld [vmem:[%s8928_s9] sm:$0xff] }
0x1e86   : > { %v5278_v20 = vpop.f32.mrb[31].mxu1  ;;  %v5339_v4 = vsel %vm451_vm0, %v8758_v5, 0.0  ;;  %v5317_v28 = vadd.f32 %v6712_v42, %v6031_v47 }
0x1e87   : > { %v5316_v38 = vadd.f32 %v6031_v47, %v5278_v20  ;;  %v5336_v22 = vsel %vm451_vm0, %v8763_v40, 0.0 }
0x1e88   : > { %5340 = vadd.xlane.f32.xlu0 %v5339_v4  ;;  %v8766_v50 = vadd.f32 %v7270_v60, %v5317_v28  ;;  %v5459_v28 = vld [vmem:[%s8928_s9 + $0x8] sm:$0xff]  ;;  %v5461_v60 = vld [vmem:[%s8928_s9 + $0x18] sm:$0xff] }
0x1e89   : > { %v6715_v23 = vpop.f32.mrb[32].mxu1  ;;  %v8771_v0 = vadd.f32 %v7271_v21, %v5316_v38 }
0x1e8a   : > { %v5288_v56 = vpop.f32.mrb[33].mxu1  ;;  %v5345_v33 = vsel %vm451_vm0, %v8766_v50, 0.0  ;;  %v5319_v45 = vadd.f32 %v6715_v23, %v6031_v47  ;;  %v6884_v23 = vpack.c.bf16 %v5459_v28, %v5458_v59 }
0x1e8b   : > { %v5318_v48 = vadd.f32 %v6031_v47, %v5288_v56  ;;  %v5342_v58 = vsel %vm451_vm0, %v8771_v0, 0.0  ;;  %v5460_v56 = vld [vmem:[%s8928_s9 + $0x10] sm:$0xff] }
0x1e8c   : > { %5337 = vadd.xlane.f32.xlu0 %v5336_v22  ;;  %v8781_v2 = vadd.f32 %v7273_v9, %v5319_v45  ;;  %6885 = vmatprep.subr.bf16.mxu0 %v6884_v23  ;;  %v6888_v38 = vpack.c.bf16 %v5461_v60, %v5460_v56 }
0x1e8d   : > { %v8776_v36 = vadd.f32 %v7272_v15, %v5318_v48  ;;  %6887 = vmatpush3.bf16.msra.mxu0 %v6884_v23 }
0x1e8e   : > { %v5351_v44 = vsel %vm451_vm0, %v8781_v2, 0.0  ;;  %6889 = vmatprep.subr.bf16.mxu0 %v6888_v38 }
0x1e8f   : > { %v5348_v35 = vsel %vm451_vm0, %v8776_v36, 0.0 }
0x1e90   : > { %5346 = vadd.xlane.f32.xlu0 %v5345_v33 }
0x1e91   : > { %6891 = vmatpush3.bf16.msra.mxu0 %v6888_v38 }
0x1e94   : > { %5343 = vadd.xlane.f32.xlu0 %v5342_v58 }
0x1e98   : > { %5349 = vadd.xlane.f32.xlu0 %v5348_v35 }
0x1e9c   : > { %5352 = vadd.xlane.f32.xlu0 %v5351_v44 }
0x1f10   : > { %v5335_v16 = vpop.xlane.xlu1 %5334 }
0x1f11   : > { %v5355_v32 = vmul.f32 0.03125, %v5335_v16  ;;  %v5332_v3 = vpop.xlane.xlu0 %5331 }
0x1f12   : > { %v5354_v11 = vmul.f32 0.03125, %v5332_v3 }
0x1f13   : > { %v8788_v1 = vsub.f32 %v8748_v41, %v5355_v32 }
0x1f14   : > { %v8791_v31 = vsub.f32 %v8751_v8, %v5354_v11 }
0x1f15   : > { %v5341_v43 = vpop.xlane.xlu0 %5340  ;;  %v5371_v12 = vmul.f32 %v8788_v1, %v8788_v1 }
0x1f16   : > { %v5357_v18 = vmul.f32 0.03125, %v5341_v43  ;;  %v5370_v55 = vmul.f32 %v8791_v31, %v8791_v31 }
0x1f17   : > { %v5381_v17 = vsel %vm451_vm0, %v5371_v12, 0.0 }
0x1f18   : > { %v8799_v39 = vsub.f32 %v8758_v5, %v5357_v18  ;;  %5382 = vadd.xlane.f32.xlu0 %v5381_v17  ;;  %v5378_v19 = vsel %vm451_vm0, %v5370_v55, 0.0 }
0x1f19   : > { %v5338_v49 = vpop.xlane.xlu0 %5337 }
0x1f1a   : > { %v5356_v37 = vmul.f32 0.03125, %v5338_v49  ;;  %v5373_v61 = vmul.f32 %v8799_v39, %v8799_v39  ;;  %v6032_v49 = vld [vmem:[%s8920_s1 + $0x2] ss:$0 sm:$0xff] }
0x1f1c   : > { %v8805_v6 = vsub.f32 %v8763_v40, %v5356_v37  ;;  %5379 = vadd.xlane.f32.xlu0 %v5378_v19  ;;  %v5387_v34 = vsel %vm451_vm0, %v5373_v61, 0.0 }
0x1f1d   : > { %5388 = vadd.xlane.f32.xlu1 %v5387_v34  ;;  %v5347_v7 = vpop.xlane.xlu0 %5346 }
0x1f1e   : > { %v5359_v53 = vmul.f32 0.03125, %v5347_v7  ;;  %v5372_v29 = vmul.f32 %v8805_v6, %v8805_v6 }
0x1f20   : > { %v8811_v54 = vsub.f32 %v8766_v50, %v5359_v53  ;;  %v5384_v52 = vsel %vm451_vm0, %v5372_v29, 0.0 }
0x1f21   : > { %v5344_v47 = vpop.xlane.xlu0 %5343  ;;  %5385 = vadd.xlane.f32.xlu0 %v5384_v52 }
0x1f22   : > { %v5358_v13 = vmul.f32 0.03125, %v5344_v47  ;;  %v5375_v51 = vmul.f32 %v8811_v54, %v8811_v54 }
0x1f24   : > { %v8817_v57 = vsub.f32 %v8771_v0, %v5358_v13  ;;  %v5393_v63 = vsel %vm451_vm0, %v5375_v51, 0.0 }
0x1f25   : > { %5394 = vadd.xlane.f32.xlu1 %v5393_v63  ;;  %v5350_v14 = vpop.xlane.xlu0 %5349 }
0x1f26   : > { %v5360_v26 = vmul.f32 0.03125, %v5350_v14  ;;  %v5374_v27 = vmul.f32 %v8817_v57, %v8817_v57 }
0x1f28   : > { %v8823_v10 = vsub.f32 %v8776_v36, %v5360_v26  ;;  %v5390_v25 = vsel %vm451_vm0, %v5374_v27, 0.0 }
0x1f29   : > { %5391 = vadd.xlane.f32.xlu0 %v5390_v25  ;;  %v5353_v46 = vpop.xlane.xlu0 %5352 }
0x1f2a   : > { %v5361_v24 = vmul.f32 0.03125, %v5353_v46  ;;  %v5376_v30 = vmul.f32 %v8823_v10, %v8823_v10 }
0x1f2c   : > { %v8829_v62 = vsub.f32 %v8781_v2, %v5361_v24  ;;  %v5396_v42 = vsel %vm451_vm0, %v5376_v30, 0.0 }
0x1f2d   : > { %5397 = vadd.xlane.f32.xlu0 %v5396_v42 }
0x1f2e   : > { %v5377_v20 = vmul.f32 %v8829_v62, %v8829_v62 }
0x1f30   : > { %v5399_v4 = vsel %vm451_vm0, %v5377_v20, 0.0 }
0x1f31   : > { %5400 = vadd.xlane.f32.xlu1 %v5399_v4 }
0x1fa5   : > { %v5383_v22 = vpop.xlane.xlu0 %5382 }
0x1fa6   : > { %v5403_v21 = vmul.f32 0.03125, %v5383_v22 }
0x1fa8   : > { %v5411_v48 = vadd.f32 1e-05, %v5403_v21 }
0x1fa9   : > { %v5380_v33 = vpop.xlane.xlu0 %5379 }
0x1faa   : > { %7234 = vrsqrt.f32 %v5411_v48  ;;  %v5402_v45 = vmul.f32 0.03125, %v5380_v33  ;;  %v5389_v15 = vpop.xlane.xlu1 %5388 }
0x1fab   : > { %v5405_v58 = vmul.f32 0.03125, %v5389_v15 }
0x1fac   : > { %v5410_v9 = vadd.f32 1e-05, %v5402_v45  ;;  %v5639_v45 = vld [vmem:[%s8930_s11 + $0x8] sm:$0xff] }
0x1fad   : > { %v5413_v35 = vadd.f32 1e-05, %v5405_v58  ;;  %v5641_v58 = vld [vmem:[%s8930_s11 + $0x18] sm:$0xff] }
0x1fae   : > { %7236 = vrsqrt.f32 %v5410_v9  ;;  %v5386_v44 = vpop.xlane.xlu0 %5385 }
0x1faf   : > { %7238 = vrsqrt.f32 %v5413_v35  ;;  %v5404_v16 = vmul.f32 0.03125, %v5386_v44  ;;  %v6034_v35 = vld [vmem:[%s8929_s10] ss:$0 sm:$0xff] }
0x1fb1   : > { %v5412_v32 = vadd.f32 1e-05, %v5404_v16 }
0x1fb2   : > { %v5395_v3 = vpop.xlane.xlu1 %5394 }
0x1fb3   : > { %7240 = vrsqrt.f32 %v5412_v32  ;;  %v5407_v11 = vmul.f32 0.03125, %v5395_v3 }
0x1fb4   : > { %v7235_v43 = vpop.eup %7234 }
0x1fb5   : > { %v5415_v12 = vadd.f32 1e-05, %v5407_v11  ;;  %v5427_v18 = vmul.f32 %v7235_v43, %v8788_v1  ;;  %v6033_v1 = vld [vmem:[%s8920_s1 + $0x3] ss:$0 sm:$0xff] }
0x1fb6   : > { %v5392_v17 = vpop.xlane.xlu0 %5391 }
0x1fb7   : > { %7242 = vrsqrt.f32 %v5415_v12  ;;  %v5406_v55 = vmul.f32 0.03125, %v5392_v17  ;;  %v5439_v53 = vmul.f32 %v6032_v49, %v5427_v18 }
0x1fb8   : > { %v7237_v37 = vpop.eup %7236 }
0x1fb9   : > { %v7239_v61 = vpop.eup %7238  ;;  %v5414_v19 = vadd.f32 1e-05, %v5406_v55  ;;  %v5426_v34 = vmul.f32 %v7237_v37, %v8791_v31  ;;  %v5451_v26 = vadd.f32 %v6033_v1, %v5439_v53 }
0x1fba   : > { %v5398_v7 = vpop.xlane.xlu0 %5397  ;;  %v5429_v47 = vmul.f32 %v7239_v61, %v8799_v39 }
0x1fbb   : > { %7244 = vrsqrt.f32 %v5414_v19  ;;  %v5408_v29 = vmul.f32 0.03125, %v5398_v7  ;;  %v5438_v52 = vmul.f32 %v6032_v49, %v5426_v34 }
0x1fbc   : > { %v5441_v25 = vmul.f32 %v6032_v49, %v5429_v47 }
0x1fbd   : > { %v7241_v13 = vpop.eup %7240  ;;  %v5416_v51 = vadd.f32 1e-05, %v5408_v29  ;;  %v5450_v63 = vadd.f32 %v6033_v1, %v5438_v52 }
0x1fbe   : > { %v5401_v14 = vpop.xlane.xlu1 %5400  ;;  %v5428_v27 = vmul.f32 %v7241_v13, %v8805_v6  ;;  %v5453_v39 = vadd.f32 %v6033_v1, %v5441_v25 }
0x1fbf   : > { %7246 = vrsqrt.f32 %v5416_v51  ;;  %v5409_v31 = vmul.f32 0.03125, %v5401_v14  ;;  %6724 = vmatprep.mubr.msk.f32.mxu0 %vm451_vm0, %v5450_v63 }
0x1fc0   : > { %6725 = vmatmul.mubr.msk.f32.vlgmr.msra.gmra.mrb[14].mxu0 %vm451_vm0, %v5451_v26  ;;  %v5440_v46 = vmul.f32 %v6032_v49, %v5428_v27 }
0x1fc1   : > { %v7243_v24 = vpop.eup %7242  ;;  %v5417_v30 = vadd.f32 1e-05, %v5409_v31 }
0x1fc2   : > { %v5452_v42 = vadd.f32 %v6033_v1, %v5440_v46  ;;  %v5431_v20 = vmul.f32 %v7243_v24, %v8811_v54 }
0x1fc3   : > { %7248 = vrsqrt.f32 %v5417_v30 }
0x1fc4   : > { %6727 = vmatprep.mubr.msk.f32.mxu0 %vm451_vm0, %v5452_v42  ;;  %v5443_v59 = vmul.f32 %v6032_v49, %v5431_v20 }
0x1fc5   : > { %v7245_v4 = vpop.eup %7244  ;;  %6728 = vmatmul.mubr.msk.f32.gmra.mrb[16].mxu0 %vm451_vm0, %v5453_v39 }
0x1fc6   : > { %v5430_v6 = vmul.f32 %v7245_v4, %v8817_v57  ;;  %v5455_v38 = vadd.f32 %v6033_v1, %v5443_v59 }
0x1fc8   : > { %v5442_v28 = vmul.f32 %v6032_v49, %v5430_v6 }
0x1fc9   : > { %v7247_v23 = vpop.eup %7246 }
0x1fca   : > { %v5454_v56 = vadd.f32 %v6033_v1, %v5442_v28  ;;  %v5432_v60 = vmul.f32 %v7247_v23, %v8823_v10  ;;  %v5638_v10 = vld [vmem:[%s8930_s11] sm:$0xff] }
0x1fcb   : > { %v6892_v15 = vpack.c.bf16 %v5639_v45, %v5638_v10 }
0x1fcc   : > { %6730 = vmatprep.mubr.msk.f32.mxu0 %vm451_vm0, %v5454_v56  ;;  %v5444_v22 = vmul.f32 %v6032_v49, %v5432_v60 }
0x1fcd   : > { %v7249_v21 = vpop.eup %7248  ;;  %6731 = vmatmul.mubr.msk.f32.gmra.mrb[18].mxu0 %vm451_vm0, %v5455_v38  ;;  %6893 = vmatprep.subr.bf16.mxu1 %v6892_v15 }
0x1fce   : > { %v5456_v54 = vadd.f32 %v6033_v1, %v5444_v22  ;;  %v5433_v48 = vmul.f32 %v7249_v21, %v8829_v62  ;;  %6895 = vmatpush3.bf16.msra.mxu1 %v6892_v15  ;;  %v5640_v62 = vld [vmem:[%s8930_s11 + $0x10] sm:$0xff] }
0x1fcf   : > { %v6896_v9 = vpack.c.bf16 %v5641_v58, %v5640_v62 }
0x1fd0   : > { %6733 = vmatprep.mubr.msk.f32.mxu0 %vm451_vm0, %v5456_v54  ;;  %v5445_v33 = vmul.f32 %v6032_v49, %v5433_v48 }
0x1fd1   : > { %6897 = vmatprep.subr.bf16.mxu1 %v6896_v9 }
0x1fd2   : > { %v5457_v57 = vadd.f32 %v6033_v1, %v5445_v33  ;;  %6899 = vmatpush3.bf16.msra.mxu1 %v6896_v9 }
0x1fd4   : > { %6734 = vmatmul.mubr.msk.f32.gmra.mrb[20].mxu0 %vm451_vm0, %v5457_v57 }
0x2093   : > { %v6726_v44 = vpop.f32.mrb[14].mxu0 }
0x2094   : > { %v5565_v16 = vadd.f32 %v6726_v44, %v6034_v35  ;;  %v5559_v32 = vpop.f32.mrb[15].mxu0  ;;  %v6043_v44 = vld [vmem:[%s8931_s12] ss:$0 sm:$0xff] }
0x2095   : > { %v5560_v3 = vadd.f32 %v6034_v35, %v5559_v32 }
0x2096   : > { %v5607_v11 = vmul.f32 0.70710677, %v5565_v16  ;;  %v5599_v63 = vmul.f32 0.5, %v5565_v16 }
0x2097   : > { %v5606_v43 = vmul.f32 0.70710677, %v5560_v3  ;;  %v5598_v47 = vmul.f32 0.5, %v5560_v3 }
0x2098   : > { %7250 = verf.f32 %v5607_v11  ;;  %v6729_v12 = vpop.f32.mrb[16].mxu0 }
0x2099   : > { %7252 = verf.f32 %v5606_v43  ;;  %v5575_v18 = vadd.f32 %v6729_v12, %v6034_v35  ;;  %v5569_v17 = vpop.f32.mrb[17].mxu0 }
0x209a   : > { %v5570_v55 = vadd.f32 %v6034_v35, %v5569_v17 }
0x209b   : > { %v5609_v49 = vmul.f32 0.70710677, %v5575_v18  ;;  %v5601_v4 = vmul.f32 0.5, %v5575_v18 }
0x209c   : > { %v5608_v37 = vmul.f32 0.70710677, %v5570_v55  ;;  %v5600_v42 = vmul.f32 0.5, %v5570_v55 }
0x209d   : > { %7254 = verf.f32 %v5609_v49 }
0x209e   : > { %7256 = verf.f32 %v5608_v37 }
0x20a0   : > { %v6732_v61 = vpop.f32.mrb[18].mxu0 }
0x20a1   : > { %v5585_v19 = vadd.f32 %v6732_v61, %v6034_v35  ;;  %v5579_v34 = vpop.f32.mrb[19].mxu0 }
0x20a2   : > { %v7251_v7 = vpop.eup %7250  ;;  %v5580_v53 = vadd.f32 %v6034_v35, %v5579_v34 }
0x20a3   : > { %v7253_v29 = vpop.eup %7252  ;;  %v5623_v1 = vadd.f32 1.0, %v7251_v7  ;;  %v5611_v52 = vmul.f32 0.70710677, %v5585_v19  ;;  %v5603_v54 = vmul.f32 0.5, %v5585_v19 }
0x20a4   : > { %v5622_v13 = vadd.f32 1.0, %v7253_v29  ;;  %v5610_v51 = vmul.f32 0.70710677, %v5580_v53  ;;  %v5602_v22 = vmul.f32 0.5, %v5580_v53 }
0x20a5   : > { %7258 = verf.f32 %v5611_v52  ;;  %v5631_v27 = vmul.f32 %v5623_v1, %v5599_v63 }
0x20a6   : > { %v5630_v14 = vmul.f32 %v5622_v13, %v5598_v47  ;;  %7260 = verf.f32 %v5610_v51 }
0x20a7   : > { %v7255_v26 = vpop.eup %7254  ;;  %v6735_v31 = vpop.f32.mrb[20].mxu0 }
0x20a8   : > { %v7257_v25 = vpop.eup %7256  ;;  %v5625_v46 = vadd.f32 1.0, %v7255_v26  ;;  %v5595_v24 = vadd.f32 %v6735_v31, %v6034_v35  ;;  %v5589_v30 = vpop.f32.mrb[21].mxu0  ;;  %6744 = vmatprep.mubr.msk.f32.mxu1 %vm451_vm0, %v5630_v14 }
0x20a9   : > { %v5624_v39 = vadd.f32 1.0, %v7257_v25  ;;  %v5590_v20 = vadd.f32 %v6034_v35, %v5589_v30  ;;  %6745 = vmatmul.mubr.msk.f32.vlgmr.msra.gmra.mrb[50].mxu1 %vm451_vm0, %v5631_v27 }
0x20aa   : > { %v5613_v6 = vmul.f32 0.70710677, %v5595_v24  ;;  %v5633_v23 = vmul.f32 %v5625_v46, %v5601_v4  ;;  %v5605_v58 = vmul.f32 0.5, %v5595_v24 }
0x20ab   : > { %v5632_v59 = vmul.f32 %v5624_v39, %v5600_v42  ;;  %v5612_v28 = vmul.f32 0.70710677, %v5590_v20  ;;  %v5604_v15 = vmul.f32 0.5, %v5590_v20 }
0x20ac   : > { %7262 = verf.f32 %v5613_v6 }
0x20ad   : > { %7264 = verf.f32 %v5612_v28  ;;  %6747 = vmatprep.mubr.msk.f32.mxu1 %vm451_vm0, %v5632_v59 }
0x20ae   : > { %6748 = vmatmul.mubr.msk.f32.gmra.mrb[52].mxu1 %vm451_vm0, %v5633_v23 }
0x20af   : > { %v7259_v56 = vpop.eup %7258 }
0x20b0   : > { %v7261_v60 = vpop.eup %7260  ;;  %v5627_v38 = vadd.f32 1.0, %v7259_v56 }
0x20b1   : > { %v5626_v21 = vadd.f32 1.0, %v7261_v60 }
0x20b2   : > { %v5635_v33 = vmul.f32 %v5627_v38, %v5603_v54 }
0x20b3   : > { %v5634_v48 = vmul.f32 %v5626_v21, %v5602_v22 }
0x20b5   : > { %6750 = vmatprep.mubr.msk.f32.mxu1 %vm451_vm0, %v5634_v48 }
0x20b6   : > { %v7263_v57 = vpop.eup %7262  ;;  %6751 = vmatmul.mubr.msk.f32.gmra.mrb[54].mxu1 %vm451_vm0, %v5635_v33 }
0x20b7   : > { %v7265_v10 = vpop.eup %7264  ;;  %v5629_v45 = vadd.f32 1.0, %v7263_v57 }
0x20b8   : > { %v5628_v62 = vadd.f32 1.0, %v7265_v10 }
0x20b9   : > { %v5637_v35 = vmul.f32 %v5629_v45, %v5605_v58 }
0x20ba   : > { %v5636_v9 = vmul.f32 %v5628_v62, %v5604_v15 }
0x20bc   : > { %6753 = vmatprep.mubr.msk.f32.mxu1 %vm451_vm0, %v5636_v9 }
0x20bd   : > { %6754 = vmatmul.mubr.msk.f32.gmra.mrb[56].mxu1 %vm451_vm0, %v5637_v35 }
0x217c   : > { %v6746_v16 = vpop.f32.mrb[50].mxu1 }
0x217d   : > { %v5745_v32 = vadd.f32 %v6746_v16, %v6043_v44  ;;  %v5739_v3 = vpop.f32.mrb[51].mxu1 }
0x217e   : > { %v5740_v11 = vadd.f32 %v6043_v44, %v5739_v3 }
0x217f   : > { %v5779_v43 = vadd.f32 %v5745_v32, %v8748_v41 }
0x2180   : > { %v5778_v12 = vadd.f32 %v5740_v11, %v8751_v8 }
0x2181   : > { %5787 = vst.msk [vmem:[%s440_s18 + $0x8] sm:$0xff] %vm451_vm0, %v5779_v43  ;;  %v6749_v18 = vpop.f32.mrb[52].mxu1 }
0x2182   : > { %5786 = vst.msk [vmem:[%s440_s18] sm:$0xff] %vm451_vm0, %v5778_v12  ;;  %v5755_v17 = vadd.f32 %v6749_v18, %v6043_v44  ;;  %v5749_v55 = vpop.f32.mrb[53].mxu1 }
0x2183   : > { %v5750_v49 = vadd.f32 %v6043_v44, %v5749_v55 }
0x2184   : > { %v5781_v37 = vadd.f32 %v5755_v17, %v8758_v5 }
0x2185   : > { %v5780_v61 = vadd.f32 %v5750_v49, %v8763_v40 }
0x2186   : > { %5789 = vst.msk [vmem:[%s440_s18 + $0x18] sm:$0xff] %vm451_vm0, %v5781_v37 }
0x2187   : > { %5788 = vst.msk [vmem:[%s440_s18 + $0x10] sm:$0xff] %vm451_vm0, %v5780_v61 }
0x2189   : > { %v6752_v19 = vpop.f32.mrb[54].mxu1 }
0x218a   : > { %v5765_v41 = vadd.f32 %v6752_v19, %v6043_v44  ;;  %v5759_v34 = vpop.f32.mrb[55].mxu1 }
0x218b   : > { %v5760_v8 = vadd.f32 %v6043_v44, %v5759_v34 }
0x218c   : > { %v5783_v7 = vadd.f32 %v5765_v41, %v8766_v50 }
0x218d   : > { %v5782_v53 = vadd.f32 %v5760_v8, %v8771_v0 }
0x218e   : > { %5791 = vst.msk [vmem:[%s440_s18 + $0x28] sm:$0xff] %vm451_vm0, %v5783_v7 }
0x218f   : > { %5790 = vst.msk [vmem:[%s440_s18 + $0x20] sm:$0xff] %vm451_vm0, %v5782_v53 }
0x2190   : > { %v6755_v29 = vpop.f32.mrb[56].mxu1 }
0x2191   : > { %v5775_v5 = vadd.f32 %v6755_v29, %v6043_v44  ;;  %v5769_v1 = vpop.f32.mrb[57].mxu1 }
0x2192   : > { %v5770_v40 = vadd.f32 %v6043_v44, %v5769_v1 }
0x2193   : > { %v5785_v52 = vadd.f32 %v5775_v5, %v8781_v2 }
0x2194   : > { %v5784_v47 = vadd.f32 %v5770_v40, %v8776_v36 }
0x2195   : > { %5793 = vst.msk [vmem:[%s440_s18 + $0x38] sm:$0xff] %vm451_vm0, %v5785_v52 }
0x2196   : > { %5792 = vst.msk [vmem:[%s440_s18 + $0x30] sm:$0xff] %vm451_vm0, %v5784_v47 }
0x2197 PF: > { %s23_s25 = sadd.s32 1, %s7280_s25  }
0x2198   : > { %p20_p4 = scmp.ge.s32.totalorder %s23_s25, 4  }
0x219a   :  { %22 = sbr.rel (!%p20_p4) target bundleno = 1 (0x1), region = 113 }

// kernel: model_forward.5
= control target key start
LH: loop header
LB: loop body
LE: loop exit
PB: predicated region body
PF: predicated region fallthrough
CT: control target
= control target key end

     0   :  { %s7767_s20 = smov 0   ;;  %s9400_s0 = inlined_call_operand.vmem [shape: f32[2,64,32], index: 0, kind: input, shape index: {}]   ;;  %s9401_s1 = inlined_call_operand.vmem [shape: f32[6,32], index: 1, kind: input, shape index: {}]   ;;  %s9402_s2 = inlined_call_operand.vmem [shape: f32[9,32,64], index: 2, kind: input, shape index: {}]   ;;  %s9403_s3 = inlined_call_operand.vmem [shape: f32[1,64], index: 3, kind: input, shape index: {}]   ;;  %s9404_s4 = inlined_call_operand.vmem [shape: f32[32,32], index: 4, kind: input, shape index: {}]   ;;  %s9405_s5 = inlined_call_operand.vmem [shape: f32[1,32], index: 5, kind: input, shape index: {}]   ;;  %s9406_s6 = inlined_call_operand.vmem [shape: f32[4,8,24], index: 6, kind: input, shape index: {}]   ;;  %s9407_s7 = inlined_call_operand.vmem [shape: f32[32,32], index: 7, kind: input, shape index: {}]   ;;  %s9408_s8 = inlined_call_operand.vmem [shape: f32[1,32], index: 8, kind: input, shape index: {}]   ;;  %s9409_s9 = inlined_call_operand.vmem [shape: f32[32,32], index: 9, kind: input, shape index: {}]   ;;  %s9410_s10 = inlined_call_operand.vmem [shape: f32[1,32], index: 10, kind: input, shape index: {}]   ;;  %s9411_s11 = inlined_call_operand.vmem [shape: f32[32,32], index: 11, kind: input, shape index: {}]   ;;  %s9412_s12 = inlined_call_operand.vmem [shape: f32[1,32], index: 12, kind: input, shape index: {}]   ;;  %s9413_s13 = inlined_call_operand.vmem [shape: f32[32,1], index: 13, kind: input, shape index: {}]   ;;  %s9414_s14 = inlined_call_operand.<no memory space> [shape: f32[1,1], index: 14, kind: input, shape index: {}]   ;;  %s9415_s15 = inlined_call_operand.vmem [shape: f32[2,64,1], index: 15, kind: output, shape index: {}]  }
   0x1   :  { %v20_v0 = vstv %s9414_s14 }
   0x2   :  { %21 = vst [vmem:[#allocation2] sm:$0x1] %v20_v0 }
   0x3 LB: > { %s6176_s21 = sadd.s32 4294967295, %s7674_s20   ;;  %p6180_p0 = scmp.ge.s32.totalorder %s7674_s20, 1  ;;  %s7674_s20 = sphi %s7767_s20, %s27_s20  }
   0x4   : > { %p439_p1 = scmp.lt.s32.totalorder %s7674_s20, 3 }
   0x6   : > { %p440_p2 = pnand %p6180_p0, %p439_p1 }
   0x7   : > { %p487_p3 = scmp.lt.s32.totalorder (!%p440_p2), %s6176_s21, 1  ;;  %vm507_vm0 = vcmask (!%p440_p2), 261120   ;;  %v6187_v57 = vld [vmem:[%s9402_s2 + $0x20] sm:$0xff] (!%p440_p2)  ;;  %v6188_v58 = vld [vmem:[%s9402_s2 + $0x28] sm:$0xff] (!%p440_p2)  ;;  %v6189_v60 = vld [vmem:[%s9402_s2 + $0x30] sm:$0xff] (!%p440_p2)  ;;  %v9419_v63 = vmov (!%p440_p2), 0.0  }
   0x8   : > { %443 = sbr.rel (%p440_p2) target bundleno = 9130 (0x23aa), region = 80  ;;  %v7126_v59 = vpack.c.bf16 (!%p440_p2), %v6188_v58, %v6187_v57  ;;  %v6190_v61 = vld [vmem:[%s9402_s2 + $0x38] sm:$0xff] (!%p440_p2)  ;;  %6662 = vmatprep.mubr.f32.mxu0 (!%p440_p2), %v9419_v63  ;;  %v815_v0 = vld [vmem:[%s9402_s2] sm:$0xff] (!%p440_p2)  ;;  %v7910_v58 = vrot.slane (!%p440_p2), %v9419_v63, 7  ;;  %vm782_vm1 = vcmask (!%p440_p2), 1040384   ;;  %vm1107_vm4 = vcmask (!%p440_p2), 1046528  }
   0x9   : > { %v7130_v62 = vpack.c.bf16 (!%p440_p2), %v6190_v61, %v6189_v60  ;;  %v6206_v60 = vld [vmem:[%s9402_s2 + $0x40] sm:$0xff] (!%p440_p2)  ;;  %s7678_s27 = smov (!%p440_p2), 96   ;;  %s7681_s17 = smov (!%p440_p2), 120  }
   0xa   : > { %7127 = vmatprep.subr.bf16.mxu0 (!%p440_p2), %v7126_v59  ;;  %s7682_s18 = smov (!%p440_p2), 112   ;;  %s7683_s30 = smov (!%p440_p2), 104  }
   0xb   : > { %7129 = vmatpush3.bf16.msra.mxu0 (!%p440_p2), %v7126_v59 }
   0xc   : > { %7131 = vmatprep.subr.bf16.mxu0 (!%p440_p2), %v7130_v62 }
   0xf   : > { %s9434_s21 = smov (!%p487_p3, %s6176_s21), 1  ;;  %7133 = vmatpush3.bf16.msra.mxu0 %v7130_v62 }
  0x10   : > { %s6392_s14 = sshll.u32 %s9434_s21, 6 }
  0x11   : > { %s7783_s24 = scalar_lea.vmem %s9400_s0, %s6392_s14  ;;  %s496_s26 = scalar_lea.vmem %s9415_s15, %s6392_s14 }
  0x12   : > { %v497_v1 = vld [vmem:[%s7783_s24] sm:$0xff]  ;;  %v499_v2 = vld [vmem:[%s7783_s24 + $0x10] sm:$0xff]  ;;  %v498_v3 = vld [vmem:[%s7783_s24 + $0x8] sm:$0xff] }
  0x13   : > { %v508_v4 = vsel %vm507_vm0, %v497_v1, 0.0  ;;  %v514_v5 = vsel %vm507_vm0, %v499_v2, 0.0  ;;  %v500_v6 = vld [vmem:[%s7783_s24 + $0x18] sm:$0xff]  ;;  %v511_v7 = vsel %vm507_vm0, %v498_v3, 0.0  ;;  %v501_v9 = vld [vmem:[%s7783_s24 + $0x20] sm:$0xff]  ;;  %v502_v10 = vld [vmem:[%s7783_s24 + $0x28] sm:$0xff] }
  0x14   : > { %509 = vadd.xlane.f32.xlu0 %v508_v4  ;;  %515 = vadd.xlane.f32.xlu1 %v514_v5  ;;  %v517_v8 = vsel %vm507_vm0, %v500_v6, 0.0  ;;  %v520_v11 = vsel %vm507_vm0, %v501_v9, 0.0  ;;  %v523_v12 = vsel %vm507_vm0, %v502_v10, 0.0  ;;  %v503_v13 = vld [vmem:[%s7783_s24 + $0x30] sm:$0xff]  ;;  %v504_v14 = vld [vmem:[%s7783_s24 + $0x38] sm:$0xff] }
  0x15   : > { %v526_v15 = vsel %vm507_vm0, %v503_v13, 0.0  ;;  %v529_v16 = vsel %vm507_vm0, %v504_v14, 0.0 }
  0x18   : > { %512 = vadd.xlane.f32.xlu0 %v511_v7  ;;  %518 = vadd.xlane.f32.xlu1 %v517_v8 }
  0x1c   : > { %521 = vadd.xlane.f32.xlu0 %v520_v11  ;;  %524 = vadd.xlane.f32.xlu1 %v523_v12 }
  0x20   : > { %527 = vadd.xlane.f32.xlu0 %v526_v15  ;;  %530 = vadd.xlane.f32.xlu1 %v529_v16 }
  0xa1   : > { %v510_v17 = vpop.xlane.xlu0 %509  ;;  %v516_v18 = vpop.xlane.xlu1 %515 }
  0xa2   : > { %v533_v19 = vmul.f32 0.03125, %v510_v17  ;;  %v535_v20 = vmul.f32 0.03125, %v516_v18 }
  0xa4   : > { %v7801_v21 = vsub.f32 %v497_v1, %v533_v19  ;;  %v7803_v22 = vsub.f32 %v499_v2, %v535_v20  ;;  %v816_v1 = vld [vmem:[%s9402_s2 + $0x8] sm:$0xff] }
  0xa5   : > { %v513_v23 = vpop.xlane.xlu0 %512  ;;  %v519_v24 = vpop.xlane.xlu1 %518  ;;  %v7860_v2 = vpack.c.bf16 %v816_v1, %v815_v0 }
  0xa6   : > { %v534_v25 = vmul.f32 0.03125, %v513_v23  ;;  %v536_v26 = vmul.f32 0.03125, %v519_v24  ;;  %v549_v27 = vmul.f32 %v7801_v21, %v7801_v21  ;;  %v551_v28 = vmul.f32 %v7803_v22, %v7803_v22 }
  0xa7   : > { %7135 = vmatprep.subr.bf16.mxu0 %v7860_v2 }
  0xa8   : > { %v7809_v29 = vsub.f32 %v498_v3, %v534_v25  ;;  %v7811_v30 = vsub.f32 %v500_v6, %v536_v26  ;;  %v557_v31 = vsel %vm507_vm0, %v549_v27, 0.0  ;;  %v563_v34 = vsel %vm507_vm0, %v551_v28, 0.0  ;;  %v7871_v27 = vld [vmem:[%s9401_s1] ss:$0 sm:$0xff] }
  0xa9   : > { %558 = vadd.xlane.f32.xlu0 %v557_v31  ;;  %v522_v32 = vpop.xlane.xlu0 %521  ;;  %v525_v33 = vpop.xlane.xlu1 %524  ;;  %v637_v6 = vlaneseq }
  0xaa   : > { %v537_v35 = vmul.f32 0.03125, %v522_v32  ;;  %v538_v36 = vmul.f32 0.03125, %v525_v33  ;;  %v550_v37 = vmul.f32 %v7809_v29, %v7809_v29  ;;  %v552_v38 = vmul.f32 %v7811_v30, %v7811_v30 }
  0xac   : > { %v7819_v39 = vsub.f32 %v501_v9, %v537_v35  ;;  %v7821_v40 = vsub.f32 %v502_v10, %v538_v36  ;;  %v560_v41 = vsel %vm507_vm0, %v550_v37, 0.0  ;;  %v566_v44 = vsel %vm507_vm0, %v552_v38, 0.0  ;;  %v7879_v37 = vld [vmem:[%s9401_s1 + $0x1] ss:$0 sm:$0xff] }
  0xad   : > { %564 = vadd.xlane.f32.xlu0 %v563_v34  ;;  %561 = vadd.xlane.f32.xlu1 %v560_v41  ;;  %v528_v42 = vpop.xlane.xlu0 %527  ;;  %v531_v43 = vpop.xlane.xlu1 %530  ;;  %v817_v41 = vld [vmem:[%s9402_s2 + $0x10] sm:$0xff] }
  0xae   : > { %v539_v45 = vmul.f32 0.03125, %v528_v42  ;;  %v540_v46 = vmul.f32 0.03125, %v531_v43  ;;  %v553_v47 = vmul.f32 %v7819_v39, %v7819_v39  ;;  %v554_v48 = vmul.f32 %v7821_v40, %v7821_v40  ;;  %v818_v42 = vld [vmem:[%s9402_s2 + $0x18] sm:$0xff] }
  0xb0   : > { %v7829_v49 = vsub.f32 %v503_v13, %v539_v45  ;;  %v7831_v50 = vsub.f32 %v504_v14, %v540_v46  ;;  %v569_v51 = vsel %vm507_vm0, %v553_v47, 0.0  ;;  %v572_v52 = vsel %vm507_vm0, %v554_v48, 0.0 }
  0xb1   : > { %567 = vadd.xlane.f32.xlu1 %v566_v44  ;;  %570 = vadd.xlane.f32.xlu0 %v569_v51  ;;  %v7863_v13 = vshrl.u32 %v637_v6, 7 }
  0xb2   : > { %v555_v53 = vmul.f32 %v7829_v49, %v7829_v49  ;;  %v556_v54 = vmul.f32 %v7831_v50, %v7831_v50 }
  0xb3   : > { %v7866_v20 = vadd.s32 8, %v7863_v13  ;;  %v650_v33 = vand.u32 7, %v7863_v13  ;;  %v7888_v43 = vadd.s32 16, %v7863_v13  ;;  %v7892_v44 = vadd.s32 24, %v7863_v13 }
  0xb4   : > { %v575_v55 = vsel %vm507_vm0, %v555_v53, 0.0  ;;  %v578_v56 = vsel %vm507_vm0, %v556_v54, 0.0  ;;  %v7899_v51 = vadd.s32 32, %v7863_v13 }
  0xb5   : > { %573 = vadd.xlane.f32.xlu1 %v572_v52  ;;  %576 = vadd.xlane.f32.xlu0 %v575_v55  ;;  %v657_v34 = vand.u32 7, %v7866_v20  ;;  %v7894_v47 = vadd.s32 4294967295, %v650_v33  ;;  %v7138_v55 = vpack.c.bf16 %v818_v42, %v817_v41  ;;  %v664_v59 = vand.u32 7, %v7888_v43 }
  0xb6   : > { %v671_v61 = vand.u32 7, %v7892_v44  ;;  %v7923_v62 = vadd.s32 1, %v650_v33 }
  0xb7   : > { %v7896_v48 = vadd.s32 4294967295, %v657_v34  ;;  %vm9417_vm3 = vcmp.ge.s32.totalorder %v7894_v47, 0  ;;  %v7963_v20 = vadd.s32 1, %v657_v34 }
  0xb8   : > { %v807_v44 = vsel %vm9417_vm3, %v7910_v58, 0.0  ;;  %vm1090_vm11 = vcmp.lt.s32.totalorder %v7923_v62, 8 }
  0xb9   : > { %579 = vadd.xlane.f32.xlu1 %v578_v56  ;;  %v7906_v56 = vadd.s32 40, %v7863_v13  ;;  %vm9416_vm2 = vcmp.ge.s32.totalorder %v7896_v48, 0  ;;  %vm9418_vm7 = vcmp.lt.s32.totalorder %v7963_v20, 8 }
 0x136   : > { %v559_v3 = vpop.xlane.xlu0 %558 }
 0x137   : > { %v581_v4 = vmul.f32 0.03125, %v559_v3  ;;  %v7929_v3 = vadd.s32 48, %v7863_v13 }
 0x139   : > { %v589_v5 = vadd.f32 1e-05, %v581_v4  ;;  %v7932_v4 = vrot.slane %v9419_v63, 1 }
 0x13a   : > { %v562_v7 = vpop.xlane.xlu1 %561  ;;  %v565_v8 = vpop.xlane.xlu0 %564 }
 0x13b   : > { %7444 = vrsqrt.f32 %v589_v5  ;;  %v582_v9 = vmul.f32 0.03125, %v562_v7  ;;  %v583_v10 = vmul.f32 0.03125, %v565_v8  ;;  %v685_v8 = vand.u32 7, %v7906_v56 }
 0x13d   : > { %v590_v11 = vadd.f32 1e-05, %v582_v9  ;;  %v591_v12 = vadd.f32 1e-05, %v583_v10  ;;  %v8034_v56 = vadd.s32 1, %v685_v8 }
 0x13e   : > { %v568_v14 = vpop.xlane.xlu1 %567  ;;  %v571_v15 = vpop.xlane.xlu0 %570 }
 0x13f   : > { %7446 = vrsqrt.f32 %v590_v11  ;;  %v584_v16 = vmul.f32 0.03125, %v568_v14  ;;  %v585_v17 = vmul.f32 0.03125, %v571_v15  ;;  %v7945_v11 = vadd.s32 4294967295, %v664_v59 }
 0x140   : > { %7448 = vrsqrt.f32 %v591_v12  ;;  %v7953_v15 = vadd.s32 4294967295, %v671_v61 }
 0x141   : > { %v592_v18 = vadd.f32 1e-05, %v584_v16  ;;  %v593_v19 = vadd.f32 1e-05, %v585_v17  ;;  %v7956_v16 = vadd.s32 56, %v7863_v13  ;;  %vm752_vm5 = vcmp.ge.s32.totalorder %v7945_v11, 0 }
 0x142   : > { %v574_v23 = vpop.xlane.xlu1 %573  ;;  %v577_v24 = vpop.xlane.xlu0 %576  ;;  %vm753_vm6 = vcmp.ge.s32.totalorder %v7953_v15, 0 }
 0x143   : > { %7450 = vrsqrt.f32 %v592_v18  ;;  %v586_v25 = vmul.f32 0.03125, %v574_v23  ;;  %v587_v26 = vmul.f32 0.03125, %v577_v24  ;;  %v699_v34 = vand.u32 7, %v7956_v16 }
 0x144   : > { %7452 = vrsqrt.f32 %v593_v19  ;;  %v692_v19 = vand.u32 7, %v7929_v3 }
 0x145   : > { %v7445_v28 = vpop.eup %7444  ;;  %v594_v31 = vadd.f32 1e-05, %v586_v25  ;;  %v595_v32 = vadd.f32 1e-05, %v587_v26  ;;  %v7971_v26 = vadd.s32 4294967295, %v685_v8  ;;  %v8061_v3 = vadd.s32 1, %v699_v34 }
 0x146   : > { %v580_v35 = vpop.xlane.xlu1 %579  ;;  %v605_v36 = vmul.f32 %v7445_v28, %v7801_v21  ;;  %v8000_v41 = vadd.s32 4294967295, %v692_v19  ;;  %v6218_v8 = vld [vmem:[%s9402_s2 + $0x60] sm:$0xff] }
 0x147   : > { %7454 = vrsqrt.f32 %v594_v31  ;;  %v588_v38 = vmul.f32 0.03125, %v580_v35  ;;  %vm755_vm9 = vcmp.ge.s32.totalorder %v7971_v26, 0 }
 0x148   : > { %7456 = vrsqrt.f32 %v595_v32  ;;  %v617_v21 = vmul.f32 %v7871_v27, %v605_v36  ;;  %v7979_v32 = vadd.s32 1, %v664_v59  ;;  %vm756_vm10 = vcmp.ge.s32.totalorder %v8000_v41, 0 }
 0x149   : > { %v7447_v45 = vpop.eup %7446  ;;  %v596_v46 = vadd.f32 1e-05, %v588_v38  ;;  %v8041_v59 = vadd.s32 1, %v692_v19  ;;  %v9432_v41 = vmov 0.0  }
 0x14a   : > { %v7449_v52 = vpop.eup %7448  ;;  %v606_v53 = vmul.f32 %v7447_v45, %v7809_v29  ;;  %v7903_v54 = vadd.f32 %v7879_v37, %v617_v21  ;;  %v8015_v45 = vadd.s32 1, %v671_v61  ;;  %vm1092_vm12 = vcmp.lt.s32.totalorder %v7979_v32, 8 }
 0x14b   : > { %v607_v57 = vmul.f32 %v7449_v52, %v7803_v22  ;;  %7458 = vrsqrt.f32 %v596_v46  ;;  %v6207_v22 = vld [vmem:[%s9402_s2 + $0x48] sm:$0xff]  ;;  %v6208_v52 = vld [vmem:[%s9402_s2 + $0x50] sm:$0xff]  ;;  %vm1096_vm3 = vcmp.lt.s32.totalorder %v8041_v59, 8 }
 0x14c   : > { %6663 = vmatmul.mubr.msk.f32.vlgmr.msra.gmra.mrb[0].mxu0 %vm507_vm0, %v7903_v54  ;;  %v618_v29 = vmul.f32 %v7871_v27, %v606_v53  ;;  %v7947_v12 = vpack.c.bf16 %v6207_v22, %v6206_v60  ;;  %v785_v33 = vrot.slane %v7903_v54, 7  ;;  %v6209_v53 = vld [vmem:[%s9402_s2 + $0x58] sm:$0xff]  ;;  %vm1093_vm13 = vcmp.lt.s32.totalorder %v8015_v45, 8 }
 0x14d   : > { %v7451_v0 = vpop.eup %7450  ;;  %7137 = vmatpush3.bf16.msra.mxu0 %v7860_v2  ;;  %v619_v1 = vmul.f32 %v7871_v27, %v607_v57  ;;  %v678_v2 = vand.u32 7, %v7899_v51 }
 0x14e   : > { %v7453_v5 = vpop.eup %7452  ;;  %v608_v6 = vmul.f32 %v7451_v0, %v7811_v30  ;;  %v7936_v7 = vadd.f32 %v7879_v37, %v618_v29  ;;  %7139 = vmatprep.subr.bf16.mxu0 %v7138_v55  ;;  %v8024_v51 = vsel %vm782_vm1, %v7910_v58, %v785_v33 }
 0x14f   : > { %v609_v9 = vmul.f32 %v7453_v5, %v7819_v39  ;;  %v7943_v10 = vadd.f32 %v7879_v37, %v619_v1  ;;  %v7969_v13 = vadd.s32 4294967295, %v678_v2  ;;  %v8017_v46 = vadd.s32 1, %v678_v2 }
 0x150   : > { %6665 = vmatprep.mubr.msk.f32.mxu0 %vm507_vm0, %v7936_v7  ;;  %v620_v30 = vmul.f32 %v7871_v27, %v608_v6  ;;  %v787_v14 = vrot.slane %v7936_v7, 7  ;;  %v808_v0 = vsel %vm9416_vm2, %v8024_v51, 0.0  ;;  %v7146_v1 = vpack.c.bf16 %v6209_v53, %v6208_v52 }
 0x151   : > { %v7455_v39 = vpop.eup %7454  ;;  %6666 = vmatmul.mubr.msk.f32.gmra.mrb[2].mxu0 %vm507_vm0, %v7943_v10  ;;  %v621_v17 = vmul.f32 %v7871_v27, %v609_v9  ;;  %v789_v18 = vrot.slane %v7943_v10, 7  ;;  %vm754_vm8 = vcmp.ge.s32.totalorder %v7969_v13, 0  ;;  %v1111_v2 = vrot.slane %v7936_v7, 1  ;;  %v6219_v9 = vld [vmem:[%s9402_s2 + $0x68] sm:$0xff] }
 0x152   : > { %v7457_v23 = vpop.eup %7456  ;;  %v610_v24 = vmul.f32 %v7455_v39, %v7821_v40  ;;  %v7967_v25 = vadd.f32 %v7879_v37, %v620_v30  ;;  %7141 = vmatpush3.bf16.msra.mxu0 %v7138_v55  ;;  %v8032_v55 = vadd.s32 4294967295, %v699_v34  ;;  %v8048_v60 = vsel %vm782_vm1, %v785_v33, %v787_v14 }
 0x153   : > { %v611_v28 = vmul.f32 %v7457_v23, %v7829_v49  ;;  %v7975_v31 = vadd.f32 %v7879_v37, %v621_v17  ;;  %7143 = vmatprep.subr.bf16.mxu0 %v7947_v12  ;;  %v7989_v49 = vsel %vm782_vm1, %v787_v14, %v789_v18  ;;  %vm1094_vm15 = vcmp.lt.s32.totalorder %v8017_v46, 8 }
 0x154   : > { %6668 = vmatprep.mubr.msk.f32.mxu0 %vm507_vm0, %v7967_v25  ;;  %v622_v40 = vmul.f32 %v7871_v27, %v610_v24  ;;  %v7998_v38 = vsel %vm9416_vm2, %v7989_v49, 0.0  ;;  %v1115_v57 = vrot.slane %v7967_v25, 1  ;;  %v791_v22 = vrot.slane %v7967_v25, 7 }
 0x155   : > { %v7459_v35 = vpop.eup %7458  ;;  %6669 = vmatmul.mubr.msk.f32.gmra.mrb[4].mxu0 %vm507_vm0, %v7975_v31  ;;  %v623_v36 = vmul.f32 %v7871_v27, %v611_v28  ;;  %v793_v61 = vrot.slane %v7975_v31, 7  ;;  %vm9421_vm14 = vcmp.ge.s32.totalorder %v8032_v55, 0  ;;  %vm1095_vm2 = vcmp.lt.s32.totalorder %v8034_v56, 8  ;;  %v6269_v56 = vld [vmem:[%s9402_s2 + $0xf8] sm:$0xff] }
 0x156   : > { %v612_v42 = vmul.f32 %v7459_v35, %v7831_v50  ;;  %v8005_v43 = vadd.f32 %v7879_v37, %v622_v40  ;;  %v809_v14 = vsel %vm752_vm5, %v8048_v60, 0.0  ;;  %v1117_v16 = vrot.slane %v7975_v31, 1 }
 0x157   : > { %v8010_v21 = vadd.f32 %v7879_v37, %v623_v36  ;;  %v8092_v17 = vsel %vm782_vm1, %v789_v18, %v791_v22  ;;  %v8095_v19 = vsel %vm782_vm1, %v791_v22, %v793_v61  ;;  %v810_v28 = vsel %vm753_vm6, %v7989_v49, 0.0 }
 0x158   : > { %v624_v50 = vmul.f32 %v7871_v27, %v612_v42  ;;  %6671 = vmatprep.mubr.msk.f32.mxu0 %vm507_vm0, %v8005_v43  ;;  %v1113_v27 = vrot.slane %v7943_v10, 1  ;;  %v795_v5 = vrot.slane %v8005_v43, 7  ;;  %v1119_v39 = vrot.slane %v8005_v43, 1 }
 0x159   : > { %6672 = vmatmul.mubr.msk.f32.gmra.mrb[6].mxu0 %vm507_vm0, %v8010_v21  ;;  %v9422_v6 = vrot.slane %v8010_v21, 7  ;;  %v1121_v23 = vrot.slane %v8010_v21, 1  ;;  %v1109_v40 = vrot.slane %v7903_v54, 1  ;;  %v811_v36 = vsel %vm754_vm8, %v8092_v17, 0.0 }
 0x15a   : > { %v8044_v29 = vadd.f32 %v7879_v37, %v624_v50  ;;  %6682 = vmatprep.mubr.msk.f32.mxu0 %vm507_vm0, %v807_v44  ;;  %v8059_v37 = vsel %vm1107_vm4, %v1113_v27, %v1115_v57  ;;  %v8105_v18 = vsel %vm782_vm1, %v793_v61, %v795_v5  ;;  %v8113_v34 = vsel %vm1107_vm4, %v1111_v2, %v1113_v27 }
 0x15b   : > { %v8076_v30 = vsel %vm9418_vm7, %v8059_v37, 0.0  ;;  %vm1097_vm7 = vcmp.lt.s32.totalorder %v8061_v3, 8  ;;  %v8110_v33 = vsel %vm782_vm1, %v795_v5, %v9422_v6  ;;  %v812_v42 = vsel %vm755_vm9, %v8095_v19, 0.0  ;;  %v6277_v3 = vld [vmem:[%s9402_s2 + $0x100] sm:$0xff] }
 0x15c   : > { %v1123_v24 = vrot.slane %v8044_v29, 1  ;;  %v9423_v35 = vrot.slane %v8044_v29, 7  ;;  %v8124_v44 = vsel %vm1107_vm4, %v1115_v57, %v1117_v16  ;;  %v8127_v50 = vsel %vm1107_vm4, %v1117_v16, %v1119_v39 }
 0x15d   : > { %6683 = vmatmul.mubr.msk.f32.vlgmr.msra.gmra.mrb[0].mxu0 %vm507_vm0, %v808_v0  ;;  %v8131_v52 = vsel %vm1107_vm4, %v1119_v39, %v1121_v23  ;;  %v8143_v57 = vsel %vm752_vm5, %v8092_v17, 0.0  ;;  %v813_v22 = vsel %vm756_vm10, %v8105_v18, 0.0  ;;  %v8151_v61 = vsel %vm753_vm6, %v8095_v19, 0.0 }
 0x15e   : > { %6685 = vmatprep.mubr.msk.f32.mxu0 %vm507_vm0, %v809_v14  ;;  %7145 = vmatpush3.bf16.msra.mxu0 %v7947_v12  ;;  %v7150_v12 = vpack.c.bf16 %v6219_v9, %v6218_v8  ;;  %v8134_v53 = vsel %vm1107_vm4, %v1121_v23, %v1123_v24  ;;  %v8138_v27 = vsel %vm1107_vm4, %v1123_v24, %v7932_v4  ;;  %v8156_v0 = vsel %vm754_vm8, %v8105_v18, 0.0 }
 0x15f   : > { %7147 = vmatprep.subr.bf16.mxu0 %v7146_v1  ;;  %v1708_v5 = vsel %vm782_vm1, %v9423_v35, %v7910_v58  ;;  %v8170_v8 = vsel %vm1090_vm11, %v8113_v34, 0.0  ;;  %v8175_v9 = vsel %vm1092_vm12, %v8124_v44, 0.0  ;;  %v8180_v14 = vsel %vm1093_vm13, %v8127_v50, 0.0  ;;  %v6230_v35 = vld [vmem:[%s9402_s2 + $0x80] sm:$0xff] }
 0x160   : > { %v8185_v58 = vsel %vm9421_vm14, %v1708_v5, 0.0  ;;  %v8190_v16 = vsel %vm1094_vm15, %v8131_v52, 0.0  ;;  %v8195_v39 = vsel %vm1095_vm2, %v8134_v53, 0.0  ;;  %v8200_v23 = vsel %vm1096_vm3, %v8138_v27, 0.0 }
 0x161   : > { %6686 = vmatmul.mubr.msk.f32.gmra.mrb[2].mxu0 %vm507_vm0, %v810_v28  ;;  %v1110_v24 = vsel %vm1107_vm4, %v7932_v4, %v1109_v40  ;;  %v8208_v28 = vsel %vm1097_vm7, %v7932_v4, 0.0  ;;  %v8223_v4 = vsel %vm1107_vm4, %v1109_v40, %v1111_v2  ;;  %v1135_v2 = vsel %vm1092_vm12, %v8113_v34, 0.0 }
 0x162   : > { %6688 = vmatprep.mubr.msk.f32.mxu0 %vm507_vm0, %v811_v36  ;;  %7149 = vmatpush3.bf16.msra.mxu0 %v7146_v1  ;;  %v8161_v1 = vsel %vm755_vm9, %v8110_v33, 0.0  ;;  %v814_v36 = vsel %vm9421_vm14, %v8110_v33, 0.0  ;;  %v1133_v5 = vsel %vm1090_vm11, %v1110_v24, 0.0  ;;  %vm9424_vm14 = vcmp.lt.s32.totalorder %v7963_v20, 8 }
 0x163   : > { %7151 = vmatprep.subr.bf16.mxu0 %v7150_v12  ;;  %v1134_v6 = vsel %vm9424_vm14, %v8223_v4, 0.0  ;;  %v1136_v24 = vsel %vm1093_vm13, %v8059_v37, 0.0  ;;  %vm9425_vm4 = vcmp.ge.s32.totalorder %v7894_v47, 0  ;;  %vm9426_vm14 = vcmp.ge.s32.totalorder %v7896_v48, 0 }
 0x164   : > { %v1291_v11 = vsel %vm755_vm9, %v8105_v18, 0.0  ;;  %v1292_v15 = vsel %vm756_vm10, %v8110_v33, 0.0  ;;  %v6245_v18 = vld [vmem:[%s9402_s2 + $0xb8] sm:$0xff]  ;;  %v1560_v62 = vsel %vm1092_vm12, %v8059_v37, 0.0  ;;  %v1563_v32 = vsel %vm1095_vm2, %v8131_v52, 0.0  ;;  %v6268_v37 = vld [vmem:[%s9402_s2 + $0xf0] sm:$0xff] }
 0x165   : > { %6689 = vmatmul.mubr.msk.f32.gmra.mrb[4].mxu0 %vm507_vm0, %v812_v42  ;;  %v6220_v42 = vld [vmem:[%s9402_s2 + $0x70] sm:$0xff]  ;;  %v1564_v45 = vsel %vm1096_vm3, %v8134_v53, 0.0  ;;  %v1565_v46 = vsel %vm1097_vm7, %v8138_v27, 0.0  ;;  %vm3781_vm9 = vcmask 195712  }
 0x166   : > { %6691 = vmatprep.mubr.msk.f32.mxu0 %vm507_vm0, %v813_v22  ;;  %v6221_v22 = vld [vmem:[%s9402_s2 + $0x78] sm:$0xff] }
 0x167   : > { %v7154_v63 = vpack.c.bf16 %v6221_v22, %v6220_v42  ;;  %v1137_v42 = vsel %vm1094_vm15, %v8124_v44, 0.0  ;;  %v6233_v22 = vld [vmem:[%s9402_s2 + $0x98] sm:$0xff] }
 0x169   : > { %6692 = vmatmul.mubr.msk.f32.gmra.mrb[6].mxu0 %vm507_vm0, %v814_v36  ;;  %v6231_v36 = vld [vmem:[%s9402_s2 + $0x88] sm:$0xff] }
 0x16a   : > { %6702 = vmatprep.mubr.msk.f32.mxu0 %vm507_vm0, %v1133_v5  ;;  %v7158_v40 = vpack.c.bf16 %v6231_v36, %v6230_v35  ;;  %v1140_v35 = vsel %vm1097_vm7, %v8134_v53, 0.0  ;;  %v1286_v5 = vsel %vm9425_vm4, %v8024_v51, 0.0  ;;  %v1288_v51 = vsel %vm752_vm5, %v7989_v49, 0.0 }
 0x16b   : > { %v9427_v49 = vrot.slane %v8044_v29, 7  ;;  %vm9429_vm5 = vcmp.ge.s32.totalorder %v8032_v55, 0  ;;  %v6255_v55 = vld [vmem:[%s9402_s2 + $0xc8] sm:$0xff]  ;;  %vm2443_vm7 = vcmask 523264  }
 0x16d   : > { %6703 = vmatmul.mubr.msk.f32.vlgmr.msra.gmra.mrb[0].mxu0 %vm507_vm0, %v1134_v6  ;;  %v1138_v6 = vsel %vm1095_vm2, %v8127_v50, 0.0  ;;  %vm9431_vm2 = vmmov %vm9425_vm4 }
 0x16e   : > { %6705 = vmatprep.mubr.msk.f32.mxu0 %vm507_vm0, %v1135_v2  ;;  %7153 = vmatpush3.bf16.msra.mxu0 %v7150_v12  ;;  %v1139_v12 = vsel %vm1096_vm3, %v8131_v52, 0.0  ;;  %v1287_v2 = vsel %vm9426_vm14, %v8048_v60, 0.0  ;;  %v1710_v59 = vsel %vm9431_vm2, %v8048_v60, 0.0  ;;  %v6279_v60 = vld [vmem:[%s9402_s2 + $0x110] sm:$0xff]  ;;  %v6280_v52 = vld [vmem:[%s9402_s2 + $0x118] sm:$0xff]  ;;  %vm2301_vm3 = vcmask 64512  }
 0x16f   : > { %7155 = vmatprep.subr.bf16.mxu0 %v7154_v63  ;;  %v7194_v53 = vpack.c.bf16 %v6280_v52, %v6279_v60 }
 0x171   : > { %6706 = vmatmul.mubr.msk.f32.gmra.mrb[2].mxu0 %vm507_vm0, %v1136_v24  ;;  %v6242_v24 = vld [vmem:[%s9402_s2 + $0xa0] sm:$0xff] }
 0x172   : > { %6708 = vmatprep.mubr.msk.f32.mxu0 %vm507_vm0, %v1137_v42  ;;  %7157 = vmatpush3.bf16.msra.mxu0 %v7154_v63  ;;  %v6232_v63 = vld [vmem:[%s9402_s2 + $0x90] sm:$0xff]  ;;  %v6243_v42 = vld [vmem:[%s9402_s2 + $0xa8] sm:$0xff] }
 0x173   : > { %7159 = vmatprep.subr.bf16.mxu0 %v7158_v40  ;;  %v7162_v36 = vpack.c.bf16 %v6233_v22, %v6232_v63  ;;  %v7166_v48 = vpack.c.bf16 %v6243_v42, %v6242_v24  ;;  %v6257_v63 = vld [vmem:[%s9402_s2 + $0xd8] sm:$0xff]  ;;  %v1558_v22 = vsel %vm1090_vm11, %v8223_v4, 0.0  ;;  %v6267_v24 = vld [vmem:[%s9402_s2 + $0xe8] sm:$0xff]  ;;  %v1562_v4 = vsel %vm1094_vm15, %v8127_v50, 0.0 }
 0x174   : > { %v6278_v50 = vld [vmem:[%s9402_s2 + $0x108] sm:$0xff]  ;;  %vm6112_vm11 = vcmask 7168  }
 0x175   : > { %6709 = vmatmul.mubr.msk.f32.gmra.mrb[4].mxu0 %vm507_vm0, %v1138_v6  ;;  %v1289_v6 = vsel %vm753_vm6, %v8092_v17, 0.0  ;;  %v9428_v17 = vrot.slane %v8010_v21, 7  ;;  %v7190_v47 = vpack.c.bf16 %v6278_v50, %v6277_v3  ;;  %vm7679_vm6 = vmmov 0  }
 0x176   : > { %6711 = vmatprep.mubr.msk.f32.mxu0 %vm507_vm0, %v1139_v12  ;;  %v1290_v12 = vsel %vm754_vm8, %v8095_v19, 0.0  ;;  %v6244_v19 = vld [vmem:[%s9402_s2 + $0xb0] sm:$0xff]  ;;  %vm2870_vm8 = vcmask 130112  }
 0x177   : > { %v8304_v13 = vsel %vm782_vm1, %v9428_v17, %v9427_v49  ;;  %v7170_v33 = vpack.c.bf16 %v6245_v18, %v6244_v19  ;;  %vm9430_vm1 = vcmp.lt.s32.totalorder %v7963_v20, 8 }
 0x178   : > { %v1293_v26 = vsel %vm9429_vm5, %v8304_v13, 0.0 }
 0x179   : > { %6712 = vmatmul.mubr.msk.f32.gmra.mrb[6].mxu0 %vm507_vm0, %v1140_v35 }
 0x17a   : > { %6722 = vmatprep.mubr.msk.f32.mxu0 %vm507_vm0, %v1286_v5 }
 0x17d   : > { %6723 = vmatmul.mubr.msk.f32.vlgmr.msra.gmra.mrb[0].mxu0 %vm507_vm0, %v1287_v2  ;;  %v6266_v2 = vld [vmem:[%s9402_s2 + $0xe0] sm:$0xff] }
 0x17e   : > { %6725 = vmatprep.mubr.msk.f32.mxu0 %vm507_vm0, %v1288_v51  ;;  %7161 = vmatpush3.bf16.msra.mxu0 %v7158_v40  ;;  %v6254_v40 = vld [vmem:[%s9402_s2 + $0xc0] sm:$0xff]  ;;  %v7182_v20 = vpack.c.bf16 %v6267_v24, %v6266_v2 }
 0x17f   : > { %7163 = vmatprep.subr.bf16.mxu0 %v7162_v36  ;;  %v7174_v35 = vpack.c.bf16 %v6255_v55, %v6254_v40 }
 0x181   : > { %6726 = vmatmul.mubr.msk.f32.gmra.mrb[2].mxu0 %vm507_vm0, %v1289_v6 }
 0x182   : > { %6728 = vmatprep.mubr.msk.f32.mxu0 %vm507_vm0, %v1290_v12  ;;  %7165 = vmatpush3.bf16.msra.mxu0 %v7162_v36  ;;  %v1559_v36 = vsel %vm9430_vm1, %v8113_v34, 0.0  ;;  %v1561_v34 = vsel %vm1093_vm13, %v8124_v44, 0.0  ;;  %v7186_v44 = vpack.c.bf16 %v6269_v56, %v6268_v37 }
 0x183   : > { %7167 = vmatprep.subr.bf16.mxu0 %v7166_v48 }
 0x185   : > { %6729 = vmatmul.mubr.msk.f32.gmra.mrb[4].mxu0 %vm507_vm0, %v1291_v11 }
 0x186   : > { %6731 = vmatprep.mubr.msk.f32.mxu0 %vm507_vm0, %v1292_v15 }
 0x189   : > { %6732 = vmatmul.mubr.msk.f32.gmra.mrb[6].mxu0 %vm507_vm0, %v1293_v26 }
 0x18a   : > { %6742 = vmatprep.mubr.msk.f32.mxu0 %vm507_vm0, %v7903_v54  ;;  %v6256_v54 = vld [vmem:[%s9402_s2 + $0xd0] sm:$0xff] }
 0x18b   : > { %v7178_v5 = vpack.c.bf16 %v6257_v63, %v6256_v54 }
 0x18d   : > { %6743 = vmatmul.mubr.msk.f32.vlgmr.msra.gmra.mrb[0].mxu0 %vm507_vm0, %v7936_v7 }
 0x18e   : > { %6745 = vmatprep.mubr.msk.f32.mxu0 %vm507_vm0, %v7943_v10  ;;  %7169 = vmatpush3.bf16.msra.mxu0 %v7166_v48 }
 0x18f   : > { %7171 = vmatprep.subr.bf16.mxu0 %v7170_v33 }
 0x191   : > { %6746 = vmatmul.mubr.msk.f32.gmra.mrb[2].mxu0 %vm507_vm0, %v7967_v25 }
 0x192   : > { %6748 = vmatprep.mubr.msk.f32.mxu0 %vm507_vm0, %v7975_v31  ;;  %7173 = vmatpush3.bf16.msra.mxu0 %v7170_v33 }
 0x193   : > { %7175 = vmatprep.subr.bf16.mxu0 %v7174_v35 }
 0x195   : > { %6749 = vmatmul.mubr.msk.f32.gmra.mrb[4].mxu0 %vm507_vm0, %v8005_v43 }
 0x196   : > { %6751 = vmatprep.mubr.msk.f32.mxu0 %vm507_vm0, %v8010_v21 }
 0x199   : > { %6752 = vmatmul.mubr.msk.f32.gmra.mrb[6].mxu0 %vm507_vm0, %v8044_v29 }
 0x19a   : > { %6762 = vmatprep.mubr.msk.f32.mxu0 %vm507_vm0, %v1558_v22  ;;  %v6290_v22 = vld [vmem:[%s9405_s5] ss:$0 sm:$0xff] }
 0x19d   : > { %6763 = vmatmul.mubr.msk.f32.vlgmr.msra.gmra.mrb[0].mxu0 %vm507_vm0, %v1559_v36 }
 0x19e   : > { %6765 = vmatprep.mubr.msk.f32.mxu0 %vm507_vm0, %v1560_v62  ;;  %7177 = vmatpush3.bf16.msra.mxu0 %v7174_v35 }
 0x19f   : > { %7179 = vmatprep.subr.bf16.mxu0 %v7178_v5 }
 0x1a1   : > { %6766 = vmatmul.mubr.msk.f32.gmra.mrb[2].mxu0 %vm507_vm0, %v1561_v34 }
 0x1a2   : > { %6768 = vmatprep.mubr.msk.f32.mxu0 %vm507_vm0, %v1562_v4  ;;  %7181 = vmatpush3.bf16.msra.mxu0 %v7178_v5 }
 0x1a3   : > { %7183 = vmatprep.subr.bf16.mxu0 %v7182_v20 }
 0x1a5   : > { %6769 = vmatmul.mubr.msk.f32.gmra.mrb[4].mxu0 %vm507_vm0, %v1563_v32 }
 0x1a6   : > { %6771 = vmatprep.mubr.msk.f32.mxu0 %vm507_vm0, %v1564_v45 }
 0x1a9   : > { %6772 = vmatmul.mubr.msk.f32.gmra.mrb[6].mxu0 %vm507_vm0, %v1565_v46 }
 0x1aa   : > { %6782 = vmatprep.mubr.msk.f32.mxu0 %vm507_vm0, %v1710_v59 }
 0x1ad   : > { %6783 = vmatmul.mubr.msk.f32.vlgmr.msra.gmra.mrb[0].mxu0 %vm507_vm0, %v7998_v38  ;;  %v1716_v38 = vsel %vm756_vm10, %v8304_v13, 0.0  ;;  %vm4571_vm10 = vcmask 261312  }
 0x1ae   : > { %6785 = vmatprep.mubr.msk.f32.mxu0 %vm507_vm0, %v8143_v57  ;;  %7185 = vmatpush3.bf16.msra.mxu0 %v7182_v20 }
 0x1af   : > { %7187 = vmatprep.subr.bf16.mxu0 %v7186_v44 }
 0x1b1   : > { %6786 = vmatmul.mubr.msk.f32.gmra.mrb[2].mxu0 %vm507_vm0, %v8151_v61 }
 0x1b2   : > { %6788 = vmatprep.mubr.msk.f32.mxu0 %vm507_vm0, %v8156_v0  ;;  %7189 = vmatpush3.bf16.msra.mxu0 %v7186_v44 }
 0x1b3   : > { %7191 = vmatprep.subr.bf16.mxu0 %v7190_v47 }
 0x1b5   : > { %6789 = vmatmul.mubr.msk.f32.gmra.mrb[4].mxu0 %vm507_vm0, %v8161_v1 }
 0x1b6   : > { %6791 = vmatprep.mubr.msk.f32.mxu0 %vm507_vm0, %v1716_v38 }
 0x1b9   : > { %6792 = vmatmul.mubr.msk.f32.gmra.mrb[6].mxu0 %vm507_vm0, %v8185_v58 }
 0x1ba   : > { %6802 = vmatprep.mubr.msk.f32.mxu0 %vm507_vm0, %v7936_v7  ;;  %v2145_v7 = vld [vmem:[%s9404_s4] sm:$0xff] }
 0x1bd   : > { %6803 = vmatmul.mubr.msk.f32.vlgmr.msra.gmra.mrb[0].mxu0 %vm507_vm0, %v7943_v10  ;;  %v2146_v10 = vld [vmem:[%s9404_s4 + $0x8] sm:$0xff] }
 0x1be   : > { %6805 = vmatprep.mubr.msk.f32.mxu0 %vm507_vm0, %v7967_v25  ;;  %7193 = vmatpush3.bf16.msra.mxu0 %v7190_v47  ;;  %v2147_v25 = vld [vmem:[%s9404_s4 + $0x10] sm:$0xff] }
 0x1bf   : > { %7195 = vmatprep.subr.bf16.mxu0 %v7194_v53 }
 0x1c1   : > { %6806 = vmatmul.mubr.msk.f32.gmra.mrb[2].mxu0 %vm507_vm0, %v7975_v31  ;;  %v7198_v31 = vpack.c.bf16 %v2146_v10, %v2145_v7 }
 0x1c2   : > { %6808 = vmatprep.mubr.msk.f32.mxu0 %vm507_vm0, %v8005_v43  ;;  %7197 = vmatpush3.bf16.msra.mxu0 %v7194_v53  ;;  %v2148_v43 = vld [vmem:[%s9404_s4 + $0x18] sm:$0xff] }
 0x1c3   : > { %7047 = vmatprep.subr.mxu0 %v9432_v41  ;;  %7199 = vmatprep.subr.bf16.mxu1 %v7198_v31 }
 0x1c4   : > { %7201 = vmatpush3.bf16.msra.mxu1 %v7198_v31 }
 0x1c5   : > { %6809 = vmatmul.mubr.msk.f32.gmra.mrb[4].mxu0 %vm507_vm0, %v8010_v21  ;;  %v7202_v21 = vpack.c.bf16 %v2148_v43, %v2147_v25 }
 0x1c6   : > { %6811 = vmatprep.mubr.msk.f32.mxu0 %vm507_vm0, %v8044_v29  ;;  %v7677_v29 = vmov 0.0|0.0  }
 0x1c7   : > { %7203 = vmatprep.subr.bf16.mxu1 %v7202_v21 }
 0x1c8   : > { %7205 = vmatpush3.bf16.msra.mxu1 %v7202_v21 }
 0x1c9   : > { %6812 = vmatmul.mubr.f32.gmra.mrb[6].mxu0 %v9432_v41  ;;  %7206 = vmatprep.subr.bf16.mxu1 %v7677_v29 }
 0x1ca   : > { %6822 = vmatprep.mubr.msk.f32.mxu0 %vm507_vm0, %v8170_v8 }
 0x1cd   : > { %6823 = vmatmul.mubr.msk.f32.vlgmr.msra.gmra.mrb[0].mxu0 %vm507_vm0, %v8076_v30  ;;  %v6289_v30 = vld [vmem:[%s9403_s3] ss:$0 sm:$0xff] }
 0x1ce   : > { %6825 = vmatprep.mubr.msk.f32.mxu0 %vm507_vm0, %v8175_v9 }
 0x1d1   : > { %6826 = vmatmul.mubr.msk.f32.gmra.mrb[2].mxu0 %vm507_vm0, %v8180_v14 }
 0x1d2   : > { %6828 = vmatprep.mubr.msk.f32.mxu0 %vm507_vm0, %v8190_v16 }
 0x1d5   : > { %6829 = vmatmul.mubr.msk.f32.gmra.mrb[4].mxu0 %vm507_vm0, %v8195_v39 }
 0x1d6   : > { %6831 = vmatprep.mubr.msk.f32.mxu0 %vm507_vm0, %v8200_v23 }
 0x1d9   : > { %6832 = vmatmul.mubr.msk.f32.gmra.mrb[6].mxu0 %vm507_vm0, %v8208_v28 }
 0x1da   : > { %7049 = vmatprep.mubr.msk.f32.mxu0 %vm7679_vm6, %v9432_v41 }
 0x2a0   : > { %v6824_v27 = vpop.f32.mrb[0].mxu0 }
 0x2a1   : > { %v2138_v57 = vadd.f32 %v6824_v27, %v6289_v30  ;;  %v2083_v61 = vpop.f32.mrb[1].mxu0 }
 0x2a2   : > { %v2137_v0 = vadd.f32 %v6289_v30, %v2083_v61 }
 0x2a3   : > { %2166 = vrot.lane.b32.xlu1 %v2138_v57, %s7678_s27 }
 0x2a4   : > { %2164 = vrot.lane.b32.xlu0 %v2137_v0, %s7678_s27  ;;  %v6827_v1 = vpop.f32.mrb[2].mxu0  ;;  %v7207_v8 = vpack.c.bf16 %v2138_v57, %v2137_v0  ;;  %v8469_v9 = vpack.i.bf16 %v2138_v57, %v2137_v0 }
 0x2a5   : > { %v2140_v14 = vadd.f32 %v6827_v1, %v6289_v30  ;;  %v2093_v58 = vpop.f32.mrb[3].mxu0 }
 0x2a6   : > { %v2139_v16 = vadd.f32 %v6289_v30, %v2093_v58 }
 0x2a8   : > { %2168 = vrot.lane.b32.xlu1 %v2139_v16, %s7678_s27  ;;  %v6830_v39 = vpop.f32.mrb[4].mxu0  ;;  %v7210_v23 = vpack.c.bf16 %v2140_v14, %v2139_v16  ;;  %v8471_v28 = vpack.i.bf16 %v2140_v14, %v2139_v16 }
 0x2a9   : > { %v2142_v42 = vadd.f32 %v6830_v39, %v6289_v30  ;;  %v2103_v51 = vpop.f32.mrb[5].mxu0 }
 0x2aa   : > { %v2141_v48 = vadd.f32 %v6289_v30, %v2103_v51 }
 0x2ac   : > { %2170 = vrot.lane.b32.xlu1 %v2140_v14, %s7678_s27  ;;  %2172 = vrot.lane.b32.xlu0 %v2141_v48, %s7678_s27  ;;  %v6833_v6 = vpop.f32.mrb[6].mxu0  ;;  %v7213_v12 = vpack.c.bf16 %v2142_v42, %v2141_v48  ;;  %v8473_v11 = vpack.i.bf16 %v2142_v42, %v2141_v48 }
 0x2ad   : > { %v2144_v15 = vadd.f32 %v6833_v6, %v6289_v30  ;;  %v2113_v49 = vpop.f32.mrb[7].mxu0 }
 0x2ae   : > { %v2143_v17 = vadd.f32 %v6289_v30, %v2113_v49 }
 0x2b0   : > { %2174 = vrot.lane.b32.xlu1 %v2142_v42, %s7678_s27  ;;  %2176 = vrot.lane.b32.xlu0 %v2143_v17, %s7678_s27  ;;  %v7216_v13 = vpack.c.bf16 %v2144_v15, %v2143_v17  ;;  %v8475_v26 = vpack.i.bf16 %v2144_v15, %v2143_v17 }
 0x2b4   : > { %2178 = vrot.lane.b32.xlu1 %v2144_v15, %s7678_s27 }
 0x315   : > { %v2167_v19 = vpop.permute.xlu1 %2166 }
 0x316   : > { %v2165_v18 = vpop.permute.xlu0 %2164 }
 0x317   : > { %6842 = vmatprep.mubr.msk.f32.mxu1 %vm507_vm0, %v2165_v18 }
 0x318   : > { %6843 = vmatmul.mubr.msk.f32.vlgmr.msra.gmra.mrb[0].mxu1 %vm507_vm0, %v2167_v19 }
 0x319   : > { %7208 = vmatpush3.bf16.msra.mxu1 %v7207_v8 }
 0x31a   : > { %v2169_v33 = vpop.permute.xlu1 %2168  ;;  %7209 = vmatprep.subr.bf16.mxu1 %v7677_v29 }
 0x31b   : > { %6845 = vmatprep.mubr.msk.f32.mxu1 %vm507_vm0, %v2169_v33 }
 0x31d   : > { %7211 = vmatpush3.bf16.msra.mxu1 %v7210_v23 }
 0x31e   : > { %v2171_v40 = vpop.permute.xlu1 %2170  ;;  %v2173_v55 = vpop.permute.xlu0 %2172  ;;  %7212 = vmatprep.subr.bf16.mxu1 %v7677_v29 }
 0x31f   : > { %6846 = vmatmul.mubr.msk.f32.gmra.mrb[2].mxu1 %vm507_vm0, %v2171_v40 }
 0x320   : > { %6848 = vmatprep.mubr.msk.f32.mxu1 %vm507_vm0, %v2173_v55 }
 0x321   : > { %7214 = vmatpush3.bf16.msra.mxu1 %v7213_v12 }
 0x322   : > { %v2175_v35 = vpop.permute.xlu1 %2174  ;;  %v2177_v54 = vpop.permute.xlu0 %2176  ;;  %7215 = vmatprep.subr.bf16.mxu1 %v7677_v29 }
 0x323   : > { %6849 = vmatmul.mubr.msk.f32.gmra.mrb[4].mxu1 %vm507_vm0, %v2175_v35 }
 0x324   : > { %6851 = vmatprep.mubr.msk.f32.mxu1 %vm507_vm0, %v2177_v54 }
 0x325   : > { %7217 = vmatpush3.bf16.msra.mxu1 %v7216_v13 }
 0x326   : > { %v2179_v63 = vpop.permute.xlu1 %2178  ;;  %6873 = vmatprep.subr.mxu1 %v9432_v41 }
 0x327   : > { %6852 = vmatmul.mubr.msk.f32.gmra.mrb[6].mxu1 %vm507_vm0, %v2179_v63 }
 0x328   : > { %6870 = vmatprep.mubr.msk.f32.mxu1 %vm7679_vm6, %v9432_v41 }
 0x3eb   : > { %v6844_v5 = vpop.f32.mrb[0].mxu1 }
 0x3ec   : > { %v8492_v36 = vadd.f32 %v6844_v5, %v6290_v22  ;;  %v2262_v2 = vpop.f32.mrb[1].mxu1 }
 0x3ed   : > { %v8494_v24 = vadd.f32 %v6290_v22, %v2262_v2 }
 0x3ee   : > { %v2305_v62 = vsel %vm2301_vm3, %v8492_v36, -inf }
 0x3ef   : > { %2306 = vmax.xlane.f32.xlu1 %v2305_v62  ;;  %v2302_v20 = vsel %vm2301_vm3, %v8494_v24, -inf }
 0x3f0   : > { %2303 = vmax.xlane.f32.xlu0 %v2302_v20 }
 0x3f2   : > { %v6847_v34 = vpop.f32.mrb[2].mxu1 }
 0x3f3   : > { %v8500_v4 = vadd.f32 %v6847_v34, %v6290_v22  ;;  %v2272_v32 = vpop.f32.mrb[3].mxu1 }
 0x3f4   : > { %v8502_v45 = vadd.f32 %v6290_v22, %v2272_v32 }
 0x3f5   : > { %v2311_v46 = vsel %vm2301_vm3, %v8500_v4, -inf }
 0x3f6   : > { %v6850_v37 = vpop.f32.mrb[4].mxu1  ;;  %2312 = vmax.xlane.f32.xlu0 %v2311_v46  ;;  %v2308_v50 = vsel %vm2301_vm3, %v8502_v45, -inf }
 0x3f7   : > { %v8506_v56 = vadd.f32 %v6850_v37, %v6290_v22  ;;  %v2282_v59 = vpop.f32.mrb[5].mxu1 }
 0x3f8   : > { %v8508_v44 = vadd.f32 %v6290_v22, %v2282_v59 }
 0x3f9   : > { %v2317_v3 = vsel %vm2301_vm3, %v8506_v56, -inf }
 0x3fa   : > { %2318 = vmax.xlane.f32.xlu1 %v2317_v3  ;;  %2309 = vmax.xlane.f32.xlu0 %v2308_v50  ;;  %v6853_v47 = vpop.f32.mrb[6].mxu1  ;;  %v2314_v53 = vsel %vm2301_vm3, %v8508_v44, -inf }
 0x3fb   : > { %v8514_v38 = vadd.f32 %v6853_v47, %v6290_v22  ;;  %v2292_v60 = vpop.f32.mrb[7].mxu1 }
 0x3fc   : > { %v8516_v52 = vadd.f32 %v6290_v22, %v2292_v60 }
 0x3fd   : > { %v2323_v7 = vsel %vm2301_vm3, %v8514_v38, -inf }
 0x3fe   : > { %2315 = vmax.xlane.f32.xlu0 %v2314_v53  ;;  %2324 = vmax.xlane.f32.xlu1 %v2323_v7  ;;  %v2320_v10 = vsel %vm2301_vm3, %v8516_v52, -inf }
 0x402   : > { %2321 = vmax.xlane.f32.xlu0 %v2320_v10 }
 0x47c   : > { %v2307_v25 = vpop.xlane.xlu1 %2306 }
 0x47d   : > { %v2327_v31 = vsub.f32 %v8492_v36, %v2307_v25  ;;  %v2304_v43 = vpop.xlane.xlu0 %2303 }
 0x47e   : > { %v2326_v21 = vsub.f32 %v8494_v24, %v2304_v43 }
 0x47f   : > { %v2336_v30 = vmul.f32 1.442695, %v2327_v31 }
 0x480   : > { %v2334_v27 = vmul.f32 1.442695, %v2326_v21 }
 0x481   : > { %7460 = vpow2.f32 %v2336_v30 }
 0x482   : > { %7462 = vpow2.f32 %v2334_v27 }
 0x483   : > { %v2313_v57 = vpop.xlane.xlu0 %2312 }
 0x484   : > { %v2329_v61 = vsub.f32 %v8500_v4, %v2313_v57 }
 0x486   : > { %v2340_v0 = vmul.f32 1.442695, %v2329_v61 }
 0x487   : > { %v2319_v1 = vpop.xlane.xlu1 %2318  ;;  %v2310_v8 = vpop.xlane.xlu0 %2309 }
 0x488   : > { %7464 = vpow2.f32 %v2340_v0  ;;  %v2331_v14 = vsub.f32 %v8506_v56, %v2319_v1  ;;  %v2328_v58 = vsub.f32 %v8502_v45, %v2310_v8 }
 0x48a   : > { %v2344_v16 = vmul.f32 1.442695, %v2331_v14  ;;  %v2338_v39 = vmul.f32 1.442695, %v2328_v58 }
 0x48b   : > { %v7461_v23 = vpop.eup %7460  ;;  %v2325_v42 = vpop.xlane.xlu1 %2324 }
 0x48c   : > { %v2316_v51 = vpop.xlane.xlu0 %2315  ;;  %v7463_v48 = vpop.eup %7462  ;;  %7466 = vpow2.f32 %v2344_v16  ;;  %v2333_v6 = vsub.f32 %v8514_v38, %v2325_v42  ;;  %v2353_v15 = vsel %vm2301_vm3, %v7461_v23, 0.0 }
 0x48d   : > { %v2330_v12 = vsub.f32 %v8508_v44, %v2316_v51  ;;  %7468 = vpow2.f32 %v2338_v39  ;;  %2354 = vadd.xlane.f32.xlu1 %v2353_v15  ;;  %v2350_v49 = vsel %vm2301_vm3, %v7463_v48, 0.0 }
 0x48e   : > { %v2348_v17 = vmul.f32 1.442695, %v2333_v6  ;;  %2351 = vadd.xlane.f32.xlu0 %v2350_v49 }
 0x48f   : > { %v2342_v13 = vmul.f32 1.442695, %v2330_v12 }
 0x490   : > { %v2322_v19 = vpop.xlane.xlu0 %2321  ;;  %7470 = vpow2.f32 %v2348_v17 }
 0x491   : > { %v2332_v18 = vsub.f32 %v8516_v52, %v2322_v19  ;;  %7472 = vpow2.f32 %v2342_v13 }
 0x492   : > { %v7465_v33 = vpop.eup %7464 }
 0x493   : > { %v2346_v40 = vmul.f32 1.442695, %v2332_v18  ;;  %v2359_v55 = vsel %vm2301_vm3, %v7465_v33, 0.0 }
 0x494   : > { %2360 = vadd.xlane.f32.xlu1 %v2359_v55 }
 0x495   : > { %7474 = vpow2.f32 %v2346_v40 }
 0x496   : > { %v7467_v35 = vpop.eup %7466 }
 0x497   : > { %v7469_v54 = vpop.eup %7468  ;;  %v2365_v63 = vsel %vm2301_vm3, %v7467_v35, 0.0 }
 0x498   : > { %2366 = vadd.xlane.f32.xlu1 %v2365_v63  ;;  %v2356_v22 = vsel %vm2301_vm3, %v7469_v54, 0.0 }
 0x499   : > { %2357 = vadd.xlane.f32.xlu0 %v2356_v22 }
 0x49a   : > { %v7471_v5 = vpop.eup %7470 }
 0x49b   : > { %v7473_v2 = vpop.eup %7472  ;;  %v2371_v62 = vsel %vm2301_vm3, %v7471_v5, 0.0 }
 0x49c   : > { %2372 = vadd.xlane.f32.xlu1 %v2371_v62  ;;  %v2362_v20 = vsel %vm2301_vm3, %v7473_v2, 0.0 }
 0x49d   : > { %2363 = vadd.xlane.f32.xlu0 %v2362_v20 }
 0x49f   : > { %v7475_v34 = vpop.eup %7474 }
 0x4a0   : > { %v2368_v32 = vsel %vm2301_vm3, %v7475_v34, 0.0 }
 0x4a1   : > { %2369 = vadd.xlane.f32.xlu0 %v2368_v32  ;;  %v2557_v32 = vld [vmem:[%s9406_s6] sm:$0xff] }
 0x51a   : > { %v2355_v46 = vpop.xlane.xlu1 %2354 }
 0x51b   : > { %v2352_v37 = vpop.xlane.xlu0 %2351 }
 0x51c   : > { %7476 = vrcp.f32 %v2352_v37 }
 0x51d   : > { %7478 = vrcp.f32 %v2355_v46 }
 0x521   : > { %v2361_v59 = vpop.xlane.xlu1 %2360 }
 0x522   : > { %7480 = vrcp.f32 %v2361_v59 }
 0x525   : > { %v2367_v3 = vpop.xlane.xlu1 %2366 }
 0x526   : > { %v7477_v50 = vpop.eup %7476  ;;  %v2358_v47 = vpop.xlane.xlu0 %2357 }
 0x527   : > { %7482 = vrcp.f32 %v2358_v47  ;;  %v8544_v60 = vmul.f32 %v7477_v50, %v7463_v48  ;;  %v7479_v53 = vpop.eup %7478 }
 0x528   : > { %7484 = vrcp.f32 %v2367_v3  ;;  %v8547_v25 = vmul.f32 %v7479_v53, %v7461_v23 }
 0x529   : > { %2411 = vxpose.xlu0.b32.start [1/8] (short) (narrow) %v8544_v60, 8  ;;  %v2373_v7 = vpop.xlane.xlu1 %2372  ;;  %v2390_v21 = vsel %vm2301_vm3, %v8544_v60, 0.0 }
 0x52a   : > { %v2364_v10 = vpop.xlane.xlu0 %2363  ;;  %v2391_v30 = vsel %vm2301_vm3, %v8547_v25, 0.0 }
 0x52b   : > { %7486 = vrcp.f32 %v2364_v10  ;;  %v2392_v1 = vadd.f32 %v2391_v30, %v2390_v21 }
 0x52c   : > { %7488 = vrcp.f32 %v2373_v7  ;;  %v7481_v43 = vpop.eup %7480  ;;  %v2871_v7 = vsel %vm2870_vm8, %v8494_v24, -inf }
 0x52d   : > { %2412 = vxpose.xlu0.b32.cont [2/8] (short) (narrow) %v8547_v25, 8  ;;  %v8556_v61 = vmul.f32 %v7481_v43, %v7465_v33 }
 0x52e   : > { %v2370_v31 = vpop.xlane.xlu0 %2369 }
 0x52f   : > { %7490 = vrcp.f32 %v2370_v31  ;;  %v2395_v16 = vsel %vm2301_vm3, %v8556_v61, 0.0 }
 0x531   : > { %v7483_v27 = vpop.eup %7482 }
 0x532   : > { %v8554_v57 = vmul.f32 %v7483_v27, %v7469_v54  ;;  %v7485_v0 = vpop.eup %7484  ;;  %v2874_v27 = vsel %vm2870_vm8, %v8492_v36, -inf }
 0x533   : > { %v8565_v23 = vmul.f32 %v7485_v0, %v7467_v35  ;;  %v2877_v0 = vsel %vm2870_vm8, %v8502_v45, -inf }
 0x534   : > { %2413 = vxpose.xlu0.b32.cont [3/8] (short) (narrow) %v8554_v57, 8  ;;  %v2393_v8 = vsel %vm2301_vm3, %v8554_v57, 0.0 }
 0x535   : > { %v7487_v14 = vpop.eup %7486  ;;  %v2394_v58 = vadd.f32 %v2393_v8, %v2392_v1  ;;  %v2399_v15 = vsel %vm2301_vm3, %v8565_v23, 0.0  ;;  %v2880_v1 = vsel %vm2870_vm8, %v8500_v4, -inf  ;;  %v2883_v8 = vsel %vm2870_vm8, %v8508_v44, -inf }
 0x536   : > { %v8563_v39 = vmul.f32 %v7487_v14, %v7473_v2  ;;  %v7489_v42 = vpop.eup %7488  ;;  %v7680_v2 = vmov 0   ;;  %v2886_v14 = vsel %vm2870_vm8, %v8506_v56, -inf }
 0x537   : > { %v2396_v51 = vadd.f32 %v2395_v16, %v2394_v58  ;;  %v8574_v17 = vmul.f32 %v7489_v42, %v7471_v5  ;;  %v2889_v58 = vsel %vm2870_vm8, %v8516_v52, -inf  ;;  %v2892_v16 = vsel %vm2870_vm8, %v8514_v38, -inf }
 0x538   : > { %2414 = vxpose.xlu0.b32.cont [4/8] (short) (narrow) %v8556_v61, 8  ;;  %v2397_v48 = vsel %vm2301_vm3, %v8563_v39, 0.0 }
 0x539   : > { %v7491_v6 = vpop.eup %7490  ;;  %v2398_v12 = vadd.f32 %v2397_v48, %v2396_v51  ;;  %v2403_v33 = vsel %vm2301_vm3, %v8574_v17, 0.0 }
 0x53a   : > { %v8572_v49 = vmul.f32 %v7491_v6, %v7475_v34 }
 0x53b   : > { %v2400_v13 = vadd.f32 %v2399_v15, %v2398_v12 }
 0x53c   : > { %2415 = vxpose.xlu0.b32.cont [5/8] (short) (narrow) %v8563_v39, 8  ;;  %v2401_v19 = vsel %vm2301_vm3, %v8572_v49, 0.0 }
 0x53d   : > { %v2402_v18 = vadd.f32 %v2401_v19, %v2400_v13 }
 0x53f   : > { %v2404_v40 = vadd.f32 %v2403_v33, %v2402_v18 }
 0x540   : > { %2416 = vxpose.xlu0.b32.cont [6/8] (short) (narrow) %v8565_v23, 8 }
 0x541   : > { %v2405_v55 = vrot.slane %v2404_v40, 4 }
 0x543   : > { %v2406_v35 = vadd.f32 %v2405_v55, %v2404_v40 }
 0x544   : > { %2417 = vxpose.xlu0.b32.cont [7/8] (short) (narrow) %v8572_v49, 8 }
 0x545   : > { %v2407_v54 = vrot.slane %v2406_v35, 2 }
 0x547   : > { %v2408_v63 = vadd.f32 %v2407_v54, %v2406_v35 }
 0x548   : > { %2418 = vxpose.xlu0.b32.end [8/8] (short) (narrow) %v8574_v17, 8 }
 0x549   : > { %v2409_v22 = vrot.slane %v2408_v63, 1 }
 0x54b   : > { %v2410_v5 = vadd.f32 %v2409_v22, %v2408_v63 }
 0x54d   : > { %2517 = vxpose.xlu1.b32.start.end [1/1] (short) (narrow) %v2410_v5, 8 }
 0x56b   : > { %7382 = vset.pattern.permute.xlu1 %v7680_v2 }
 0x5ac   : > { %v2427_v62 = vpop.trf.xlu0 }
 0x5ad   : > { %6871 = vmatmul.mubr.msk.f32.vlgmr.msra.gmra.mrb[8].mxu1 %vm2443_vm7, %v2427_v62 }
 0x5ae   : > { %6875 = vmatprep.mubr.msk.f32.mxu1 %vm7679_vm6, %v9432_v41  ;;  %6874 = vmatpush3.msra.mxu1 %v2557_v32 }
 0x5af   : > { %6878 = vmatprep.subr.mxu1 %v9432_v41 }
 0x5cd   : > { %v2533_v20 = vpop.trf.xlu1 }
 0x5ce   : > { %v2549_v34 = vadd.f32 1e-05, %v2533_v20 }
 0x5d0   : > { %2552 = vperm.xlu1 %7382, %v2549_v34  }
 0x64f   : > { %v2553_v46 = vpop.permute.xlu1 %2552 }
 0x650   : > { %7492 = vrcp.f32 %v2553_v46 }
 0x65a   : > { %v7493_v37 = vpop.eup %7492 }
 0x680   : > { %v2513_v59 = vpop.f32.mrb[8].mxu1 }
 0x681   : > { %v2556_v3 = vmul.f32 %v7493_v37, %v2513_v59  ;;  %v6872_v50 = vpop.f32.mrb[9].mxu1 }
 0x683   : > { %6876 = vmatmul.mubr.msk.f32.vlgmr.msra.gmra.mrb[10].mxu1 %vm2301_vm3, %v2556_v3 }
 0x684   : > { %6880 = vmatprep.mubr.msk.f32.mxu1 %vm7679_vm6, %v9432_v41 }
 0x756   : > { %v2627_v47 = vpop.f32.mrb[10].mxu1 }
 0x757   : > { %2632 = vrot.lane.b32.xlu0 %v2627_v47, %s7681_s17  ;;  %v6877_v53 = vpop.f32.mrb[11].mxu1 }
 0x776   : > { %2872 = vmax.xlane.f32.xlu0 %v2871_v7 }
 0x7c9   : > { %v2633_v10 = vpop.permute.xlu0 %2632 }
 0x7ca   : > { %6879 = vmatpush3.xpose.msk.msra.mxu1 %vm2301_vm3, %v2633_v10 }
 0x7cb   : > { %6883 = vmatprep.subr.mxu1 %v9432_v41 }
 0x7cd   : > { %6881 = vmatmul.mubr.msk.f32.vlgmr.msra.gmra.mrb[12].mxu1 %vm2301_vm3, %v2627_v47 }
 0x7ce   : > { %6885 = vmatprep.mubr.msk.f32.mxu1 %vm7679_vm6, %v9432_v41 }
 0x803   : > { %v2873_v22 = vpop.xlane.xlu0 %2872 }
 0x804   : > { %v2895_v62 = vsub.f32 %v8494_v24, %v2873_v22 }
 0x806   : > { %v2903_v37 = vmul.f32 1.442695, %v2895_v62 }
 0x8a0   : > { %v2704_v31 = vpop.f32.mrb[12].mxu1 }
 0x8a1   : > { %v2708_v43 = vmul.f32 0.35355338, %v2704_v31  ;;  %v6882_v21 = vpop.f32.mrb[13].mxu1 }
 0x8a3   : > { %v2709_v30 = vsel %vm2301_vm3, %v2708_v43, -inf }
 0x8a4   : > { %2710 = vmax.xlane.f32.xlu1 %v2709_v30 }
 0x8a8   : > { %2875 = vmax.xlane.f32.xlu1 %v2874_v27 }
 0x8ac   : > { %2878 = vmax.xlane.f32.xlu1 %v2877_v0 }
 0x8b0   : > { %2881 = vmax.xlane.f32.xlu1 %v2880_v1 }
 0x8b4   : > { %2884 = vmax.xlane.f32.xlu1 %v2883_v8 }
 0x8b8   : > { %2887 = vmax.xlane.f32.xlu1 %v2886_v14 }
 0x8bc   : > { %2890 = vmax.xlane.f32.xlu1 %v2889_v58 }
 0x8c0   : > { %2893 = vmax.xlane.f32.xlu1 %v2892_v16 }
 0x8d1   : > { %2720 = vrot.lane.b32.xlu1 %v2627_v47, %s7682_s18 }
 0x931   : > { %v2711_v42 = vpop.xlane.xlu1 %2710 }
 0x932   : > { %v2712_v51 = vsub.f32 %v2708_v43, %v2711_v42 }
 0x934   : > { %v2713_v48 = vmul.f32 1.442695, %v2712_v51 }
 0x935   : > { %v2876_v6 = vpop.xlane.xlu1 %2875 }
 0x936   : > { %7494 = vpow2.f32 %v2713_v48  ;;  %v2896_v12 = vsub.f32 %v8492_v36, %v2876_v6 }
 0x938   : > { %v2905_v15 = vmul.f32 1.442695, %v2896_v12 }
 0x939   : > { %v2879_v13 = vpop.xlane.xlu1 %2878 }
 0x93a   : > { %7496 = vpow2.f32 %v2905_v15  ;;  %v2897_v19 = vsub.f32 %v8502_v45, %v2879_v13 }
 0x93c   : > { %v2907_v18 = vmul.f32 1.442695, %v2897_v19 }
 0x93d   : > { %v2882_v33 = vpop.xlane.xlu1 %2881 }
 0x93e   : > { %7498 = vpow2.f32 %v2907_v18  ;;  %v2898_v40 = vsub.f32 %v8500_v4, %v2882_v33 }
 0x940   : > { %v8622_v55 = vpop.eup %7494  ;;  %v2909_v35 = vmul.f32 1.442695, %v2898_v40 }
 0x941   : > { %v2885_v54 = vpop.xlane.xlu1 %2884  ;;  %v2715_v63 = vsel %vm2301_vm3, %v8622_v55, 0.0 }
 0x942   : > { %7500 = vpow2.f32 %v2909_v35  ;;  %2716 = vadd.xlane.f32.xlu0 %v2715_v63  ;;  %v2899_v59 = vsub.f32 %v8508_v44, %v2885_v54 }
 0x944   : > { %v8626_v5 = vpop.eup %7496  ;;  %v2911_v47 = vmul.f32 1.442695, %v2899_v59 }
 0x945   : > { %2929 = vrot.lane.b32.xlu1 %v8626_v5, %s7681_s17  ;;  %v2888_v20 = vpop.xlane.xlu1 %2887 }
 0x946   : > { %v2900_v34 = vsub.f32 %v8506_v56, %v2888_v20  ;;  %v2796_v20 = vld [vmem:[%s9407_s7] sm:$0xff] }
 0x948   : > { %v8632_v32 = vpop.eup %7498  ;;  %v2913_v46 = vmul.f32 1.442695, %v2900_v34 }
 0x949   : > { %2931 = vrot.lane.b32.xlu1 %v8632_v32, %s7681_s17  ;;  %v2891_v3 = vpop.xlane.xlu1 %2890 }
 0x94a   : > { %7502 = vpow2.f32 %v2913_v46  ;;  %v2901_v53 = vsub.f32 %v8516_v52, %v2891_v3 }
 0x94b   : > { %7504 = vpow2.f32 %v2903_v37 }
 0x94c   : > { %v8637_v50 = vpop.eup %7500  ;;  %7506 = vpow2.f32 %v2911_v47  ;;  %v2915_v43 = vmul.f32 1.442695, %v2901_v53 }
 0x94d   : > { %2933 = vrot.lane.b32.xlu1 %v8637_v50, %s7681_s17  ;;  %v2894_v7 = vpop.xlane.xlu1 %2893 }
 0x94e   : > { %v2902_v10 = vsub.f32 %v8514_v38, %v2894_v7 }
 0x950   : > { %v2917_v31 = vmul.f32 1.442695, %v2902_v10 }
 0x951   : > { %v2721_v21 = vpop.permute.xlu1 %2720 }
 0x952   : > { %7508 = vpow2.f32 %v2917_v31  ;;  %6884 = vmatpush3.msra.mxu1 %v2721_v21 }
 0x953   : > { %6888 = vmatprep.subr.mxu1 %v9432_v41  ;;  %7510 = vpow2.f32 %v2915_v43 }
 0x954   : > { %v8644_v30 = vpop.eup %7502 }
 0x955   : > { %2937 = vrot.lane.b32.xlu1 %v8644_v30, %s7681_s17  ;;  %v7505_v27 = vpop.eup %7504 }
 0x956   : > { %v8649_v0 = vpop.eup %7506 }
 0x958   : > { %2927 = vrot.lane.b32.xlu0 %v7505_v27, %s7681_s17 }
 0x95c   : > { %v8651_v1 = vpop.eup %7508  ;;  %2935 = vrot.lane.b32.xlu0 %v8649_v0, %s7681_s17 }
 0x95d   : > { %2941 = vrot.lane.b32.xlu1 %v8651_v1, %s7681_s17  ;;  %v8657_v8 = vpop.eup %7510 }
 0x960   : > { %2939 = vrot.lane.b32.xlu0 %v8657_v8, %s7681_s17 }
 0x9b7   : > { %v2930_v14 = vpop.permute.xlu1 %2929 }
 0x9b8   : > { %v2954_v58 = vsel %vm2301_vm3, %v2930_v14, 0.0 }
 0x9b9   : > { %2955 = vadd.xlane.f32.xlu1 %v2954_v58 }
 0x9bb   : > { %v2932_v16 = vpop.permute.xlu1 %2931 }
 0x9bc   : > { %v2957_v18 = vsel %vm2301_vm3, %v2932_v16, 0.0 }
 0x9bf   : > { %v2934_v42 = vpop.permute.xlu1 %2933 }
 0x9c0   : > { %v2960_v54 = vsel %vm2301_vm3, %v2934_v42, 0.0 }
 0x9c7   : > { %v2938_v51 = vpop.permute.xlu1 %2937 }
 0x9c8   : > { %v2966_v48 = vsel %vm2301_vm3, %v2938_v51, 0.0 }
 0x9c9   : > { %2967 = vadd.xlane.f32.xlu1 %v2966_v48 }
 0x9cf   : > { %v2717_v6 = vpop.xlane.xlu0 %2716  ;;  %v2942_v12 = vpop.permute.xlu1 %2941 }
 0x9d0   : > { %7512 = vrcp.f32 %v2717_v6  ;;  %v2972_v15 = vsel %vm2301_vm3, %v2942_v12, 0.0 }
 0x9d1   : > { %2973 = vadd.xlane.f32.xlu1 %v2972_v15 }
 0x9d3   : > { %v2928_v13 = vpop.permute.xlu0 %2927 }
 0x9d4   : > { %v2951_v19 = vsel %vm2301_vm3, %v2928_v13, 0.0 }
 0x9d5   : > { %2952 = vadd.xlane.f32.xlu0 %v2951_v19 }
 0x9d7   : > { %v2936_v40 = vpop.permute.xlu0 %2935 }
 0x9d8   : > { %v2963_v63 = vsel %vm2301_vm3, %v2936_v40, 0.0 }
 0x9d9   : > { %2958 = vadd.xlane.f32.xlu0 %v2957_v18 }
 0x9da   : > { %v7513_v33 = vpop.eup %7512 }
 0x9db   : > { %v2719_v35 = vmul.f32 %v7513_v33, %v8622_v55  ;;  %v2940_v22 = vpop.permute.xlu0 %2939 }
 0x9dc   : > { %v2969_v62 = vsel %vm2301_vm3, %v2940_v22, 0.0 }
 0x9dd   : > { %6886 = vmatmul.mubr.msk.f32.vlgmr.msra.gmra.mrb[14].mxu1 %vm2301_vm3, %v2719_v35  ;;  %2961 = vadd.xlane.f32.xlu0 %v2960_v54 }
 0x9de   : > { %6890 = vmatprep.mubr.msk.f32.mxu1 %vm7679_vm6, %v9432_v41  ;;  %6889 = vmatpush3.msra.mxu1 %v2796_v20 }
 0x9df   : > { %7218 = vmatprep.subr.bf16.mxu1 %v7677_v29 }
 0x9e1   : > { %2964 = vadd.xlane.f32.xlu0 %v2963_v63 }
 0x9e5   : > { %2970 = vadd.xlane.f32.xlu0 %v2969_v62 }
 0xa46   : > { %v2956_v55 = vpop.xlane.xlu1 %2955 }
 0xa47   : > { %7514 = vrcp.f32 %v2956_v55 }
 0xa51   : > { %v7515_v34 = vpop.eup %7514 }
 0xa52   : > { %v2978_v46 = vmul.f32 %v7515_v34, %v8626_v5 }
 0xa54   : > { %3022 = vrot.lane.b32.xlu1 %v2978_v46, %s7681_s17  ;;  %v2992_v16 = vsel %vm2870_vm8, %v2978_v46, 0.0 }
 0xa56   : > { %v2968_v3 = vpop.xlane.xlu1 %2967 }
 0xa5e   : > { %v2974_v7 = vpop.xlane.xlu1 %2973 }
 0xa62   : > { %v2953_v37 = vpop.xlane.xlu0 %2952 }
 0xa63   : > { %7516 = vrcp.f32 %v2953_v37 }
 0xa66   : > { %v2959_v59 = vpop.xlane.xlu0 %2958 }
 0xa67   : > { %7518 = vrcp.f32 %v2959_v59 }
 0xa6a   : > { %v2962_v47 = vpop.xlane.xlu0 %2961 }
 0xa6b   : > { %7520 = vrcp.f32 %v2962_v47 }
 0xa6c   : > { %7522 = vrcp.f32 %v2968_v3 }
 0xa6d   : > { %v7517_v53 = vpop.eup %7516 }
 0xa6e   : > { %v2965_v10 = vpop.xlane.xlu0 %2964  ;;  %v2976_v31 = vmul.f32 %v7517_v53, %v7505_v27 }
 0xa6f   : > { %7524 = vrcp.f32 %v2965_v10 }
 0xa70   : > { %3020 = vrot.lane.b32.xlu0 %v2976_v31, %s7681_s17  ;;  %7526 = vrcp.f32 %v2974_v7  ;;  %v2991_v14 = vsel %vm2870_vm8, %v2976_v31, 0.0 }
 0xa71   : > { %v7519_v43 = vpop.eup %7518  ;;  %v2993_v48 = vadd.f32 %v2992_v16, %v2991_v14 }
 0xa72   : > { %v2971_v5 = vpop.xlane.xlu0 %2970  ;;  %v2980_v21 = vmul.f32 %v7519_v43, %v8632_v32 }
 0xa73   : > { %7528 = vrcp.f32 %v2971_v5 }
 0xa74   : > { %3024 = vrot.lane.b32.xlu1 %v2980_v21, %s7681_s17  ;;  %v2994_v42 = vsel %vm2870_vm8, %v2980_v21, 0.0 }
 0xa75   : > { %v7521_v58 = vpop.eup %7520  ;;  %v2995_v32 = vadd.f32 %v2994_v42, %v2993_v48 }
 0xa76   : > { %v2982_v27 = vmul.f32 %v7521_v58, %v8637_v50  ;;  %v7523_v51 = vpop.eup %7522 }
 0xa77   : > { %v2986_v13 = vmul.f32 %v7523_v51, %v8644_v30 }
 0xa78   : > { %v2996_v6 = vsel %vm2870_vm8, %v2982_v27, 0.0  ;;  %3026 = vrot.lane.b32.xlu1 %v2982_v27, %s7681_s17 }
 0xa79   : > { %v7525_v12 = vpop.eup %7524  ;;  %v2997_v18 = vadd.f32 %v2996_v6, %v2995_v32  ;;  %v3000_v35 = vsel %vm2870_vm8, %v2986_v13, 0.0 }
 0xa7a   : > { %v2984_v15 = vmul.f32 %v7525_v12, %v8649_v0  ;;  %v7527_v19 = vpop.eup %7526 }
 0xa7b   : > { %v2990_v63 = vmul.f32 %v7527_v19, %v8651_v1 }
 0xa7c   : > { %3028 = vrot.lane.b32.xlu0 %v2984_v15, %s7681_s17  ;;  %v2998_v33 = vsel %vm2870_vm8, %v2984_v15, 0.0  ;;  %3030 = vrot.lane.b32.xlu1 %v2986_v13, %s7681_s17 }
 0xa7d   : > { %v7529_v50 = vpop.eup %7528  ;;  %v2999_v40 = vadd.f32 %v2998_v33, %v2997_v18  ;;  %v3004_v62 = vsel %vm2870_vm8, %v2990_v63, 0.0 }
 0xa7e   : > { %v2988_v54 = vmul.f32 %v7529_v50, %v8657_v8 }
 0xa7f   : > { %v3001_v22 = vadd.f32 %v3000_v35, %v2999_v40 }
 0xa80   : > { %3032 = vrot.lane.b32.xlu0 %v2988_v54, %s7681_s17  ;;  %v3002_v30 = vsel %vm2870_vm8, %v2988_v54, 0.0  ;;  %3034 = vrot.lane.b32.xlu1 %v2990_v63, %s7681_s17 }
 0xa81   : > { %v3003_v0 = vadd.f32 %v3002_v30, %v3001_v22 }
 0xa83   : > { %v3005_v20 = vadd.f32 %v3004_v62, %v3003_v0  ;;  %v6306_v0 = vld [vmem:[%s9406_s6 + $0x8] sm:$0xff] }
 0xa84   : > { %7384 = vrot.lane.b32.xlu0 %v8469_v9, %s7681_s17  ;;  %7389 = vrot.lane.b32.xlu1 %v8471_v28, %s7681_s17 }
 0xa85   : > { %v3006_v8 = vrot.slane %v3005_v20, 4 }
 0xa87   : > { %v3007_v55 = vadd.f32 %v3006_v8, %v3005_v20 }
 0xa88   : > { %7394 = vrot.lane.b32.xlu0 %v8473_v11, %s7681_s17  ;;  %7399 = vrot.lane.b32.xlu1 %v8475_v26, %s7681_s17 }
 0xa89   : > { %v3008_v1 = vrot.slane %v3007_v55, 2 }
 0xa8b   : > { %v3009_v34 = vadd.f32 %v3008_v1, %v3007_v55 }
 0xa8d   : > { %v3010_v46 = vrot.slane %v3009_v34, 1 }
 0xa8f   : > { %v3011_v37 = vadd.f32 %v3010_v46, %v3009_v34 }
 0xa91   : > { %3174 = vrot.lane.b32.xlu1 %v3011_v37, %s7681_s17 }
 0xab0   : > { %v2792_v59 = vpop.f32.mrb[14].mxu1 }
 0xab1   : > { %v6887_v3 = vpop.f32.mrb[15].mxu1  ;;  %6891 = vmatmul.mubr.msk.f32.vlgmr.msra.gmra.mrb[16].mxu1 %vm2301_vm3, %v2792_v59 }
 0xab2   : > { %6909 = vmatprep.mubr.msk.f32.mxu1 %vm7679_vm6, %v9432_v41 }
 0xac6   : > { %v8712_v47 = vpop.permute.xlu1 %3022 }
 0xae2   : > { %v8714_v53 = vpop.permute.xlu0 %3020 }
 0xae3   : > { %3044 = vxpose.xlu0.b32.start [1/8] (short) (narrow) %v8714_v53, 8 }
 0xae6   : > { %v8717_v7 = vpop.permute.xlu1 %3024 }
 0xae7   : > { %3045 = vxpose.xlu0.b32.cont [2/8] (short) (narrow) %v8712_v47, 8 }
 0xaea   : > { %v8720_v10 = vpop.permute.xlu1 %3026 }
 0xaeb   : > { %3046 = vxpose.xlu0.b32.cont [3/8] (short) (narrow) %v8717_v7, 8 }
 0xaee   : > { %v8723_v31 = vpop.permute.xlu0 %3028  ;;  %v8725_v43 = vpop.permute.xlu1 %3030 }
 0xaef   : > { %3047 = vxpose.xlu0.b32.cont [4/8] (short) (narrow) %v8720_v10, 8 }
 0xaf2   : > { %v8728_v5 = vpop.permute.xlu0 %3032  ;;  %v8730_v21 = vpop.permute.xlu1 %3034 }
 0xaf3   : > { %3048 = vxpose.xlu0.b32.cont [5/8] (short) (narrow) %v8723_v31, 8 }
 0xaf6   : > { %v7385_v14 = vpop.permute.xlu0 %7384  ;;  %v7390_v58 = vpop.permute.xlu1 %7389 }
 0xaf7   : > { %v7387_v16 = vunpack.i.h.bf16 %v7385_v14  ;;  %v7386_v42 = vunpack.i.l.bf16 %v7385_v14  ;;  %3049 = vxpose.xlu0.b32.cont [6/8] (short) (narrow) %v8725_v43, 8  ;;  %v7392_v51 = vunpack.i.h.bf16 %v7390_v58  ;;  %v7391_v48 = vunpack.i.l.bf16 %v7390_v58 }
 0xaf9   : > { %v7219_v27 = vpack.c.bf16 %v7387_v16, %v7386_v42  ;;  %v7222_v12 = vpack.c.bf16 %v7392_v51, %v7391_v48  ;;  %v3785_v16 = vsel %vm3781_vm9, %v8492_v36, -inf }
 0xafa   : > { %v7395_v6 = vpop.permute.xlu0 %7394  ;;  %v7400_v13 = vpop.permute.xlu1 %7399 }
 0xafb   : > { %3050 = vxpose.xlu0.b32.cont [7/8] (short) (narrow) %v8728_v5, 8  ;;  %7220 = vmatpush3.bf16.msra.mxu1 %v7219_v27  ;;  %v7397_v32 = vunpack.i.h.bf16 %v7395_v6  ;;  %v7396_v15 = vunpack.i.l.bf16 %v7395_v6  ;;  %v7402_v18 = vunpack.i.h.bf16 %v7400_v13  ;;  %v7401_v33 = vunpack.i.l.bf16 %v7400_v13 }
 0xafc   : > { %7221 = vmatprep.subr.bf16.mxu1 %v7677_v29  ;;  %v3791_v13 = vsel %vm3781_vm9, %v8500_v4, -inf }
 0xafd   : > { %v7225_v19 = vpack.c.bf16 %v7397_v32, %v7396_v15  ;;  %v7228_v40 = vpack.c.bf16 %v7402_v18, %v7401_v33  ;;  %v3782_v32 = vsel %vm3781_vm9, %v8494_v24, -inf  ;;  %v3788_v15 = vsel %vm3781_vm9, %v8502_v45, -inf }
 0xafe   : > { %v3797_v18 = vsel %vm3781_vm9, %v8506_v56, -inf  ;;  %v3800_v33 = vsel %vm3781_vm9, %v8516_v52, -inf }
 0xaff   : > { %3051 = vxpose.xlu0.b32.end [8/8] (short) (narrow) %v8730_v21, 8  ;;  %7223 = vmatpush3.bf16.msra.mxu1 %v7222_v12 }
 0xb00   : > { %7224 = vmatprep.subr.bf16.mxu1 %v7677_v29 }
 0xb03   : > { %v3175_v50 = vpop.permute.xlu1 %3174  ;;  %7226 = vmatpush3.bf16.msra.mxu1 %v7225_v19  ;;  %v3794_v19 = vsel %vm3781_vm9, %v8508_v44, -inf }
 0xb04   : > { %3177 = vxpose.xlu1.b32.start.end [1/1] (short) (narrow) %v3175_v50, 8  ;;  %7227 = vmatprep.subr.bf16.mxu1 %v7677_v29  ;;  %v3803_v50 = vsel %vm3781_vm9, %v8514_v38, -inf }
 0xb07   : > { %7229 = vmatpush3.bf16.msra.mxu1 %v7228_v40 }
 0xb08   : > { %6912 = vmatprep.subr.mxu1 %v9432_v41 }
 0xb63   : > { %v3060_v35 = vpop.trf.xlu0 }
 0xb64   : > { %6910 = vmatmul.mubr.msk.f32.vlgmr.msra.gmra.mrb[18].mxu1 %vm2443_vm7, %v3060_v35 }
 0xb65   : > { %6914 = vmatprep.mubr.msk.f32.mxu1 %vm7679_vm6, %v9432_v41  ;;  %6913 = vmatpush3.msra.mxu1 %v6306_v0 }
 0xb66   : > { %6917 = vmatprep.subr.mxu1 %v9432_v41 }
 0xb84   : > { %v3193_v54 = vpop.trf.xlu1  ;;  %v8743_v63 = vpop.f32.mrb[16].mxu1 }
 0xb85   : > { %v3209_v22 = vadd.f32 1e-05, %v3193_v54  ;;  %v6892_v30 = vpop.f32.mrb[17].mxu1 }
 0xb87   : > { %3212 = vperm.xlu1 %7382, %v3209_v22  }
 0xc06   : > { %v3213_v62 = vpop.permute.xlu1 %3212 }
 0xc07   : > { %7530 = vrcp.f32 %v3213_v62 }
 0xc11   : > { %v7531_v20 = vpop.eup %7530 }
 0xc37   : > { %v3169_v8 = vpop.f32.mrb[18].mxu1 }
 0xc38   : > { %v3216_v55 = vmul.f32 %v7531_v20, %v3169_v8  ;;  %v6911_v1 = vpop.f32.mrb[19].mxu1 }
 0xc3a   : > { %6915 = vmatmul.mubr.msk.f32.vlgmr.msra.gmra.mrb[20].mxu1 %vm2301_vm3, %v3216_v55 }
 0xc3b   : > { %6919 = vmatprep.mubr.msk.f32.mxu1 %vm7679_vm6, %v9432_v41 }
 0xd0d   : > { %v3288_v34 = vpop.f32.mrb[20].mxu1 }
 0xd0e   : > { %3293 = vrot.lane.b32.xlu0 %v3288_v34, %s7681_s17  ;;  %v6916_v46 = vpop.f32.mrb[21].mxu1 }
 0xd80   : > { %v3294_v37 = vpop.permute.xlu0 %3293 }
 0xd81   : > { %6918 = vmatpush3.xpose.msk.msra.mxu1 %vm2301_vm3, %v3294_v37 }
 0xd82   : > { %6922 = vmatprep.subr.mxu1 %v9432_v41 }
 0xd84   : > { %6920 = vmatmul.mubr.msk.f32.vlgmr.msra.gmra.mrb[22].mxu1 %vm2301_vm3, %v3288_v34 }
 0xd85   : > { %6924 = vmatprep.mubr.msk.f32.mxu1 %vm7679_vm6, %v9432_v41 }
 0xe57   : > { %v3365_v59 = vpop.f32.mrb[22].mxu1 }
 0xe58   : > { %v3369_v3 = vmul.f32 0.35355338, %v3365_v59  ;;  %v6921_v14 = vpop.f32.mrb[23].mxu1 }
 0xe5a   : > { %v3370_v58 = vsel %vm2301_vm3, %v3369_v3, -inf }
 0xe5b   : > { %3371 = vmax.xlane.f32.xlu1 %v3370_v58 }
 0xe6c   : > { %3381 = vrot.lane.b32.xlu1 %v3288_v34, %s7682_s18 }
 0xe90   : > { %3786 = vmax.xlane.f32.xlu1 %v3785_v16 }
 0xee8   : > { %v3372_v42 = vpop.xlane.xlu1 %3371 }
 0xee9   : > { %v3373_v27 = vsub.f32 %v3369_v3, %v3372_v42 }
 0xeeb   : > { %v3374_v51 = vmul.f32 1.442695, %v3373_v27 }
 0xeec   : > { %v3382_v48 = vpop.permute.xlu1 %3381 }
 0xeed   : > { %7532 = vpow2.f32 %v3374_v51  ;;  %6923 = vmatpush3.msra.mxu1 %v3382_v48 }
 0xeee   : > { %6927 = vmatprep.subr.mxu1 %v9432_v41 }
 0xef7   : > { %v7533_v6 = vpop.eup %7532 }
 0xef8   : > { %v3376_v12 = vsel %vm2301_vm3, %v7533_v6, 0.0 }
 0xef9   : > { %3377 = vadd.xlane.f32.xlu0 %v3376_v12 }
 0xefd   : > { %3783 = vmax.xlane.f32.xlu0 %v3782_v32 }
 0xf01   : > { %3789 = vmax.xlane.f32.xlu0 %v3788_v15 }
 0xf05   : > { %3792 = vmax.xlane.f32.xlu0 %v3791_v13 }
 0xf09   : > { %3795 = vmax.xlane.f32.xlu0 %v3794_v19 }
 0xf0d   : > { %3798 = vmax.xlane.f32.xlu0 %v3797_v18 }
 0xf11   : > { %3801 = vmax.xlane.f32.xlu0 %v3800_v33 }
 0xf15   : > { %3804 = vmax.xlane.f32.xlu0 %v3803_v50 }
 0xf1d   : > { %v3787_v40 = vpop.xlane.xlu1 %3786 }
 0xf1e   : > { %v3807_v35 = vsub.f32 %v8492_v36, %v3787_v40 }
 0xf20   : > { %v3816_v54 = vmul.f32 1.442695, %v3807_v35 }
 0xf22   : > { %7534 = vpow2.f32 %v3816_v54 }
 0xf2c   : > { %v8779_v22 = vpop.eup %7534 }
 0xf2d   : > { %3840 = vrot.lane.b32.xlu1 %v8779_v22, %s7682_s18 }
 0xf86   : > { %v3378_v30 = vpop.xlane.xlu0 %3377 }
 0xf87   : > { %7536 = vrcp.f32 %v3378_v30 }
 0xf8a   : > { %v3784_v0 = vpop.xlane.xlu0 %3783 }
 0xf8b   : > { %v3806_v62 = vsub.f32 %v8494_v24, %v3784_v0 }
 0xf8d   : > { %v3814_v20 = vmul.f32 1.442695, %v3806_v62  ;;  %v3457_v62 = vld [vmem:[%s9407_s7 + $0x8] sm:$0xff] }
 0xf8e   : > { %v3790_v8 = vpop.xlane.xlu0 %3789 }
 0xf8f   : > { %7538 = vpow2.f32 %v3814_v20  ;;  %v3808_v55 = vsub.f32 %v8502_v45, %v3790_v8 }
 0xf91   : > { %v7537_v1 = vpop.eup %7536  ;;  %v3818_v34 = vmul.f32 1.442695, %v3808_v55 }
 0xf92   : > { %v3793_v46 = vpop.xlane.xlu0 %3792  ;;  %v3380_v37 = vmul.f32 %v7537_v1, %v7533_v6 }
 0xf93   : > { %7540 = vpow2.f32 %v3818_v34  ;;  %v3809_v59 = vsub.f32 %v8500_v4, %v3793_v46 }
 0xf94   : > { %6925 = vmatmul.mubr.msk.f32.vlgmr.msra.gmra.mrb[24].mxu1 %vm2301_vm3, %v3380_v37 }
 0xf95   : > { %v3820_v3 = vmul.f32 1.442695, %v3809_v59  ;;  %6929 = vmatprep.mubr.msk.f32.mxu1 %vm7679_vm6, %v9432_v41  ;;  %6928 = vmatpush3.msra.mxu1 %v3457_v62 }
 0xf96   : > { %v3796_v14 = vpop.xlane.xlu0 %3795 }
 0xf97   : > { %7542 = vpow2.f32 %v3820_v3  ;;  %v3810_v58 = vsub.f32 %v8508_v44, %v3796_v14 }
 0xf99   : > { %v8790_v16 = vpop.eup %7538  ;;  %v3822_v42 = vmul.f32 1.442695, %v3810_v58 }
 0xf9a   : > { %3838 = vrot.lane.b32.xlu0 %v8790_v16, %s7682_s18  ;;  %v3799_v27 = vpop.xlane.xlu0 %3798 }
 0xf9b   : > { %7544 = vpow2.f32 %v3822_v42  ;;  %v3811_v51 = vsub.f32 %v8506_v56, %v3799_v27 }
 0xf9d   : > { %v8795_v48 = vpop.eup %7540  ;;  %v3824_v6 = vmul.f32 1.442695, %v3811_v51 }
 0xf9e   : > { %3842 = vrot.lane.b32.xlu0 %v8795_v48, %s7682_s18  ;;  %v3802_v12 = vpop.xlane.xlu0 %3801 }
 0xf9f   : > { %7546 = vpow2.f32 %v3824_v6  ;;  %v3812_v32 = vsub.f32 %v8516_v52, %v3802_v12  ;;  %v3841_v30 = vpop.permute.xlu1 %3840 }
 0xfa0   : > { %v3865_v0 = vsel %vm2301_vm3, %v3841_v30, 0.0 }
 0xfa1   : > { %v8800_v15 = vpop.eup %7542  ;;  %v3826_v13 = vmul.f32 1.442695, %v3812_v32 }
 0xfa2   : > { %3844 = vrot.lane.b32.xlu0 %v8800_v15, %s7682_s18  ;;  %v3805_v19 = vpop.xlane.xlu0 %3804 }
 0xfa3   : > { %7548 = vpow2.f32 %v3826_v13  ;;  %v3813_v18 = vsub.f32 %v8514_v38, %v3805_v19 }
 0xfa5   : > { %v8805_v33 = vpop.eup %7544  ;;  %v3828_v50 = vmul.f32 1.442695, %v3813_v18 }
 0xfa6   : > { %3846 = vrot.lane.b32.xlu1 %v8805_v33, %s7682_s18 }
 0xfa7   : > { %7550 = vpow2.f32 %v3828_v50 }
 0xfa9   : > { %v8809_v40 = vpop.eup %7546 }
 0xfaa   : > { %3848 = vrot.lane.b32.xlu0 %v8809_v40, %s7682_s18 }
 0xfad   : > { %v8813_v35 = vpop.eup %7548 }
 0xfae   : > { %3850 = vrot.lane.b32.xlu1 %v8813_v35, %s7682_s18 }
 0xfb1   : > { %v8817_v54 = vpop.eup %7550 }
 0xfb2   : > { %3852 = vrot.lane.b32.xlu0 %v8817_v54, %s7682_s18 }
 0xfd1   : > { %3866 = vadd.xlane.f32.xlu0 %v3865_v0 }
0x100c   : > { %v3839_v20 = vpop.permute.xlu0 %3838 }
0x100d   : > { %v3862_v8 = vsel %vm2301_vm3, %v3839_v20, 0.0 }
0x100e   : > { %3863 = vadd.xlane.f32.xlu1 %v3862_v8 }
0x1010   : > { %v3843_v55 = vpop.permute.xlu0 %3842 }
0x1011   : > { %v3868_v1 = vsel %vm2301_vm3, %v3843_v55, 0.0 }
0x1012   : > { %3869 = vadd.xlane.f32.xlu0 %v3868_v1 }
0x1014   : > { %v3845_v34 = vpop.permute.xlu0 %3844 }
0x1015   : > { %v3871_v46 = vsel %vm2301_vm3, %v3845_v34, 0.0 }
0x1016   : > { %3872 = vadd.xlane.f32.xlu1 %v3871_v46 }
0x1018   : > { %v3847_v37 = vpop.permute.xlu1 %3846 }
0x1019   : > { %v3874_v59 = vsel %vm2301_vm3, %v3847_v37, 0.0 }
0x101a   : > { %3875 = vadd.xlane.f32.xlu0 %v3874_v59 }
0x101c   : > { %v3849_v3 = vpop.permute.xlu0 %3848 }
0x101d   : > { %v3877_v14 = vsel %vm2301_vm3, %v3849_v3, 0.0 }
0x101e   : > { %3878 = vadd.xlane.f32.xlu1 %v3877_v14 }
0x1020   : > { %v3851_v58 = vpop.permute.xlu1 %3850 }
0x1021   : > { %v3880_v42 = vsel %vm2301_vm3, %v3851_v58, 0.0 }
0x1022   : > { %3881 = vadd.xlane.f32.xlu0 %v3880_v42 }
0x1024   : > { %v3853_v27 = vpop.permute.xlu0 %3852 }
0x1025   : > { %v3883_v51 = vsel %vm2301_vm3, %v3853_v27, 0.0 }
0x1026   : > { %3884 = vadd.xlane.f32.xlu1 %v3883_v51 }
0x105e   : > { %v3867_v6 = vpop.xlane.xlu0 %3866 }
0x105f   : > { %7552 = vrcp.f32 %v3867_v6 }
0x1067   : > { %v3453_v12 = vpop.f32.mrb[24].mxu1 }
0x1068   : > { %v6926_v32 = vpop.f32.mrb[25].mxu1  ;;  %6930 = vmatmul.mubr.msk.f32.vlgmr.msra.gmra.mrb[26].mxu1 %vm2301_vm3, %v3453_v12 }
0x1069   : > { %v7553_v13 = vpop.eup %7552  ;;  %6934 = vmatprep.mubr.msk.f32.mxu1 %vm2301_vm3, %v8714_v53 }
0x106a   : > { %v3889_v19 = vmul.f32 %v7553_v13, %v8779_v22 }
0x106c   : > { %3933 = vrot.lane.b32.xlu1 %v3889_v19, %s7682_s18  ;;  %v3903_v3 = vsel %vm3781_vm9, %v3889_v19, 0.0 }
0x109b   : > { %v3864_v18 = vpop.xlane.xlu1 %3863 }
0x109c   : > { %7554 = vrcp.f32 %v3864_v18 }
0x109f   : > { %v3870_v50 = vpop.xlane.xlu0 %3869 }
0x10a0   : > { %7556 = vrcp.f32 %v3870_v50 }
0x10a3   : > { %v3873_v30 = vpop.xlane.xlu1 %3872 }
0x10a4   : > { %7558 = vrcp.f32 %v3873_v30 }
0x10a6   : > { %v7555_v0 = vpop.eup %7554 }
0x10a7   : > { %v3876_v62 = vpop.xlane.xlu0 %3875  ;;  %v3887_v20 = vmul.f32 %v7555_v0, %v8790_v16 }
0x10a8   : > { %7560 = vrcp.f32 %v3876_v62 }
0x10a9   : > { %3931 = vrot.lane.b32.xlu0 %v3887_v20, %s7682_s18  ;;  %v3902_v16 = vsel %vm3781_vm9, %v3887_v20, 0.0 }
0x10aa   : > { %v7557_v8 = vpop.eup %7556  ;;  %v3904_v58 = vadd.f32 %v3903_v3, %v3902_v16 }
0x10ab   : > { %v3879_v55 = vpop.xlane.xlu1 %3878  ;;  %v3891_v53 = vmul.f32 %v7557_v8, %v8795_v48 }
0x10ac   : > { %7562 = vrcp.f32 %v3879_v55 }
0x10ad   : > { %3935 = vrot.lane.b32.xlu1 %v3891_v53, %s7682_s18  ;;  %v3905_v48 = vsel %vm3781_vm9, %v3891_v53, 0.0 }
0x10ae   : > { %v7559_v22 = vpop.eup %7558  ;;  %v3906_v27 = vadd.f32 %v3905_v48, %v3904_v58 }
0x10af   : > { %v3882_v1 = vpop.xlane.xlu0 %3881  ;;  %v3893_v34 = vmul.f32 %v7559_v22, %v8800_v15 }
0x10b0   : > { %7564 = vrcp.f32 %v3882_v1 }
0x10b1   : > { %3937 = vrot.lane.b32.xlu0 %v3893_v34, %s7682_s18  ;;  %v3907_v15 = vsel %vm3781_vm9, %v3893_v34, 0.0 }
0x10b2   : > { %v7561_v46 = vpop.eup %7560 }
0x10b3   : > { %v3885_v37 = vpop.xlane.xlu1 %3884  ;;  %v3895_v59 = vmul.f32 %v7561_v46, %v8805_v33  ;;  %v3908_v33 = vadd.f32 %v3907_v15, %v3906_v27 }
0x10b4   : > { %7566 = vrcp.f32 %v3885_v37 }
0x10b5   : > { %3939 = vrot.lane.b32.xlu1 %v3895_v59, %s7682_s18  ;;  %v3909_v51 = vsel %vm3781_vm9, %v3895_v59, 0.0 }
0x10b6   : > { %v7563_v14 = vpop.eup %7562  ;;  %v3910_v13 = vadd.f32 %v3909_v51, %v3908_v33 }
0x10b7   : > { %v3897_v42 = vmul.f32 %v7563_v14, %v8809_v40 }
0x10b9   : > { %3941 = vrot.lane.b32.xlu0 %v3897_v42, %s7682_s18  ;;  %v3911_v12 = vsel %vm3781_vm9, %v3897_v42, 0.0 }
0x10ba   : > { %v7565_v6 = vpop.eup %7564  ;;  %v3912_v50 = vadd.f32 %v3911_v12, %v3910_v13 }
0x10bb   : > { %v3899_v32 = vmul.f32 %v7565_v6, %v8813_v35 }
0x10bd   : > { %3943 = vrot.lane.b32.xlu1 %v3899_v32, %s7682_s18  ;;  %v3913_v19 = vsel %vm3781_vm9, %v3899_v32, 0.0 }
0x10be   : > { %v7567_v18 = vpop.eup %7566  ;;  %v3914_v30 = vadd.f32 %v3913_v19, %v3912_v50 }
0x10bf   : > { %v3901_v40 = vmul.f32 %v7567_v18, %v8817_v54 }
0x10c1   : > { %7404 = vrot.lane.b32.xlu1 %v8469_v9, %s7682_s18  ;;  %3945 = vrot.lane.b32.xlu0 %v3901_v40, %s7682_s18  ;;  %v3915_v0 = vsel %vm3781_vm9, %v3901_v40, 0.0 }
0x10c2   : > { %v3916_v62 = vadd.f32 %v3915_v0, %v3914_v30 }
0x10c4   : > { %v3917_v20 = vrot.slane %v3916_v62, 4 }
0x10c5   : > { %7414 = vrot.lane.b32.xlu1 %v8473_v11, %s7682_s18  ;;  %7409 = vrot.lane.b32.xlu0 %v8471_v28, %s7682_s18 }
0x10c6   : > { %v3918_v35 = vadd.f32 %v3917_v20, %v3916_v62  ;;  %v4572_v62 = vsel %vm4571_vm10, %v8494_v24, -inf }
0x10c8   : > { %v3919_v8 = vrot.slane %v3918_v35, 2 }
0x10c9   : > { %7419 = vrot.lane.b32.xlu0 %v8475_v26, %s7682_s18 }
0x10ca   : > { %v3920_v54 = vadd.f32 %v3919_v8, %v3918_v35 }
0x10cc   : > { %v3921_v55 = vrot.slane %v3920_v54, 1 }
0x10ce   : > { %v3922_v53 = vadd.f32 %v3921_v55, %v3920_v54 }
0x10d0   : > { %4085 = vrot.lane.b32.xlu0 %v3922_v53, %s7682_s18 }
0x10de   : > { %v8871_v1 = vpop.permute.xlu1 %3933 }
0x111b   : > { %v8868_v22 = vpop.permute.xlu0 %3931 }
0x111c   : > { %3955 = vxpose.xlu1.b32.start [1/8] (short) (narrow) %v8868_v22, 8 }
0x111f   : > { %v8874_v34 = vpop.permute.xlu1 %3935 }
0x1120   : > { %3956 = vxpose.xlu1.b32.cont [2/8] (short) (narrow) %v8871_v1, 8 }
0x1123   : > { %v8877_v46 = vpop.permute.xlu0 %3937 }
0x1124   : > { %3957 = vxpose.xlu1.b32.cont [3/8] (short) (narrow) %v8874_v34, 8 }
0x1127   : > { %v8880_v16 = vpop.permute.xlu1 %3939 }
0x1128   : > { %3958 = vxpose.xlu1.b32.cont [4/8] (short) (narrow) %v8877_v46, 8 }
0x112b   : > { %v8883_v37 = vpop.permute.xlu0 %3941 }
0x112c   : > { %3959 = vxpose.xlu1.b32.cont [5/8] (short) (narrow) %v8880_v16, 8 }
0x112f   : > { %v8886_v59 = vpop.permute.xlu1 %3943 }
0x1130   : > { %3960 = vxpose.xlu1.b32.cont [6/8] (short) (narrow) %v8883_v37, 8 }
0x1133   : > { %v8888_v3 = vpop.permute.xlu0 %3945  ;;  %v7405_v27 = vpop.permute.xlu1 %7404 }
0x1134   : > { %3961 = vxpose.xlu1.b32.cont [7/8] (short) (narrow) %v8886_v59, 8 }
0x1137   : > { %v7410_v48 = vpop.permute.xlu0 %7409  ;;  %v7415_v6 = vpop.permute.xlu1 %7414 }
0x1138   : > { %3962 = vxpose.xlu1.b32.end [8/8] (short) (narrow) %v8888_v3, 8  ;;  %v7411_v51 = vunpack.i.l.bf16 %v7410_v48 }
0x113b   : > { %v3527_v14 = vpop.f32.mrb[26].mxu1  ;;  %v7420_v15 = vpop.permute.xlu0 %7419 }
0x113c   : > { %v6931_v58 = vpop.f32.mrb[27].mxu1  ;;  %6932 = vmatprep.subr.mxu1 %v3527_v14 }
0x113d   : > { %6933 = vmatpush3.msra.mxu1 %v3527_v14  ;;  %v4578_v14 = vsel %vm4571_vm10, %v8502_v45, -inf  ;;  %v4581_v58 = vsel %vm4571_vm10, %v8500_v4, -inf }
0x113e   : > { %6935 = vmatmul.mubr.msk.f32.vlgmr.msra.gmra.mrb[28].mxu1 %vm2301_vm3, %v8712_v47  ;;  %6946 = vmatprep.subr.mxu1 %v8743_v63  ;;  %v7407_v47 = vunpack.i.h.bf16 %v7405_v27 }
0x113f   : > { %6937 = vmatprep.mubr.msk.f32.mxu1 %vm2301_vm3, %v8717_v7  ;;  %6947 = vmatpush3.msra.mxu1 %v8743_v63  ;;  %v7406_v7 = vunpack.i.l.bf16 %v7405_v27  ;;  %v7412_v63 = vunpack.i.h.bf16 %v7410_v48  ;;  %v4575_v48 = vsel %vm4571_vm10, %v8492_v36, -inf  ;;  %v4590_v27 = vsel %vm4571_vm10, %v8516_v52, -inf }
0x1140   : > { %7230 = vmatprep.subr.bf16.mxu1 %v7677_v29 }
0x1142   : > { %v4086_v42 = vpop.permute.xlu0 %4085  ;;  %6938 = vmatmul.mubr.msk.f32.gmra.mrb[30].mxu1 %vm2301_vm3, %v8720_v10  ;;  %v7231_v10 = vpack.c.bf16 %v7407_v47, %v7406_v7  ;;  %v4593_v47 = vsel %vm4571_vm10, %v8514_v38, -inf }
0x1143   : > { %4088 = vxpose.xlu0.b32.start.end [1/1] (short) (narrow) %v4086_v42, 8  ;;  %6940 = vmatprep.mubr.msk.f32.mxu1 %vm2301_vm3, %v8723_v31  ;;  %v7234_v31 = vpack.c.bf16 %v7412_v63, %v7411_v51  ;;  %v4587_v42 = vsel %vm4571_vm10, %v8506_v56, -inf }
0x1146   : > { %6941 = vmatmul.mubr.msk.f32.gmra.mrb[32].mxu1 %vm2301_vm3, %v8725_v43  ;;  %v7417_v43 = vunpack.i.h.bf16 %v7415_v6 }
0x1147   : > { %6943 = vmatprep.mubr.msk.f32.mxu1 %vm2301_vm3, %v8728_v5  ;;  %v7416_v5 = vunpack.i.l.bf16 %v7415_v6 }
0x114a   : > { %6944 = vmatmul.mubr.msk.f32.gmra.mrb[34].mxu1 %vm2301_vm3, %v8730_v21  ;;  %v7421_v21 = vunpack.i.l.bf16 %v7420_v15 }
0x114b   : > { %6948 = vmatprep.mubr.msk.f32.mxu1 %vm2301_vm3, %v8544_v60  ;;  %v7237_v60 = vpack.c.bf16 %v7417_v43, %v7416_v5 }
0x114e   : > { %6949 = vmatmul.mubr.msk.f32.vlgmr.msra.gmra.mrb[28].mxu1 %vm2301_vm3, %v8547_v25  ;;  %v7422_v25 = vunpack.i.h.bf16 %v7420_v15  ;;  %v4584_v15 = vsel %vm4571_vm10, %v8508_v44, -inf }
0x114f   : > { %7232 = vmatpush3.bf16.msra.mxu1 %v7231_v10  ;;  %6951 = vmatprep.mubr.msk.f32.mxu1 %vm2301_vm3, %v8554_v57 }
0x1150   : > { %7233 = vmatprep.subr.bf16.mxu1 %v7677_v29  ;;  %v7240_v57 = vpack.c.bf16 %v7422_v25, %v7421_v21 }
0x1152   : > { %6952 = vmatmul.mubr.msk.f32.gmra.mrb[30].mxu1 %vm2301_vm3, %v8556_v61 }
0x1153   : > { %7235 = vmatpush3.bf16.msra.mxu1 %v7234_v31  ;;  %6954 = vmatprep.mubr.msk.f32.mxu1 %vm2301_vm3, %v8563_v39 }
0x1154   : > { %7236 = vmatprep.subr.bf16.mxu1 %v7677_v29 }
0x1156   : > { %6955 = vmatmul.mubr.msk.f32.gmra.mrb[32].mxu1 %vm2301_vm3, %v8565_v23 }
0x1157   : > { %7238 = vmatpush3.bf16.msra.mxu1 %v7237_v60  ;;  %6957 = vmatprep.mubr.msk.f32.mxu1 %vm2301_vm3, %v8572_v49  ;;  %v6329_v49 = vld [vmem:[%s9406_s6 + $0x10] sm:$0xff] }
0x1158   : > { %7239 = vmatprep.subr.bf16.mxu1 %v7677_v29 }
0x115a   : > { %6958 = vmatmul.mubr.msk.f32.gmra.mrb[34].mxu1 %vm2301_vm3, %v8574_v17 }
0x115b   : > { %7241 = vmatpush3.bf16.msra.mxu1 %v7240_v57  ;;  %6976 = vmatprep.mubr.msk.f32.mxu1 %vm7679_vm6, %v9432_v41 }
0x115c   : > { %6979 = vmatprep.subr.mxu1 %v9432_v41 }
0x116c   : > { %7423 = vset.pattern.permute.xlu0 %v7680_v2 }
0x119c   : > { %v3971_v61 = vpop.trf.xlu1 }
0x119d   : > { %6977 = vmatmul.mubr.msk.f32.vlgmr.msra.gmra.mrb[36].mxu1 %vm2443_vm7, %v3971_v61 }
0x119e   : > { %6981 = vmatprep.mubr.msk.f32.mxu1 %vm7679_vm6, %v9432_v41  ;;  %6980 = vmatpush3.msra.mxu1 %v6329_v49 }
0x119f   : > { %6984 = vmatprep.subr.mxu1 %v9432_v41 }
0x11c3   : > { %v4104_v39 = vpop.trf.xlu0 }
0x11c4   : > { %v4120_v23 = vadd.f32 1e-05, %v4104_v39 }
0x11c6   : > { %4123 = vperm.xlu0 %7423, %v4120_v23  }
0x1245   : > { %v4124_v17 = vpop.permute.xlu0 %4123 }
0x1246   : > { %7568 = vrcp.f32 %v4124_v17 }
0x1250   : > { %v7569_v33 = vpop.eup %7568 }
0x1270   : > { %v4080_v2 = vpop.f32.mrb[36].mxu1 }
0x1271   : > { %v4127_v12 = vmul.f32 %v7569_v33, %v4080_v2  ;;  %v6978_v32 = vpop.f32.mrb[37].mxu1 }
0x1273   : > { %6982 = vmatmul.mubr.msk.f32.vlgmr.msra.gmra.mrb[38].mxu1 %vm2301_vm3, %v4127_v12 }
0x1274   : > { %6986 = vmatprep.mubr.msk.f32.mxu1 %vm7679_vm6, %v9432_v41 }
0x1346   : > { %v4199_v13 = vpop.f32.mrb[38].mxu1 }
0x1347   : > { %4204 = vrot.lane.b32.xlu1 %v4199_v13, %s7681_s17  ;;  %v6983_v19 = vpop.f32.mrb[39].mxu1 }
0x13b9   : > { %v4205_v18 = vpop.permute.xlu1 %4204 }
0x13ba   : > { %6985 = vmatpush3.xpose.msk.msra.mxu1 %vm2301_vm3, %v4205_v18 }
0x13bb   : > { %6989 = vmatprep.subr.mxu1 %v9432_v41 }
0x13bd   : > { %6987 = vmatmul.mubr.msk.f32.vlgmr.msra.gmra.mrb[40].mxu1 %vm2301_vm3, %v4199_v13 }
0x13be   : > { %6991 = vmatprep.mubr.msk.f32.mxu1 %vm7679_vm6, %v9432_v41 }
0x1490   : > { %v4276_v50 = vpop.f32.mrb[40].mxu1 }
0x1491   : > { %v4280_v40 = vmul.f32 0.35355338, %v4276_v50  ;;  %v6988_v30 = vpop.f32.mrb[41].mxu1 }
0x1493   : > { %v4281_v0 = vsel %vm2301_vm3, %v4280_v40, -inf }
0x1494   : > { %4282 = vmax.xlane.f32.xlu0 %v4281_v0 }
0x14aa   : > { %4292 = vrot.lane.b32.xlu0 %v4199_v13, %s7682_s18 }
0x14c9   : > { %4573 = vmax.xlane.f32.xlu0 %v4572_v62 }
0x1521   : > { %v4283_v20 = vpop.xlane.xlu0 %4282 }
0x1522   : > { %v4284_v35 = vsub.f32 %v4280_v40, %v4283_v20  ;;  %v4368_v20 = vld [vmem:[%s9407_s7 + $0x10] sm:$0xff] }
0x1524   : > { %v4285_v8 = vmul.f32 1.442695, %v4284_v35 }
0x1525   : > { %v4293_v54 = vpop.permute.xlu0 %4292 }
0x1526   : > { %7570 = vpow2.f32 %v4285_v8  ;;  %6990 = vmatpush3.msra.mxu1 %v4293_v54 }
0x1527   : > { %6994 = vmatprep.subr.mxu1 %v9432_v41 }
0x1530   : > { %v7571_v55 = vpop.eup %7570 }
0x1531   : > { %v4287_v53 = vsel %vm2301_vm3, %v7571_v55, 0.0 }
0x1532   : > { %4288 = vadd.xlane.f32.xlu1 %v4287_v53 }
0x1536   : > { %4576 = vmax.xlane.f32.xlu1 %v4575_v48 }
0x153a   : > { %4579 = vmax.xlane.f32.xlu1 %v4578_v14 }
0x153e   : > { %4582 = vmax.xlane.f32.xlu1 %v4581_v58 }
0x1542   : > { %4585 = vmax.xlane.f32.xlu1 %v4584_v15 }
0x1546   : > { %4588 = vmax.xlane.f32.xlu1 %v4587_v42 }
0x154a   : > { %4591 = vmax.xlane.f32.xlu1 %v4590_v27 }
0x154e   : > { %4594 = vmax.xlane.f32.xlu1 %v4593_v47 }
0x1556   : > { %v4574_v7 = vpop.xlane.xlu0 %4573 }
0x1557   : > { %v4596_v10 = vsub.f32 %v8494_v24, %v4574_v7 }
0x1559   : > { %v4604_v63 = vmul.f32 1.442695, %v4596_v10 }
0x155b   : > { %7572 = vpow2.f32 %v4604_v63 }
0x1565   : > { %v8969_v51 = vpop.eup %7572 }
0x1566   : > { %4628 = vrot.lane.b32.xlu0 %v8969_v51, %s7683_s30 }
0x15bf   : > { %v4289_v6 = vpop.xlane.xlu1 %4288 }
0x15c0   : > { %7574 = vrcp.f32 %v4289_v6 }
0x15c3   : > { %v4577_v31 = vpop.xlane.xlu1 %4576 }
0x15c4   : > { %v4597_v43 = vsub.f32 %v8492_v36, %v4577_v31 }
0x15c6   : > { %v4606_v5 = vmul.f32 1.442695, %v4597_v43 }
0x15c7   : > { %v4580_v60 = vpop.xlane.xlu1 %4579 }
0x15c8   : > { %7576 = vpow2.f32 %v4606_v5  ;;  %v4598_v25 = vsub.f32 %v8502_v45, %v4580_v60 }
0x15ca   : > { %v7575_v21 = vpop.eup %7574  ;;  %v4608_v24 = vmul.f32 1.442695, %v4598_v25 }
0x15cb   : > { %v4291_v57 = vmul.f32 %v7575_v21, %v7571_v55  ;;  %v4583_v61 = vpop.xlane.xlu1 %4582 }
0x15cc   : > { %7578 = vpow2.f32 %v4608_v24  ;;  %v4599_v39 = vsub.f32 %v8500_v4, %v4583_v61 }
0x15cd   : > { %6992 = vmatmul.mubr.msk.f32.vlgmr.msra.gmra.mrb[42].mxu1 %vm2301_vm3, %v4291_v57 }
0x15ce   : > { %v4610_v23 = vmul.f32 1.442695, %v4599_v39  ;;  %6996 = vmatprep.mubr.msk.f32.mxu1 %vm7679_vm6, %v9432_v41  ;;  %6995 = vmatpush3.msra.mxu1 %v4368_v20 }
0x15cf   : > { %v4586_v49 = vpop.xlane.xlu1 %4585 }
0x15d0   : > { %7580 = vpow2.f32 %v4610_v23  ;;  %v4600_v36 = vsub.f32 %v8508_v44, %v4586_v49 }
0x15d2   : > { %v8980_v17 = vpop.eup %7576  ;;  %v4612_v45 = vmul.f32 1.442695, %v4600_v36 }
0x15d3   : > { %4630 = vrot.lane.b32.xlu1 %v8980_v17, %s7683_s30  ;;  %v4589_v33 = vpop.xlane.xlu1 %4588 }
0x15d4   : > { %7582 = vpow2.f32 %v4612_v45  ;;  %v4601_v4 = vsub.f32 %v8506_v56, %v4589_v33 }
0x15d6   : > { %v8985_v2 = vpop.eup %7578  ;;  %v4614_v12 = vmul.f32 1.442695, %v4601_v4 }
0x15d7   : > { %4632 = vrot.lane.b32.xlu1 %v8985_v2, %s7683_s30  ;;  %v4592_v32 = vpop.xlane.xlu1 %4591 }
0x15d8   : > { %7584 = vpow2.f32 %v4614_v12  ;;  %v4602_v44 = vsub.f32 %v8516_v52, %v4592_v32 }
0x15da   : > { %v8990_v13 = vpop.eup %7580  ;;  %v4616_v19 = vmul.f32 1.442695, %v4602_v44 }
0x15db   : > { %4634 = vrot.lane.b32.xlu1 %v8990_v13, %s7683_s30  ;;  %v4595_v18 = vpop.xlane.xlu1 %4594 }
0x15dc   : > { %7586 = vpow2.f32 %v4616_v19  ;;  %v4603_v56 = vsub.f32 %v8514_v38, %v4595_v18  ;;  %v4629_v38 = vpop.permute.xlu0 %4628 }
0x15dd   : > { %v4652_v62 = vsel %vm2301_vm3, %v4629_v38, 0.0 }
0x15de   : > { %v8995_v50 = vpop.eup %7582  ;;  %v4618_v40 = vmul.f32 1.442695, %v4603_v56 }
0x15df   : > { %4636 = vrot.lane.b32.xlu0 %v8995_v50, %s7683_s30 }
0x15e0   : > { %7588 = vpow2.f32 %v4618_v40 }
0x15e2   : > { %v8999_v30 = vpop.eup %7584 }
0x15e3   : > { %4638 = vrot.lane.b32.xlu1 %v8999_v30, %s7683_s30 }
0x15e6   : > { %v9003_v52 = vpop.eup %7586 }
0x15e7   : > { %4640 = vrot.lane.b32.xlu0 %v9003_v52, %s7683_s30 }
0x15ea   : > { %v9007_v0 = vpop.eup %7588 }
0x15eb   : > { %4642 = vrot.lane.b32.xlu1 %v9007_v0, %s7683_s30 }
0x1606   : > { %4653 = vadd.xlane.f32.xlu0 %v4652_v62 }
0x1645   : > { %v4631_v35 = vpop.permute.xlu1 %4630 }
0x1646   : > { %v4655_v8 = vsel %vm2301_vm3, %v4631_v35, 0.0 }
0x1647   : > { %4656 = vadd.xlane.f32.xlu1 %v4655_v8 }
0x1649   : > { %v4633_v54 = vpop.permute.xlu1 %4632 }
0x164a   : > { %v4658_v55 = vsel %vm2301_vm3, %v4633_v54, 0.0 }
0x164b   : > { %4659 = vadd.xlane.f32.xlu0 %v4658_v55 }
0x164d   : > { %v4635_v53 = vpop.permute.xlu1 %4634 }
0x164e   : > { %v4661_v48 = vsel %vm2301_vm3, %v4635_v53, 0.0 }
0x164f   : > { %4662 = vadd.xlane.f32.xlu0 %v4661_v48 }
0x1651   : > { %v4637_v14 = vpop.permute.xlu0 %4636 }
0x1652   : > { %v4664_v58 = vsel %vm2301_vm3, %v4637_v14, 0.0 }
0x1653   : > { %4665 = vadd.xlane.f32.xlu0 %v4664_v58 }
0x1655   : > { %v4639_v15 = vpop.permute.xlu1 %4638 }
0x1656   : > { %v4667_v42 = vsel %vm2301_vm3, %v4639_v15, 0.0 }
0x1657   : > { %4668 = vadd.xlane.f32.xlu1 %v4667_v42 }
0x1659   : > { %v4641_v27 = vpop.permute.xlu0 %4640 }
0x165a   : > { %v4670_v47 = vsel %vm2301_vm3, %v4641_v27, 0.0 }
0x165b   : > { %4671 = vadd.xlane.f32.xlu0 %v4670_v47 }
0x165d   : > { %v4643_v7 = vpop.permute.xlu1 %4642 }
0x165e   : > { %v4673_v10 = vsel %vm2301_vm3, %v4643_v7, 0.0 }
0x165f   : > { %4674 = vadd.xlane.f32.xlu1 %v4673_v10 }
0x1693   : > { %v4654_v63 = vpop.xlane.xlu0 %4653 }
0x1694   : > { %7590 = vrcp.f32 %v4654_v63 }
0x169e   : > { %v7591_v6 = vpop.eup %7590 }
0x169f   : > { %v4677_v31 = vmul.f32 %v7591_v6, %v8969_v51 }
0x16a0   : > { %v4364_v43 = vpop.f32.mrb[42].mxu1 }
0x16a1   : > { %4721 = vrot.lane.b32.xlu0 %v4677_v31, %s7683_s30  ;;  %v6993_v5 = vpop.f32.mrb[43].mxu1  ;;  %6997 = vmatmul.mubr.msk.f32.vlgmr.msra.gmra.mrb[44].mxu1 %vm2301_vm3, %v4364_v43  ;;  %v4692_v12 = vsel %vm4571_vm10, %v4677_v31, 0.0 }
0x16a2   : > { %7001 = vmatprep.mubr.msk.f32.mxu1 %vm2301_vm3, %v8868_v22 }
0x16d4   : > { %v4657_v60 = vpop.xlane.xlu1 %4656 }
0x16d5   : > { %7592 = vrcp.f32 %v4657_v60 }
0x16d8   : > { %v4660_v25 = vpop.xlane.xlu0 %4659 }
0x16d9   : > { %7594 = vrcp.f32 %v4660_v25 }
0x16dc   : > { %v4663_v21 = vpop.xlane.xlu0 %4662 }
0x16dd   : > { %7596 = vrcp.f32 %v4663_v21 }
0x16df   : > { %v7593_v24 = vpop.eup %7592 }
0x16e0   : > { %v4666_v57 = vpop.xlane.xlu0 %4665  ;;  %v4679_v61 = vmul.f32 %v7593_v24, %v8980_v17 }
0x16e1   : > { %7598 = vrcp.f32 %v4666_v57 }
0x16e2   : > { %4723 = vrot.lane.b32.xlu1 %v4679_v61, %s7683_s30  ;;  %v4693_v17 = vsel %vm4571_vm10, %v4679_v61, 0.0 }
0x16e3   : > { %v7595_v51 = vpop.eup %7594  ;;  %v4694_v44 = vadd.f32 %v4693_v17, %v4692_v12 }
0x16e4   : > { %v4669_v39 = vpop.xlane.xlu1 %4668  ;;  %v4681_v23 = vmul.f32 %v7595_v51, %v8985_v2 }
0x16e5   : > { %7600 = vrcp.f32 %v4669_v39 }
0x16e6   : > { %4725 = vrot.lane.b32.xlu1 %v4681_v23, %s7683_s30  ;;  %v4695_v2 = vsel %vm4571_vm10, %v4681_v23, 0.0 }
0x16e7   : > { %v7597_v22 = vpop.eup %7596  ;;  %v4696_v18 = vadd.f32 %v4695_v2, %v4694_v44 }
0x16e8   : > { %v4672_v49 = vpop.xlane.xlu0 %4671  ;;  %v4683_v36 = vmul.f32 %v7597_v22, %v8990_v13 }
0x16e9   : > { %7602 = vrcp.f32 %v4672_v49 }
0x16ea   : > { %4727 = vrot.lane.b32.xlu1 %v4683_v36, %s7683_s30  ;;  %v4697_v13 = vsel %vm4571_vm10, %v4683_v36, 0.0 }
0x16eb   : > { %v7599_v45 = vpop.eup %7598 }
0x16ec   : > { %v4675_v33 = vpop.xlane.xlu1 %4674  ;;  %v4685_v4 = vmul.f32 %v7599_v45, %v8995_v50  ;;  %v4698_v50 = vadd.f32 %v4697_v13, %v4696_v18 }
0x16ed   : > { %7604 = vrcp.f32 %v4675_v33 }
0x16ee   : > { %4729 = vrot.lane.b32.xlu0 %v4685_v4, %s7683_s30  ;;  %v4699_v56 = vsel %vm4571_vm10, %v4685_v4, 0.0 }
0x16ef   : > { %v7601_v32 = vpop.eup %7600  ;;  %v4700_v20 = vadd.f32 %v4699_v56, %v4698_v50 }
0x16f0   : > { %v4687_v19 = vmul.f32 %v7601_v32, %v8999_v30 }
0x16f2   : > { %4731 = vrot.lane.b32.xlu1 %v4687_v19, %s7683_s30  ;;  %v4701_v38 = vsel %vm4571_vm10, %v4687_v19, 0.0 }
0x16f3   : > { %v7603_v40 = vpop.eup %7602  ;;  %v4702_v54 = vadd.f32 %v4701_v38, %v4700_v20 }
0x16f4   : > { %v4689_v62 = vmul.f32 %v7603_v40, %v9003_v52 }
0x16f6   : > { %4733 = vrot.lane.b32.xlu0 %v4689_v62, %s7683_s30  ;;  %v4703_v35 = vsel %vm4571_vm10, %v4689_v62, 0.0 }
0x16f7   : > { %v7605_v8 = vpop.eup %7604  ;;  %v4704_v55 = vadd.f32 %v4703_v35, %v4702_v54 }
0x16f8   : > { %v4691_v30 = vmul.f32 %v7605_v8, %v9007_v0 }
0x16fa   : > { %v4705_v53 = vsel %vm4571_vm10, %v4691_v30, 0.0  ;;  %4735 = vrot.lane.b32.xlu1 %v4691_v30, %s7683_s30  ;;  %7425 = vrot.lane.b32.xlu0 %v8469_v9, %s7683_s30 }
0x16fb   : > { %v4706_v48 = vadd.f32 %v4705_v53, %v4704_v55 }
0x16fd   : > { %v4707_v14 = vrot.slane %v4706_v48, 4 }
0x16fe   : > { %7430 = vrot.lane.b32.xlu1 %v8471_v28, %s7683_s30  ;;  %7435 = vrot.lane.b32.xlu0 %v8473_v11, %s7683_s30 }
0x16ff   : > { %v4708_v52 = vadd.f32 %v4707_v14, %v4706_v48  ;;  %v6358_v48 = vld [vmem:[%s9408_s8] ss:$0 sm:$0xff] }
0x1701   : > { %v4709_v58 = vrot.slane %v4708_v52, 2 }
0x1702   : > { %7440 = vrot.lane.b32.xlu1 %v8475_v26, %s7683_s30 }
0x1703   : > { %v4710_v0 = vadd.f32 %v4709_v58, %v4708_v52 }
0x1705   : > { %v4711_v15 = vrot.slane %v4710_v0, 1 }
0x1707   : > { %v4712_v42 = vadd.f32 %v4711_v15, %v4710_v0  ;;  %v7660_v15 = vld [vmem:[%s7783_s24 + $0x8] sm:$0xff] }
0x1709   : > { %4875 = vrot.lane.b32.xlu1 %v4712_v42, %s7683_s30 }
0x1713   : > { %v9058_v27 = vpop.permute.xlu0 %4721 }
0x171c   : > { %4745 = vxpose.xlu0.b32.start [1/8] (short) (narrow) %v9058_v27, 8 }
0x1754   : > { %v9061_v9 = vpop.permute.xlu1 %4723 }
0x1755   : > { %4746 = vxpose.xlu0.b32.cont [2/8] (short) (narrow) %v9061_v9, 8 }
0x1758   : > { %v9064_v28 = vpop.permute.xlu1 %4725 }
0x1759   : > { %4747 = vxpose.xlu0.b32.cont [3/8] (short) (narrow) %v9064_v28, 8 }
0x175c   : > { %v9067_v11 = vpop.permute.xlu1 %4727 }
0x175d   : > { %4748 = vxpose.xlu0.b32.cont [4/8] (short) (narrow) %v9067_v11, 8 }
0x1760   : > { %v9070_v26 = vpop.permute.xlu0 %4729 }
0x1761   : > { %4749 = vxpose.xlu0.b32.cont [5/8] (short) (narrow) %v9070_v26, 8 }
0x1764   : > { %v9073_v47 = vpop.permute.xlu1 %4731 }
0x1765   : > { %4750 = vxpose.xlu0.b32.cont [6/8] (short) (narrow) %v9073_v47, 8 }
0x1768   : > { %v9076_v7 = vpop.permute.xlu0 %4733 }
0x1769   : > { %4751 = vxpose.xlu0.b32.cont [7/8] (short) (narrow) %v9076_v7, 8 }
0x176c   : > { %v9079_v10 = vpop.permute.xlu1 %4735  ;;  %v7426_v63 = vpop.permute.xlu0 %7425 }
0x176d   : > { %4752 = vxpose.xlu0.b32.end [8/8] (short) (narrow) %v9079_v10, 8  ;;  %v7428_v31 = vunpack.i.h.bf16 %v7426_v63  ;;  %v7427_v43 = vunpack.i.l.bf16 %v7426_v63  ;;  %v7662_v63 = vld [vmem:[%s7783_s24 + $0x18] sm:$0xff] }
0x176f   : > { %v7243_v25 = vpack.c.bf16 %v7428_v31, %v7427_v43 }
0x1770   : > { %v7431_v6 = vpop.permute.xlu1 %7430  ;;  %v7436_v61 = vpop.permute.xlu0 %7435 }
0x1771   : > { %v7433_v21 = vunpack.i.h.bf16 %v7431_v6  ;;  %v7432_v24 = vunpack.i.l.bf16 %v7431_v6  ;;  %v7438_v39 = vunpack.i.h.bf16 %v7436_v61  ;;  %v7437_v23 = vunpack.i.l.bf16 %v7436_v61  ;;  %v7664_v61 = vld [vmem:[%s7783_s24 + $0x28] sm:$0xff] }
0x1773   : > { %v7246_v51 = vpack.c.bf16 %v7433_v21, %v7432_v24 }
0x1774   : > { %v4438_v5 = vpop.f32.mrb[44].mxu1  ;;  %v7441_v57 = vpop.permute.xlu1 %7440 }
0x1775   : > { %v6998_v60 = vpop.f32.mrb[45].mxu1  ;;  %6999 = vmatprep.subr.mxu1 %v4438_v5  ;;  %v7443_v49 = vunpack.i.h.bf16 %v7441_v57 }
0x1776   : > { %7000 = vmatpush3.msra.mxu1 %v4438_v5  ;;  %v7663_v60 = vld [vmem:[%s7783_s24 + $0x10] sm:$0xff] }
0x1777   : > { %7002 = vmatmul.mubr.msk.f32.vlgmr.msra.gmra.mrb[28].mxu1 %vm2301_vm3, %v8871_v1  ;;  %7242 = vmatprep.subr.bf16.mxu1 %v7677_v29  ;;  %v7249_v1 = vpack.c.bf16 %v7438_v39, %v7437_v23 }
0x1778   : > { %7004 = vmatprep.mubr.msk.f32.mxu1 %vm2301_vm3, %v8874_v34  ;;  %7244 = vmatpush3.bf16.msra.mxu1 %v7243_v25  ;;  %v7442_v34 = vunpack.i.l.bf16 %v7441_v57 }
0x1779   : > { %7245 = vmatprep.subr.bf16.mxu1 %v7677_v29 }
0x177b   : > { %v4876_v22 = vpop.permute.xlu1 %4875  ;;  %7005 = vmatmul.mubr.msk.f32.gmra.mrb[30].mxu1 %vm2301_vm3, %v8877_v46  ;;  %v7252_v46 = vpack.c.bf16 %v7443_v49, %v7442_v34 }
0x177c   : > { %4878 = vxpose.xlu1.b32.start.end [1/1] (short) (narrow) %v4876_v22, 8  ;;  %7007 = vmatprep.mubr.msk.f32.mxu1 %vm2301_vm3, %v8880_v16  ;;  %v7665_v22 = vld [vmem:[%s7783_s24 + $0x20] sm:$0xff] }
0x177d   : > { %7247 = vmatpush3.bf16.msra.mxu1 %v7246_v51 }
0x177e   : > { %7248 = vmatprep.subr.bf16.mxu1 %v7677_v29 }
0x177f   : > { %7008 = vmatmul.mubr.msk.f32.gmra.mrb[32].mxu1 %vm2301_vm3, %v8883_v37 }
0x1780   : > { %7010 = vmatprep.mubr.msk.f32.mxu1 %vm2301_vm3, %v8886_v59 }
0x1781   : > { %7250 = vmatpush3.bf16.msra.mxu1 %v7249_v1 }
0x1782   : > { %7251 = vmatprep.subr.bf16.mxu1 %v7677_v29  ;;  %v6344_v29 = vld [vmem:[%s9406_s6 + $0x18] sm:$0xff] }
0x1783   : > { %7011 = vmatmul.mubr.msk.f32.gmra.mrb[34].mxu1 %vm2301_vm3, %v8888_v3 }
0x1784   : > { %7029 = vmatprep.mubr.msk.f32.mxu1 %vm7679_vm6, %v9432_v41 }
0x1785   : > { %7253 = vmatpush3.bf16.msra.mxu1 %v7252_v46 }
0x1786   : > { %7032 = vmatprep.subr.mxu1 %v9432_v41 }
0x17d1   : > { %v4761_v16 = vpop.trf.xlu0 }
0x17d2   : > { %7030 = vmatmul.mubr.msk.f32.vlgmr.msra.gmra.mrb[46].mxu1 %vm2443_vm7, %v4761_v16  ;;  %v7666_v16 = vld [vmem:[%s7783_s24 + $0x30] sm:$0xff] }
0x17d3   : > { %7034 = vmatprep.mubr.msk.f32.mxu1 %vm7679_vm6, %v9432_v41  ;;  %7033 = vmatpush3.msra.mxu1 %v6344_v29  ;;  %v7667_v29 = vld [vmem:[%s7783_s24 + $0x38] sm:$0xff] }
0x17d4   : > { %7037 = vmatprep.subr.mxu1 %v9432_v41 }
0x17fc   : > { %v4894_v37 = vpop.trf.xlu1 }
0x17fd   : > { %v4910_v59 = vadd.f32 1e-05, %v4894_v37 }
0x17ff   : > { %4913 = vperm.xlu1 %7382, %v4910_v59  }
0x187e   : > { %v4914_v3 = vpop.permute.xlu1 %4913 }
0x187f   : > { %7606 = vrcp.f32 %v4914_v3 }
0x1889   : > { %v7607_v36 = vpop.eup %7606 }
0x18a5   : > { %v4870_v45 = vpop.f32.mrb[46].mxu1 }
0x18a6   : > { %v4917_v17 = vmul.f32 %v7607_v36, %v4870_v45  ;;  %v7031_v33 = vpop.f32.mrb[47].mxu1 }
0x18a8   : > { %7035 = vmatmul.mubr.msk.f32.vlgmr.msra.gmra.mrb[48].mxu1 %vm2301_vm3, %v4917_v17 }
0x18a9   : > { %7039 = vmatprep.mubr.msk.f32.mxu1 %vm7679_vm6, %v9432_v41 }
0x197b   : > { %v4989_v4 = vpop.f32.mrb[48].mxu1 }
0x197c   : > { %4994 = vrot.lane.b32.xlu0 %v4989_v4, %s7681_s17  ;;  %v7036_v12 = vpop.f32.mrb[49].mxu1 }
0x19ee   : > { %v4995_v2 = vpop.permute.xlu0 %4994 }
0x19ef   : > { %7038 = vmatpush3.xpose.msk.msra.mxu1 %vm2301_vm3, %v4995_v2 }
0x19f0   : > { %7042 = vmatprep.subr.mxu1 %v9432_v41 }
0x19f2   : > { %7040 = vmatmul.mubr.msk.f32.vlgmr.msra.gmra.mrb[50].mxu1 %vm2301_vm3, %v4989_v4 }
0x19f3   : > { %7044 = vmatprep.mubr.msk.f32.mxu1 %vm7679_vm6, %v9432_v41  ;;  %v5158_v41 = vld [vmem:[%s9407_s7 + $0x18] sm:$0xff] }
0x19f4   : > { %7048 = vmatpush3.msra.mxu0 %v5158_v41 }
0x1ac5   : > { %v5066_v32 = vpop.f32.mrb[50].mxu1 }
0x1ac6   : > { %v5070_v44 = vmul.f32 0.35355338, %v5066_v32  ;;  %v7041_v13 = vpop.f32.mrb[51].mxu1 }
0x1ac8   : > { %v5071_v19 = vsel %vm2301_vm3, %v5070_v44, -inf }
0x1ac9   : > { %5072 = vmax.xlane.f32.xlu1 %v5071_v19 }
0x1ada   : > { %5082 = vrot.lane.b32.xlu1 %v4989_v4, %s7682_s18 }
0x1b56   : > { %v5073_v18 = vpop.xlane.xlu1 %5072 }
0x1b57   : > { %v5074_v56 = vsub.f32 %v5070_v44, %v5073_v18 }
0x1b59   : > { %v5075_v40 = vmul.f32 1.442695, %v5074_v56 }
0x1b5a   : > { %v5083_v50 = vpop.permute.xlu1 %5082 }
0x1b5b   : > { %7608 = vpow2.f32 %v5075_v40  ;;  %7043 = vmatpush3.msra.mxu1 %v5083_v50 }
0x1b65   : > { %v7609_v38 = vpop.eup %7608 }
0x1b66   : > { %v5077_v62 = vsel %vm2301_vm3, %v7609_v38, 0.0 }
0x1b67   : > { %5078 = vadd.xlane.f32.xlu0 %v5077_v62 }
0x1bf4   : > { %v5079_v20 = vpop.xlane.xlu0 %5078 }
0x1bf5   : > { %7610 = vrcp.f32 %v5079_v20 }
0x1bff   : > { %v7611_v35 = vpop.eup %7610 }
0x1c00   : > { %v5081_v8 = vmul.f32 %v7611_v35, %v7609_v38 }
0x1c02   : > { %7045 = vmatmul.mubr.msk.f32.vlgmr.msra.gmra.mrb[52].mxu1 %vm2301_vm3, %v5081_v8 }
0x1c03   : > { %7054 = vmatprep.mubr.msk.f32.mxu1 %vm2301_vm3, %v9058_v27  ;;  %v7661_v27 = vld [vmem:[%s7783_s24] sm:$0xff] }
0x1cd5   : > { %v5154_v54 = vpop.f32.mrb[52].mxu1 }
0x1cd6   : > { %v7046_v30 = vpop.f32.mrb[53].mxu1  ;;  %7050 = vmatmul.mubr.msk.f32.vlgmr.msra.gmra.mrb[8].mxu0 %vm2301_vm3, %v5154_v54 }
0x1da9   : > { %v5228_v55 = vpop.f32.mrb[8].mxu0 }
0x1daa   : > { %v7051_v53 = vpop.f32.mrb[9].mxu0  ;;  %7052 = vmatprep.subr.mxu1 %v5228_v55 }
0x1dab   : > { %7053 = vmatpush3.msra.mxu1 %v5228_v55 }
0x1dac   : > { %7055 = vmatmul.mubr.msk.f32.vlgmr.msra.gmra.mrb[28].mxu1 %vm2301_vm3, %v9061_v9 }
0x1dad   : > { %7057 = vmatprep.mubr.msk.f32.mxu1 %vm2301_vm3, %v9064_v28 }
0x1db0   : > { %7058 = vmatmul.mubr.msk.f32.gmra.mrb[30].mxu1 %vm2301_vm3, %v9067_v11 }
0x1db1   : > { %7060 = vmatprep.mubr.msk.f32.mxu1 %vm2301_vm3, %v9070_v26 }
0x1db4   : > { %7061 = vmatmul.mubr.msk.f32.gmra.mrb[32].mxu1 %vm2301_vm3, %v9073_v47 }
0x1db5   : > { %7063 = vmatprep.mubr.msk.f32.mxu1 %vm2301_vm3, %v9076_v7 }
0x1db8   : > { %7064 = vmatmul.mubr.msk.f32.gmra.mrb[34].mxu1 %vm2301_vm3, %v9079_v10 }
0x1e7f   : > { %v7056_v14 = vpop.f32.mrb[28].mxu1 }
0x1e80   : > { %v5369_v52 = vadd.f32 %v7056_v14, %v6358_v48  ;;  %v5314_v58 = vpop.f32.mrb[29].mxu1 }
0x1e81   : > { %v5368_v0 = vadd.f32 %v6358_v48, %v5314_v58 }
0x1e82   : > { %v9147_v42 = vadd.f32 %v7660_v15, %v5369_v52 }
0x1e83   : > { %v9150_v9 = vadd.f32 %v7661_v27, %v5368_v0  ;;  %v7059_v28 = vpop.f32.mrb[30].mxu1 }
0x1e84   : > { %v5371_v11 = vadd.f32 %v7059_v28, %v6358_v48  ;;  %v5324_v26 = vpop.f32.mrb[31].mxu1  ;;  %v5389_v47 = vsel %vm507_vm0, %v9147_v42, 0.0 }
0x1e85   : > { %v5370_v7 = vadd.f32 %v6358_v48, %v5324_v26  ;;  %5390 = vadd.xlane.f32.xlu1 %v5389_v47  ;;  %v5386_v10 = vsel %vm507_vm0, %v9150_v9, 0.0 }
0x1e86   : > { %v9157_v6 = vadd.f32 %v7662_v63, %v5371_v11  ;;  %5387 = vadd.xlane.f32.xlu0 %v5386_v10 }
0x1e87   : > { %v7062_v31 = vpop.f32.mrb[32].mxu1  ;;  %v9162_v25 = vadd.f32 %v7663_v60, %v5370_v7  ;;  %v5514_v60 = vld [vmem:[%s9409_s9] sm:$0xff] }
0x1e88   : > { %v5334_v43 = vpop.f32.mrb[33].mxu1  ;;  %v5395_v5 = vsel %vm507_vm0, %v9157_v6, 0.0  ;;  %v5373_v21 = vadd.f32 %v7062_v31, %v6358_v48 }
0x1e89   : > { %v5372_v39 = vadd.f32 %v6358_v48, %v5334_v43  ;;  %v5392_v23 = vsel %vm507_vm0, %v9162_v25, 0.0 }
0x1e8a   : > { %5396 = vadd.xlane.f32.xlu0 %v5395_v5  ;;  %v9165_v51 = vadd.f32 %v7664_v61, %v5373_v21  ;;  %v5515_v21 = vld [vmem:[%s9409_s9 + $0x8] sm:$0xff]  ;;  %v5517_v61 = vld [vmem:[%s9409_s9 + $0x18] sm:$0xff] }
0x1e8b   : > { %v7065_v24 = vpop.f32.mrb[34].mxu1  ;;  %v9170_v1 = vadd.f32 %v7665_v22, %v5372_v39 }
0x1e8c   : > { %v5344_v57 = vpop.f32.mrb[35].mxu1  ;;  %v5401_v34 = vsel %vm507_vm0, %v9165_v51, 0.0  ;;  %v5375_v46 = vadd.f32 %v7065_v24, %v6358_v48  ;;  %v7254_v24 = vpack.c.bf16 %v5515_v21, %v5514_v60 }
0x1e8d   : > { %v5374_v49 = vadd.f32 %v6358_v48, %v5344_v57  ;;  %v5398_v59 = vsel %vm507_vm0, %v9170_v1, 0.0  ;;  %v5516_v57 = vld [vmem:[%s9409_s9 + $0x10] sm:$0xff] }
0x1e8e   : > { %5393 = vadd.xlane.f32.xlu0 %v5392_v23  ;;  %v9180_v3 = vadd.f32 %v7667_v29, %v5375_v46  ;;  %7255 = vmatprep.subr.bf16.mxu0 %v7254_v24  ;;  %v7258_v39 = vpack.c.bf16 %v5517_v61, %v5516_v57 }
0x1e8f   : > { %v9175_v37 = vadd.f32 %v7666_v16, %v5374_v49  ;;  %7257 = vmatpush3.bf16.msra.mxu0 %v7254_v24 }
0x1e90   : > { %v5407_v45 = vsel %vm507_vm0, %v9180_v3, 0.0  ;;  %7259 = vmatprep.subr.bf16.mxu0 %v7258_v39 }
0x1e91   : > { %v5404_v36 = vsel %vm507_vm0, %v9175_v37, 0.0 }
0x1e92   : > { %5402 = vadd.xlane.f32.xlu0 %v5401_v34 }
0x1e93   : > { %7261 = vmatpush3.bf16.msra.mxu0 %v7258_v39 }
0x1e96   : > { %5399 = vadd.xlane.f32.xlu0 %v5398_v59 }
0x1e9a   : > { %5405 = vadd.xlane.f32.xlu0 %v5404_v36 }
0x1e9e   : > { %5408 = vadd.xlane.f32.xlu0 %v5407_v45 }
0x1f12   : > { %v5391_v17 = vpop.xlane.xlu1 %5390 }
0x1f13   : > { %v5411_v33 = vmul.f32 0.03125, %v5391_v17  ;;  %v5388_v4 = vpop.xlane.xlu0 %5387 }
0x1f14   : > { %v5410_v12 = vmul.f32 0.03125, %v5388_v4 }
0x1f15   : > { %v9187_v2 = vsub.f32 %v9147_v42, %v5411_v33 }
0x1f16   : > { %v9190_v32 = vsub.f32 %v9150_v9, %v5410_v12 }
0x1f17   : > { %v5397_v44 = vpop.xlane.xlu0 %5396  ;;  %v5427_v13 = vmul.f32 %v9187_v2, %v9187_v2 }
0x1f18   : > { %v5413_v19 = vmul.f32 0.03125, %v5397_v44  ;;  %v5426_v56 = vmul.f32 %v9190_v32, %v9190_v32 }
0x1f19   : > { %v5437_v18 = vsel %vm507_vm0, %v5427_v13, 0.0 }
0x1f1a   : > { %v9198_v40 = vsub.f32 %v9157_v6, %v5413_v19  ;;  %5438 = vadd.xlane.f32.xlu0 %v5437_v18  ;;  %v5434_v41 = vsel %vm507_vm0, %v5426_v56, 0.0 }
0x1f1b   : > { %v5394_v50 = vpop.xlane.xlu0 %5393 }
0x1f1c   : > { %v5412_v38 = vmul.f32 0.03125, %v5394_v50  ;;  %v5429_v62 = vmul.f32 %v9198_v40, %v9198_v40  ;;  %v6359_v50 = vld [vmem:[%s9401_s1 + $0x2] ss:$0 sm:$0xff] }
0x1f1e   : > { %v9204_v20 = vsub.f32 %v9162_v25, %v5412_v38  ;;  %5435 = vadd.xlane.f32.xlu0 %v5434_v41  ;;  %v5443_v35 = vsel %vm507_vm0, %v5429_v62, 0.0 }
0x1f1f   : > { %5444 = vadd.xlane.f32.xlu1 %v5443_v35  ;;  %v5403_v8 = vpop.xlane.xlu0 %5402 }
0x1f20   : > { %v5415_v54 = vmul.f32 0.03125, %v5403_v8  ;;  %v5428_v30 = vmul.f32 %v9204_v20, %v9204_v20 }
0x1f22   : > { %v9210_v55 = vsub.f32 %v9165_v51, %v5415_v54  ;;  %v5440_v53 = vsel %vm507_vm0, %v5428_v30, 0.0 }
0x1f23   : > { %v5400_v48 = vpop.xlane.xlu0 %5399  ;;  %5441 = vadd.xlane.f32.xlu0 %v5440_v53 }
0x1f24   : > { %v5414_v14 = vmul.f32 0.03125, %v5400_v48  ;;  %v5431_v52 = vmul.f32 %v9210_v55, %v9210_v55 }
0x1f26   : > { %v9216_v58 = vsub.f32 %v9170_v1, %v5414_v14  ;;  %v5449_v0 = vsel %vm507_vm0, %v5431_v52, 0.0 }
0x1f27   : > { %5450 = vadd.xlane.f32.xlu1 %v5449_v0  ;;  %v5406_v15 = vpop.xlane.xlu0 %5405 }
0x1f28   : > { %v5416_v27 = vmul.f32 0.03125, %v5406_v15  ;;  %v5430_v28 = vmul.f32 %v9216_v58, %v9216_v58 }
0x1f2a   : > { %v9222_v11 = vsub.f32 %v9175_v37, %v5416_v27  ;;  %v5446_v26 = vsel %vm507_vm0, %v5430_v28, 0.0 }
0x1f2b   : > { %5447 = vadd.xlane.f32.xlu0 %v5446_v26  ;;  %v5409_v47 = vpop.xlane.xlu0 %5408 }
0x1f2c   : > { %v5417_v7 = vmul.f32 0.03125, %v5409_v47  ;;  %v5432_v10 = vmul.f32 %v9222_v11, %v9222_v11 }
0x1f2e   : > { %v9228_v63 = vsub.f32 %v9180_v3, %v5417_v7  ;;  %v5452_v31 = vsel %vm507_vm0, %v5432_v10, 0.0 }
0x1f2f   : > { %5453 = vadd.xlane.f32.xlu0 %v5452_v31 }
0x1f30   : > { %v5433_v43 = vmul.f32 %v9228_v63, %v9228_v63 }
0x1f32   : > { %v5455_v5 = vsel %vm507_vm0, %v5433_v43, 0.0 }
0x1f33   : > { %5456 = vadd.xlane.f32.xlu1 %v5455_v5 }
0x1fa7   : > { %v5439_v23 = vpop.xlane.xlu0 %5438 }
0x1fa8   : > { %v5459_v22 = vmul.f32 0.03125, %v5439_v23 }
0x1faa   : > { %v5467_v49 = vadd.f32 1e-05, %v5459_v22 }
0x1fab   : > { %v5436_v34 = vpop.xlane.xlu0 %5435 }
0x1fac   : > { %7612 = vrsqrt.f32 %v5467_v49  ;;  %v5458_v46 = vmul.f32 0.03125, %v5436_v34  ;;  %v5445_v16 = vpop.xlane.xlu1 %5444 }
0x1fad   : > { %v5461_v59 = vmul.f32 0.03125, %v5445_v16 }
0x1fae   : > { %v5466_v29 = vadd.f32 1e-05, %v5458_v46  ;;  %v5695_v46 = vld [vmem:[%s9411_s11 + $0x8] sm:$0xff] }
0x1faf   : > { %v5469_v36 = vadd.f32 1e-05, %v5461_v59  ;;  %v5697_v59 = vld [vmem:[%s9411_s11 + $0x18] sm:$0xff] }
0x1fb0   : > { %7614 = vrsqrt.f32 %v5466_v29  ;;  %v5442_v45 = vpop.xlane.xlu0 %5441 }
0x1fb1   : > { %7616 = vrsqrt.f32 %v5469_v36  ;;  %v5460_v17 = vmul.f32 0.03125, %v5442_v45  ;;  %v6361_v36 = vld [vmem:[%s9410_s10] ss:$0 sm:$0xff] }
0x1fb3   : > { %v5468_v33 = vadd.f32 1e-05, %v5460_v17 }
0x1fb4   : > { %v5451_v4 = vpop.xlane.xlu1 %5450 }
0x1fb5   : > { %7618 = vrsqrt.f32 %v5468_v33  ;;  %v5463_v12 = vmul.f32 0.03125, %v5451_v4 }
0x1fb6   : > { %v7613_v44 = vpop.eup %7612 }
0x1fb7   : > { %v5471_v13 = vadd.f32 1e-05, %v5463_v12  ;;  %v5483_v19 = vmul.f32 %v7613_v44, %v9187_v2  ;;  %v6360_v2 = vld [vmem:[%s9401_s1 + $0x3] ss:$0 sm:$0xff] }
0x1fb8   : > { %v5448_v18 = vpop.xlane.xlu0 %5447 }
0x1fb9   : > { %7620 = vrsqrt.f32 %v5471_v13  ;;  %v5462_v56 = vmul.f32 0.03125, %v5448_v18  ;;  %v5495_v54 = vmul.f32 %v6359_v50, %v5483_v19 }
0x1fba   : > { %v7615_v38 = vpop.eup %7614 }
0x1fbb   : > { %v7617_v62 = vpop.eup %7616  ;;  %v5470_v41 = vadd.f32 1e-05, %v5462_v56  ;;  %v5482_v35 = vmul.f32 %v7615_v38, %v9190_v32  ;;  %v5507_v27 = vadd.f32 %v6360_v2, %v5495_v54 }
0x1fbc   : > { %v5454_v8 = vpop.xlane.xlu0 %5453  ;;  %v5485_v48 = vmul.f32 %v7617_v62, %v9198_v40 }
0x1fbd   : > { %7622 = vrsqrt.f32 %v5470_v41  ;;  %v5464_v30 = vmul.f32 0.03125, %v5454_v8  ;;  %v5494_v53 = vmul.f32 %v6359_v50, %v5482_v35 }
0x1fbe   : > { %v5497_v26 = vmul.f32 %v6359_v50, %v5485_v48 }
0x1fbf   : > { %v7619_v14 = vpop.eup %7618  ;;  %v5472_v52 = vadd.f32 1e-05, %v5464_v30  ;;  %v5506_v0 = vadd.f32 %v6360_v2, %v5494_v53 }
0x1fc0   : > { %v5457_v15 = vpop.xlane.xlu1 %5456  ;;  %v5484_v28 = vmul.f32 %v7619_v14, %v9204_v20  ;;  %v5509_v40 = vadd.f32 %v6360_v2, %v5497_v26 }
0x1fc1   : > { %7624 = vrsqrt.f32 %v5472_v52  ;;  %v5465_v32 = vmul.f32 0.03125, %v5457_v15  ;;  %7074 = vmatprep.mubr.msk.f32.mxu0 %vm507_vm0, %v5506_v0 }
0x1fc2   : > { %7075 = vmatmul.mubr.msk.f32.vlgmr.msra.gmra.mrb[10].mxu0 %vm507_vm0, %v5507_v27  ;;  %v5496_v47 = vmul.f32 %v6359_v50, %v5484_v28 }
0x1fc3   : > { %v7621_v7 = vpop.eup %7620  ;;  %v5473_v10 = vadd.f32 1e-05, %v5465_v32 }
0x1fc4   : > { %v5508_v31 = vadd.f32 %v6360_v2, %v5496_v47  ;;  %v5487_v43 = vmul.f32 %v7621_v7, %v9210_v55 }
0x1fc5   : > { %7626 = vrsqrt.f32 %v5473_v10 }
0x1fc6   : > { %7077 = vmatprep.mubr.msk.f32.mxu0 %vm507_vm0, %v5508_v31  ;;  %v5499_v60 = vmul.f32 %v6359_v50, %v5487_v43 }
0x1fc7   : > { %v7623_v5 = vpop.eup %7622  ;;  %7078 = vmatmul.mubr.msk.f32.gmra.mrb[12].mxu0 %vm507_vm0, %v5509_v40 }
0x1fc8   : > { %v5486_v20 = vmul.f32 %v7623_v5, %v9216_v58  ;;  %v5511_v39 = vadd.f32 %v6360_v2, %v5499_v60 }
0x1fca   : > { %v5498_v21 = vmul.f32 %v6359_v50, %v5486_v20 }
0x1fcb   : > { %v7625_v24 = vpop.eup %7624 }
0x1fcc   : > { %v5510_v57 = vadd.f32 %v6360_v2, %v5498_v21  ;;  %v5488_v61 = vmul.f32 %v7625_v24, %v9222_v11  ;;  %v5694_v11 = vld [vmem:[%s9411_s11] sm:$0xff] }
0x1fcd   : > { %v7262_v16 = vpack.c.bf16 %v5695_v46, %v5694_v11 }
0x1fce   : > { %7080 = vmatprep.mubr.msk.f32.mxu0 %vm507_vm0, %v5510_v57  ;;  %v5500_v23 = vmul.f32 %v6359_v50, %v5488_v61 }
0x1fcf   : > { %v7627_v22 = vpop.eup %7626  ;;  %7081 = vmatmul.mubr.msk.f32.gmra.mrb[14].mxu0 %vm507_vm0, %v5511_v39  ;;  %7263 = vmatprep.subr.bf16.mxu1 %v7262_v16 }
0x1fd0   : > { %v5512_v55 = vadd.f32 %v6360_v2, %v5500_v23  ;;  %v5489_v49 = vmul.f32 %v7627_v22, %v9228_v63  ;;  %7265 = vmatpush3.bf16.msra.mxu1 %v7262_v16  ;;  %v5696_v63 = vld [vmem:[%s9411_s11 + $0x10] sm:$0xff] }
0x1fd1   : > { %v7266_v29 = vpack.c.bf16 %v5697_v59, %v5696_v63 }
0x1fd2   : > { %7083 = vmatprep.mubr.msk.f32.mxu0 %vm507_vm0, %v5512_v55  ;;  %v5501_v34 = vmul.f32 %v6359_v50, %v5489_v49 }
0x1fd3   : > { %7267 = vmatprep.subr.bf16.mxu1 %v7266_v29 }
0x1fd4   : > { %v5513_v58 = vadd.f32 %v6360_v2, %v5501_v34  ;;  %7269 = vmatpush3.bf16.msra.mxu1 %v7266_v29 }
0x1fd6   : > { %7084 = vmatmul.mubr.msk.f32.gmra.mrb[16].mxu0 %vm507_vm0, %v5513_v58 }
0x2095   : > { %v7076_v45 = vpop.f32.mrb[10].mxu0 }
0x2096   : > { %v5621_v17 = vadd.f32 %v7076_v45, %v6361_v36  ;;  %v5615_v33 = vpop.f32.mrb[11].mxu0  ;;  %v6370_v45 = vld [vmem:[%s9412_s12] ss:$0 sm:$0xff] }
0x2097   : > { %v5616_v4 = vadd.f32 %v6361_v36, %v5615_v33 }
0x2098   : > { %v5663_v12 = vmul.f32 0.70710677, %v5621_v17  ;;  %v5655_v0 = vmul.f32 0.5, %v5621_v17 }
0x2099   : > { %v5662_v44 = vmul.f32 0.70710677, %v5616_v4  ;;  %v5654_v48 = vmul.f32 0.5, %v5616_v4 }
0x209a   : > { %7628 = verf.f32 %v5663_v12  ;;  %v7079_v13 = vpop.f32.mrb[12].mxu0 }
0x209b   : > { %7630 = verf.f32 %v5662_v44  ;;  %v5631_v19 = vadd.f32 %v7079_v13, %v6361_v36  ;;  %v5625_v18 = vpop.f32.mrb[13].mxu0 }
0x209c   : > { %v5626_v56 = vadd.f32 %v6361_v36, %v5625_v18 }
0x209d   : > { %v5665_v50 = vmul.f32 0.70710677, %v5631_v19  ;;  %v5657_v5 = vmul.f32 0.5, %v5631_v19 }
0x209e   : > { %v5664_v38 = vmul.f32 0.70710677, %v5626_v56  ;;  %v5656_v31 = vmul.f32 0.5, %v5626_v56 }
0x209f   : > { %7632 = verf.f32 %v5665_v50 }
0x20a0   : > { %7634 = verf.f32 %v5664_v38 }
0x20a2   : > { %v7082_v62 = vpop.f32.mrb[14].mxu0 }
0x20a3   : > { %v5641_v41 = vadd.f32 %v7082_v62, %v6361_v36  ;;  %v5635_v35 = vpop.f32.mrb[15].mxu0 }
0x20a4   : > { %v7629_v8 = vpop.eup %7628  ;;  %v5636_v54 = vadd.f32 %v6361_v36, %v5635_v35 }
0x20a5   : > { %v7631_v30 = vpop.eup %7630  ;;  %v5679_v2 = vadd.f32 1.0, %v7629_v8  ;;  %v5667_v53 = vmul.f32 0.70710677, %v5641_v41  ;;  %v5659_v55 = vmul.f32 0.5, %v5641_v41 }
0x20a6   : > { %v5678_v14 = vadd.f32 1.0, %v7631_v30  ;;  %v5666_v52 = vmul.f32 0.70710677, %v5636_v54  ;;  %v5658_v23 = vmul.f32 0.5, %v5636_v54 }
0x20a7   : > { %7636 = verf.f32 %v5667_v53  ;;  %v5687_v28 = vmul.f32 %v5679_v2, %v5655_v0 }
0x20a8   : > { %v5686_v15 = vmul.f32 %v5678_v14, %v5654_v48  ;;  %7638 = verf.f32 %v5666_v52 }
0x20a9   : > { %v7633_v27 = vpop.eup %7632  ;;  %v7085_v32 = vpop.f32.mrb[16].mxu0 }
0x20aa   : > { %v7635_v26 = vpop.eup %7634  ;;  %v5681_v47 = vadd.f32 1.0, %v7633_v27  ;;  %v5651_v7 = vadd.f32 %v7085_v32, %v6361_v36  ;;  %v5645_v10 = vpop.f32.mrb[17].mxu0  ;;  %7094 = vmatprep.mubr.msk.f32.mxu1 %vm507_vm0, %v5686_v15 }
0x20ab   : > { %v5680_v40 = vadd.f32 1.0, %v7635_v26  ;;  %v5646_v43 = vadd.f32 %v6361_v36, %v5645_v10  ;;  %7095 = vmatmul.mubr.msk.f32.vlgmr.msra.gmra.mrb[54].mxu1 %vm507_vm0, %v5687_v28 }
0x20ac   : > { %v5669_v20 = vmul.f32 0.70710677, %v5651_v7  ;;  %v5689_v24 = vmul.f32 %v5681_v47, %v5657_v5  ;;  %v5661_v59 = vmul.f32 0.5, %v5651_v7 }
0x20ad   : > { %v5688_v60 = vmul.f32 %v5680_v40, %v5656_v31  ;;  %v5668_v21 = vmul.f32 0.70710677, %v5646_v43  ;;  %v5660_v16 = vmul.f32 0.5, %v5646_v43 }
0x20ae   : > { %7640 = verf.f32 %v5669_v20 }
0x20af   : > { %7642 = verf.f32 %v5668_v21  ;;  %7097 = vmatprep.mubr.msk.f32.mxu1 %vm507_vm0, %v5688_v60 }
0x20b0   : > { %7098 = vmatmul.mubr.msk.f32.gmra.mrb[56].mxu1 %vm507_vm0, %v5689_v24 }
0x20b1   : > { %v7637_v57 = vpop.eup %7636 }
0x20b2   : > { %v7639_v61 = vpop.eup %7638  ;;  %v5683_v39 = vadd.f32 1.0, %v7637_v57 }
0x20b3   : > { %v5682_v22 = vadd.f32 1.0, %v7639_v61 }
0x20b4   : > { %v5691_v34 = vmul.f32 %v5683_v39, %v5659_v55 }
0x20b5   : > { %v5690_v49 = vmul.f32 %v5682_v22, %v5658_v23 }
0x20b7   : > { %7100 = vmatprep.mubr.msk.f32.mxu1 %vm507_vm0, %v5690_v49 }
0x20b8   : > { %v7641_v58 = vpop.eup %7640  ;;  %7101 = vmatmul.mubr.msk.f32.gmra.mrb[58].mxu1 %vm507_vm0, %v5691_v34 }
0x20b9   : > { %v7643_v11 = vpop.eup %7642  ;;  %v5685_v46 = vadd.f32 1.0, %v7641_v58 }
0x20ba   : > { %v5684_v63 = vadd.f32 1.0, %v7643_v11 }
0x20bb   : > { %v5693_v36 = vmul.f32 %v5685_v46, %v5661_v59 }
0x20bc   : > { %v5692_v29 = vmul.f32 %v5684_v63, %v5660_v16 }
0x20be   : > { %7103 = vmatprep.mubr.msk.f32.mxu1 %vm507_vm0, %v5692_v29 }
0x20bf   : > { %7104 = vmatmul.mubr.msk.f32.gmra.mrb[60].mxu1 %vm507_vm0, %v5693_v36 }
0x217e   : > { %v7096_v17 = vpop.f32.mrb[54].mxu1 }
0x217f   : > { %v5801_v33 = vadd.f32 %v7096_v17, %v6370_v45  ;;  %v5795_v4 = vpop.f32.mrb[55].mxu1 }
0x2180   : > { %v5796_v12 = vadd.f32 %v6370_v45, %v5795_v4 }
0x2181   : > { %v5835_v44 = vadd.f32 %v5801_v33, %v9147_v42 }
0x2182   : > { %v5834_v13 = vadd.f32 %v5796_v12, %v9150_v9 }
0x2183   : > { %v7099_v19 = vpop.f32.mrb[56].mxu1  ;;  %v5847_v18 = vsel %vm507_vm0, %v5835_v44, 0.0 }
0x2184   : > { %v5811_v56 = vadd.f32 %v7099_v19, %v6370_v45  ;;  %5848 = vadd.xlane.f32.xlu1 %v5847_v18  ;;  %v5805_v50 = vpop.f32.mrb[57].mxu1  ;;  %v5844_v38 = vsel %vm507_vm0, %v5834_v13, 0.0 }
0x2185   : > { %v5806_v62 = vadd.f32 %v6370_v45, %v5805_v50  ;;  %5845 = vadd.xlane.f32.xlu0 %v5844_v38  ;;  %v5973_v50 = vld [vmem:[%s9413_s13 + $0x8] sm:$0xff]  ;;  %v5974_v38 = vld [vmem:[%s9413_s13 + $0x10] sm:$0xff] }
0x2186   : > { %v5837_v41 = vadd.f32 %v5811_v56, %v9157_v6  ;;  %v5972_v56 = vld [vmem:[%s9413_s13] sm:$0xff] }
0x2187   : > { %v5836_v35 = vadd.f32 %v5806_v62, %v9162_v25  ;;  %v7270_v62 = vpack.c.bf16 %v5973_v50, %v5972_v56 }
0x2188   : > { %v5853_v8 = vsel %vm507_vm0, %v5837_v41, 0.0 }
0x2189   : > { %5854 = vadd.xlane.f32.xlu1 %v5853_v8  ;;  %v5850_v42 = vsel %vm507_vm0, %v5836_v35, 0.0  ;;  %7271 = vmatprep.subr.bf16.mxu0 %v7270_v62 }
0x218a   : > { %5851 = vadd.xlane.f32.xlu0 %v5850_v42  ;;  %7273 = vmatpush3.bf16.msra.mxu0 %v7270_v62 }
0x218b   : > { %v7102_v9 = vpop.f32.mrb[58].mxu1 }
0x218c   : > { %v5821_v54 = vadd.f32 %v7102_v9, %v6370_v45  ;;  %v5815_v30 = vpop.f32.mrb[59].mxu1 }
0x218d   : > { %v5816_v2 = vadd.f32 %v6370_v45, %v5815_v30 }
0x218e   : > { %v5839_v53 = vadd.f32 %v5821_v54, %v9165_v51 }
0x218f   : > { %v5838_v48 = vadd.f32 %v5816_v2, %v9170_v1 }
0x2190   : > { %v5859_v14 = vsel %vm507_vm0, %v5839_v53, 0.0 }
0x2191   : > { %5860 = vadd.xlane.f32.xlu1 %v5859_v14  ;;  %v5856_v6 = vsel %vm507_vm0, %v5838_v48, 0.0 }
0x2192   : > { %5857 = vadd.xlane.f32.xlu0 %v5856_v6  ;;  %v7105_v25 = vpop.f32.mrb[60].mxu1 }
0x2193   : > { %v5831_v52 = vadd.f32 %v7105_v25, %v6370_v45  ;;  %v5825_v0 = vpop.f32.mrb[61].mxu1 }
0x2194   : > { %v5826_v15 = vadd.f32 %v6370_v45, %v5825_v0 }
0x2195   : > { %v5841_v27 = vadd.f32 %v5831_v52, %v9180_v3 }
0x2196   : > { %v5840_v28 = vadd.f32 %v5826_v15, %v9175_v37 }
0x2197   : > { %v5865_v32 = vsel %vm507_vm0, %v5841_v27, 0.0 }
0x2198   : > { %5866 = vadd.xlane.f32.xlu1 %v5865_v32  ;;  %v5862_v51 = vsel %vm507_vm0, %v5840_v28, 0.0  ;;  %v6379_v32 = vld [vmem:[%s9401_s1 + $0x4] ss:$0 sm:$0xff] }
0x2199   : > { %5863 = vadd.xlane.f32.xlu0 %v5862_v51 }
0x2211   : > { %v5849_v1 = vpop.xlane.xlu1 %5848 }
0x2212   : > { %v5869_v26 = vmul.f32 0.03125, %v5849_v1  ;;  %v5846_v47 = vpop.xlane.xlu0 %5845 }
0x2213   : > { %v5868_v7 = vmul.f32 0.03125, %v5846_v47 }
0x2214   : > { %v9310_v10 = vsub.f32 %v5835_v44, %v5869_v26 }
0x2215   : > { %v9312_v31 = vsub.f32 %v5834_v13, %v5868_v7 }
0x2216   : > { %v5855_v40 = vpop.xlane.xlu1 %5854  ;;  %v5885_v3 = vmul.f32 %v9310_v10, %v9310_v10 }
0x2217   : > { %v5871_v43 = vmul.f32 0.03125, %v5855_v40  ;;  %v5852_v37 = vpop.xlane.xlu0 %5851  ;;  %v5884_v5 = vmul.f32 %v9312_v31, %v9312_v31 }
0x2218   : > { %v5870_v20 = vmul.f32 0.03125, %v5852_v37  ;;  %v5895_v60 = vsel %vm507_vm0, %v5885_v3, 0.0  ;;  %v6380_v3 = vld [vmem:[%s9401_s1 + $0x5] ss:$0 sm:$0xff] }
0x2219   : > { %v9319_v21 = vsub.f32 %v5837_v41, %v5871_v43  ;;  %5896 = vadd.xlane.f32.xlu1 %v5895_v60  ;;  %v5892_v24 = vsel %vm507_vm0, %v5884_v5, 0.0  ;;  %v5975_v41 = vld [vmem:[%s9413_s13 + $0x18] sm:$0xff] }
0x221a   : > { %v9322_v57 = vsub.f32 %v5836_v35, %v5870_v20  ;;  %5893 = vadd.xlane.f32.xlu0 %v5892_v24  ;;  %v7274_v35 = vpack.c.bf16 %v5975_v41, %v5974_v38 }
0x221b   : > { %v5887_v61 = vmul.f32 %v9319_v21, %v9319_v21 }
0x221c   : > { %v5886_v39 = vmul.f32 %v9322_v57, %v9322_v57  ;;  %7275 = vmatprep.subr.bf16.mxu0 %v7274_v35 }
0x221d   : > { %v5901_v23 = vsel %vm507_vm0, %v5887_v61, 0.0  ;;  %7277 = vmatpush3.bf16.msra.mxu0 %v7274_v35 }
0x221e   : > { %v5861_v22 = vpop.xlane.xlu1 %5860  ;;  %5902 = vadd.xlane.f32.xlu1 %v5901_v23  ;;  %v5898_v55 = vsel %vm507_vm0, %v5886_v39, 0.0 }
0x221f   : > { %v5873_v49 = vmul.f32 0.03125, %v5861_v22  ;;  %5899 = vadd.xlane.f32.xlu0 %v5898_v55  ;;  %v5858_v34 = vpop.xlane.xlu0 %5857 }
0x2220   : > { %v5872_v58 = vmul.f32 0.03125, %v5858_v34 }
0x2221   : > { %v9330_v11 = vsub.f32 %v5839_v53, %v5873_v49 }
0x2222   : > { %v9332_v46 = vsub.f32 %v5838_v48, %v5872_v58 }
0x2223   : > { %v5889_v16 = vmul.f32 %v9330_v11, %v9330_v11 }
0x2224   : > { %v5888_v63 = vmul.f32 %v9332_v46, %v9332_v46 }
0x2225   : > { %v5867_v59 = vpop.xlane.xlu1 %5866  ;;  %v5907_v29 = vsel %vm507_vm0, %v5889_v16, 0.0 }
0x2226   : > { %v5875_v36 = vmul.f32 0.03125, %v5867_v59  ;;  %5908 = vadd.xlane.f32.xlu1 %v5907_v29  ;;  %v5864_v45 = vpop.xlane.xlu0 %5863  ;;  %v5904_v17 = vsel %vm507_vm0, %v5888_v63, 0.0 }
0x2227   : > { %v5874_v33 = vmul.f32 0.03125, %v5864_v45  ;;  %5905 = vadd.xlane.f32.xlu0 %v5904_v17 }
0x2228   : > { %v9340_v4 = vsub.f32 %v5841_v27, %v5875_v36 }
0x2229   : > { %v9342_v12 = vsub.f32 %v5840_v28, %v5874_v33 }
0x222a   : > { %v5891_v44 = vmul.f32 %v9340_v4, %v9340_v4 }
0x222b   : > { %v5890_v13 = vmul.f32 %v9342_v12, %v9342_v12 }
0x222c   : > { %v5913_v19 = vsel %vm507_vm0, %v5891_v44, 0.0 }
0x222d   : > { %5914 = vadd.xlane.f32.xlu1 %v5913_v19  ;;  %v5910_v18 = vsel %vm507_vm0, %v5890_v13, 0.0 }
0x222e   : > { %5911 = vadd.xlane.f32.xlu0 %v5910_v18 }
0x22a6   : > { %v5897_v8 = vpop.xlane.xlu1 %5896 }
0x22a7   : > { %v5917_v42 = vmul.f32 0.03125, %v5897_v8  ;;  %v5894_v9 = vpop.xlane.xlu0 %5893 }
0x22a8   : > { %v5916_v54 = vmul.f32 0.03125, %v5894_v9 }
0x22a9   : > { %v5925_v30 = vadd.f32 1e-05, %v5917_v42 }
0x22aa   : > { %v5924_v2 = vadd.f32 1e-05, %v5916_v54 }
0x22ab   : > { %7644 = vrsqrt.f32 %v5925_v30  ;;  %v5903_v53 = vpop.xlane.xlu1 %5902 }
0x22ac   : > { %7646 = vrsqrt.f32 %v5924_v2  ;;  %v5919_v48 = vmul.f32 0.03125, %v5903_v53  ;;  %v5900_v14 = vpop.xlane.xlu0 %5899 }
0x22ad   : > { %v5918_v6 = vmul.f32 0.03125, %v5900_v14 }
0x22ae   : > { %v5927_v25 = vadd.f32 1e-05, %v5919_v48 }
0x22af   : > { %v5926_v52 = vadd.f32 1e-05, %v5918_v6 }
0x22b0   : > { %7648 = vrsqrt.f32 %v5927_v25 }
0x22b1   : > { %7650 = vrsqrt.f32 %v5926_v52 }
0x22b3   : > { %v5909_v0 = vpop.xlane.xlu1 %5908 }
0x22b4   : > { %v5921_v15 = vmul.f32 0.03125, %v5909_v0  ;;  %v5906_v27 = vpop.xlane.xlu0 %5905 }
0x22b5   : > { %v7645_v28 = vpop.eup %7644  ;;  %v5920_v51 = vmul.f32 0.03125, %v5906_v27 }
0x22b6   : > { %v7647_v1 = vpop.eup %7646  ;;  %v5941_v26 = vmul.f32 %v7645_v28, %v9310_v10  ;;  %v5929_v47 = vadd.f32 1e-05, %v5921_v15 }
0x22b7   : > { %v5928_v7 = vadd.f32 1e-05, %v5920_v51  ;;  %v5940_v40 = vmul.f32 %v7647_v1, %v9312_v31 }
0x22b8   : > { %v5953_v43 = vmul.f32 %v6379_v32, %v5941_v26  ;;  %7652 = vrsqrt.f32 %v5929_v47 }
0x22b9   : > { %7654 = vrsqrt.f32 %v5928_v7  ;;  %v5952_v37 = vmul.f32 %v6379_v32, %v5940_v40 }
0x22ba   : > { %v7649_v5 = vpop.eup %7648  ;;  %v5915_v20 = vpop.xlane.xlu1 %5914  ;;  %v5965_v23 = vadd.f32 %v6380_v3, %v5953_v43 }
0x22bb   : > { %v7651_v60 = vpop.eup %7650  ;;  %v5923_v24 = vmul.f32 0.03125, %v5915_v20  ;;  %v5912_v61 = vpop.xlane.xlu0 %5911  ;;  %v5964_v39 = vadd.f32 %v6380_v3, %v5952_v37  ;;  %v5943_v10 = vmul.f32 %v7649_v5, %v9319_v21 }
0x22bc   : > { %v5922_v22 = vmul.f32 0.03125, %v5912_v61  ;;  %v5942_v31 = vmul.f32 %v7651_v60, %v9322_v57 }
0x22bd   : > { %v5931_v55 = vadd.f32 1e-05, %v5923_v24  ;;  %7114 = vmatprep.mubr.msk.f32.mxu0 %vm507_vm0, %v5964_v39  ;;  %v5955_v49 = vmul.f32 %v6379_v32, %v5943_v10 }
0x22be   : > { %v5930_v34 = vadd.f32 1e-05, %v5922_v22  ;;  %7115 = vmatmul.mubr.msk.f32.vlgmr.msra.gmra.mrb[18].mxu0 %vm507_vm0, %v5965_v23  ;;  %v5954_v58 = vmul.f32 %v6379_v32, %v5942_v31 }
0x22bf   : > { %7656 = vrsqrt.f32 %v5931_v55  ;;  %v5967_v63 = vadd.f32 %v6380_v3, %v5955_v49 }
0x22c0   : > { %7658 = vrsqrt.f32 %v5930_v34  ;;  %v5966_v16 = vadd.f32 %v6380_v3, %v5954_v58 }
0x22c2   : > { %v7653_v59 = vpop.eup %7652  ;;  %7117 = vmatprep.mubr.msk.f32.mxu0 %vm507_vm0, %v5966_v16 }
0x22c3   : > { %v7655_v21 = vpop.eup %7654  ;;  %7118 = vmatmul.mubr.msk.f32.gmra.mrb[20].mxu0 %vm507_vm0, %v5967_v63  ;;  %v5945_v57 = vmul.f32 %v7653_v59, %v9330_v11 }
0x22c4   : > { %v5944_v29 = vmul.f32 %v7655_v21, %v9332_v46  ;;  %v6381_v46 = vld [vmem:[#allocation2] ss:$0 sm:$0xff] }
0x22c5   : > { %v5957_v36 = vmul.f32 %v6379_v32, %v5945_v57 }
0x22c6   : > { %v5956_v45 = vmul.f32 %v6379_v32, %v5944_v29 }
0x22c7   : > { %v5969_v44 = vadd.f32 %v6380_v3, %v5957_v36 }
0x22c8   : > { %v5968_v17 = vadd.f32 %v6380_v3, %v5956_v45 }
0x22c9   : > { %v7657_v33 = vpop.eup %7656 }
0x22ca   : > { %v7659_v13 = vpop.eup %7658  ;;  %7120 = vmatprep.mubr.msk.f32.mxu0 %vm507_vm0, %v5968_v17  ;;  %v5947_v19 = vmul.f32 %v7657_v33, %v9340_v4 }
0x22cb   : > { %7121 = vmatmul.mubr.msk.f32.gmra.mrb[22].mxu0 %vm507_vm0, %v5969_v44  ;;  %v5946_v18 = vmul.f32 %v7659_v13, %v9342_v12 }
0x22cc   : > { %v5959_v56 = vmul.f32 %v6379_v32, %v5947_v19 }
0x22cd   : > { %v5958_v50 = vmul.f32 %v6379_v32, %v5946_v18 }
0x22ce   : > { %v5971_v38 = vadd.f32 %v6380_v3, %v5959_v56 }
0x22cf   : > { %v5970_v11 = vadd.f32 %v6380_v3, %v5958_v50 }
0x22d1   : > { %7123 = vmatprep.mubr.msk.f32.mxu0 %vm507_vm0, %v5970_v11 }
0x22d2   : > { %7124 = vmatmul.mubr.msk.f32.gmra.mrb[24].mxu0 %vm507_vm0, %v5971_v38 }
0x2391   : > { %v7116_v62 = vpop.f32.mrb[18].mxu0 }
0x2392   : > { %v6079_v4 = vadd.f32 %v7116_v62, %v6381_v46  ;;  %v6073_v41 = vpop.f32.mrb[19].mxu0 }
0x2393   : > { %v6074_v35 = vadd.f32 %v6381_v46, %v6073_v41 }
0x2394   : > { %6114 = vst.msk [vmem:[%s496_s26 + $0x8] sm:$0xff] %vm6112_vm11, %v6079_v4 }
0x2395   : > { %6113 = vst.msk [vmem:[%s496_s26] sm:$0xff] %vm6112_vm11, %v6074_v35 }
0x2396   : > { %v7119_v12 = vpop.f32.mrb[20].mxu0 }
0x2397   : > { %v6089_v8 = vadd.f32 %v7119_v12, %v6381_v46  ;;  %v6083_v42 = vpop.f32.mrb[21].mxu0 }
0x2398   : > { %v6084_v9 = vadd.f32 %v6381_v46, %v6083_v42 }
0x2399   : > { %6116 = vst.msk [vmem:[%s496_s26 + $0x18] sm:$0xff] %vm6112_vm11, %v6089_v8 }
0x239a   : > { %6115 = vst.msk [vmem:[%s496_s26 + $0x10] sm:$0xff] %vm6112_vm11, %v6084_v9 }
0x239e   : > { %v7122_v54 = vpop.f32.mrb[22].mxu0 }
0x239f   : > { %v6099_v30 = vadd.f32 %v7122_v54, %v6381_v46  ;;  %v6093_v2 = vpop.f32.mrb[23].mxu0 }
0x23a0   : > { %v6094_v53 = vadd.f32 %v6381_v46, %v6093_v2 }
0x23a1   : > { %6118 = vst.msk [vmem:[%s496_s26 + $0x28] sm:$0xff] %vm6112_vm11, %v6099_v30 }
0x23a2   : > { %6117 = vst.msk [vmem:[%s496_s26 + $0x20] sm:$0xff] %vm6112_vm11, %v6094_v53 }
0x23a5   : > { %v7125_v48 = vpop.f32.mrb[24].mxu0 }
0x23a6   : > { %v6109_v14 = vadd.f32 %v7125_v48, %v6381_v46  ;;  %v6103_v6 = vpop.f32.mrb[25].mxu0 }
0x23a7   : > { %v6104_v25 = vadd.f32 %v6381_v46, %v6103_v6 }
0x23a8   : > { %6120 = vst.msk [vmem:[%s496_s26 + $0x38] sm:$0xff] %vm6112_vm11, %v6109_v14 }
0x23a9   : > { %6119 = vst.msk [vmem:[%s496_s26 + $0x30] sm:$0xff] %vm6112_vm11, %v6104_v25 }
0x23aa PF: > { %s27_s20 = sadd.s32 1, %s7674_s20  }
0x23ab   : > { %p24_p4 = scmp.ge.s32.totalorder %s27_s20, 4  }
0x23ad   :  { %26 = sbr.rel (!%p24_p4) target bundleno = 3 (0x3), region = 121 }

</bundles_post_ra>
